<compile_context>
chip_gen: v7x
topology: tpu7x:2x2x1
jax: 0.10.0
libtpu: 0.0.40
codegen_flags: <defaults>
</compile_context>

<pallas_src>
import functools

import jax
import jax.numpy as jnp
from jax import lax
from jax.experimental import pallas as pl
from jax.experimental.pallas import tpu as pltpu

EPS = 1e-5  # nn.LayerNorm default eps

# ---------------------- static (specialised) configuration ------------------ #
C_IN = 3                       # input channels
NF = 32                        # num_filters
IMG = 64                       # obs spatial size
PH = IMG // 2                  # 32: phase-grid side for the stride-2 conv
OUT1 = 31                      # conv1 valid spatial size
OUT2 = 29                      # conv2 valid spatial size (OUT_DIM_64[2])
A1_LANES = PH * PH             # 1024: conv1 act lanes, index = i1*32 + j1
XP_LANES = A1_LANES + 128      # 1152: zero-padded phase lanes (keeps slices in range)
A2_LANES = OUT2 * PH           # 928:  conv2 act lanes, index = i*32 + j (j>=29 garbage)
K_FC = NF * A2_LANES           # 29696: padded fc contraction dim
TK_FC = K_FC // 4              # 7424 = 58*128: fc K tile (4 grid steps)


# ------------------------------ Pallas kernels ------------------------------ #

def _conv_fused_kernel(xp_ref, w1_ref, b1_ref, w2_ref, b2_ref, o_ref, a1_ref):
    """Fused conv1(stride2)+ReLU+conv2(stride1)+ReLU for one sample.

    xp_ref : (1, 2, 2, C_IN, XP_LANES)  phase-decomposed obs (zero lane pad)
    w1_ref : (9, NF, C_IN)   conv1 per-tap matrices (1/255 folded in)
    b1_ref : (NF, 1)
    w2_ref : (9, NF, NF)     conv2 per-tap matrices
    b2_ref : (NF, 1)
    o_ref  : (1, NF, A2_LANES)  f32 output; also used as the conv2 accumulator
    a1_ref : (NF, A1_LANES)  f32 scratch (conv1 activation, incl. garbage cols)
    """
    # conv1: 3x3 stride-2 as 9 phase-tap matmuls accumulated in VMEM.
    # output(i1, j1) uses input(2*i1+kh, 2*j1+kw) = phase[kh%2, kw%2][i1+kh//2, j1+kw//2]
    for kh in range(3):
        for kw in range(3):
            t = kh * 3 + kw
            off = (kh // 2) * PH + (kw // 2)
            xs = xp_ref[0, kh % 2, kw % 2, :, pl.ds(off, A1_LANES)]  # (C_IN, 1024)
            contrib = jnp.dot(w1_ref[t], xs, preferred_element_type=jnp.float32)
            if t == 0:
                a1_ref[...] = contrib + b1_ref[...]     # bias folded into init
            else:
                a1_ref[...] += contrib
    a1_ref[...] = jnp.maximum(a1_ref[...], 0.0)

    # conv2: 3x3 stride-1 as 9 shifted-slice matmuls on the VMEM activation,
    # accumulated directly in the f32 output block.
    # acc col s = i*32 + j reads a1 col (i+kh)*32 + (j+kw); columns j>=29 are
    # garbage but finite, and are multiplied by zeros in the padded fc weight.
    for kh in range(3):
        for kw in range(3):
            t = kh * 3 + kw
            off = kh * PH + kw
            xs = a1_ref[:, pl.ds(off, A2_LANES)]                     # (NF, 928)
            contrib = jnp.dot(w2_ref[t], xs, preferred_element_type=jnp.float32)
            if t == 0:
                o_ref[0] = contrib + b2_ref[...]
            else:
                o_ref[0] += contrib
    o_ref[0] = jnp.maximum(o_ref[0], 0.0)


def _conv_stack(xp, w1t, b1, w2t, b2):
    B = xp.shape[0]
    return pl.pallas_call(
        _conv_fused_kernel,
        out_shape=jax.ShapeDtypeStruct((B, NF, A2_LANES), jnp.float32),
        grid=(B,),
        in_specs=[
            pl.BlockSpec((1, 2, 2, C_IN, XP_LANES), lambda b: (b, 0, 0, 0, 0)),
            pl.BlockSpec((9, NF, C_IN), lambda b: (0, 0, 0)),
            pl.BlockSpec((NF, 1), lambda b: (0, 0)),
            pl.BlockSpec((9, NF, NF), lambda b: (0, 0, 0)),
            pl.BlockSpec((NF, 1), lambda b: (0, 0)),
        ],
        out_specs=pl.BlockSpec((1, NF, A2_LANES), lambda b: (b, 0, 0)),
        scratch_shapes=[pltpu.VMEM((NF, A1_LANES), jnp.float32)],
        compiler_params=pltpu.CompilerParams(
            dimension_semantics=("parallel",),
            vmem_limit_bytes=32 * 1024 * 1024),
    )(xp, w1t, b1, w2t, b2)


def _fc_ln_tanh_kernel(h_ref, w_ref, b_ref, g_ref, beta_ref, o_ref, acc_ref, *,
                       output_logits):
    """K-tiled fc matmul with f32 accumulator; LN (+tanh) fused at the last step."""
    k = pl.program_id(0)

    @pl.when(k == 0)
    def _():
        acc_ref[...] = jnp.zeros_like(acc_ref)

    acc_ref[...] += jnp.dot(h_ref[...], w_ref[...],
                            preferred_element_type=jnp.float32)

    @pl.when(k == pl.num_programs(0) - 1)
    def _():
        y = acc_ref[...] + b_ref[...]
        mean = jnp.mean(y, axis=-1, keepdims=True)
        var = jnp.mean((y - mean) ** 2, axis=-1, keepdims=True)
        yn = (y - mean) * lax.rsqrt(var + EPS) * g_ref[...] + beta_ref[...]
        if not output_logits:
            yn = jnp.tanh(yn)
        o_ref[...] = yn


def _fc_ln_tanh(h, w, b, g, beta, *, output_logits=False):
    B, K = h.shape
    K2, F = w.shape
    assert K == K2 and K % TK_FC == 0
    kern = functools.partial(_fc_ln_tanh_kernel, output_logits=output_logits)
    return pl.pallas_call(
        kern,
        out_shape=jax.ShapeDtypeStruct((B, F), jnp.float32),
        grid=(K // TK_FC,),
        in_specs=[
            pl.BlockSpec((B, TK_FC), lambda k: (0, k)),
            pl.BlockSpec((TK_FC, F), lambda k: (k, 0)),
            pl.BlockSpec((1, F), lambda k: (0, 0)),
            pl.BlockSpec((1, F), lambda k: (0, 0)),
            pl.BlockSpec((1, F), lambda k: (0, 0)),
        ],
        out_specs=pl.BlockSpec((B, F), lambda k: (0, 0)),
        scratch_shapes=[pltpu.VMEM((B, F), jnp.float32)],
        compiler_params=pltpu.CompilerParams(
            dimension_semantics=("arbitrary",),
            vmem_limit_bytes=32 * 1024 * 1024),
    )(h, w, b.reshape(1, F), g.reshape(1, F), beta.reshape(1, F))


# --------------------------- one-time weight prep --------------------------- #

def prepare_params(params):
    """Done ONCE, outside the per-call forward:
      * fold 1/255 into the conv1 weight,
      * reorder conv weights to per-tap (9, Cout, Cin) matrices,
      * permute + zero-pad the fc weight to the kernel's channel-major
        (c, row, col-with-garbage) activation layout, matching PyTorch's
        NCHW .view(B, -1) flatten order on the valid columns."""
    w1 = params['conv_w'][0] * (1.0 / 255.0)                 # (NF, C_IN, 3, 3)
    w1t = jnp.transpose(w1, (2, 3, 0, 1)).reshape(9, NF, C_IN)
    w2 = params['conv_w'][1]                                  # (NF, NF, 3, 3)
    w2t = jnp.transpose(w2, (2, 3, 0, 1)).reshape(9, NF, NF)
    b1 = params['conv_b'][0].reshape(NF, 1)
    b2 = params['conv_b'][1].reshape(NF, 1)

    F = params['fc_w'].shape[0]
    wfc = params['fc_w'].reshape(F, NF, OUT2, OUT2)           # (F, C, H, W), PyTorch order
    wfc = jnp.pad(wfc, ((0, 0), (0, 0), (0, 0), (0, PH - OUT2)))  # zero the garbage cols
    wfc = jnp.transpose(wfc.reshape(F, K_FC))                 # (K_FC, F), idx = c*928+i*32+j
    return {
        'w1t': w1t, 'b1': b1, 'w2t': w2t, 'b2': b2,
        'wfc': wfc, 'fc_b': params['fc_b'],
        'ln_g': params['ln_g'], 'ln_b': params['ln_b'],
    }


# --------------------------------- forward ---------------------------------- #

def _phase_decompose(obs_nchw):
    """NCHW obs -> stride-2 phase planes (B, 2, 2, C, XP_LANES):
    channels on sublane, flattened 32x32 phase spatial on lane, zero lane pad
    so every in-kernel tap slice stays in bounds (and is finite)."""
    B, C, H, W = obs_nchw.shape
    x = obs_nchw.reshape(B, C, PH, 2, PH, 2)
    x = jnp.transpose(x, (0, 3, 5, 1, 2, 4))       # (B, ph, pw, C, 32, 32)
    x = x.reshape(B, 2, 2, C, PH * PH)
    return jnp.pad(x, ((0, 0),) * 4 + ((0, XP_LANES - PH * PH),))


def pixel_encoder_forward(obs_nchw, prepped, *, output_logits=False):
    """Equivalent of PixelEncoder.forward (inference; detach is a no-op)."""
    assert obs_nchw.shape[1:] == (C_IN, IMG, IMG), obs_nchw.shape
    B = obs_nchw.shape[0]
    xp = _phase_decompose(obs_nchw.astype(jnp.float32))
    conv = _conv_stack(xp, prepped['w1t'], prepped['b1'],
                       prepped['w2t'], prepped['b2'])          # (B, NF, 928)
    h = conv.reshape(B, K_FC)                                  # free contiguous reshape
    return _fc_ln_tanh(h, prepped['wfc'], prepped['fc_b'],
                       prepped['ln_g'], prepped['ln_b'],
                       output_logits=output_logits)


# ------------------------- pure-JAX reference check ------------------------- #

def reference_forward(obs, params, *, num_layers=2, output_logits=False):
    hp = lax.Precision.HIGHEST
    x = obs / 255.0
    for i in range(num_layers):
        stride = 2 if i == 0 else 1
        x = lax.conv_general_dilated(
            x, params['conv_w'][i], (stride, stride), 'VALID',
            dimension_numbers=('NCHW', 'OIHW', 'NCHW'), precision=hp)
        x = jax.nn.relu(x + params['conv_b'][i][None, :, None, None])
    h = x.reshape(x.shape[0], -1)
    hf = jnp.dot(h, params['fc_w'].T, precision=hp) + params['fc_b']
    mean = hf.mean(-1, keepdims=True)
    var = ((hf - mean) ** 2).mean(-1, keepdims=True)
    hn = (hf - mean) / jnp.sqrt(var + EPS) * params['ln_g'] + params['ln_b']
    return hn if output_logits else jnp.tanh(hn)


# ----------------------------------- main ------------------------------------ #

if __name__ == "__main__":
    obs_shape = (3, 64, 64)
    feature_dim = 32
    num_layers = 2
    num_filters = 32
    batch = 2
    out_dim = 29  # OUT_DIM_64[2]

    key = jax.random.PRNGKey(0)
    k = jax.random.split(key, 8)
    params = {
        'conv_w': [
            jax.random.normal(k[0], (num_filters, obs_shape[0], 3, 3),
                              jnp.float32) * 0.1,
            jax.random.normal(k[1], (num_filters, num_filters, 3, 3),
                              jnp.float32) * 0.05,
        ],
        'conv_b': [
            jax.random.normal(k[2], (num_filters,), jnp.float32) * 0.1,
            jax.random.normal(k[3], (num_filters,), jnp.float32) * 0.1,
        ],
        'fc_w': jax.random.normal(
            k[4], (feature_dim, num_filters * out_dim * out_dim),
            jnp.float32) * 0.01,
        'fc_b': jax.random.normal(k[5], (feature_dim,), jnp.float32) * 0.1,
        # nn.LayerNorm defaults: weight=1, bias=0
        'ln_g': jnp.ones((feature_dim,), jnp.float32),
        'ln_b': jnp.zeros((feature_dim,), jnp.float32),
    }

    obs = jax.random.uniform(k[6], (batch,) + obs_shape, jnp.float32,
                             0.0, 255.0)

    prepped = prepare_params(params)          # one-time weight prep (not per forward)
    fwd = jax.jit(pixel_encoder_forward)
    out = jax.block_until_ready(fwd(obs, prepped))

    ref = reference_forward(obs, params, num_layers=num_layers)
    assert out.shape == (batch, feature_dim), out.shape
    max_err = float(jnp.max(jnp.abs(out - ref)))
    # Typical max_err is ~1e-5; the bound stays conservative because the MXU
    # f32 matmul pass count (rounding) is backend/generation dependent.
    assert max_err < 5e-3, max_err

    print("KERNEL_OK")
</pallas_src>

<mosaic_0001>
module attributes {stable_mosaic.version = 11 : i64} {
  func.func @_conv_fused_kernel(%arg0: i32, %arg1: memref<1x2x2x3x1152xf32, #tpu.memory_space<vmem>>, %arg2: memref<9x32x3xf32, #tpu.memory_space<vmem>>, %arg3: memref<32x1xf32, #tpu.memory_space<vmem>>, %arg4: memref<9x32x32xf32, #tpu.memory_space<vmem>>, %arg5: memref<32x1xf32, #tpu.memory_space<vmem>>, %arg6: memref<1x32x928xf32, #tpu.memory_space<vmem>>, %arg7: memref<32x1024xf32, #tpu.memory_space<vmem>>) attributes {dimension_semantics = [#tpu.dimension_semantics<parallel>], iteration_bounds = array<i64: 2>, scalar_prefetch = 0 : i64, scratch_operands = 1 : i64, tpu.core_type = #tpu.core_type<tc>, window_params = [{transform_indices = @transform_0, window_bounds = array<i64: 1, 2, 2, 3, 1152>}, {pipeline_mode = #tpu.pipeline_mode<synchronous>, transform_indices = @transform_1, window_bounds = array<i64: 9, 32, 3>}, {pipeline_mode = #tpu.pipeline_mode<synchronous>, transform_indices = @transform_2, window_bounds = array<i64: 32, 1>}, {pipeline_mode = #tpu.pipeline_mode<synchronous>, transform_indices = @transform_3, window_bounds = array<i64: 9, 32, 32>}, {pipeline_mode = #tpu.pipeline_mode<synchronous>, transform_indices = @transform_4, window_bounds = array<i64: 32, 1>}, {transform_indices = @transform_5, window_bounds = array<i64: 1, 32, 928>}]} {
    %c0 = arith.constant 0 : index
    %c0_0 = arith.constant 0 : index
    %c0_1 = arith.constant 0 : index
    %c0_2 = arith.constant 0 : index
    %c0_3 = arith.constant 0 : index
    %0 = vector.load %arg1[%c0, %c0_0, %c0_1, %c0_2, %c0_3] : memref<1x2x2x3x1152xf32, #tpu.memory_space<vmem>>, vector<1x1x1x3x1024xf32>
    %1 = vector.shape_cast %0 : vector<1x1x1x3x1024xf32> to vector<3x1024xf32>
    %c0_4 = arith.constant 0 : index
    %c0_5 = arith.constant 0 : index
    %c0_6 = arith.constant 0 : index
    %2 = vector.load %arg2[%c0_4, %c0_5, %c0_6] : memref<9x32x3xf32, #tpu.memory_space<vmem>>, vector<1x32x3xf32>
    %3 = vector.shape_cast %2 : vector<1x32x3xf32> to vector<32x3xf32>
    %cst = arith.constant dense<0.000000e+00> : vector<32x1024xf32>
    %4 = tpu.matmul %3, %1, %cst {dimension_numbers = #tpu.dot_dimension_numbers<[1], [0], [0], [1], [0, 0, 1, 1], [], []>} : vector<32x3xf32>, vector<3x1024xf32>, vector<32x1024xf32> -> vector<32x1024xf32>
    %c0_7 = arith.constant 0 : index
    %c0_8 = arith.constant 0 : index
    %5 = vector.load %arg3[%c0_7, %c0_8] : memref<32x1xf32, #tpu.memory_space<vmem>>, vector<32x1xf32>
    %6 = vector.broadcast %5 : vector<32x1xf32> to vector<32x1024xf32>
    %7 = arith.addf %4, %6 : vector<32x1024xf32>
    %c0_9 = arith.constant 0 : index
    %c0_10 = arith.constant 0 : index
    %8 = vector.load %arg7[%c0_9, %c0_10] : memref<32x1024xf32, #tpu.memory_space<vmem>>, vector<32x1024xf32>
    tpu.vector_store %arg7[%c0_9, %c0_10], %7 {strides = array<i32>} : memref<32x1024xf32, #tpu.memory_space<vmem>>, vector<32x1024xf32>,
    %c0_11 = arith.constant 0 : index
    %c0_12 = arith.constant 0 : index
    %c1 = arith.constant 1 : index
    %c0_13 = arith.constant 0 : index
    %c0_14 = arith.constant 0 : index
    %9 = vector.load %arg1[%c0_11, %c0_12, %c1, %c0_13, %c0_14] : memref<1x2x2x3x1152xf32, #tpu.memory_space<vmem>>, vector<1x1x1x3x1024xf32>
    %10 = vector.shape_cast %9 : vector<1x1x1x3x1024xf32> to vector<3x1024xf32>
    %c1_15 = arith.constant 1 : index
    %c0_16 = arith.constant 0 : index
    %c0_17 = arith.constant 0 : index
    %11 = vector.load %arg2[%c1_15, %c0_16, %c0_17] : memref<9x32x3xf32, #tpu.memory_space<vmem>>, vector<1x32x3xf32>
    %12 = vector.shape_cast %11 : vector<1x32x3xf32> to vector<32x3xf32>
    %cst_18 = arith.constant dense<0.000000e+00> : vector<32x1024xf32>
    %13 = tpu.matmul %12, %10, %cst_18 {dimension_numbers = #tpu.dot_dimension_numbers<[1], [0], [0], [1], [0, 0, 1, 1], [], []>} : vector<32x3xf32>, vector<3x1024xf32>, vector<32x1024xf32> -> vector<32x1024xf32>
    %c0_19 = arith.constant 0 : index
    %c0_20 = arith.constant 0 : index
    %14 = vector.load %arg7[%c0_19, %c0_20] : memref<32x1024xf32, #tpu.memory_space<vmem>>, vector<32x1024xf32>
    %15 = arith.addf %14, %13 : vector<32x1024xf32>
    %c0_21 = arith.constant 0 : index
    %c0_22 = arith.constant 0 : index
    %16 = vector.load %arg7[%c0_21, %c0_22] : memref<32x1024xf32, #tpu.memory_space<vmem>>, vector<32x1024xf32>
    tpu.vector_store %arg7[%c0_21, %c0_22], %15 {strides = array<i32>} : memref<32x1024xf32, #tpu.memory_space<vmem>>, vector<32x1024xf32>,
    %c0_23 = arith.constant 0 : index
    %c0_24 = arith.constant 0 : index
    %c0_25 = arith.constant 0 : index
    %c0_26 = arith.constant 0 : index
    %c1_27 = arith.constant 1 : index
    %17 = vector.load %arg1[%c0_23, %c0_24, %c0_25, %c0_26, %c1_27] : memref<1x2x2x3x1152xf32, #tpu.memory_space<vmem>>, vector<1x1x1x3x1024xf32>
    %18 = vector.shape_cast %17 : vector<1x1x1x3x1024xf32> to vector<3x1024xf32>
    %c2 = arith.constant 2 : index
    %c0_28 = arith.constant 0 : index
    %c0_29 = arith.constant 0 : index
    %19 = vector.load %arg2[%c2, %c0_28, %c0_29] : memref<9x32x3xf32, #tpu.memory_space<vmem>>, vector<1x32x3xf32>
    %20 = vector.shape_cast %19 : vector<1x32x3xf32> to vector<32x3xf32>
    %cst_30 = arith.constant dense<0.000000e+00> : vector<32x1024xf32>
    %21 = tpu.matmul %20, %18, %cst_30 {dimension_numbers = #tpu.dot_dimension_numbers<[1], [0], [0], [1], [0, 0, 1, 1], [], []>} : vector<32x3xf32>, vector<3x1024xf32>, vector<32x1024xf32> -> vector<32x1024xf32>
    %c0_31 = arith.constant 0 : index
    %c0_32 = arith.constant 0 : index
    %22 = vector.load %arg7[%c0_31, %c0_32] : memref<32x1024xf32, #tpu.memory_space<vmem>>, vector<32x1024xf32>
    %23 = arith.addf %22, %21 : vector<32x1024xf32>
    %c0_33 = arith.constant 0 : index
    %c0_34 = arith.constant 0 : index
    %24 = vector.load %arg7[%c0_33, %c0_34] : memref<32x1024xf32, #tpu.memory_space<vmem>>, vector<32x1024xf32>
    tpu.vector_store %arg7[%c0_33, %c0_34], %23 {strides = array<i32>} : memref<32x1024xf32, #tpu.memory_space<vmem>>, vector<32x1024xf32>,
    %c0_35 = arith.constant 0 : index
    %c1_36 = arith.constant 1 : index
    %c0_37 = arith.constant 0 : index
    %c0_38 = arith.constant 0 : index
    %c0_39 = arith.constant 0 : index
    %25 = vector.load %arg1[%c0_35, %c1_36, %c0_37, %c0_38, %c0_39] : memref<1x2x2x3x1152xf32, #tpu.memory_space<vmem>>, vector<1x1x1x3x1024xf32>
    %26 = vector.shape_cast %25 : vector<1x1x1x3x1024xf32> to vector<3x1024xf32>
    %c3 = arith.constant 3 : index
    %c0_40 = arith.constant 0 : index
    %c0_41 = arith.constant 0 : index
    %27 = vector.load %arg2[%c3, %c0_40, %c0_41] : memref<9x32x3xf32, #tpu.memory_space<vmem>>, vector<1x32x3xf32>
    %28 = vector.shape_cast %27 : vector<1x32x3xf32> to vector<32x3xf32>
    %cst_42 = arith.constant dense<0.000000e+00> : vector<32x1024xf32>
    %29 = tpu.matmul %28, %26, %cst_42 {dimension_numbers = #tpu.dot_dimension_numbers<[1], [0], [0], [1], [0, 0, 1, 1], [], []>} : vector<32x3xf32>, vector<3x1024xf32>, vector<32x1024xf32> -> vector<32x1024xf32>
    %c0_43 = arith.constant 0 : index
    %c0_44 = arith.constant 0 : index
    %30 = vector.load %arg7[%c0_43, %c0_44] : memref<32x1024xf32, #tpu.memory_space<vmem>>, vector<32x1024xf32>
    %31 = arith.addf %30, %29 : vector<32x1024xf32>
    %c0_45 = arith.constant 0 : index
    %c0_46 = arith.constant 0 : index
    %32 = vector.load %arg7[%c0_45, %c0_46] : memref<32x1024xf32, #tpu.memory_space<vmem>>, vector<32x1024xf32>
    tpu.vector_store %arg7[%c0_45, %c0_46], %31 {strides = array<i32>} : memref<32x1024xf32, #tpu.memory_space<vmem>>, vector<32x1024xf32>,
    %c0_47 = arith.constant 0 : index
    %c1_48 = arith.constant 1 : index
    %c1_49 = arith.constant 1 : index
    %c0_50 = arith.constant 0 : index
    %c0_51 = arith.constant 0 : index
    %33 = vector.load %arg1[%c0_47, %c1_48, %c1_49, %c0_50, %c0_51] : memref<1x2x2x3x1152xf32, #tpu.memory_space<vmem>>, vector<1x1x1x3x1024xf32>
    %34 = vector.shape_cast %33 : vector<1x1x1x3x1024xf32> to vector<3x1024xf32>
    %c4 = arith.constant 4 : index
    %c0_52 = arith.constant 0 : index
    %c0_53 = arith.constant 0 : index
    %35 = vector.load %arg2[%c4, %c0_52, %c0_53] : memref<9x32x3xf32, #tpu.memory_space<vmem>>, vector<1x32x3xf32>
    %36 = vector.shape_cast %35 : vector<1x32x3xf32> to vector<32x3xf32>
    %cst_54 = arith.constant dense<0.000000e+00> : vector<32x1024xf32>
    %37 = tpu.matmul %36, %34, %cst_54 {dimension_numbers = #tpu.dot_dimension_numbers<[1], [0], [0], [1], [0, 0, 1, 1], [], []>} : vector<32x3xf32>, vector<3x1024xf32>, vector<32x1024xf32> -> vector<32x1024xf32>
    %c0_55 = arith.constant 0 : index
    %c0_56 = arith.constant 0 : index
    %38 = vector.load %arg7[%c0_55, %c0_56] : memref<32x1024xf32, #tpu.memory_space<vmem>>, vector<32x1024xf32>
    %39 = arith.addf %38, %37 : vector<32x1024xf32>
    %c0_57 = arith.constant 0 : index
    %c0_58 = arith.constant 0 : index
    %40 = vector.load %arg7[%c0_57, %c0_58] : memref<32x1024xf32, #tpu.memory_space<vmem>>, vector<32x1024xf32>
    tpu.vector_store %arg7[%c0_57, %c0_58], %39 {strides = array<i32>} : memref<32x1024xf32, #tpu.memory_space<vmem>>, vector<32x1024xf32>,
    %c0_59 = arith.constant 0 : index
    %c1_60 = arith.constant 1 : index
    %c0_61 = arith.constant 0 : index
    %c0_62 = arith.constant 0 : index
    %c1_63 = arith.constant 1 : index
    %41 = vector.load %arg1[%c0_59, %c1_60, %c0_61, %c0_62, %c1_63] : memref<1x2x2x3x1152xf32, #tpu.memory_space<vmem>>, vector<1x1x1x3x1024xf32>
    %42 = vector.shape_cast %41 : vector<1x1x1x3x1024xf32> to vector<3x1024xf32>
    %c5 = arith.constant 5 : index
    %c0_64 = arith.constant 0 : index
    %c0_65 = arith.constant 0 : index
    %43 = vector.load %arg2[%c5, %c0_64, %c0_65] : memref<9x32x3xf32, #tpu.memory_space<vmem>>, vector<1x32x3xf32>
    %44 = vector.shape_cast %43 : vector<1x32x3xf32> to vector<32x3xf32>
    %cst_66 = arith.constant dense<0.000000e+00> : vector<32x1024xf32>
    %45 = tpu.matmul %44, %42, %cst_66 {dimension_numbers = #tpu.dot_dimension_numbers<[1], [0], [0], [1], [0, 0, 1, 1], [], []>} : vector<32x3xf32>, vector<3x1024xf32>, vector<32x1024xf32> -> vector<32x1024xf32>
    %c0_67 = arith.constant 0 : index
    %c0_68 = arith.constant 0 : index
    %46 = vector.load %arg7[%c0_67, %c0_68] : memref<32x1024xf32, #tpu.memory_space<vmem>>, vector<32x1024xf32>
    %47 = arith.addf %46, %45 : vector<32x1024xf32>
    %c0_69 = arith.constant 0 : index
    %c0_70 = arith.constant 0 : index
    %48 = vector.load %arg7[%c0_69, %c0_70] : memref<32x1024xf32, #tpu.memory_space<vmem>>, vector<32x1024xf32>
    tpu.vector_store %arg7[%c0_69, %c0_70], %47 {strides = array<i32>} : memref<32x1024xf32, #tpu.memory_space<vmem>>, vector<32x1024xf32>,
    %c0_71 = arith.constant 0 : index
    %c0_72 = arith.constant 0 : index
    %c0_73 = arith.constant 0 : index
    %c0_74 = arith.constant 0 : index
    %c32 = arith.constant 32 : index
    %49 = vector.load %arg1[%c0_71, %c0_72, %c0_73, %c0_74, %c32] : memref<1x2x2x3x1152xf32, #tpu.memory_space<vmem>>, vector<1x1x1x3x1024xf32>
    %50 = vector.shape_cast %49 : vector<1x1x1x3x1024xf32> to vector<3x1024xf32>
    %c6 = arith.constant 6 : index
    %c0_75 = arith.constant 0 : index
    %c0_76 = arith.constant 0 : index
    %51 = vector.load %arg2[%c6, %c0_75, %c0_76] : memref<9x32x3xf32, #tpu.memory_space<vmem>>, vector<1x32x3xf32>
    %52 = vector.shape_cast %51 : vector<1x32x3xf32> to vector<32x3xf32>
    %cst_77 = arith.constant dense<0.000000e+00> : vector<32x1024xf32>
    %53 = tpu.matmul %52, %50, %cst_77 {dimension_numbers = #tpu.dot_dimension_numbers<[1], [0], [0], [1], [0, 0, 1, 1], [], []>} : vector<32x3xf32>, vector<3x1024xf32>, vector<32x1024xf32> -> vector<32x1024xf32>
    %c0_78 = arith.constant 0 : index
    %c0_79 = arith.constant 0 : index
    %54 = vector.load %arg7[%c0_78, %c0_79] : memref<32x1024xf32, #tpu.memory_space<vmem>>, vector<32x1024xf32>
    %55 = arith.addf %54, %53 : vector<32x1024xf32>
    %c0_80 = arith.constant 0 : index
    %c0_81 = arith.constant 0 : index
    %56 = vector.load %arg7[%c0_80, %c0_81] : memref<32x1024xf32, #tpu.memory_space<vmem>>, vector<32x1024xf32>
    tpu.vector_store %arg7[%c0_80, %c0_81], %55 {strides = array<i32>} : memref<32x1024xf32, #tpu.memory_space<vmem>>, vector<32x1024xf32>,
    %c0_82 = arith.constant 0 : index
    %c0_83 = arith.constant 0 : index
    %c1_84 = arith.constant 1 : index
    %c0_85 = arith.constant 0 : index
    %c32_86 = arith.constant 32 : index
    %57 = vector.load %arg1[%c0_82, %c0_83, %c1_84, %c0_85, %c32_86] : memref<1x2x2x3x1152xf32, #tpu.memory_space<vmem>>, vector<1x1x1x3x1024xf32>
    %58 = vector.shape_cast %57 : vector<1x1x1x3x1024xf32> to vector<3x1024xf32>
    %c7 = arith.constant 7 : index
    %c0_87 = arith.constant 0 : index
    %c0_88 = arith.constant 0 : index
    %59 = vector.load %arg2[%c7, %c0_87, %c0_88] : memref<9x32x3xf32, #tpu.memory_space<vmem>>, vector<1x32x3xf32>
    %60 = vector.shape_cast %59 : vector<1x32x3xf32> to vector<32x3xf32>
    %cst_89 = arith.constant dense<0.000000e+00> : vector<32x1024xf32>
    %61 = tpu.matmul %60, %58, %cst_89 {dimension_numbers = #tpu.dot_dimension_numbers<[1], [0], [0], [1], [0, 0, 1, 1], [], []>} : vector<32x3xf32>, vector<3x1024xf32>, vector<32x1024xf32> -> vector<32x1024xf32>
    %c0_90 = arith.constant 0 : index
    %c0_91 = arith.constant 0 : index
    %62 = vector.load %arg7[%c0_90, %c0_91] : memref<32x1024xf32, #tpu.memory_space<vmem>>, vector<32x1024xf32>
    %63 = arith.addf %62, %61 : vector<32x1024xf32>
    %c0_92 = arith.constant 0 : index
    %c0_93 = arith.constant 0 : index
    %64 = vector.load %arg7[%c0_92, %c0_93] : memref<32x1024xf32, #tpu.memory_space<vmem>>, vector<32x1024xf32>
    tpu.vector_store %arg7[%c0_92, %c0_93], %63 {strides = array<i32>} : memref<32x1024xf32, #tpu.memory_space<vmem>>, vector<32x1024xf32>,
    %c0_94 = arith.constant 0 : index
    %c0_95 = arith.constant 0 : index
    %c0_96 = arith.constant 0 : index
    %c0_97 = arith.constant 0 : index
    %c33 = arith.constant 33 : index
    %65 = vector.load %arg1[%c0_94, %c0_95, %c0_96, %c0_97, %c33] : memref<1x2x2x3x1152xf32, #tpu.memory_space<vmem>>, vector<1x1x1x3x1024xf32>
    %66 = vector.shape_cast %65 : vector<1x1x1x3x1024xf32> to vector<3x1024xf32>
    %c8 = arith.constant 8 : index
    %c0_98 = arith.constant 0 : index
    %c0_99 = arith.constant 0 : index
    %67 = vector.load %arg2[%c8, %c0_98, %c0_99] : memref<9x32x3xf32, #tpu.memory_space<vmem>>, vector<1x32x3xf32>
    %68 = vector.shape_cast %67 : vector<1x32x3xf32> to vector<32x3xf32>
    %cst_100 = arith.constant dense<0.000000e+00> : vector<32x1024xf32>
    %69 = tpu.matmul %68, %66, %cst_100 {dimension_numbers = #tpu.dot_dimension_numbers<[1], [0], [0], [1], [0, 0, 1, 1], [], []>} : vector<32x3xf32>, vector<3x1024xf32>, vector<32x1024xf32> -> vector<32x1024xf32>
    %c0_101 = arith.constant 0 : index
    %c0_102 = arith.constant 0 : index
    %70 = vector.load %arg7[%c0_101, %c0_102] : memref<32x1024xf32, #tpu.memory_space<vmem>>, vector<32x1024xf32>
    %71 = arith.addf %70, %69 : vector<32x1024xf32>
    %c0_103 = arith.constant 0 : index
    %c0_104 = arith.constant 0 : index
    %72 = vector.load %arg7[%c0_103, %c0_104] : memref<32x1024xf32, #tpu.memory_space<vmem>>, vector<32x1024xf32>
    tpu.vector_store %arg7[%c0_103, %c0_104], %71 {strides = array<i32>} : memref<32x1024xf32, #tpu.memory_space<vmem>>, vector<32x1024xf32>,
    %c0_105 = arith.constant 0 : index
    %c0_106 = arith.constant 0 : index
    %73 = vector.load %arg7[%c0_105, %c0_106] : memref<32x1024xf32, #tpu.memory_space<vmem>>, vector<32x1024xf32>
    %cst_107 = arith.constant 0.000000e+00 : f32
    %74 = vector.broadcast %cst_107 : f32 to vector<32x1024xf32>
    %75 = arith.maximumf %73, %74 : vector<32x1024xf32>
    %c0_108 = arith.constant 0 : index
    %c0_109 = arith.constant 0 : index
    %76 = vector.load %arg7[%c0_108, %c0_109] : memref<32x1024xf32, #tpu.memory_space<vmem>>, vector<32x1024xf32>
    tpu.vector_store %arg7[%c0_108, %c0_109], %75 {strides = array<i32>} : memref<32x1024xf32, #tpu.memory_space<vmem>>, vector<32x1024xf32>,
    %c0_110 = arith.constant 0 : index
    %c0_111 = arith.constant 0 : index
    %77 = vector.load %arg7[%c0_110, %c0_111] : memref<32x1024xf32, #tpu.memory_space<vmem>>, vector<32x928xf32>
    %c0_112 = arith.constant 0 : index
    %c0_113 = arith.constant 0 : index
    %c0_114 = arith.constant 0 : index
    %78 = vector.load %arg4[%c0_112, %c0_113, %c0_114] : memref<9x32x32xf32, #tpu.memory_space<vmem>>, vector<1x32x32xf32>
    %79 = vector.shape_cast %78 : vector<1x32x32xf32> to vector<32x32xf32>
    %cst_115 = arith.constant dense<0.000000e+00> : vector<32x928xf32>
    %80 = tpu.matmul %79, %77, %cst_115 {dimension_numbers = #tpu.dot_dimension_numbers<[1], [0], [0], [1], [0, 0, 1, 1], [], []>} : vector<32x32xf32>, vector<32x928xf32>, vector<32x928xf32> -> vector<32x928xf32>
    %c0_116 = arith.constant 0 : index
    %c0_117 = arith.constant 0 : index
    %81 = vector.load %arg5[%c0_116, %c0_117] : memref<32x1xf32, #tpu.memory_space<vmem>>, vector<32x1xf32>
    %82 = vector.broadcast %81 : vector<32x1xf32> to vector<32x928xf32>
    %83 = arith.addf %80, %82 : vector<32x928xf32>
    %c0_118 = arith.constant 0 : index
    %c0_119 = arith.constant 0 : index
    %c0_120 = arith.constant 0 : index
    %84 = vector.load %arg6[%c0_118, %c0_119, %c0_120] : memref<1x32x928xf32, #tpu.memory_space<vmem>>, vector<1x32x928xf32>
    %85 = vector.shape_cast %84 : vector<1x32x928xf32> to vector<32x928xf32>
    %86 = vector.shape_cast %83 : vector<32x928xf32> to vector<1x32x928xf32>
    tpu.vector_store %arg6[%c0_118, %c0_119, %c0_120], %86 {strides = array<i32>} : memref<1x32x928xf32, #tpu.memory_space<vmem>>, vector<1x32x928xf32>,
    %c0_121 = arith.constant 0 : index
    %c1_122 = arith.constant 1 : index
    %87 = vector.load %arg7[%c0_121, %c1_122] : memref<32x1024xf32, #tpu.memory_space<vmem>>, vector<32x928xf32>
    %c1_123 = arith.constant 1 : index
    %c0_124 = arith.constant 0 : index
    %c0_125 = arith.constant 0 : index
    %88 = vector.load %arg4[%c1_123, %c0_124, %c0_125] : memref<9x32x32xf32, #tpu.memory_space<vmem>>, vector<1x32x32xf32>
    %89 = vector.shape_cast %88 : vector<1x32x32xf32> to vector<32x32xf32>
    %cst_126 = arith.constant dense<0.000000e+00> : vector<32x928xf32>
    %90 = tpu.matmul %89, %87, %cst_126 {dimension_numbers = #tpu.dot_dimension_numbers<[1], [0], [0], [1], [0, 0, 1, 1], [], []>} : vector<32x32xf32>, vector<32x928xf32>, vector<32x928xf32> -> vector<32x928xf32>
    %c0_127 = arith.constant 0 : index
    %c0_128 = arith.constant 0 : index
    %c0_129 = arith.constant 0 : index
    %91 = vector.load %arg6[%c0_127, %c0_128, %c0_129] : memref<1x32x928xf32, #tpu.memory_space<vmem>>, vector<1x32x928xf32>
    %92 = vector.shape_cast %91 : vector<1x32x928xf32> to vector<32x928xf32>
    %93 = arith.addf %92, %90 : vector<32x928xf32>
    %c0_130 = arith.constant 0 : index
    %c0_131 = arith.constant 0 : index
    %c0_132 = arith.constant 0 : index
    %94 = vector.load %arg6[%c0_130, %c0_131, %c0_132] : memref<1x32x928xf32, #tpu.memory_space<vmem>>, vector<1x32x928xf32>
    %95 = vector.shape_cast %94 : vector<1x32x928xf32> to vector<32x928xf32>
    %96 = vector.shape_cast %93 : vector<32x928xf32> to vector<1x32x928xf32>
    tpu.vector_store %arg6[%c0_130, %c0_131, %c0_132], %96 {strides = array<i32>} : memref<1x32x928xf32, #tpu.memory_space<vmem>>, vector<1x32x928xf32>,
    %c0_133 = arith.constant 0 : index
    %c2_134 = arith.constant 2 : index
    %97 = vector.load %arg7[%c0_133, %c2_134] : memref<32x1024xf32, #tpu.memory_space<vmem>>, vector<32x928xf32>
    %c2_135 = arith.constant 2 : index
    %c0_136 = arith.constant 0 : index
    %c0_137 = arith.constant 0 : index
    %98 = vector.load %arg4[%c2_135, %c0_136, %c0_137] : memref<9x32x32xf32, #tpu.memory_space<vmem>>, vector<1x32x32xf32>
    %99 = vector.shape_cast %98 : vector<1x32x32xf32> to vector<32x32xf32>
    %cst_138 = arith.constant dense<0.000000e+00> : vector<32x928xf32>
    %100 = tpu.matmul %99, %97, %cst_138 {dimension_numbers = #tpu.dot_dimension_numbers<[1], [0], [0], [1], [0, 0, 1, 1], [], []>} : vector<32x32xf32>, vector<32x928xf32>, vector<32x928xf32> -> vector<32x928xf32>
    %c0_139 = arith.constant 0 : index
    %c0_140 = arith.constant 0 : index
    %c0_141 = arith.constant 0 : index
    %101 = vector.load %arg6[%c0_139, %c0_140, %c0_141] : memref<1x32x928xf32, #tpu.memory_space<vmem>>, vector<1x32x928xf32>
    %102 = vector.shape_cast %101 : vector<1x32x928xf32> to vector<32x928xf32>
    %103 = arith.addf %102, %100 : vector<32x928xf32>
    %c0_142 = arith.constant 0 : index
    %c0_143 = arith.constant 0 : index
    %c0_144 = arith.constant 0 : index
    %104 = vector.load %arg6[%c0_142, %c0_143, %c0_144] : memref<1x32x928xf32, #tpu.memory_space<vmem>>, vector<1x32x928xf32>
    %105 = vector.shape_cast %104 : vector<1x32x928xf32> to vector<32x928xf32>
    %106 = vector.shape_cast %103 : vector<32x928xf32> to vector<1x32x928xf32>
    tpu.vector_store %arg6[%c0_142, %c0_143, %c0_144], %106 {strides = array<i32>} : memref<1x32x928xf32, #tpu.memory_space<vmem>>, vector<1x32x928xf32>,
    %c0_145 = arith.constant 0 : index
    %c32_146 = arith.constant 32 : index
    %107 = vector.load %arg7[%c0_145, %c32_146] : memref<32x1024xf32, #tpu.memory_space<vmem>>, vector<32x928xf32>
    %c3_147 = arith.constant 3 : index
    %c0_148 = arith.constant 0 : index
    %c0_149 = arith.constant 0 : index
    %108 = vector.load %arg4[%c3_147, %c0_148, %c0_149] : memref<9x32x32xf32, #tpu.memory_space<vmem>>, vector<1x32x32xf32>
    %109 = vector.shape_cast %108 : vector<1x32x32xf32> to vector<32x32xf32>
    %cst_150 = arith.constant dense<0.000000e+00> : vector<32x928xf32>
    %110 = tpu.matmul %109, %107, %cst_150 {dimension_numbers = #tpu.dot_dimension_numbers<[1], [0], [0], [1], [0, 0, 1, 1], [], []>} : vector<32x32xf32>, vector<32x928xf32>, vector<32x928xf32> -> vector<32x928xf32>
    %c0_151 = arith.constant 0 : index
    %c0_152 = arith.constant 0 : index
    %c0_153 = arith.constant 0 : index
    %111 = vector.load %arg6[%c0_151, %c0_152, %c0_153] : memref<1x32x928xf32, #tpu.memory_space<vmem>>, vector<1x32x928xf32>
    %112 = vector.shape_cast %111 : vector<1x32x928xf32> to vector<32x928xf32>
    %113 = arith.addf %112, %110 : vector<32x928xf32>
    %c0_154 = arith.constant 0 : index
    %c0_155 = arith.constant 0 : index
    %c0_156 = arith.constant 0 : index
    %114 = vector.load %arg6[%c0_154, %c0_155, %c0_156] : memref<1x32x928xf32, #tpu.memory_space<vmem>>, vector<1x32x928xf32>
    %115 = vector.shape_cast %114 : vector<1x32x928xf32> to vector<32x928xf32>
    %116 = vector.shape_cast %113 : vector<32x928xf32> to vector<1x32x928xf32>
    tpu.vector_store %arg6[%c0_154, %c0_155, %c0_156], %116 {strides = array<i32>} : memref<1x32x928xf32, #tpu.memory_space<vmem>>, vector<1x32x928xf32>,
    %c0_157 = arith.constant 0 : index
    %c33_158 = arith.constant 33 : index
    %117 = vector.load %arg7[%c0_157, %c33_158] : memref<32x1024xf32, #tpu.memory_space<vmem>>, vector<32x928xf32>
    %c4_159 = arith.constant 4 : index
    %c0_160 = arith.constant 0 : index
    %c0_161 = arith.constant 0 : index
    %118 = vector.load %arg4[%c4_159, %c0_160, %c0_161] : memref<9x32x32xf32, #tpu.memory_space<vmem>>, vector<1x32x32xf32>
    %119 = vector.shape_cast %118 : vector<1x32x32xf32> to vector<32x32xf32>
    %cst_162 = arith.constant dense<0.000000e+00> : vector<32x928xf32>
    %120 = tpu.matmul %119, %117, %cst_162 {dimension_numbers = #tpu.dot_dimension_numbers<[1], [0], [0], [1], [0, 0, 1, 1], [], []>} : vector<32x32xf32>, vector<32x928xf32>, vector<32x928xf32> -> vector<32x928xf32>
    %c0_163 = arith.constant 0 : index
    %c0_164 = arith.constant 0 : index
    %c0_165 = arith.constant 0 : index
    %121 = vector.load %arg6[%c0_163, %c0_164, %c0_165] : memref<1x32x928xf32, #tpu.memory_space<vmem>>, vector<1x32x928xf32>
    %122 = vector.shape_cast %121 : vector<1x32x928xf32> to vector<32x928xf32>
    %123 = arith.addf %122, %120 : vector<32x928xf32>
    %c0_166 = arith.constant 0 : index
    %c0_167 = arith.constant 0 : index
    %c0_168 = arith.constant 0 : index
    %124 = vector.load %arg6[%c0_166, %c0_167, %c0_168] : memref<1x32x928xf32, #tpu.memory_space<vmem>>, vector<1x32x928xf32>
    %125 = vector.shape_cast %124 : vector<1x32x928xf32> to vector<32x928xf32>
    %126 = vector.shape_cast %123 : vector<32x928xf32> to vector<1x32x928xf32>
    tpu.vector_store %arg6[%c0_166, %c0_167, %c0_168], %126 {strides = array<i32>} : memref<1x32x928xf32, #tpu.memory_space<vmem>>, vector<1x32x928xf32>,
    %c0_169 = arith.constant 0 : index
    %c34 = arith.constant 34 : index
    %127 = vector.load %arg7[%c0_169, %c34] : memref<32x1024xf32, #tpu.memory_space<vmem>>, vector<32x928xf32>
    %c5_170 = arith.constant 5 : index
    %c0_171 = arith.constant 0 : index
    %c0_172 = arith.constant 0 : index
    %128 = vector.load %arg4[%c5_170, %c0_171, %c0_172] : memref<9x32x32xf32, #tpu.memory_space<vmem>>, vector<1x32x32xf32>
    %129 = vector.shape_cast %128 : vector<1x32x32xf32> to vector<32x32xf32>
    %cst_173 = arith.constant dense<0.000000e+00> : vector<32x928xf32>
    %130 = tpu.matmul %129, %127, %cst_173 {dimension_numbers = #tpu.dot_dimension_numbers<[1], [0], [0], [1], [0, 0, 1, 1], [], []>} : vector<32x32xf32>, vector<32x928xf32>, vector<32x928xf32> -> vector<32x928xf32>
    %c0_174 = arith.constant 0 : index
    %c0_175 = arith.constant 0 : index
    %c0_176 = arith.constant 0 : index
    %131 = vector.load %arg6[%c0_174, %c0_175, %c0_176] : memref<1x32x928xf32, #tpu.memory_space<vmem>>, vector<1x32x928xf32>
    %132 = vector.shape_cast %131 : vector<1x32x928xf32> to vector<32x928xf32>
    %133 = arith.addf %132, %130 : vector<32x928xf32>
    %c0_177 = arith.constant 0 : index
    %c0_178 = arith.constant 0 : index
    %c0_179 = arith.constant 0 : index
    %134 = vector.load %arg6[%c0_177, %c0_178, %c0_179] : memref<1x32x928xf32, #tpu.memory_space<vmem>>, vector<1x32x928xf32>
    %135 = vector.shape_cast %134 : vector<1x32x928xf32> to vector<32x928xf32>
    %136 = vector.shape_cast %133 : vector<32x928xf32> to vector<1x32x928xf32>
    tpu.vector_store %arg6[%c0_177, %c0_178, %c0_179], %136 {strides = array<i32>} : memref<1x32x928xf32, #tpu.memory_space<vmem>>, vector<1x32x928xf32>,
    %c0_180 = arith.constant 0 : index
    %c64 = arith.constant 64 : index
    %137 = vector.load %arg7[%c0_180, %c64] : memref<32x1024xf32, #tpu.memory_space<vmem>>, vector<32x928xf32>
    %c6_181 = arith.constant 6 : index
    %c0_182 = arith.constant 0 : index
    %c0_183 = arith.constant 0 : index
    %138 = vector.load %arg4[%c6_181, %c0_182, %c0_183] : memref<9x32x32xf32, #tpu.memory_space<vmem>>, vector<1x32x32xf32>
    %139 = vector.shape_cast %138 : vector<1x32x32xf32> to vector<32x32xf32>
    %cst_184 = arith.constant dense<0.000000e+00> : vector<32x928xf32>
    %140 = tpu.matmul %139, %137, %cst_184 {dimension_numbers = #tpu.dot_dimension_numbers<[1], [0], [0], [1], [0, 0, 1, 1], [], []>} : vector<32x32xf32>, vector<32x928xf32>, vector<32x928xf32> -> vector<32x928xf32>
    %c0_185 = arith.constant 0 : index
    %c0_186 = arith.constant 0 : index
    %c0_187 = arith.constant 0 : index
    %141 = vector.load %arg6[%c0_185, %c0_186, %c0_187] : memref<1x32x928xf32, #tpu.memory_space<vmem>>, vector<1x32x928xf32>
    %142 = vector.shape_cast %141 : vector<1x32x928xf32> to vector<32x928xf32>
    %143 = arith.addf %142, %140 : vector<32x928xf32>
    %c0_188 = arith.constant 0 : index
    %c0_189 = arith.constant 0 : index
    %c0_190 = arith.constant 0 : index
    %144 = vector.load %arg6[%c0_188, %c0_189, %c0_190] : memref<1x32x928xf32, #tpu.memory_space<vmem>>, vector<1x32x928xf32>
    %145 = vector.shape_cast %144 : vector<1x32x928xf32> to vector<32x928xf32>
    %146 = vector.shape_cast %143 : vector<32x928xf32> to vector<1x32x928xf32>
    tpu.vector_store %arg6[%c0_188, %c0_189, %c0_190], %146 {strides = array<i32>} : memref<1x32x928xf32, #tpu.memory_space<vmem>>, vector<1x32x928xf32>,
    %c0_191 = arith.constant 0 : index
    %c65 = arith.constant 65 : index
    %147 = vector.load %arg7[%c0_191, %c65] : memref<32x1024xf32, #tpu.memory_space<vmem>>, vector<32x928xf32>
    %c7_192 = arith.constant 7 : index
    %c0_193 = arith.constant 0 : index
    %c0_194 = arith.constant 0 : index
    %148 = vector.load %arg4[%c7_192, %c0_193, %c0_194] : memref<9x32x32xf32, #tpu.memory_space<vmem>>, vector<1x32x32xf32>
    %149 = vector.shape_cast %148 : vector<1x32x32xf32> to vector<32x32xf32>
    %cst_195 = arith.constant dense<0.000000e+00> : vector<32x928xf32>
    %150 = tpu.matmul %149, %147, %cst_195 {dimension_numbers = #tpu.dot_dimension_numbers<[1], [0], [0], [1], [0, 0, 1, 1], [], []>} : vector<32x32xf32>, vector<32x928xf32>, vector<32x928xf32> -> vector<32x928xf32>
    %c0_196 = arith.constant 0 : index
    %c0_197 = arith.constant 0 : index
    %c0_198 = arith.constant 0 : index
    %151 = vector.load %arg6[%c0_196, %c0_197, %c0_198] : memref<1x32x928xf32, #tpu.memory_space<vmem>>, vector<1x32x928xf32>
    %152 = vector.shape_cast %151 : vector<1x32x928xf32> to vector<32x928xf32>
    %153 = arith.addf %152, %150 : vector<32x928xf32>
    %c0_199 = arith.constant 0 : index
    %c0_200 = arith.constant 0 : index
    %c0_201 = arith.constant 0 : index
    %154 = vector.load %arg6[%c0_199, %c0_200, %c0_201] : memref<1x32x928xf32, #tpu.memory_space<vmem>>, vector<1x32x928xf32>
    %155 = vector.shape_cast %154 : vector<1x32x928xf32> to vector<32x928xf32>
    %156 = vector.shape_cast %153 : vector<32x928xf32> to vector<1x32x928xf32>
    tpu.vector_store %arg6[%c0_199, %c0_200, %c0_201], %156 {strides = array<i32>} : memref<1x32x928xf32, #tpu.memory_space<vmem>>, vector<1x32x928xf32>,
    %c0_202 = arith.constant 0 : index
    %c66 = arith.constant 66 : index
    %157 = vector.load %arg7[%c0_202, %c66] : memref<32x1024xf32, #tpu.memory_space<vmem>>, vector<32x928xf32>
    %c8_203 = arith.constant 8 : index
    %c0_204 = arith.constant 0 : index
    %c0_205 = arith.constant 0 : index
    %158 = vector.load %arg4[%c8_203, %c0_204, %c0_205] : memref<9x32x32xf32, #tpu.memory_space<vmem>>, vector<1x32x32xf32>
    %159 = vector.shape_cast %158 : vector<1x32x32xf32> to vector<32x32xf32>
    %cst_206 = arith.constant dense<0.000000e+00> : vector<32x928xf32>
    %160 = tpu.matmul %159, %157, %cst_206 {dimension_numbers = #tpu.dot_dimension_numbers<[1], [0], [0], [1], [0, 0, 1, 1], [], []>} : vector<32x32xf32>, vector<32x928xf32>, vector<32x928xf32> -> vector<32x928xf32>
    %c0_207 = arith.constant 0 : index
    %c0_208 = arith.constant 0 : index
    %c0_209 = arith.constant 0 : index
    %161 = vector.load %arg6[%c0_207, %c0_208, %c0_209] : memref<1x32x928xf32, #tpu.memory_space<vmem>>, vector<1x32x928xf32>
    %162 = vector.shape_cast %161 : vector<1x32x928xf32> to vector<32x928xf32>
    %163 = arith.addf %162, %160 : vector<32x928xf32>
    %c0_210 = arith.constant 0 : index
    %c0_211 = arith.constant 0 : index
    %c0_212 = arith.constant 0 : index
    %164 = vector.load %arg6[%c0_210, %c0_211, %c0_212] : memref<1x32x928xf32, #tpu.memory_space<vmem>>, vector<1x32x928xf32>
    %165 = vector.shape_cast %164 : vector<1x32x928xf32> to vector<32x928xf32>
    %166 = vector.shape_cast %163 : vector<32x928xf32> to vector<1x32x928xf32>
    tpu.vector_store %arg6[%c0_210, %c0_211, %c0_212], %166 {strides = array<i32>} : memref<1x32x928xf32, #tpu.memory_space<vmem>>, vector<1x32x928xf32>,
    %c0_213 = arith.constant 0 : index
    %c0_214 = arith.constant 0 : index
    %c0_215 = arith.constant 0 : index
    %167 = vector.load %arg6[%c0_213, %c0_214, %c0_215] : memref<1x32x928xf32, #tpu.memory_space<vmem>>, vector<1x32x928xf32>
    %168 = vector.shape_cast %167 : vector<1x32x928xf32> to vector<32x928xf32>
    %cst_216 = arith.constant 0.000000e+00 : f32
    %169 = vector.broadcast %cst_216 : f32 to vector<32x928xf32>
    %170 = arith.maximumf %168, %169 : vector<32x928xf32>
    %c0_217 = arith.constant 0 : index
    %c0_218 = arith.constant 0 : index
    %c0_219 = arith.constant 0 : index
    %171 = vector.load %arg6[%c0_217, %c0_218, %c0_219] : memref<1x32x928xf32, #tpu.memory_space<vmem>>, vector<1x32x928xf32>
    %172 = vector.shape_cast %171 : vector<1x32x928xf32> to vector<32x928xf32>
    %173 = vector.shape_cast %170 : vector<32x928xf32> to vector<1x32x928xf32>
    tpu.vector_store %arg6[%c0_217, %c0_218, %c0_219], %173 {strides = array<i32>} : memref<1x32x928xf32, #tpu.memory_space<vmem>>, vector<1x32x928xf32>,
    return
  }
  func.func @transform_0(%arg0: i32) -> (i32, i32, i32, i32, i32) {
    %c0_i32 = arith.constant 0 : i32
    %c0_i32_0 = arith.constant 0 : i32
    %c0_i32_1 = arith.constant 0 : i32
    %c0_i32_2 = arith.constant 0 : i32
    %c0_i32_3 = arith.constant 0 : i32
    return %arg0, %c0_i32, %c0_i32_0, %c0_i32_1, %c0_i32_2 : i32, i32, i32, i32, i32
  }
  func.func @transform_1(%arg0: i32) -> (i32, i32, i32) {
    %c0_i32 = arith.constant 0 : i32
    %c0_i32_0 = arith.constant 0 : i32
    %c0_i32_1 = arith.constant 0 : i32
    %c0_i32_2 = arith.constant 0 : i32
    return %c0_i32, %c0_i32_0, %c0_i32_1 : i32, i32, i32
  }
  func.func @transform_2(%arg0: i32) -> (i32, i32) {
    %c0_i32 = arith.constant 0 : i32
    %c0_i32_0 = arith.constant 0 : i32
    %c0_i32_1 = arith.constant 0 : i32
    return %c0_i32, %c0_i32_0 : i32, i32
  }
  func.func @transform_3(%arg0: i32) -> (i32, i32, i32) {
    %c0_i32 = arith.constant 0 : i32
    %c0_i32_0 = arith.constant 0 : i32
    %c0_i32_1 = arith.constant 0 : i32
    %c0_i32_2 = arith.constant 0 : i32
    return %c0_i32, %c0_i32_0, %c0_i32_1 : i32, i32, i32
  }
  func.func @transform_4(%arg0: i32) -> (i32, i32) {
    %c0_i32 = arith.constant 0 : i32
    %c0_i32_0 = arith.constant 0 : i32
    %c0_i32_1 = arith.constant 0 : i32
    return %c0_i32, %c0_i32_0 : i32, i32
  }
  func.func @transform_5(%arg0: i32) -> (i32, i32, i32) {
    %c0_i32 = arith.constant 0 : i32
    %c0_i32_0 = arith.constant 0 : i32
    %c0_i32_1 = arith.constant 0 : i32
    return %arg0, %c0_i32, %c0_i32_0 : i32, i32, i32
  }
}

module attributes {stable_mosaic.version = 11 : i64} {
  func.func @_fc_ln_tanh_kernel(%arg0: i32, %arg1: memref<2x7424xf32, #tpu.memory_space<vmem>>, %arg2: memref<7424x32xf32, #tpu.memory_space<vmem>>, %arg3: memref<1x32xf32, #tpu.memory_space<vmem>>, %arg4: memref<1x32xf32, #tpu.memory_space<vmem>>, %arg5: memref<1x32xf32, #tpu.memory_space<vmem>>, %arg6: memref<2x32xf32, #tpu.memory_space<vmem>>, %arg7: memref<2x32xf32, #tpu.memory_space<vmem>>) attributes {dimension_semantics = [#tpu.dimension_semantics<arbitrary>], iteration_bounds = array<i64: 4>, scalar_prefetch = 0 : i64, scratch_operands = 1 : i64, tpu.core_type = #tpu.core_type<tc>, window_params = [{transform_indices = @transform_0, window_bounds = array<i64: 2, 7424>}, {transform_indices = @transform_1, window_bounds = array<i64: 7424, 32>}, {pipeline_mode = #tpu.pipeline_mode<synchronous>, transform_indices = @transform_2, window_bounds = array<i64: 1, 32>}, {pipeline_mode = #tpu.pipeline_mode<synchronous>, transform_indices = @transform_3, window_bounds = array<i64: 1, 32>}, {pipeline_mode = #tpu.pipeline_mode<synchronous>, transform_indices = @transform_4, window_bounds = array<i64: 1, 32>}, {pipeline_mode = #tpu.pipeline_mode<synchronous>, transform_indices = @transform_5, window_bounds = array<i64: 2, 32>}]} {
    %c0_i32 = arith.constant 0 : i32
    %0 = arith.cmpi eq, %arg0, %c0_i32 : i32
    %1 = arith.extui %0 : i1 to i32
    %c0_i32_0 = arith.constant 0 : i32
    %2 = arith.cmpi ne, %1, %c0_i32_0 : i32
    scf.if %2 {
      %cst_9 = arith.constant 0.000000e+00 : f32
      %12 = vector.broadcast %cst_9 : f32 to vector<2x32xf32>
      %c0_10 = arith.constant 0 : index
      %c0_11 = arith.constant 0 : index
      %13 = vector.load %arg7[%c0_10, %c0_11] : memref<2x32xf32, #tpu.memory_space<vmem>>, vector<2x32xf32>
      tpu.vector_store %arg7[%c0_10, %c0_11], %12 {strides = array<i32>} : memref<2x32xf32, #tpu.memory_space<vmem>>, vector<2x32xf32>,
    } else {
    }
    %c0 = arith.constant 0 : index
    %c0_1 = arith.constant 0 : index
    %3 = vector.load %arg7[%c0, %c0_1] : memref<2x32xf32, #tpu.memory_space<vmem>>, vector<2x32xf32>
    %c0_2 = arith.constant 0 : index
    %c0_3 = arith.constant 0 : index
    %4 = vector.load %arg1[%c0_2, %c0_3] : memref<2x7424xf32, #tpu.memory_space<vmem>>, vector<2x7424xf32>
    %c0_4 = arith.constant 0 : index
    %c0_5 = arith.constant 0 : index
    %5 = vector.load %arg2[%c0_4, %c0_5] : memref<7424x32xf32, #tpu.memory_space<vmem>>, vector<7424x32xf32>
    %cst = arith.constant dense<0.000000e+00> : vector<2x32xf32>
    %6 = tpu.matmul %4, %5, %cst {dimension_numbers = #tpu.dot_dimension_numbers<[1], [0], [0], [1], [0, 0, 1, 1], [], []>} : vector<2x7424xf32>, vector<7424x32xf32>, vector<2x32xf32> -> vector<2x32xf32>
    %7 = arith.addf %3, %6 : vector<2x32xf32>
    %c0_6 = arith.constant 0 : index
    %c0_7 = arith.constant 0 : index
    %8 = vector.load %arg7[%c0_6, %c0_7] : memref<2x32xf32, #tpu.memory_space<vmem>>, vector<2x32xf32>
    tpu.vector_store %arg7[%c0_6, %c0_7], %7 {strides = array<i32>} : memref<2x32xf32, #tpu.memory_space<vmem>>, vector<2x32xf32>,
    %c3_i32 = arith.constant 3 : i32
    %9 = arith.cmpi eq, %arg0, %c3_i32 : i32
    %10 = arith.extui %9 : i1 to i32
    %c0_i32_8 = arith.constant 0 : i32
    %11 = arith.cmpi ne, %10, %c0_i32_8 : i32
    scf.if %11 {
      %c0_9 = arith.constant 0 : index
      %c0_10 = arith.constant 0 : index
      %12 = vector.load %arg7[%c0_9, %c0_10] : memref<2x32xf32, #tpu.memory_space<vmem>>, vector<2x32xf32>
      %c0_11 = arith.constant 0 : index
      %c0_12 = arith.constant 0 : index
      %13 = vector.load %arg3[%c0_11, %c0_12] : memref<1x32xf32, #tpu.memory_space<vmem>>, vector<1x32xf32>
      %14 = vector.broadcast %13 : vector<1x32xf32> to vector<2x32xf32>
      %15 = arith.addf %12, %14 : vector<2x32xf32>
      %cst_13 = arith.constant dense<0.000000e+00> : vector<2xf32>
      %16 = vector.multi_reduction <add>, %15, %cst_13 [1] : vector<2x32xf32> to vector<2xf32>
      %17 = vector.shape_cast %16 : vector<2xf32> to vector<2x1xf32>
      %cst_14 = arith.constant 3.200000e+01 : f32
      %18 = vector.broadcast %cst_14 : f32 to vector<2x1xf32>
      %19 = arith.divf %17, %18 : vector<2x1xf32>
      %20 = vector.broadcast %19 : vector<2x1xf32> to vector<2x32xf32>
      %21 = arith.subf %15, %20 : vector<2x32xf32>
      %22 = arith.mulf %21, %21 : vector<2x32xf32>
      %cst_15 = arith.constant dense<0.000000e+00> : vector<2xf32>
      %23 = vector.multi_reduction <add>, %22, %cst_15 [1] : vector<2x32xf32> to vector<2xf32>
      %24 = vector.shape_cast %23 : vector<2xf32> to vector<2x1xf32>
      %cst_16 = arith.constant 3.200000e+01 : f32
      %25 = vector.broadcast %cst_16 : f32 to vector<2x1xf32>
      %26 = arith.divf %24, %25 : vector<2x1xf32>
      %27 = vector.broadcast %19 : vector<2x1xf32> to vector<2x32xf32>
      %28 = arith.subf %15, %27 : vector<2x32xf32>
      %cst_17 = arith.constant 9.99999974E-6 : f32
      %29 = vector.broadcast %cst_17 : f32 to vector<2x1xf32>
      %30 = arith.addf %26, %29 : vector<2x1xf32>
      %31 = math.rsqrt %30 : vector<2x1xf32>
      %32 = vector.broadcast %31 : vector<2x1xf32> to vector<2x32xf32>
      %33 = arith.mulf %28, %32 : vector<2x32xf32>
      %c0_18 = arith.constant 0 : index
      %c0_19 = arith.constant 0 : index
      %34 = vector.load %arg4[%c0_18, %c0_19] : memref<1x32xf32, #tpu.memory_space<vmem>>, vector<1x32xf32>
      %35 = vector.broadcast %34 : vector<1x32xf32> to vector<2x32xf32>
      %36 = arith.mulf %33, %35 : vector<2x32xf32>
      %c0_20 = arith.constant 0 : index
      %c0_21 = arith.constant 0 : index
      %37 = vector.load %arg5[%c0_20, %c0_21] : memref<1x32xf32, #tpu.memory_space<vmem>>, vector<1x32xf32>
      %38 = vector.broadcast %37 : vector<1x32xf32> to vector<2x32xf32>
      %39 = arith.addf %36, %38 : vector<2x32xf32>
      %40 = math.tanh %39 : vector<2x32xf32>
      %c0_22 = arith.constant 0 : index
      %c0_23 = arith.constant 0 : index
      %41 = vector.load %arg6[%c0_22, %c0_23] : memref<2x32xf32, #tpu.memory_space<vmem>>, vector<2x32xf32>
      tpu.vector_store %arg6[%c0_22, %c0_23], %40 {strides = array<i32>} : memref<2x32xf32, #tpu.memory_space<vmem>>, vector<2x32xf32>,
    } else {
    }
    return
  }
  func.func @transform_0(%arg0: i32) -> (i32, i32) {
    %c0_i32 = arith.constant 0 : i32
    %c0_i32_0 = arith.constant 0 : i32
    return %c0_i32, %arg0 : i32, i32
  }
  func.func @transform_1(%arg0: i32) -> (i32, i32) {
    %c0_i32 = arith.constant 0 : i32
    %c0_i32_0 = arith.constant 0 : i32
    return %arg0, %c0_i32 : i32, i32
  }
  func.func @transform_2(%arg0: i32) -> (i32, i32) {
    %c0_i32 = arith.constant 0 : i32
    %c0_i32_0 = arith.constant 0 : i32
    %c0_i32_1 = arith.constant 0 : i32
    return %c0_i32, %c0_i32_0 : i32, i32
  }
  func.func @transform_3(%arg0: i32) -> (i32, i32) {
    %c0_i32 = arith.constant 0 : i32
    %c0_i32_0 = arith.constant 0 : i32
    %c0_i32_1 = arith.constant 0 : i32
    return %c0_i32, %c0_i32_0 : i32, i32
  }
  func.func @transform_4(%arg0: i32) -> (i32, i32) {
    %c0_i32 = arith.constant 0 : i32
    %c0_i32_0 = arith.constant 0 : i32
    %c0_i32_1 = arith.constant 0 : i32
    return %c0_i32, %c0_i32_0 : i32, i32
  }
  func.func @transform_5(%arg0: i32) -> (i32, i32) {
    %c0_i32 = arith.constant 0 : i32
    %c0_i32_0 = arith.constant 0 : i32
    %c0_i32_1 = arith.constant 0 : i32
    return %c0_i32, %c0_i32_0 : i32, i32
  }
}

</mosaic_0001>

<bundles_post_ra>
// kernel: pixel_encoder_forward.3
= control target key start
LH: loop header
LB: loop body
LE: loop exit
PB: predicated region body
PF: predicated region fallthrough
CT: control target
= control target key end

     0   :  { %10 = vsyncpa [#allocation4], 0  ;;  %s5705_s18 = smov 0   ;;  %s6897_s0 = inlined_call_operand.vmem [shape: f32[2,29696], index: 0, kind: input, shape index: {}]   ;;  %s6898_s1 = inlined_call_operand.vmem [shape: f32[29696,32], index: 1, kind: input, shape index: {}]   ;;  %s6899_s2 = inlined_call_operand.vmem [shape: f32[1,32], index: 2, kind: input, shape index: {}]   ;;  %s6900_s3 = inlined_call_operand.vmem [shape: f32[1,32], index: 3, kind: input, shape index: {}]   ;;  %s6901_s4 = inlined_call_operand.vmem [shape: f32[1,32], index: 4, kind: input, shape index: {}]   ;;  %s6902_s5 = inlined_call_operand.hbm [shape: f32[2,32], index: 5, kind: output, shape index: {}]  }
   0x1 LB: > { %s5711_s19 = sadd.s32 4294967295, %s5670_s18   ;;  %p3643_p0 = scmp.ge.s32.totalorder %s5670_s18, 1  ;;  %s5670_s18 = sphi %s5705_s18, %s16_s18  }
   0x2   : > { %p195_p1 = scmp.lt.s32.totalorder %s5670_s18, 5 }
   0x4   : > { %p196_p2 = pnand %p3643_p0, %p195_p1 }
   0x5   : > { %s223_s20 = smul.u32 (!%p196_p2), 58, %s5711_s19  ;;  %p3646_p5 = scmp.ne.s32.totalorder (!%p196_p2), %s5711_s19, 0 }
   0x6   : > { %199 = sbr.rel (%p196_p2) target bundleno = 1086 (0x43e), region = 40 }
   0x7   : > { %s229_s21 = smul.u32 (!%p196_p2), 928, %s5711_s19  ;;  %p224_p3 = scmp.lt.s32.totalorder (!%p196_p2), %s223_s20, 231 }
   0x9   : > { %p230_p4 = scmp.lt.s32.totalorder (!%p196_p2), %s229_s21, 3711 }
   0xd   : > { %s6904_s20 = smov (!%p224_p3, %s223_s20), 231  ;;  %s6906_s21 = smov (!%p230_p4, %s229_s21), 3711 }
   0xe   : > { %s3644_s22 = sshll.u32 %s6904_s20, 1  ;;  %s3645_s26 = sshll.u32 %s6906_s21, 3  ;;  %vm239_vm0 = vcmask (!%p3646_p5), 254976   ;;  %v5672_v0 = vmov (!%p3646_p5), 0.0  }
   0xf   : > { %s5720_s25 = scalar_lea.vmem %s6897_s0, %s3644_s22  ;;  %s5725_s29 = scalar_lea.vmem %s6898_s1, %s3645_s26  ;;  %240 = vst.msk [vmem:[#allocation2] sm:$0x3] (!%p3646_p5), %vm239_vm0, %v5672_v0 }
  0x10   : > { %238 = sbr.rel (%p3646_p5) target bundleno = 23 (0x17), region = 44 }
  0x17 PF: > { %v273_v1 = vld [vmem:[%s5725_s29 + $0x80] sm:$0xff]  ;;  %v274_v2 = vld [vmem:[%s5725_s29 + $0x88] sm:$0xff]  ;;  %v275_v12 = vld [vmem:[%s5725_s29 + $0x90] sm:$0xff]  ;;  %v5673_v48 = vmov 1983009808   ;;  %v1204_v50 = vlaneseq  ;;  %vm3535_vm1 = vcmask 254976  }
  0x18   : > { %v305_v3 = vld [vmem:[%s5725_s29 + $0x180] sm:$0xff]  ;;  %v4671_v4 = vpack.c.bf16 %v274_v2, %v273_v1  ;;  %v306_v5 = vld [vmem:[%s5725_s29 + $0x188] sm:$0xff]  ;;  %v276_v14 = vld [vmem:[%s5725_s29 + $0x98] sm:$0xff]  ;;  %v1202_v49 = vunpack.c.l.s4 %v5673_v48  ;;  %p3648_p6 = scmp.ne.s32.totalorder %s5711_s19, 3 }
  0x19   : > { %v257_v6 = vld [vmem:[%s5725_s29] sm:$0xff]  ;;  %v258_v7 = vld [vmem:[%s5725_s29 + $0x8] sm:$0xff]  ;;  %v4703_v8 = vpack.c.bf16 %v306_v5, %v305_v3  ;;  %v307_v15 = vld [vmem:[%s5725_s29 + $0x190] sm:$0xff]  ;;  %v4675_v17 = vpack.c.bf16 %v276_v14, %v275_v12  ;;  %v1205_v1 = vshrl.u32 %v1204_v50, 7 }
  0x1a   : > { %v4673_v9 = vpack.c.bf16 %v258_v7, %v257_v6  ;;  %v289_v10 = vld [vmem:[%s5725_s29 + $0x100] sm:$0xff]  ;;  %v290_v11 = vld [vmem:[%s5725_s29 + $0x108] sm:$0xff]  ;;  %4672 = vmatprep.subr.bf16.mxu0 %v4671_v4  ;;  %v308_v16 = vld [vmem:[%s5725_s29 + $0x198] sm:$0xff]  ;;  %v1203_v0 = vunpack.c.0.s8 %v1202_v49 }
  0x1b   : > { %v4705_v13 = vpack.c.bf16 %v290_v11, %v289_v10  ;;  %4704 = vmatprep.subr.bf16.mxu1 %v4703_v8  ;;  %v4707_v18 = vpack.c.bf16 %v308_v16, %v307_v15  ;;  %v259_v19 = vld [vmem:[%s5725_s29 + $0x10] sm:$0xff]  ;;  %v260_v20 = vld [vmem:[%s5725_s29 + $0x18] sm:$0xff]  ;;  %v277_v24 = vld [vmem:[%s5725_s29 + $0xa0] sm:$0xff] }
  0x1c   : > { %4674 = vmatpush3.bf16.msra.mxu0 %v4673_v9  ;;  %v291_v21 = vld [vmem:[%s5725_s29 + $0x110] sm:$0xff]  ;;  %v4677_v22 = vpack.c.bf16 %v260_v20, %v259_v19  ;;  %v292_v23 = vld [vmem:[%s5725_s29 + $0x118] sm:$0xff]  ;;  %v278_v25 = vld [vmem:[%s5725_s29 + $0xa8] sm:$0xff]  ;;  %v5778_v14 = vsub.s32 %v1203_v0, %v1205_v1 }
  0x1d   : > { %4706 = vmatpush3.bf16.msra.mxu1 %v4705_v13  ;;  %4676 = vmatprep.subr.bf16.mxu0 %v4675_v17  ;;  %v4709_v26 = vpack.c.bf16 %v292_v23, %v291_v21  ;;  %v4679_v27 = vpack.c.bf16 %v278_v25, %v277_v24  ;;  %v309_v28 = vld [vmem:[%s5725_s29 + $0x1a0] sm:$0xff]  ;;  %v310_v29 = vld [vmem:[%s5725_s29 + $0x1a8] sm:$0xff]  ;;  %v279_v36 = vld [vmem:[%s5725_s29 + $0xb0] sm:$0xff] }
  0x1e   : > { %4708 = vmatprep.subr.bf16.mxu1 %v4707_v18  ;;  %v261_v30 = vld [vmem:[%s5725_s29 + $0x20] sm:$0xff]  ;;  %v4711_v31 = vpack.c.bf16 %v310_v29, %v309_v28  ;;  %v262_v32 = vld [vmem:[%s5725_s29 + $0x28] sm:$0xff]  ;;  %v280_v37 = vld [vmem:[%s5725_s29 + $0xb8] sm:$0xff] }
  0x1f   : > { %v293_v33 = vld [vmem:[%s5725_s29 + $0x120] sm:$0xff]  ;;  %v294_v34 = vld [vmem:[%s5725_s29 + $0x128] sm:$0xff]  ;;  %v4681_v35 = vpack.c.bf16 %v262_v32, %v261_v30  ;;  %v311_v38 = vld [vmem:[%s5725_s29 + $0x1b0] sm:$0xff]  ;;  %v4683_v40 = vpack.c.bf16 %v280_v37, %v279_v36 }
  0x20   : > { %4678 = vmatpush3.bf16.msra.mxu0 %v4677_v22  ;;  %v4713_v39 = vpack.c.bf16 %v294_v34, %v293_v33  ;;  %v312_v41 = vld [vmem:[%s5725_s29 + $0x1b8] sm:$0xff]  ;;  %v263_v42 = vld [vmem:[%s5725_s29 + $0x30] sm:$0xff]  ;;  %v281_v47 = vld [vmem:[%s5725_s29 + $0xc0] sm:$0xff] }
  0x21   : > { %4710 = vmatpush3.bf16.msra.mxu1 %v4709_v26  ;;  %4680 = vmatprep.subr.bf16.mxu0 %v4679_v27  ;;  %v264_v43 = vld [vmem:[%s5725_s29 + $0x38] sm:$0xff]  ;;  %v4715_v44 = vpack.c.bf16 %v312_v41, %v311_v38  ;;  %v295_v45 = vld [vmem:[%s5725_s29 + $0x130] sm:$0xff]  ;;  %v282_v51 = vld [vmem:[%s5725_s29 + $0xc8] sm:$0xff] }
  0x22   : > { %4712 = vmatprep.subr.bf16.mxu1 %v4711_v31  ;;  %v296_v46 = vld [vmem:[%s5725_s29 + $0x138] sm:$0xff]  ;;  %v313_v52 = vld [vmem:[%s5725_s29 + $0x1c0] sm:$0xff]  ;;  %v314_v53 = vld [vmem:[%s5725_s29 + $0x1c8] sm:$0xff]  ;;  %v4685_v54 = vpack.c.bf16 %v264_v43, %v263_v42  ;;  %v4687_v56 = vpack.c.bf16 %v282_v51, %v281_v47 }
  0x23   : > { %v4717_v55 = vpack.c.bf16 %v296_v46, %v295_v45  ;;  %v265_v57 = vld [vmem:[%s5725_s29 + $0x40] sm:$0xff]  ;;  %v266_v58 = vld [vmem:[%s5725_s29 + $0x48] sm:$0xff]  ;;  %v4719_v60 = vpack.c.bf16 %v314_v53, %v313_v52  ;;  %v283_v62 = vld [vmem:[%s5725_s29 + $0xd0] sm:$0xff] }
  0x24   : > { %4682 = vmatpush3.bf16.msra.mxu0 %v4681_v35  ;;  %v297_v59 = vld [vmem:[%s5725_s29 + $0x140] sm:$0xff]  ;;  %v298_v61 = vld [vmem:[%s5725_s29 + $0x148] sm:$0xff]  ;;  %v284_v63 = vld [vmem:[%s5725_s29 + $0xd8] sm:$0xff]  ;;  %v4689_v4 = vpack.c.bf16 %v266_v58, %v265_v57 }
  0x25   : > { %4714 = vmatpush3.bf16.msra.mxu1 %v4713_v39  ;;  %4684 = vmatprep.subr.bf16.mxu0 %v4683_v40  ;;  %v315_v2 = vld [vmem:[%s5725_s29 + $0x1d0] sm:$0xff]  ;;  %v316_v3 = vld [vmem:[%s5725_s29 + $0x1d8] sm:$0xff]  ;;  %v4721_v5 = vpack.c.bf16 %v298_v61, %v297_v59  ;;  %v4691_v6 = vpack.c.bf16 %v284_v63, %v283_v62  ;;  %v285_v12 = vld [vmem:[%s5725_s29 + $0xe0] sm:$0xff] }
  0x26   : > { %4716 = vmatprep.subr.bf16.mxu1 %v4715_v44  ;;  %v267_v7 = vld [vmem:[%s5725_s29 + $0x50] sm:$0xff]  ;;  %v268_v8 = vld [vmem:[%s5725_s29 + $0x58] sm:$0xff]  ;;  %v4723_v10 = vpack.c.bf16 %v316_v3, %v315_v2  ;;  %v286_v13 = vld [vmem:[%s5725_s29 + $0xe8] sm:$0xff] }
  0x27   : > { %v299_v9 = vld [vmem:[%s5725_s29 + $0x150] sm:$0xff]  ;;  %v300_v11 = vld [vmem:[%s5725_s29 + $0x158] sm:$0xff]  ;;  %v317_v15 = vld [vmem:[%s5725_s29 + $0x1e0] sm:$0xff]  ;;  %v4693_v17 = vpack.c.bf16 %v268_v8, %v267_v7  ;;  %v4695_v20 = vpack.c.bf16 %v286_v13, %v285_v12 }
  0x28   : > { %4686 = vmatpush3.bf16.msra.mxu0 %v4685_v54  ;;  %v318_v16 = vld [vmem:[%s5725_s29 + $0x1e8] sm:$0xff]  ;;  %v269_v18 = vld [vmem:[%s5725_s29 + $0x60] sm:$0xff]  ;;  %v4725_v19 = vpack.c.bf16 %v300_v11, %v299_v9  ;;  %v287_v26 = vld [vmem:[%s5725_s29 + $0xf0] sm:$0xff] }
  0x29   : > { %4718 = vmatpush3.bf16.msra.mxu1 %v4717_v55  ;;  %4688 = vmatprep.subr.bf16.mxu0 %v4687_v56  ;;  %v270_v21 = vld [vmem:[%s5725_s29 + $0x68] sm:$0xff]  ;;  %v301_v22 = vld [vmem:[%s5725_s29 + $0x160] sm:$0xff]  ;;  %v4727_v24 = vpack.c.bf16 %v318_v16, %v317_v15  ;;  %v288_v27 = vld [vmem:[%s5725_s29 + $0xf8] sm:$0xff] }
  0x2a   : > { %4720 = vmatprep.subr.bf16.mxu1 %v4719_v60  ;;  %v242_v23 = vld [vmem:[%s5720_s25] sm:$0xff]  ;;  %v302_v25 = vld [vmem:[%s5725_s29 + $0x168] sm:$0xff]  ;;  %v319_v30 = vld [vmem:[%s5725_s29 + $0x1f0] sm:$0xff]  ;;  %v4697_v32 = vpack.c.bf16 %v270_v21, %v269_v18  ;;  %v4699_v36 = vpack.c.bf16 %v288_v27, %v287_v26 }
  0x2b   : > { %v1207_v28 = vrot.slane %v242_v23, %v5778_v14  ;;  %v1200_v29 = vcombine.high %v242_v23, %v242_v23  ;;  %v320_v31 = vld [vmem:[%s5725_s29 + $0x1f8] sm:$0xff]  ;;  %v4729_v35 = vpack.c.bf16 %v302_v25, %v301_v22  ;;  %v271_v37 = vld [vmem:[%s5725_s29 + $0x70] sm:$0xff]  ;;  %v337_v43 = vld [vmem:[%s5725_s29 + $0x280] sm:$0xff] }
  0x2c   : > { %4690 = vmatpush3.bf16.msra.mxu0 %v4689_v4  ;;  %v272_v38 = vld [vmem:[%s5725_s29 + $0x78] sm:$0xff]  ;;  %v303_v39 = vld [vmem:[%s5725_s29 + $0x170] sm:$0xff]  ;;  %v4731_v40 = vpack.c.bf16 %v320_v31, %v319_v30  ;;  %v338_v44 = vld [vmem:[%s5725_s29 + $0x288] sm:$0xff] }
  0x2d   : > { %4722 = vmatpush3.bf16.msra.mxu1 %v4721_v5  ;;  %4692 = vmatprep.subr.bf16.mxu0 %v4691_v6  ;;  %v1215_v33 = vcombine.high %v1207_v28, %v1207_v28  ;;  %v1214_v34 = vrot.slane %v1200_v29, %v5778_v14  ;;  %v304_v41 = vld [vmem:[%s5725_s29 + $0x178] sm:$0xff]  ;;  %v369_v45 = vld [vmem:[%s5725_s29 + $0x380] sm:$0xff]  ;;  %v370_v46 = vld [vmem:[%s5725_s29 + $0x388] sm:$0xff]  ;;  %v4701_v47 = vpack.c.bf16 %v272_v38, %v271_v37 }
  0x2e   : > { %4724 = vmatprep.subr.bf16.mxu1 %v4723_v10  ;;  %v4733_v48 = vpack.c.bf16 %v304_v41, %v303_v39  ;;  %v4735_v49 = vpack.c.bf16 %v338_v44, %v337_v43  ;;  %v321_v50 = vld [vmem:[%s5725_s29 + $0x200] sm:$0xff]  ;;  %v322_v51 = vld [vmem:[%s5725_s29 + $0x208] sm:$0xff]  ;;  %v4767_v53 = vpack.c.bf16 %v370_v46, %v369_v45  ;;  %v339_v55 = vld [vmem:[%s5725_s29 + $0x290] sm:$0xff] }
  0x2f   : > { %1568 = vmatprep.mubr.f32.mxu0 %v1215_v33  ;;  %v1216_v42 = vcombine.high %v1214_v34, %v1214_v34  ;;  %v353_v52 = vld [vmem:[%s5725_s29 + $0x300] sm:$0xff]  ;;  %v354_v54 = vld [vmem:[%s5725_s29 + $0x308] sm:$0xff]  ;;  %v340_v56 = vld [vmem:[%s5725_s29 + $0x298] sm:$0xff]  ;;  %v4737_v59 = vpack.c.bf16 %v322_v51, %v321_v50 }
  0x30   : > { %4694 = vmatpush3.bf16.msra.mxu0 %v4693_v17  ;;  %v371_v57 = vld [vmem:[%s5725_s29 + $0x390] sm:$0xff]  ;;  %v372_v58 = vld [vmem:[%s5725_s29 + $0x398] sm:$0xff]  ;;  %v4769_v60 = vpack.c.bf16 %v354_v54, %v353_v52  ;;  %v4739_v61 = vpack.c.bf16 %v340_v56, %v339_v55  ;;  %v341_v3 = vld [vmem:[%s5725_s29 + $0x2a0] sm:$0xff] }
  0x31   : > { %4726 = vmatpush3.bf16.msra.mxu1 %v4725_v19  ;;  %4696 = vmatprep.subr.bf16.mxu0 %v4695_v20  ;;  %v323_v62 = vld [vmem:[%s5725_s29 + $0x210] sm:$0xff]  ;;  %v324_v63 = vld [vmem:[%s5725_s29 + $0x218] sm:$0xff]  ;;  %v4771_v1 = vpack.c.bf16 %v372_v58, %v371_v57  ;;  %v342_v4 = vld [vmem:[%s5725_s29 + $0x2a8] sm:$0xff] }
  0x32   : > { %4728 = vmatprep.subr.bf16.mxu1 %v4727_v24  ;;  %1638 = vmatprep.mubr.f32.mxu1 %v1216_v42  ;;  %v355_v0 = vld [vmem:[%s5725_s29 + $0x310] sm:$0xff]  ;;  %v356_v2 = vld [vmem:[%s5725_s29 + $0x318] sm:$0xff]  ;;  %v373_v5 = vld [vmem:[%s5725_s29 + $0x3a0] sm:$0xff]  ;;  %v4741_v7 = vpack.c.bf16 %v324_v63, %v323_v62  ;;  %v4743_v9 = vpack.c.bf16 %v342_v4, %v341_v3 }
  0x33   : > { %v374_v6 = vld [vmem:[%s5725_s29 + $0x3a8] sm:$0xff]  ;;  %v4773_v8 = vpack.c.bf16 %v356_v2, %v355_v0  ;;  %v325_v10 = vld [vmem:[%s5725_s29 + $0x220] sm:$0xff]  ;;  %v343_v16 = vld [vmem:[%s5725_s29 + $0x2b0] sm:$0xff] }
  0x34   : > { %4698 = vmatpush3.bf16.msra.mxu0 %v4697_v32  ;;  %v326_v11 = vld [vmem:[%s5725_s29 + $0x228] sm:$0xff]  ;;  %v357_v12 = vld [vmem:[%s5725_s29 + $0x320] sm:$0xff]  ;;  %v4775_v13 = vpack.c.bf16 %v374_v6, %v373_v5  ;;  %v344_v17 = vld [vmem:[%s5725_s29 + $0x2b8] sm:$0xff] }
  0x35   : > { %4730 = vmatpush3.bf16.msra.mxu1 %v4729_v35  ;;  %4700 = vmatprep.subr.bf16.mxu0 %v4699_v36  ;;  %v358_v15 = vld [vmem:[%s5725_s29 + $0x328] sm:$0xff]  ;;  %v375_v18 = vld [vmem:[%s5725_s29 + $0x3b0] sm:$0xff]  ;;  %v376_v19 = vld [vmem:[%s5725_s29 + $0x3b8] sm:$0xff]  ;;  %v4745_v20 = vpack.c.bf16 %v326_v11, %v325_v10  ;;  %v4747_v23 = vpack.c.bf16 %v344_v17, %v343_v16 }
  0x36   : > { %4732 = vmatprep.subr.bf16.mxu1 %v4731_v40  ;;  %v327_v21 = vld [vmem:[%s5725_s29 + $0x230] sm:$0xff]  ;;  %v4777_v22 = vpack.c.bf16 %v358_v15, %v357_v12  ;;  %v328_v24 = vld [vmem:[%s5725_s29 + $0x238] sm:$0xff]  ;;  %v4779_v27 = vpack.c.bf16 %v376_v19, %v375_v18  ;;  %v346_v29 = vld [vmem:[%s5725_s29 + $0x2c8] sm:$0xff] }
  0x37   : > { %v359_v25 = vld [vmem:[%s5725_s29 + $0x330] sm:$0xff]  ;;  %v360_v26 = vld [vmem:[%s5725_s29 + $0x338] sm:$0xff]  ;;  %v243_v30 = vld [vmem:[%s5720_s25 + $0x8] sm:$0xff]  ;;  %v4749_v35 = vpack.c.bf16 %v328_v24, %v327_v21 }
  0x38   : > { %4702 = vmatpush3.bf16.msra.mxu0 %v4701_v47  ;;  %v377_v31 = vld [vmem:[%s5725_s29 + $0x3c0] sm:$0xff]  ;;  %v378_v32 = vld [vmem:[%s5725_s29 + $0x3c8] sm:$0xff]  ;;  %v5835_v33 = vrot.slane %v243_v30, %v5778_v14  ;;  %v4781_v36 = vpack.c.bf16 %v360_v26, %v359_v25  ;;  %v347_v45 = vld [vmem:[%s5725_s29 + $0x2d0] sm:$0xff] }
  0x39   : > { %4734 = vmatpush3.bf16.msra.mxu1 %v4733_v48  ;;  %4736 = vmatprep.subr.bf16.mxu0 %v4735_v49  ;;  %v329_v38 = vld [vmem:[%s5725_s29 + $0x240] sm:$0xff]  ;;  %v330_v39 = vld [vmem:[%s5725_s29 + $0x248] sm:$0xff]  ;;  %v4783_v43 = vpack.c.bf16 %v378_v32, %v377_v31  ;;  %v348_v46 = vld [vmem:[%s5725_s29 + $0x2d8] sm:$0xff] }
  0x3a   : > { %4768 = vmatprep.subr.bf16.mxu1 %v4767_v53  ;;  %v361_v40 = vld [vmem:[%s5725_s29 + $0x340] sm:$0xff]  ;;  %v1232_v41 = vcombine.high %v5835_v33, %v5835_v33  ;;  %v362_v44 = vld [vmem:[%s5725_s29 + $0x348] sm:$0xff]  ;;  %v379_v47 = vld [vmem:[%s5725_s29 + $0x3d0] sm:$0xff]  ;;  %v4753_v50 = vpack.c.bf16 %v330_v39, %v329_v38  ;;  %v4755_v52 = vpack.c.bf16 %v348_v46, %v347_v45 }
  0x3b   : > { %1569 = vmatmul.mubr.f32.vlgmr.msra.gmra.mrb[0].mxu0 %v1207_v28  ;;  %v345_v28 = vld [vmem:[%s5725_s29 + $0x2c0] sm:$0xff]  ;;  %v380_v48 = vld [vmem:[%s5725_s29 + $0x3d8] sm:$0xff]  ;;  %v4785_v51 = vpack.c.bf16 %v362_v44, %v361_v40  ;;  %v331_v53 = vld [vmem:[%s5725_s29 + $0x250] sm:$0xff] }
  0x3c   : > { %1639 = vmatmul.mubr.f32.vlgmr.msra.gmra.mrb[0].mxu1 %v1214_v34  ;;  %4738 = vmatpush3.bf16.msra.mxu0 %v4737_v59  ;;  %v1217_v34 = vcombine.high %v243_v30, %v243_v30  ;;  %v4751_v37 = vpack.c.bf16 %v346_v29, %v345_v28  ;;  %v332_v54 = vld [vmem:[%s5725_s29 + $0x258] sm:$0xff]  ;;  %v363_v55 = vld [vmem:[%s5725_s29 + $0x350] sm:$0xff]  ;;  %v4787_v56 = vpack.c.bf16 %v380_v48, %v379_v47  ;;  %v349_v58 = vld [vmem:[%s5725_s29 + $0x2e0] sm:$0xff] }
  0x3d   : > { %4770 = vmatpush3.bf16.msra.mxu1 %v4769_v60  ;;  %4740 = vmatprep.subr.bf16.mxu0 %v4739_v61  ;;  %v364_v57 = vld [vmem:[%s5725_s29 + $0x358] sm:$0xff]  ;;  %v350_v59 = vld [vmem:[%s5725_s29 + $0x2e8] sm:$0xff]  ;;  %v381_v60 = vld [vmem:[%s5725_s29 + $0x3e0] sm:$0xff]  ;;  %v4757_v62 = vpack.c.bf16 %v332_v54, %v331_v53 }
  0x3e   : > { %4772 = vmatprep.subr.bf16.mxu1 %v4771_v1  ;;  %v5843_v42 = vrot.slane %v1217_v34, %v5778_v14  ;;  %1708 = vmatprep.mubr.f32.mxu0 %v1232_v41  ;;  %v382_v61 = vld [vmem:[%s5725_s29 + $0x3e8] sm:$0xff]  ;;  %v4789_v63 = vpack.c.bf16 %v364_v57, %v363_v55  ;;  %v4759_v0 = vpack.c.bf16 %v350_v59, %v349_v58  ;;  %v333_v1 = vld [vmem:[%s5725_s29 + $0x260] sm:$0xff]  ;;  %v351_v6 = vld [vmem:[%s5725_s29 + $0x2f0] sm:$0xff] }
  0x3f   : > { %v334_v2 = vld [vmem:[%s5725_s29 + $0x268] sm:$0xff]  ;;  %v365_v3 = vld [vmem:[%s5725_s29 + $0x360] sm:$0xff]  ;;  %v4791_v4 = vpack.c.bf16 %v382_v61, %v381_v60  ;;  %v336_v15 = vld [vmem:[%s5725_s29 + $0x278] sm:$0xff] }
  0x40   : > { %4742 = vmatpush3.bf16.msra.mxu0 %v4741_v7  ;;  %v1233_v49 = vcombine.high %v5843_v42, %v5843_v42  ;;  %v366_v5 = vld [vmem:[%s5725_s29 + $0x368] sm:$0xff]  ;;  %v352_v7 = vld [vmem:[%s5725_s29 + $0x2f8] sm:$0xff]  ;;  %v4761_v10 = vpack.c.bf16 %v334_v2, %v333_v1  ;;  %v367_v16 = vld [vmem:[%s5725_s29 + $0x370] sm:$0xff] }
  0x41   : > { %4774 = vmatpush3.bf16.msra.mxu1 %v4773_v8  ;;  %4744 = vmatprep.subr.bf16.mxu0 %v4743_v9  ;;  %v383_v8 = vld [vmem:[%s5725_s29 + $0x3f0] sm:$0xff]  ;;  %v384_v9 = vld [vmem:[%s5725_s29 + $0x3f8] sm:$0xff]  ;;  %v4793_v11 = vpack.c.bf16 %v366_v5, %v365_v3  ;;  %v4763_v12 = vpack.c.bf16 %v352_v7, %v351_v6  ;;  %v401_v19 = vld [vmem:[%s5725_s29 + $0x480] sm:$0xff] }
  0x42   : > { %4776 = vmatprep.subr.bf16.mxu1 %v4775_v13  ;;  %1778 = vmatprep.mubr.f32.mxu1 %v1233_v49  ;;  %v335_v13 = vld [vmem:[%s5725_s29 + $0x270] sm:$0xff]  ;;  %v4795_v17 = vpack.c.bf16 %v384_v9, %v383_v8  ;;  %v368_v18 = vld [vmem:[%s5725_s29 + $0x378] sm:$0xff]  ;;  %v433_v21 = vld [vmem:[%s5725_s29 + $0x580] sm:$0xff] }
  0x43   : > { %v385_v24 = vld [vmem:[%s5725_s29 + $0x400] sm:$0xff]  ;;  %v4797_v25 = vpack.c.bf16 %v368_v18, %v367_v16  ;;  %v418_v29 = vld [vmem:[%s5725_s29 + $0x508] sm:$0xff]  ;;  %v403_v31 = vld [vmem:[%s5725_s29 + $0x490] sm:$0xff] }
  0x44   : > { %4746 = vmatpush3.bf16.msra.mxu0 %v4745_v20  ;;  %v402_v20 = vld [vmem:[%s5725_s29 + $0x488] sm:$0xff]  ;;  %v417_v28 = vld [vmem:[%s5725_s29 + $0x500] sm:$0xff]  ;;  %v404_v32 = vld [vmem:[%s5725_s29 + $0x498] sm:$0xff] }
  0x45   : > { %4778 = vmatpush3.bf16.msra.mxu1 %v4777_v22  ;;  %4748 = vmatprep.subr.bf16.mxu0 %v4747_v23  ;;  %v434_v22 = vld [vmem:[%s5725_s29 + $0x588] sm:$0xff]  ;;  %v4765_v23 = vpack.c.bf16 %v336_v15, %v335_v13  ;;  %v4799_v26 = vpack.c.bf16 %v402_v20, %v401_v19  ;;  %v435_v34 = vld [vmem:[%s5725_s29 + $0x590] sm:$0xff]  ;;  %v4803_v39 = vpack.c.bf16 %v404_v32, %v403_v31  ;;  %v388_v41 = vld [vmem:[%s5725_s29 + $0x418] sm:$0xff] }
  0x46   : > { %4780 = vmatprep.subr.bf16.mxu1 %v4779_v27  ;;  %v386_v27 = vld [vmem:[%s5725_s29 + $0x408] sm:$0xff]  ;;  %v4831_v30 = vpack.c.bf16 %v434_v22, %v433_v21  ;;  %v244_v38 = vld [vmem:[%s5720_s25 + $0x10] sm:$0xff]  ;;  %v420_v47 = vld [vmem:[%s5725_s29 + $0x518] sm:$0xff] }
  0x47   : > { %v387_v40 = vld [vmem:[%s5725_s29 + $0x410] sm:$0xff]  ;;  %v5889_v44 = vrot.slane %v244_v38, %v5778_v14  ;;  %v1234_v45 = vcombine.high %v244_v38, %v244_v38  ;;  %v405_v48 = vld [vmem:[%s5725_s29 + $0x4a0] sm:$0xff]  ;;  %v406_v49 = vld [vmem:[%s5725_s29 + $0x4a8] sm:$0xff] }
  0x48   : > { %4750 = vmatpush3.bf16.msra.mxu0 %v4749_v35  ;;  %v436_v35 = vld [vmem:[%s5725_s29 + $0x598] sm:$0xff]  ;;  %v4805_v54 = vpack.c.bf16 %v388_v41, %v387_v40  ;;  %v4807_v55 = vpack.c.bf16 %v406_v49, %v405_v48  ;;  %v390_v57 = vld [vmem:[%s5725_s29 + $0x428] sm:$0xff]  ;;  %v421_v58 = vld [vmem:[%s5725_s29 + $0x520] sm:$0xff] }
  0x49   : > { %4782 = vmatpush3.bf16.msra.mxu1 %v4781_v36  ;;  %4752 = vmatprep.subr.bf16.mxu0 %v4751_v37  ;;  %v4801_v36 = vpack.c.bf16 %v386_v27, %v385_v24  ;;  %v4833_v37 = vpack.c.bf16 %v418_v29, %v417_v28  ;;  %v4835_v46 = vpack.c.bf16 %v436_v35, %v435_v34  ;;  %v422_v61 = vld [vmem:[%s5725_s29 + $0x528] sm:$0xff]  ;;  %v392_v5 = vld [vmem:[%s5725_s29 + $0x438] sm:$0xff]  ;;  %v423_v6 = vld [vmem:[%s5725_s29 + $0x530] sm:$0xff] }
  0x4a   : > { %4784 = vmatprep.subr.bf16.mxu1 %v4783_v43  ;;  %v419_v43 = vld [vmem:[%s5725_s29 + $0x510] sm:$0xff]  ;;  %v5900_v53 = vrot.slane %v1234_v45, %v5778_v14  ;;  %v4841_v2 = vpack.c.bf16 %v422_v61, %v421_v58  ;;  %v424_v8 = vld [vmem:[%s5725_s29 + $0x538] sm:$0xff]  ;;  %v409_v9 = vld [vmem:[%s5725_s29 + $0x4c0] sm:$0xff] }
  0x4b   : > { %v4845_v15 = vpack.c.bf16 %v424_v8, %v423_v6  ;;  %v394_v18 = vld [vmem:[%s5725_s29 + $0x448] sm:$0xff]  ;;  %v425_v19 = vld [vmem:[%s5725_s29 + $0x540] sm:$0xff]  ;;  %v411_v22 = vld [vmem:[%s5725_s29 + $0x4d0] sm:$0xff] }
  0x4c   : > { %4754 = vmatpush3.bf16.msra.mxu0 %v4753_v50  ;;  %v437_v50 = vld [vmem:[%s5725_s29 + $0x5a0] sm:$0xff]  ;;  %v1250_v59 = vcombine.high %v5900_v53, %v5900_v53  ;;  %v426_v21 = vld [vmem:[%s5725_s29 + $0x548] sm:$0xff]  ;;  %v443_v24 = vld [vmem:[%s5725_s29 + $0x5d0] sm:$0xff] }
  0x4d   : > { %4786 = vmatpush3.bf16.msra.mxu1 %v4785_v51  ;;  %4756 = vmatprep.subr.bf16.mxu0 %v4755_v52  ;;  %v438_v51 = vld [vmem:[%s5725_s29 + $0x5a8] sm:$0xff]  ;;  %v1249_v52 = vcombine.high %v5889_v44, %v5889_v44  ;;  %v4849_v27 = vpack.c.bf16 %v426_v21, %v425_v19  ;;  %v395_v29 = vld [vmem:[%s5725_s29 + $0x450] sm:$0xff]  ;;  %v428_v34 = vld [vmem:[%s5725_s29 + $0x558] sm:$0xff] }
  0x4e   : > { %4788 = vmatprep.subr.bf16.mxu1 %v4787_v56  ;;  %v389_v56 = vld [vmem:[%s5725_s29 + $0x420] sm:$0xff]  ;;  %v4839_v60 = vpack.c.bf16 %v438_v51, %v437_v50  ;;  %v427_v31 = vld [vmem:[%s5725_s29 + $0x550] sm:$0xff]  ;;  %v446_v38 = vld [vmem:[%s5725_s29 + $0x5e8] sm:$0xff] }
  0x4f   : > { %v4809_v1 = vpack.c.bf16 %v390_v57, %v389_v56  ;;  %v413_v35 = vld [vmem:[%s5725_s29 + $0x4e0] sm:$0xff]  ;;  %v4853_v40 = vpack.c.bf16 %v428_v34, %v427_v31  ;;  %v398_v45 = vld [vmem:[%s5725_s29 + $0x468] sm:$0xff]  ;;  %v415_v49 = vld [vmem:[%s5725_s29 + $0x4f0] sm:$0xff] }
  0x50   : > { %4758 = vmatpush3.bf16.msra.mxu0 %v4757_v62  ;;  %v408_v62 = vld [vmem:[%s5725_s29 + $0x4b8] sm:$0xff]  ;;  %v430_v48 = vld [vmem:[%s5725_s29 + $0x568] sm:$0xff]  ;;  %v447_v51 = vld [vmem:[%s5725_s29 + $0x5f0] sm:$0xff] }
  0x51   : > { %4790 = vmatpush3.bf16.msra.mxu1 %v4789_v63  ;;  %4760 = vmatprep.subr.bf16.mxu0 %v4759_v0  ;;  %v439_v63 = vld [vmem:[%s5725_s29 + $0x5b0] sm:$0xff]  ;;  %v440_v0 = vld [vmem:[%s5725_s29 + $0x5b8] sm:$0xff]  ;;  %v450_v6 = vld [vmem:[%s5725_s29 + $0x608] sm:$0xff] }
  0x52   : > { %4792 = vmatprep.subr.bf16.mxu1 %v4791_v4  ;;  %v391_v4 = vld [vmem:[%s5725_s29 + $0x430] sm:$0xff]  ;;  %v4843_v7 = vpack.c.bf16 %v440_v0, %v439_v63  ;;  %v416_v50 = vld [vmem:[%s5725_s29 + $0x4f8] sm:$0xff]  ;;  %v497_v63 = vld [vmem:[%s5725_s29 + $0x780] sm:$0xff] }
  0x53   : > { %v4813_v13 = vpack.c.bf16 %v392_v5, %v391_v4  ;;  %v4827_v56 = vpack.c.bf16 %v416_v50, %v415_v49  ;;  %v399_v57 = vld [vmem:[%s5725_s29 + $0x470] sm:$0xff]  ;;  %v400_v58 = vld [vmem:[%s5725_s29 + $0x478] sm:$0xff]  ;;  %v498_v0 = vld [vmem:[%s5725_s29 + $0x788] sm:$0xff] }
  0x54   : > { %4762 = vmatpush3.bf16.msra.mxu0 %v4761_v10  ;;  %v410_v10 = vld [vmem:[%s5725_s29 + $0x4c8] sm:$0xff]  ;;  %v432_v61 = vld [vmem:[%s5725_s29 + $0x578] sm:$0xff]  ;;  %v449_v5 = vld [vmem:[%s5725_s29 + $0x600] sm:$0xff]  ;;  %v4895_v8 = vpack.c.bf16 %v498_v0, %v497_v63 }
  0x55   : > { %4794 = vmatpush3.bf16.msra.mxu1 %v4793_v11  ;;  %4764 = vmatprep.subr.bf16.mxu0 %v4763_v12  ;;  %v441_v11 = vld [vmem:[%s5725_s29 + $0x5c0] sm:$0xff]  ;;  %v442_v12 = vld [vmem:[%s5725_s29 + $0x5c8] sm:$0xff]  ;;  %v4815_v16 = vpack.c.bf16 %v410_v10, %v409_v9  ;;  %v467_v10 = vld [vmem:[%s5725_s29 + $0x690] sm:$0xff] }
  0x56   : > { %4796 = vmatprep.subr.bf16.mxu1 %v4795_v17  ;;  %v393_v17 = vld [vmem:[%s5725_s29 + $0x440] sm:$0xff]  ;;  %v4847_v20 = vpack.c.bf16 %v442_v12, %v441_v11  ;;  %v482_v9 = vld [vmem:[%s5725_s29 + $0x708] sm:$0xff]  ;;  %v468_v11 = vld [vmem:[%s5725_s29 + $0x698] sm:$0xff] }
  0x57   : > { %v4867_v19 = vpack.c.bf16 %v468_v11, %v467_v10  ;;  %v452_v21 = vld [vmem:[%s5725_s29 + $0x618] sm:$0xff]  ;;  %v487_v49 = vld [vmem:[%s5725_s29 + $0x730] sm:$0xff]  ;;  %v477_v11 = vld [vmem:[%s5725_s29 + $0x6e0] sm:$0xff] }
  0x58   : > { %4766 = vmatpush3.bf16.msra.mxu0 %v4765_v23  ;;  %v412_v23 = vld [vmem:[%s5725_s29 + $0x4d8] sm:$0xff]  ;;  %v475_v63 = vld [vmem:[%s5725_s29 + $0x6d0] sm:$0xff] }
  0x59   : > { %4798 = vmatpush3.bf16.msra.mxu1 %v4797_v25  ;;  %4800 = vmatprep.subr.bf16.mxu0 %v4799_v26  ;;  %v444_v25 = vld [vmem:[%s5725_s29 + $0x5d8] sm:$0xff]  ;;  %v4817_v26 = vpack.c.bf16 %v394_v18, %v393_v17  ;;  %v4819_v28 = vpack.c.bf16 %v412_v23, %v411_v22  ;;  %v4865_v17 = vpack.c.bf16 %v450_v6, %v449_v5  ;;  %v483_v22 = vld [vmem:[%s5725_s29 + $0x710] sm:$0xff] }
  0x5a   : > { %4832 = vmatprep.subr.bf16.mxu1 %v4831_v30  ;;  %v396_v30 = vld [vmem:[%s5725_s29 + $0x458] sm:$0xff]  ;;  %v4851_v32 = vpack.c.bf16 %v444_v25, %v443_v24  ;;  %v469_v25 = vld [vmem:[%s5725_s29 + $0x6a0] sm:$0xff]  ;;  %v459_v6 = vld [vmem:[%s5725_s29 + $0x650] sm:$0xff] }
  0x5b   : > { %1709 = vmatmul.mubr.f32.vlgmr.msra.gmra.mrb[2].mxu0 %v5835_v33  ;;  %v4837_v33 = vpack.c.bf16 %v420_v47, %v419_v43  ;;  %v397_v43 = vld [vmem:[%s5725_s29 + $0x460] sm:$0xff]  ;;  %v484_v24 = vld [vmem:[%s5725_s29 + $0x718] sm:$0xff] }
  0x5c   : > { %4802 = vmatpush3.bf16.msra.mxu0 %v4801_v36  ;;  %1779 = vmatmul.mubr.f32.vlgmr.msra.gmra.mrb[2].mxu1 %v5843_v42  ;;  %v407_v42 = vld [vmem:[%s5725_s29 + $0x4b0] sm:$0xff]  ;;  %v414_v36 = vld [vmem:[%s5725_s29 + $0x4e8] sm:$0xff]  ;;  %v476_v0 = vld [vmem:[%s5725_s29 + $0x6d8] sm:$0xff] }
  0x5d   : > { %4834 = vmatpush3.bf16.msra.mxu1 %v4833_v37  ;;  %4804 = vmatprep.subr.bf16.mxu0 %v4803_v39  ;;  %v4811_v3 = vpack.c.bf16 %v408_v62, %v407_v42  ;;  %v445_v37 = vld [vmem:[%s5725_s29 + $0x5e0] sm:$0xff]  ;;  %v4821_v39 = vpack.c.bf16 %v396_v30, %v395_v29  ;;  %v4823_v41 = vpack.c.bf16 %v414_v36, %v413_v35  ;;  %v466_v62 = vld [vmem:[%s5725_s29 + $0x688] sm:$0xff]  ;;  %v492_v10 = vld [vmem:[%s5725_s29 + $0x758] sm:$0xff] }
  0x5e   : > { %4836 = vmatprep.subr.bf16.mxu1 %v4835_v46  ;;  %1848 = vmatprep.mubr.f32.mxu0 %v1249_v52  ;;  %v429_v46 = vld [vmem:[%s5725_s29 + $0x560] sm:$0xff]  ;;  %v4855_v47 = vpack.c.bf16 %v446_v38, %v445_v37  ;;  %v448_v52 = vld [vmem:[%s5725_s29 + $0x5f8] sm:$0xff]  ;;  %v502_v29 = vld [vmem:[%s5725_s29 + $0x7a8] sm:$0xff]  ;;  %v4883_v5 = vpack.c.bf16 %v476_v0, %v475_v63 }
  0x5f   : > { %1918 = vmatprep.mubr.f32.mxu1 %v1250_v59  ;;  %v431_v59 = vld [vmem:[%s5725_s29 + $0x570] sm:$0xff]  ;;  %v465_v42 = vld [vmem:[%s5725_s29 + $0x680] sm:$0xff]  ;;  %v486_v38 = vld [vmem:[%s5725_s29 + $0x728] sm:$0xff] }
  0x60   : > { %4806 = vmatpush3.bf16.msra.mxu0 %v4805_v54  ;;  %v4825_v54 = vpack.c.bf16 %v398_v45, %v397_v43  ;;  %v4863_v4 = vpack.c.bf16 %v466_v62, %v465_v42  ;;  %v453_v35 = vld [vmem:[%s5725_s29 + $0x620] sm:$0xff]  ;;  %v490_v62 = vld [vmem:[%s5725_s29 + $0x748] sm:$0xff]  ;;  %v547_v63 = vld [vmem:[%s5725_s29 + $0x910] sm:$0xff] }
  0x61   : > { %4838 = vmatpush3.bf16.msra.mxu1 %v4837_v33  ;;  %4808 = vmatprep.subr.bf16.mxu0 %v4807_v55  ;;  %v245_v33 = vld [vmem:[%s5720_s25 + $0x18] sm:$0xff]  ;;  %v4857_v55 = vpack.c.bf16 %v430_v48, %v429_v46  ;;  %v485_v36 = vld [vmem:[%s5725_s29 + $0x720] sm:$0xff] }
  0x62   : > { %4840 = vmatprep.subr.bf16.mxu1 %v4839_v60  ;;  %v4859_v60 = vpack.c.bf16 %v448_v52, %v447_v51  ;;  %v5961_v12 = vrot.slane %v245_v33, %v5778_v14  ;;  %v4905_v45 = vpack.c.bf16 %v486_v38, %v485_v36  ;;  %v456_v48 = vld [vmem:[%s5725_s29 + $0x638] sm:$0xff]  ;;  %v473_v52 = vld [vmem:[%s5725_s29 + $0x6c0] sm:$0xff]  ;;  %v495_v36 = vld [vmem:[%s5725_s29 + $0x770] sm:$0xff] }
  0x63   : > { %v488_v51 = vld [vmem:[%s5725_s29 + $0x738] sm:$0xff] }
  0x64   : > { %4810 = vmatpush3.bf16.msra.mxu0 %v4809_v1  ;;  %v1251_v1 = vcombine.high %v245_v33, %v245_v33  ;;  %v505_v33 = vld [vmem:[%s5725_s29 + $0x7c0] sm:$0xff]  ;;  %v496_v38 = vld [vmem:[%s5725_s29 + $0x778] sm:$0xff] }
  0x65   : > { %4842 = vmatpush3.bf16.msra.mxu1 %v4841_v2  ;;  %4812 = vmatprep.subr.bf16.mxu0 %v4811_v3  ;;  %v4829_v2 = vpack.c.bf16 %v400_v58, %v399_v57  ;;  %v4861_v3 = vpack.c.bf16 %v432_v61, %v431_v59  ;;  %v4909_v57 = vpack.c.bf16 %v488_v51, %v487_v49  ;;  %v457_v59 = vld [vmem:[%s5725_s29 + $0x640] sm:$0xff]  ;;  %v514_v49 = vld [vmem:[%s5725_s29 + $0x808] sm:$0xff] }
  0x66   : > { %4844 = vmatprep.subr.bf16.mxu1 %v4843_v7  ;;  %v481_v7 = vld [vmem:[%s5725_s29 + $0x700] sm:$0xff] }
  0x67   : > { %v4897_v18 = vpack.c.bf16 %v482_v9, %v481_v7  ;;  %v489_v61 = vld [vmem:[%s5725_s29 + $0x740] sm:$0xff]  ;;  %v460_v7 = vld [vmem:[%s5725_s29 + $0x658] sm:$0xff] }
  0x68   : > { %4814 = vmatpush3.bf16.msra.mxu0 %v4813_v13  ;;  %v499_v13 = vld [vmem:[%s5725_s29 + $0x790] sm:$0xff] }
  0x69   : > { %4846 = vmatpush3.bf16.msra.mxu1 %v4845_v15  ;;  %4816 = vmatprep.subr.bf16.mxu0 %v4815_v16  ;;  %v500_v15 = vld [vmem:[%s5725_s29 + $0x798] sm:$0xff]  ;;  %v5966_v16 = vrot.slane %v1251_v1, %v5778_v14  ;;  %v507_v1 = vld [vmem:[%s5725_s29 + $0x7d0] sm:$0xff] }
  0x6a   : > { %4848 = vmatprep.subr.bf16.mxu1 %v4847_v20  ;;  %v451_v20 = vld [vmem:[%s5725_s29 + $0x610] sm:$0xff]  ;;  %v4899_v23 = vpack.c.bf16 %v500_v15, %v499_v13  ;;  %v478_v13 = vld [vmem:[%s5725_s29 + $0x6e8] sm:$0xff]  ;;  %v509_v15 = vld [vmem:[%s5725_s29 + $0x7e0] sm:$0xff] }
  0x6b   : > { %v1267_v30 = vcombine.high %v5966_v16, %v5966_v16  ;;  %v4869_v31 = vpack.c.bf16 %v452_v21, %v451_v20  ;;  %v4887_v20 = vpack.c.bf16 %v478_v13, %v477_v11  ;;  %v461_v21 = vld [vmem:[%s5725_s29 + $0x660] sm:$0xff] }
  0x6c   : > { %4818 = vmatpush3.bf16.msra.mxu0 %v4817_v26  ;;  %v470_v26 = vld [vmem:[%s5725_s29 + $0x6a8] sm:$0xff]  ;;  %v517_v11 = vld [vmem:[%s5725_s29 + $0x820] sm:$0xff] }
  0x6d   : > { %4850 = vmatpush3.bf16.msra.mxu1 %v4849_v27  ;;  %4820 = vmatprep.subr.bf16.mxu0 %v4819_v28  ;;  %v1266_v27 = vcombine.high %v5961_v12, %v5961_v12  ;;  %v501_v28 = vld [vmem:[%s5725_s29 + $0x7a0] sm:$0xff]  ;;  %v4871_v34 = vpack.c.bf16 %v470_v26, %v469_v25  ;;  %v494_v25 = vld [vmem:[%s5725_s29 + $0x768] sm:$0xff]  ;;  %v479_v26 = vld [vmem:[%s5725_s29 + $0x6f0] sm:$0xff] }
  0x6e   : > { %4852 = vmatprep.subr.bf16.mxu1 %v4851_v32  ;;  %v4901_v32 = vpack.c.bf16 %v484_v24, %v483_v22  ;;  %v4903_v37 = vpack.c.bf16 %v502_v29, %v501_v28  ;;  %v462_v22 = vld [vmem:[%s5725_s29 + $0x668] sm:$0xff]  ;;  %v511_v28 = vld [vmem:[%s5725_s29 + $0x7f0] sm:$0xff]  ;;  %v512_v29 = vld [vmem:[%s5725_s29 + $0x7f8] sm:$0xff] }
  0x6f   : > { %v549_v13 = vld [vmem:[%s5725_s29 + $0x920] sm:$0xff] }
  0x70   : > { %4822 = vmatpush3.bf16.msra.mxu0 %v4821_v39  ;;  %v471_v39 = vld [vmem:[%s5725_s29 + $0x6b0] sm:$0xff] }
  0x71   : > { %4854 = vmatpush3.bf16.msra.mxu1 %v4853_v40  ;;  %4824 = vmatprep.subr.bf16.mxu0 %v4823_v41  ;;  %v472_v40 = vld [vmem:[%s5725_s29 + $0x6b8] sm:$0xff] }
  0x72   : > { %4856 = vmatprep.subr.bf16.mxu1 %v4855_v47  ;;  %v504_v41 = vld [vmem:[%s5725_s29 + $0x7b8] sm:$0xff]  ;;  %v4875_v46 = vpack.c.bf16 %v472_v40, %v471_v39  ;;  %v455_v47 = vld [vmem:[%s5725_s29 + $0x630] sm:$0xff]  ;;  %v529_v39 = vld [vmem:[%s5725_s29 + $0x880] sm:$0xff] }
  0x73   : > { %v530_v40 = vld [vmem:[%s5725_s29 + $0x888] sm:$0xff] }
  0x74   : > { %4826 = vmatpush3.bf16.msra.mxu0 %v4825_v54  ;;  %v474_v54 = vld [vmem:[%s5725_s29 + $0x6c8] sm:$0xff] }
  0x75   : > { %4858 = vmatpush3.bf16.msra.mxu1 %v4857_v55  ;;  %4828 = vmatprep.subr.bf16.mxu0 %v4827_v56  ;;  %v506_v55 = vld [vmem:[%s5725_s29 + $0x7c8] sm:$0xff]  ;;  %v4877_v56 = vpack.c.bf16 %v456_v48, %v455_v47  ;;  %v4879_v58 = vpack.c.bf16 %v474_v54, %v473_v52  ;;  %v4927_v47 = vpack.c.bf16 %v530_v40, %v529_v39  ;;  %v513_v48 = vld [vmem:[%s5725_s29 + $0x800] sm:$0xff]  ;;  %v531_v54 = vld [vmem:[%s5725_s29 + $0x890] sm:$0xff] }
  0x76   : > { %4860 = vmatprep.subr.bf16.mxu1 %v4859_v60  ;;  %v458_v60 = vld [vmem:[%s5725_s29 + $0x648] sm:$0xff]  ;;  %v4911_v42 = vpack.c.bf16 %v506_v55, %v505_v33  ;;  %v532_v33 = vld [vmem:[%s5725_s29 + $0x898] sm:$0xff] }
  0x77   : > { %v546_v52 = vld [vmem:[%s5725_s29 + $0x908] sm:$0xff] }
  0x78   : > { %4830 = vmatpush3.bf16.msra.mxu0 %v4829_v2  ;;  %v508_v2 = vld [vmem:[%s5725_s29 + $0x7d8] sm:$0xff]  ;;  %v554_v40 = vld [vmem:[%s5725_s29 + $0x948] sm:$0xff] }
  0x79   : > { %4862 = vmatpush3.bf16.msra.mxu1 %v4861_v3  ;;  %4864 = vmatprep.subr.bf16.mxu0 %v4863_v4  ;;  %v4881_v3 = vpack.c.bf16 %v458_v60, %v457_v59  ;;  %v4913_v4 = vpack.c.bf16 %v490_v62, %v489_v61  ;;  %v4915_v9 = vpack.c.bf16 %v508_v2, %v507_v1  ;;  %v516_v62 = vld [vmem:[%s5725_s29 + $0x818] sm:$0xff]  ;;  %v533_v2 = vld [vmem:[%s5725_s29 + $0x8a0] sm:$0xff] }
  0x7a   : > { %4896 = vmatprep.subr.bf16.mxu1 %v4895_v8  ;;  %v491_v8 = vld [vmem:[%s5725_s29 + $0x750] sm:$0xff]  ;;  %v4929_v59 = vpack.c.bf16 %v514_v49, %v513_v48  ;;  %v4931_v61 = vpack.c.bf16 %v532_v33, %v531_v54  ;;  %v548_v1 = vld [vmem:[%s5725_s29 + $0x918] sm:$0xff]  ;;  %v541_v33 = vld [vmem:[%s5725_s29 + $0x8e0] sm:$0xff] }
  0x7b   : > { %1849 = vmatmul.mubr.f32.vlgmr.msra.gmra.mrb[4].mxu0 %v5889_v44  ;;  %v454_v44 = vld [vmem:[%s5725_s29 + $0x628] sm:$0xff]  ;;  %v523_v49 = vld [vmem:[%s5725_s29 + $0x850] sm:$0xff]  ;;  %v556_v54 = vld [vmem:[%s5725_s29 + $0x958] sm:$0xff] }
  0x7c   : > { %4866 = vmatpush3.bf16.msra.mxu0 %v4865_v17  ;;  %1919 = vmatmul.mubr.f32.vlgmr.msra.gmra.mrb[4].mxu1 %v5900_v53  ;;  %v503_v53 = vld [vmem:[%s5725_s29 + $0x7b0] sm:$0xff]  ;;  %v4873_v43 = vpack.c.bf16 %v454_v44, %v453_v35  ;;  %v510_v17 = vld [vmem:[%s5725_s29 + $0x7e8] sm:$0xff]  ;;  %v464_v44 = vld [vmem:[%s5725_s29 + $0x678] sm:$0xff] }
  0x7d   : > { %4898 = vmatpush3.bf16.msra.mxu1 %v4897_v18  ;;  %4868 = vmatprep.subr.bf16.mxu0 %v4867_v19  ;;  %v4907_v50 = vpack.c.bf16 %v504_v41, %v503_v53  ;;  %v4885_v18 = vpack.c.bf16 %v460_v7, %v459_v6  ;;  %v4917_v19 = vpack.c.bf16 %v492_v10, %v491_v8  ;;  %v463_v35 = vld [vmem:[%s5725_s29 + $0x670] sm:$0xff]  ;;  %v561_v53 = vld [vmem:[%s5725_s29 + $0x980] sm:$0xff]  ;;  %v562_v41 = vld [vmem:[%s5725_s29 + $0x988] sm:$0xff] }
  0x7e   : > { %4900 = vmatprep.subr.bf16.mxu1 %v4899_v23  ;;  %1988 = vmatprep.mubr.f32.mxu0 %v1266_v27  ;;  %v493_v23 = vld [vmem:[%s5725_s29 + $0x760] sm:$0xff]  ;;  %v4919_v24 = vpack.c.bf16 %v510_v17, %v509_v15  ;;  %v480_v27 = vld [vmem:[%s5725_s29 + $0x6f8] sm:$0xff]  ;;  %v4959_v51 = vpack.c.bf16 %v562_v41, %v561_v53  ;;  %v566_v6 = vld [vmem:[%s5725_s29 + $0x9a8] sm:$0xff] }
  0x7f   : > { %2058 = vmatprep.mubr.f32.mxu1 %v1267_v30  ;;  %v4889_v30 = vpack.c.bf16 %v462_v22, %v461_v21  ;;  %v550_v17 = vld [vmem:[%s5725_s29 + $0x928] sm:$0xff]  ;;  %v539_v53 = vld [vmem:[%s5725_s29 + $0x8d0] sm:$0xff]  ;;  %v540_v41 = vld [vmem:[%s5725_s29 + $0x8d8] sm:$0xff] }
  0x80   : > { %4870 = vmatpush3.bf16.msra.mxu0 %v4869_v31  ;;  %v246_v31 = vld [vmem:[%s5720_s25 + $0x20] sm:$0xff]  ;;  %v4969_v22 = vpack.c.bf16 %v550_v17, %v549_v13  ;;  %v4947_v48 = vpack.c.bf16 %v540_v41, %v539_v53  ;;  %v559_v13 = vld [vmem:[%s5725_s29 + $0x970] sm:$0xff]  ;;  %v560_v17 = vld [vmem:[%s5725_s29 + $0x978] sm:$0xff] }
  0x81   : > { %4902 = vmatpush3.bf16.msra.mxu1 %v4901_v32  ;;  %4872 = vmatprep.subr.bf16.mxu0 %v4871_v34  ;;  %v4921_v32 = vpack.c.bf16 %v494_v25, %v493_v23  ;;  %v4891_v34 = vpack.c.bf16 %v480_v27, %v479_v26  ;;  %v6038_v55 = vrot.slane %v246_v31, %v5778_v14  ;;  %v520_v25 = vld [vmem:[%s5725_s29 + $0x838] sm:$0xff]  ;;  %v551_v26 = vld [vmem:[%s5725_s29 + $0x930] sm:$0xff] }
  0x82   : > { %4904 = vmatprep.subr.bf16.mxu1 %v4903_v37  ;;  %v4923_v37 = vpack.c.bf16 %v512_v29, %v511_v28  ;;  %v552_v28 = vld [vmem:[%s5725_s29 + $0x938] sm:$0xff]  ;;  %v537_v29 = vld [vmem:[%s5725_s29 + $0x8c0] sm:$0xff]  ;;  %v611_v53 = vld [vmem:[%s5725_s29 + $0xb10] sm:$0xff] }
  0x84   : > { %4874 = vmatpush3.bf16.msra.mxu0 %v4873_v43  ;;  %v1268_v43 = vcombine.high %v246_v31, %v246_v31  ;;  %v569_v31 = vld [vmem:[%s5725_s29 + $0x9c0] sm:$0xff] }
  0x85   : > { %4906 = vmatpush3.bf16.msra.mxu1 %v4905_v45  ;;  %4876 = vmatprep.subr.bf16.mxu0 %v4875_v46  ;;  %v4893_v45 = vpack.c.bf16 %v464_v44, %v463_v35  ;;  %v4925_v46 = vpack.c.bf16 %v496_v38, %v495_v36  ;;  %v4973_v35 = vpack.c.bf16 %v552_v28, %v551_v26  ;;  %v521_v36 = vld [vmem:[%s5725_s29 + $0x840] sm:$0xff]  ;;  %v578_v26 = vld [vmem:[%s5725_s29 + $0xa08] sm:$0xff] }
  0x86   : > { %4908 = vmatprep.subr.bf16.mxu1 %v4907_v50  ;;  %v545_v50 = vld [vmem:[%s5725_s29 + $0x900] sm:$0xff] }
  0x87   : > { %v4961_v60 = vpack.c.bf16 %v546_v52, %v545_v50  ;;  %v553_v38 = vld [vmem:[%s5725_s29 + $0x940] sm:$0xff]  ;;  %v524_v50 = vld [vmem:[%s5725_s29 + $0x858] sm:$0xff] }
  0x88   : > { %4878 = vmatpush3.bf16.msra.mxu0 %v4877_v56  ;;  %v563_v56 = vld [vmem:[%s5725_s29 + $0x990] sm:$0xff] }
  0x89   : > { %4910 = vmatpush3.bf16.msra.mxu1 %v4909_v57  ;;  %4880 = vmatprep.subr.bf16.mxu0 %v4879_v58  ;;  %v564_v57 = vld [vmem:[%s5725_s29 + $0x998] sm:$0xff]  ;;  %v6043_v58 = vrot.slane %v1268_v43, %v5778_v14  ;;  %v571_v43 = vld [vmem:[%s5725_s29 + $0x9d0] sm:$0xff] }
  0x8a   : > { %4912 = vmatprep.subr.bf16.mxu1 %v4911_v42  ;;  %v515_v42 = vld [vmem:[%s5725_s29 + $0x810] sm:$0xff]  ;;  %v4963_v0 = vpack.c.bf16 %v564_v57, %v563_v56  ;;  %v542_v56 = vld [vmem:[%s5725_s29 + $0x8e8] sm:$0xff]  ;;  %v573_v57 = vld [vmem:[%s5725_s29 + $0x9e0] sm:$0xff] }
  0x8b   : > { %v1284_v7 = vcombine.high %v6043_v58, %v6043_v58  ;;  %v4933_v8 = vpack.c.bf16 %v516_v62, %v515_v42  ;;  %v4951_v42 = vpack.c.bf16 %v542_v56, %v541_v33  ;;  %v525_v62 = vld [vmem:[%s5725_s29 + $0x860] sm:$0xff] }
  0x8c   : > { %4882 = vmatpush3.bf16.msra.mxu0 %v4881_v3  ;;  %v534_v3 = vld [vmem:[%s5725_s29 + $0x8a8] sm:$0xff]  ;;  %v581_v33 = vld [vmem:[%s5725_s29 + $0xa20] sm:$0xff] }
  0x8d   : > { %4914 = vmatpush3.bf16.msra.mxu1 %v4913_v4  ;;  %4884 = vmatprep.subr.bf16.mxu0 %v4883_v5  ;;  %v1283_v4 = vcombine.high %v6038_v55, %v6038_v55  ;;  %v565_v5 = vld [vmem:[%s5725_s29 + $0x9a0] sm:$0xff]  ;;  %v4935_v10 = vpack.c.bf16 %v534_v3, %v533_v2  ;;  %v558_v2 = vld [vmem:[%s5725_s29 + $0x968] sm:$0xff]  ;;  %v543_v3 = vld [vmem:[%s5725_s29 + $0x8f0] sm:$0xff] }
  0x8e   : > { %4916 = vmatprep.subr.bf16.mxu1 %v4915_v9  ;;  %v4965_v9 = vpack.c.bf16 %v548_v1, %v547_v63  ;;  %v4967_v15 = vpack.c.bf16 %v566_v6, %v565_v5  ;;  %v526_v63 = vld [vmem:[%s5725_s29 + $0x868] sm:$0xff]  ;;  %v575_v5 = vld [vmem:[%s5725_s29 + $0x9f0] sm:$0xff]  ;;  %v576_v6 = vld [vmem:[%s5725_s29 + $0x9f8] sm:$0xff] }
  0x8f   : > { %v613_v56 = vld [vmem:[%s5725_s29 + $0xb20] sm:$0xff] }
  0x90   : > { %4886 = vmatpush3.bf16.msra.mxu0 %v4885_v18  ;;  %v535_v18 = vld [vmem:[%s5725_s29 + $0x8b0] sm:$0xff] }
  0x91   : > { %4918 = vmatpush3.bf16.msra.mxu1 %v4917_v19  ;;  %4888 = vmatprep.subr.bf16.mxu0 %v4887_v20  ;;  %v536_v19 = vld [vmem:[%s5725_s29 + $0x8b8] sm:$0xff] }
  0x92   : > { %4920 = vmatprep.subr.bf16.mxu1 %v4919_v24  ;;  %v568_v20 = vld [vmem:[%s5725_s29 + $0x9b8] sm:$0xff]  ;;  %v4939_v23 = vpack.c.bf16 %v536_v19, %v535_v18  ;;  %v519_v24 = vld [vmem:[%s5725_s29 + $0x830] sm:$0xff]  ;;  %v593_v18 = vld [vmem:[%s5725_s29 + $0xa80] sm:$0xff] }
  0x93   : > { %v594_v19 = vld [vmem:[%s5725_s29 + $0xa88] sm:$0xff] }
  0x94   : > { %4890 = vmatpush3.bf16.msra.mxu0 %v4889_v30  ;;  %v538_v30 = vld [vmem:[%s5725_s29 + $0x8c8] sm:$0xff] }
  0x95   : > { %4922 = vmatpush3.bf16.msra.mxu1 %v4921_v32  ;;  %4892 = vmatprep.subr.bf16.mxu0 %v4891_v34  ;;  %v570_v32 = vld [vmem:[%s5725_s29 + $0x9c8] sm:$0xff]  ;;  %v4941_v34 = vpack.c.bf16 %v520_v25, %v519_v24  ;;  %v4943_v44 = vpack.c.bf16 %v538_v30, %v537_v29  ;;  %v4991_v24 = vpack.c.bf16 %v594_v19, %v593_v18  ;;  %v577_v25 = vld [vmem:[%s5725_s29 + $0xa00] sm:$0xff]  ;;  %v595_v30 = vld [vmem:[%s5725_s29 + $0xa90] sm:$0xff] }
  0x96   : > { %4924 = vmatprep.subr.bf16.mxu1 %v4923_v37  ;;  %v522_v37 = vld [vmem:[%s5725_s29 + $0x848] sm:$0xff]  ;;  %v4975_v39 = vpack.c.bf16 %v570_v32, %v569_v31  ;;  %v596_v31 = vld [vmem:[%s5725_s29 + $0xa98] sm:$0xff] }
  0x97   : > { %v610_v29 = vld [vmem:[%s5725_s29 + $0xb08] sm:$0xff] }
  0x98   : > { %4894 = vmatpush3.bf16.msra.mxu0 %v4893_v45  ;;  %v572_v45 = vld [vmem:[%s5725_s29 + $0x9d8] sm:$0xff]  ;;  %v618_v19 = vld [vmem:[%s5725_s29 + $0xb48] sm:$0xff] }
  0x99   : > { %4926 = vmatpush3.bf16.msra.mxu1 %v4925_v46  ;;  %4928 = vmatprep.subr.bf16.mxu0 %v4927_v47  ;;  %v4945_v46 = vpack.c.bf16 %v522_v37, %v521_v36  ;;  %v4977_v47 = vpack.c.bf16 %v554_v40, %v553_v38  ;;  %v4979_v52 = vpack.c.bf16 %v572_v45, %v571_v43  ;;  %v580_v40 = vld [vmem:[%s5725_s29 + $0xa18] sm:$0xff]  ;;  %v597_v45 = vld [vmem:[%s5725_s29 + $0xaa0] sm:$0xff] }
  0x9a   : > { %4960 = vmatprep.subr.bf16.mxu1 %v4959_v51  ;;  %v555_v51 = vld [vmem:[%s5725_s29 + $0x950] sm:$0xff]  ;;  %v4993_v36 = vpack.c.bf16 %v578_v26, %v577_v25  ;;  %v4995_v38 = vpack.c.bf16 %v596_v31, %v595_v30  ;;  %v612_v43 = vld [vmem:[%s5725_s29 + $0xb18] sm:$0xff]  ;;  %v605_v31 = vld [vmem:[%s5725_s29 + $0xae0] sm:$0xff] }
  0x9b   : > { %1989 = vmatmul.mubr.f32.vlgmr.msra.gmra.mrb[6].mxu0 %v5961_v12  ;;  %v518_v12 = vld [vmem:[%s5725_s29 + $0x828] sm:$0xff]  ;;  %v587_v26 = vld [vmem:[%s5725_s29 + $0xa50] sm:$0xff]  ;;  %v620_v30 = vld [vmem:[%s5725_s29 + $0xb58] sm:$0xff] }
  0x9c   : > { %4930 = vmatpush3.bf16.msra.mxu0 %v4929_v59  ;;  %2059 = vmatmul.mubr.f32.vlgmr.msra.gmra.mrb[6].mxu1 %v5966_v16  ;;  %v567_v16 = vld [vmem:[%s5725_s29 + $0x9b0] sm:$0xff]  ;;  %v4937_v21 = vpack.c.bf16 %v518_v12, %v517_v11  ;;  %v574_v59 = vld [vmem:[%s5725_s29 + $0x9e8] sm:$0xff]  ;;  %v528_v12 = vld [vmem:[%s5725_s29 + $0x878] sm:$0xff] }
  0x9d   : > { %4962 = vmatpush3.bf16.msra.mxu1 %v4961_v60  ;;  %4932 = vmatprep.subr.bf16.mxu0 %v4931_v61  ;;  %v4971_v27 = vpack.c.bf16 %v568_v20, %v567_v16  ;;  %v4949_v60 = vpack.c.bf16 %v524_v50, %v523_v49  ;;  %v4981_v61 = vpack.c.bf16 %v556_v54, %v555_v51  ;;  %v527_v11 = vld [vmem:[%s5725_s29 + $0x870] sm:$0xff]  ;;  %v625_v16 = vld [vmem:[%s5725_s29 + $0xb80] sm:$0xff]  ;;  %v626_v20 = vld [vmem:[%s5725_s29 + $0xb88] sm:$0xff] }
  0x9e   : > { %4964 = vmatprep.subr.bf16.mxu1 %v4963_v0  ;;  %2128 = vmatprep.mubr.f32.mxu0 %v1283_v4  ;;  %v557_v0 = vld [vmem:[%s5725_s29 + $0x960] sm:$0xff]  ;;  %v4983_v1 = vpack.c.bf16 %v574_v59, %v573_v57  ;;  %v544_v4 = vld [vmem:[%s5725_s29 + $0x8f8] sm:$0xff]  ;;  %v5023_v28 = vpack.c.bf16 %v626_v20, %v625_v16  ;;  %v630_v49 = vld [vmem:[%s5725_s29 + $0xba8] sm:$0xff] }
  0x9f   : > { %2198 = vmatprep.mubr.f32.mxu1 %v1284_v7  ;;  %v4953_v7 = vpack.c.bf16 %v526_v63, %v525_v62  ;;  %v614_v59 = vld [vmem:[%s5725_s29 + $0xb28] sm:$0xff]  ;;  %v603_v16 = vld [vmem:[%s5725_s29 + $0xad0] sm:$0xff]  ;;  %v604_v20 = vld [vmem:[%s5725_s29 + $0xad8] sm:$0xff] }
  0xa0   : > { %4934 = vmatpush3.bf16.msra.mxu0 %v4933_v8  ;;  %v247_v8 = vld [vmem:[%s5720_s25 + $0x28] sm:$0xff]  ;;  %v5033_v63 = vpack.c.bf16 %v614_v59, %v613_v56  ;;  %v5011_v25 = vpack.c.bf16 %v604_v20, %v603_v16  ;;  %v623_v56 = vld [vmem:[%s5725_s29 + $0xb70] sm:$0xff]  ;;  %v624_v59 = vld [vmem:[%s5725_s29 + $0xb78] sm:$0xff] }
  0xa1   : > { %4966 = vmatpush3.bf16.msra.mxu1 %v4965_v9  ;;  %4936 = vmatprep.subr.bf16.mxu0 %v4935_v10  ;;  %v4985_v9 = vpack.c.bf16 %v558_v2, %v557_v0  ;;  %v4955_v10 = vpack.c.bf16 %v544_v4, %v543_v3  ;;  %v6115_v32 = vrot.slane %v247_v8, %v5778_v14  ;;  %v584_v2 = vld [vmem:[%s5725_s29 + $0xa38] sm:$0xff]  ;;  %v615_v3 = vld [vmem:[%s5725_s29 + $0xb30] sm:$0xff] }
  0xa2   : > { %4968 = vmatprep.subr.bf16.mxu1 %v4967_v15  ;;  %v4987_v15 = vpack.c.bf16 %v576_v6, %v575_v5  ;;  %v616_v5 = vld [vmem:[%s5725_s29 + $0xb38] sm:$0xff]  ;;  %v601_v6 = vld [vmem:[%s5725_s29 + $0xac0] sm:$0xff]  ;;  %v675_v16 = vld [vmem:[%s5725_s29 + $0xd10] sm:$0xff] }
  0xa4   : > { %4938 = vmatpush3.bf16.msra.mxu0 %v4937_v21  ;;  %v1285_v21 = vcombine.high %v247_v8, %v247_v8  ;;  %v633_v8 = vld [vmem:[%s5725_s29 + $0xbc0] sm:$0xff] }
  0xa5   : > { %4970 = vmatpush3.bf16.msra.mxu1 %v4969_v22  ;;  %4940 = vmatprep.subr.bf16.mxu0 %v4939_v23  ;;  %v4957_v22 = vpack.c.bf16 %v528_v12, %v527_v11  ;;  %v4989_v23 = vpack.c.bf16 %v560_v17, %v559_v13  ;;  %v5037_v11 = vpack.c.bf16 %v616_v5, %v615_v3  ;;  %v585_v13 = vld [vmem:[%s5725_s29 + $0xa40] sm:$0xff]  ;;  %v642_v3 = vld [vmem:[%s5725_s29 + $0xc08] sm:$0xff] }
  0xa6   : > { %4972 = vmatprep.subr.bf16.mxu1 %v4971_v27  ;;  %v609_v27 = vld [vmem:[%s5725_s29 + $0xb00] sm:$0xff] }
  0xa7   : > { %v5025_v37 = vpack.c.bf16 %v610_v29, %v609_v27  ;;  %v617_v17 = vld [vmem:[%s5725_s29 + $0xb40] sm:$0xff]  ;;  %v588_v27 = vld [vmem:[%s5725_s29 + $0xa58] sm:$0xff] }
  0xa8   : > { %4942 = vmatpush3.bf16.msra.mxu0 %v4941_v34  ;;  %v627_v34 = vld [vmem:[%s5725_s29 + $0xb90] sm:$0xff] }
  0xa9   : > { %4974 = vmatpush3.bf16.msra.mxu1 %v4973_v35  ;;  %4944 = vmatprep.subr.bf16.mxu0 %v4943_v44  ;;  %v628_v35 = vld [vmem:[%s5725_s29 + $0xb98] sm:$0xff]  ;;  %v6120_v44 = vrot.slane %v1285_v21, %v5778_v14  ;;  %v635_v21 = vld [vmem:[%s5725_s29 + $0xbd0] sm:$0xff] }
  0xaa   : > { %4976 = vmatprep.subr.bf16.mxu1 %v4975_v39  ;;  %v579_v39 = vld [vmem:[%s5725_s29 + $0xa10] sm:$0xff]  ;;  %v5027_v41 = vpack.c.bf16 %v628_v35, %v627_v34  ;;  %v606_v34 = vld [vmem:[%s5725_s29 + $0xae8] sm:$0xff]  ;;  %v637_v35 = vld [vmem:[%s5725_s29 + $0xbe0] sm:$0xff] }
  0xab   : > { %v1301_v50 = vcombine.high %v6120_v44, %v6120_v44  ;;  %v4997_v51 = vpack.c.bf16 %v580_v40, %v579_v39  ;;  %v5015_v39 = vpack.c.bf16 %v606_v34, %v605_v31  ;;  %v589_v40 = vld [vmem:[%s5725_s29 + $0xa60] sm:$0xff] }
  0xac   : > { %4946 = vmatpush3.bf16.msra.mxu0 %v4945_v46  ;;  %v598_v46 = vld [vmem:[%s5725_s29 + $0xaa8] sm:$0xff]  ;;  %v645_v31 = vld [vmem:[%s5725_s29 + $0xc20] sm:$0xff] }
  0xad   : > { %4978 = vmatpush3.bf16.msra.mxu1 %v4977_v47  ;;  %4948 = vmatprep.subr.bf16.mxu0 %v4947_v48  ;;  %v1300_v47 = vcombine.high %v6115_v32, %v6115_v32  ;;  %v629_v48 = vld [vmem:[%s5725_s29 + $0xba0] sm:$0xff]  ;;  %v4999_v54 = vpack.c.bf16 %v598_v46, %v597_v45  ;;  %v622_v45 = vld [vmem:[%s5725_s29 + $0xb68] sm:$0xff]  ;;  %v607_v46 = vld [vmem:[%s5725_s29 + $0xaf0] sm:$0xff] }
  0xae   : > { %4980 = vmatprep.subr.bf16.mxu1 %v4979_v52  ;;  %v5029_v52 = vpack.c.bf16 %v612_v43, %v611_v53  ;;  %v5031_v57 = vpack.c.bf16 %v630_v49, %v629_v48  ;;  %v590_v53 = vld [vmem:[%s5725_s29 + $0xa68] sm:$0xff]  ;;  %v639_v48 = vld [vmem:[%s5725_s29 + $0xbf0] sm:$0xff]  ;;  %v640_v49 = vld [vmem:[%s5725_s29 + $0xbf8] sm:$0xff] }
  0xaf   : > { %v677_v34 = vld [vmem:[%s5725_s29 + $0xd20] sm:$0xff] }
  0xb0   : > { %4950 = vmatpush3.bf16.msra.mxu0 %v4949_v60  ;;  %v599_v60 = vld [vmem:[%s5725_s29 + $0xab0] sm:$0xff] }
  0xb1   : > { %4982 = vmatpush3.bf16.msra.mxu1 %v4981_v61  ;;  %4952 = vmatprep.subr.bf16.mxu0 %v4951_v42  ;;  %v600_v61 = vld [vmem:[%s5725_s29 + $0xab8] sm:$0xff] }
  0xb2   : > { %4984 = vmatprep.subr.bf16.mxu1 %v4983_v1  ;;  %v632_v42 = vld [vmem:[%s5725_s29 + $0xbb8] sm:$0xff]  ;;  %v5003_v0 = vpack.c.bf16 %v600_v61, %v599_v60  ;;  %v583_v1 = vld [vmem:[%s5725_s29 + $0xa30] sm:$0xff]  ;;  %v657_v60 = vld [vmem:[%s5725_s29 + $0xc80] sm:$0xff] }
  0xb3   : > { %v658_v61 = vld [vmem:[%s5725_s29 + $0xc88] sm:$0xff] }
  0xb4   : > { %4954 = vmatpush3.bf16.msra.mxu0 %v4953_v7  ;;  %v602_v7 = vld [vmem:[%s5725_s29 + $0xac8] sm:$0xff] }
  0xb5   : > { %4986 = vmatpush3.bf16.msra.mxu1 %v4985_v9  ;;  %4956 = vmatprep.subr.bf16.mxu0 %v4955_v10  ;;  %v634_v9 = vld [vmem:[%s5725_s29 + $0xbc8] sm:$0xff]  ;;  %v5005_v10 = vpack.c.bf16 %v584_v2, %v583_v1  ;;  %v5007_v12 = vpack.c.bf16 %v602_v7, %v601_v6  ;;  %v5055_v1 = vpack.c.bf16 %v658_v61, %v657_v60  ;;  %v641_v2 = vld [vmem:[%s5725_s29 + $0xc00] sm:$0xff]  ;;  %v659_v7 = vld [vmem:[%s5725_s29 + $0xc90] sm:$0xff] }
  0xb6   : > { %4988 = vmatprep.subr.bf16.mxu1 %v4987_v15  ;;  %v586_v15 = vld [vmem:[%s5725_s29 + $0xa48] sm:$0xff]  ;;  %v5039_v18 = vpack.c.bf16 %v634_v9, %v633_v8  ;;  %v660_v8 = vld [vmem:[%s5725_s29 + $0xc98] sm:$0xff] }
  0xb7   : > { %v674_v6 = vld [vmem:[%s5725_s29 + $0xd08] sm:$0xff] }
  0xb8   : > { %4958 = vmatpush3.bf16.msra.mxu0 %v4957_v22  ;;  %v636_v22 = vld [vmem:[%s5725_s29 + $0xbd8] sm:$0xff]  ;;  %v682_v61 = vld [vmem:[%s5725_s29 + $0xd48] sm:$0xff] }
  0xb9   : > { %4990 = vmatpush3.bf16.msra.mxu1 %v4989_v23  ;;  %4992 = vmatprep.subr.bf16.mxu0 %v4991_v24  ;;  %v5009_v23 = vpack.c.bf16 %v586_v15, %v585_v13  ;;  %v5041_v24 = vpack.c.bf16 %v618_v19, %v617_v17  ;;  %v5043_v29 = vpack.c.bf16 %v636_v22, %v635_v21  ;;  %v644_v19 = vld [vmem:[%s5725_s29 + $0xc18] sm:$0xff]  ;;  %v661_v22 = vld [vmem:[%s5725_s29 + $0xca0] sm:$0xff] }
  0xba   : > { %5024 = vmatprep.subr.bf16.mxu1 %v5023_v28  ;;  %v619_v28 = vld [vmem:[%s5725_s29 + $0xb50] sm:$0xff]  ;;  %v5057_v13 = vpack.c.bf16 %v642_v3, %v641_v2  ;;  %v5059_v17 = vpack.c.bf16 %v660_v8, %v659_v7  ;;  %v676_v21 = vld [vmem:[%s5725_s29 + $0xd18] sm:$0xff]  ;;  %v669_v8 = vld [vmem:[%s5725_s29 + $0xce0] sm:$0xff] }
  0xbb   : > { %2129 = vmatmul.mubr.f32.vlgmr.msra.gmra.mrb[8].mxu0 %v6038_v55  ;;  %v582_v55 = vld [vmem:[%s5725_s29 + $0xa28] sm:$0xff]  ;;  %v651_v3 = vld [vmem:[%s5725_s29 + $0xc50] sm:$0xff]  ;;  %v684_v7 = vld [vmem:[%s5725_s29 + $0xd58] sm:$0xff] }
  0xbc   : > { %4994 = vmatpush3.bf16.msra.mxu0 %v4993_v36  ;;  %2199 = vmatmul.mubr.f32.vlgmr.msra.gmra.mrb[8].mxu1 %v6043_v58  ;;  %v631_v58 = vld [vmem:[%s5725_s29 + $0xbb0] sm:$0xff]  ;;  %v5001_v62 = vpack.c.bf16 %v582_v55, %v581_v33  ;;  %v638_v36 = vld [vmem:[%s5725_s29 + $0xbe8] sm:$0xff]  ;;  %v592_v55 = vld [vmem:[%s5725_s29 + $0xa78] sm:$0xff] }
  0xbd   : > { %5026 = vmatpush3.bf16.msra.mxu1 %v5025_v37  ;;  %4996 = vmatprep.subr.bf16.mxu0 %v4995_v38  ;;  %v5035_v4 = vpack.c.bf16 %v632_v42, %v631_v58  ;;  %v5013_v37 = vpack.c.bf16 %v588_v27, %v587_v26  ;;  %v5045_v38 = vpack.c.bf16 %v620_v30, %v619_v28  ;;  %v591_v33 = vld [vmem:[%s5725_s29 + $0xa70] sm:$0xff]  ;;  %v689_v58 = vld [vmem:[%s5725_s29 + $0xd80] sm:$0xff]  ;;  %v690_v42 = vld [vmem:[%s5725_s29 + $0xd88] sm:$0xff] }
  0xbe   : > { %5028 = vmatprep.subr.bf16.mxu1 %v5027_v41  ;;  %2268 = vmatprep.mubr.f32.mxu0 %v1300_v47  ;;  %v621_v41 = vld [vmem:[%s5725_s29 + $0xb60] sm:$0xff]  ;;  %v5047_v43 = vpack.c.bf16 %v638_v36, %v637_v35  ;;  %v608_v47 = vld [vmem:[%s5725_s29 + $0xaf8] sm:$0xff]  ;;  %v5087_v5 = vpack.c.bf16 %v690_v42, %v689_v58  ;;  %v694_v26 = vld [vmem:[%s5725_s29 + $0xda8] sm:$0xff] }
  0xbf   : > { %2338 = vmatprep.mubr.f32.mxu1 %v1301_v50  ;;  %v5017_v50 = vpack.c.bf16 %v590_v53, %v589_v40  ;;  %v678_v36 = vld [vmem:[%s5725_s29 + $0xd28] sm:$0xff]  ;;  %v667_v58 = vld [vmem:[%s5725_s29 + $0xcd0] sm:$0xff]  ;;  %v668_v42 = vld [vmem:[%s5725_s29 + $0xcd8] sm:$0xff] }
  0xc0   : > { %4998 = vmatpush3.bf16.msra.mxu0 %v4997_v51  ;;  %v248_v51 = vld [vmem:[%s5720_s25 + $0x30] sm:$0xff]  ;;  %v5097_v53 = vpack.c.bf16 %v678_v36, %v677_v34  ;;  %v5075_v2 = vpack.c.bf16 %v668_v42, %v667_v58  ;;  %v688_v36 = vld [vmem:[%s5725_s29 + $0xd78] sm:$0xff] }
  0xc1   : > { %5030 = vmatpush3.bf16.msra.mxu1 %v5029_v52  ;;  %5000 = vmatprep.subr.bf16.mxu0 %v4999_v54  ;;  %v5049_v52 = vpack.c.bf16 %v622_v45, %v621_v41  ;;  %v5019_v54 = vpack.c.bf16 %v608_v47, %v607_v46  ;;  %v6192_v9 = vrot.slane %v248_v51, %v5778_v14  ;;  %v648_v45 = vld [vmem:[%s5725_s29 + $0xc38] sm:$0xff]  ;;  %v679_v46 = vld [vmem:[%s5725_s29 + $0xd30] sm:$0xff] }
  0xc2   : > { %5032 = vmatprep.subr.bf16.mxu1 %v5031_v57  ;;  %v5051_v57 = vpack.c.bf16 %v640_v49, %v639_v48  ;;  %v680_v48 = vld [vmem:[%s5725_s29 + $0xd38] sm:$0xff]  ;;  %v665_v49 = vld [vmem:[%s5725_s29 + $0xcc0] sm:$0xff]  ;;  %v687_v34 = vld [vmem:[%s5725_s29 + $0xd70] sm:$0xff] }
  0xc3   : > { %v739_v58 = vld [vmem:[%s5725_s29 + $0xf10] sm:$0xff] }
  0xc4   : > { %5002 = vmatpush3.bf16.msra.mxu0 %v5001_v62  ;;  %v1302_v62 = vcombine.high %v248_v51, %v248_v51  ;;  %v697_v51 = vld [vmem:[%s5725_s29 + $0xdc0] sm:$0xff] }
  0xc5   : > { %5034 = vmatpush3.bf16.msra.mxu1 %v5033_v63  ;;  %5004 = vmatprep.subr.bf16.mxu0 %v5003_v0  ;;  %v5021_v63 = vpack.c.bf16 %v592_v55, %v591_v33  ;;  %v5053_v0 = vpack.c.bf16 %v624_v59, %v623_v56  ;;  %v5101_v33 = vpack.c.bf16 %v680_v48, %v679_v46  ;;  %v649_v56 = vld [vmem:[%s5725_s29 + $0xc40] sm:$0xff]  ;;  %v706_v46 = vld [vmem:[%s5725_s29 + $0xe08] sm:$0xff] }
  0xc6   : > { %5036 = vmatprep.subr.bf16.mxu1 %v5035_v4  ;;  %v673_v4 = vld [vmem:[%s5725_s29 + $0xd00] sm:$0xff] }
  0xc7   : > { %v5089_v15 = vpack.c.bf16 %v674_v6, %v673_v4  ;;  %v681_v59 = vld [vmem:[%s5725_s29 + $0xd40] sm:$0xff]  ;;  %v652_v4 = vld [vmem:[%s5725_s29 + $0xc58] sm:$0xff] }
  0xc8   : > { %5006 = vmatpush3.bf16.msra.mxu0 %v5005_v10  ;;  %v691_v10 = vld [vmem:[%s5725_s29 + $0xd90] sm:$0xff] }
  0xc9   : > { %5038 = vmatpush3.bf16.msra.mxu1 %v5037_v11  ;;  %5008 = vmatprep.subr.bf16.mxu0 %v5007_v12  ;;  %v692_v11 = vld [vmem:[%s5725_s29 + $0xd98] sm:$0xff]  ;;  %v6197_v12 = vrot.slane %v1302_v62, %v5778_v14  ;;  %v699_v62 = vld [vmem:[%s5725_s29 + $0xdd0] sm:$0xff] }
  0xca   : > { %5040 = vmatprep.subr.bf16.mxu1 %v5039_v18  ;;  %v643_v18 = vld [vmem:[%s5725_s29 + $0xc10] sm:$0xff]  ;;  %v5091_v20 = vpack.c.bf16 %v692_v11, %v691_v10  ;;  %v670_v10 = vld [vmem:[%s5725_s29 + $0xce8] sm:$0xff]  ;;  %v701_v11 = vld [vmem:[%s5725_s29 + $0xde0] sm:$0xff] }
  0xcb   : > { %v1318_v27 = vcombine.high %v6197_v12, %v6197_v12  ;;  %v5061_v28 = vpack.c.bf16 %v644_v19, %v643_v18  ;;  %v5079_v18 = vpack.c.bf16 %v670_v10, %v669_v8  ;;  %v653_v19 = vld [vmem:[%s5725_s29 + $0xc60] sm:$0xff] }
  0xcc   : > { %5010 = vmatpush3.bf16.msra.mxu0 %v5009_v23  ;;  %v662_v23 = vld [vmem:[%s5725_s29 + $0xca8] sm:$0xff]  ;;  %v709_v8 = vld [vmem:[%s5725_s29 + $0xe20] sm:$0xff] }
  0xcd   : > { %5042 = vmatpush3.bf16.msra.mxu1 %v5041_v24  ;;  %5012 = vmatprep.subr.bf16.mxu0 %v5011_v25  ;;  %v1317_v24 = vcombine.high %v6192_v9, %v6192_v9  ;;  %v693_v25 = vld [vmem:[%s5725_s29 + $0xda0] sm:$0xff]  ;;  %v5063_v30 = vpack.c.bf16 %v662_v23, %v661_v22  ;;  %v686_v22 = vld [vmem:[%s5725_s29 + $0xd68] sm:$0xff]  ;;  %v671_v23 = vld [vmem:[%s5725_s29 + $0xcf0] sm:$0xff] }
  0xce   : > { %5044 = vmatprep.subr.bf16.mxu1 %v5043_v29  ;;  %v5093_v29 = vpack.c.bf16 %v676_v21, %v675_v16  ;;  %v5095_v35 = vpack.c.bf16 %v694_v26, %v693_v25  ;;  %v654_v16 = vld [vmem:[%s5725_s29 + $0xc68] sm:$0xff]  ;;  %v703_v25 = vld [vmem:[%s5725_s29 + $0xdf0] sm:$0xff]  ;;  %v704_v26 = vld [vmem:[%s5725_s29 + $0xdf8] sm:$0xff] }
  0xcf   : > { %v741_v10 = vld [vmem:[%s5725_s29 + $0xf20] sm:$0xff] }
  0xd0   : > { %5014 = vmatpush3.bf16.msra.mxu0 %v5013_v37  ;;  %v663_v37 = vld [vmem:[%s5725_s29 + $0xcb0] sm:$0xff] }
  0xd1   : > { %5046 = vmatpush3.bf16.msra.mxu1 %v5045_v38  ;;  %5016 = vmatprep.subr.bf16.mxu0 %v5015_v39  ;;  %v664_v38 = vld [vmem:[%s5725_s29 + $0xcb8] sm:$0xff] }
  0xd2   : > { %5048 = vmatprep.subr.bf16.mxu1 %v5047_v43  ;;  %v696_v39 = vld [vmem:[%s5725_s29 + $0xdb8] sm:$0xff]  ;;  %v5067_v41 = vpack.c.bf16 %v664_v38, %v663_v37  ;;  %v647_v43 = vld [vmem:[%s5725_s29 + $0xc30] sm:$0xff]  ;;  %v721_v37 = vld [vmem:[%s5725_s29 + $0xe80] sm:$0xff] }
  0xd3   : > { %v722_v38 = vld [vmem:[%s5725_s29 + $0xe88] sm:$0xff] }
  0xd4   : > { %5018 = vmatpush3.bf16.msra.mxu0 %v5017_v50  ;;  %v666_v50 = vld [vmem:[%s5725_s29 + $0xcc8] sm:$0xff] }
  0xd5   : > { %5050 = vmatpush3.bf16.msra.mxu1 %v5049_v52  ;;  %5020 = vmatprep.subr.bf16.mxu0 %v5019_v54  ;;  %v698_v52 = vld [vmem:[%s5725_s29 + $0xdc8] sm:$0xff]  ;;  %v5069_v54 = vpack.c.bf16 %v648_v45, %v647_v43  ;;  %v5071_v55 = vpack.c.bf16 %v666_v50, %v665_v49  ;;  %v5119_v43 = vpack.c.bf16 %v722_v38, %v721_v37  ;;  %v705_v45 = vld [vmem:[%s5725_s29 + $0xe00] sm:$0xff]  ;;  %v723_v50 = vld [vmem:[%s5725_s29 + $0xe90] sm:$0xff] }
  0xd6   : > { %5052 = vmatprep.subr.bf16.mxu1 %v5051_v57  ;;  %v650_v57 = vld [vmem:[%s5725_s29 + $0xc48] sm:$0xff]  ;;  %v5103_v60 = vpack.c.bf16 %v698_v52, %v697_v51  ;;  %v724_v51 = vld [vmem:[%s5725_s29 + $0xe98] sm:$0xff] }
  0xd7   : > { %v738_v49 = vld [vmem:[%s5725_s29 + $0xf08] sm:$0xff] }
  0xd8   : > { %5022 = vmatpush3.bf16.msra.mxu0 %v5021_v63  ;;  %v700_v63 = vld [vmem:[%s5725_s29 + $0xdd8] sm:$0xff]  ;;  %v746_v38 = vld [vmem:[%s5725_s29 + $0xf48] sm:$0xff] }
  0xd9   : > { %5054 = vmatpush3.bf16.msra.mxu1 %v5053_v0  ;;  %5056 = vmatprep.subr.bf16.mxu0 %v5055_v1  ;;  %v5073_v0 = vpack.c.bf16 %v650_v57, %v649_v56  ;;  %v5105_v1 = vpack.c.bf16 %v682_v61, %v681_v59  ;;  %v5107_v6 = vpack.c.bf16 %v700_v63, %v699_v62  ;;  %v708_v61 = vld [vmem:[%s5725_s29 + $0xe18] sm:$0xff]  ;;  %v725_v63 = vld [vmem:[%s5725_s29 + $0xea0] sm:$0xff] }
  0xda   : > { %5088 = vmatprep.subr.bf16.mxu1 %v5087_v5  ;;  %v683_v5 = vld [vmem:[%s5725_s29 + $0xd50] sm:$0xff]  ;;  %v5121_v56 = vpack.c.bf16 %v706_v46, %v705_v45  ;;  %v5123_v59 = vpack.c.bf16 %v724_v51, %v723_v50  ;;  %v740_v62 = vld [vmem:[%s5725_s29 + $0xf18] sm:$0xff]  ;;  %v733_v51 = vld [vmem:[%s5725_s29 + $0xee0] sm:$0xff] }
  0xdb   : > { %2269 = vmatmul.mubr.f32.vlgmr.msra.gmra.mrb[10].mxu0 %v6115_v32  ;;  %v646_v32 = vld [vmem:[%s5725_s29 + $0xc28] sm:$0xff]  ;;  %v715_v46 = vld [vmem:[%s5725_s29 + $0xe50] sm:$0xff]  ;;  %v748_v50 = vld [vmem:[%s5725_s29 + $0xf58] sm:$0xff] }
  0xdc   : > { %5058 = vmatpush3.bf16.msra.mxu0 %v5057_v13  ;;  %2339 = vmatmul.mubr.f32.vlgmr.msra.gmra.mrb[10].mxu1 %v6120_v44  ;;  %v695_v44 = vld [vmem:[%s5725_s29 + $0xdb0] sm:$0xff]  ;;  %v5065_v40 = vpack.c.bf16 %v646_v32, %v645_v31  ;;  %v702_v13 = vld [vmem:[%s5725_s29 + $0xde8] sm:$0xff]  ;;  %v656_v32 = vld [vmem:[%s5725_s29 + $0xc78] sm:$0xff] }
  0xdd   : > { %5090 = vmatpush3.bf16.msra.mxu1 %v5089_v15  ;;  %5060 = vmatprep.subr.bf16.mxu0 %v5059_v17  ;;  %v5099_v47 = vpack.c.bf16 %v696_v39, %v695_v44  ;;  %v5077_v15 = vpack.c.bf16 %v652_v4, %v651_v3  ;;  %v5109_v17 = vpack.c.bf16 %v684_v7, %v683_v5  ;;  %v655_v31 = vld [vmem:[%s5725_s29 + $0xc70] sm:$0xff]  ;;  %v753_v44 = vld [vmem:[%s5725_s29 + $0xf80] sm:$0xff]  ;;  %v754_v39 = vld [vmem:[%s5725_s29 + $0xf88] sm:$0xff] }
  0xde   : > { %5092 = vmatprep.subr.bf16.mxu1 %v5091_v20  ;;  %2408 = vmatprep.mubr.f32.mxu0 %v1317_v24  ;;  %v685_v20 = vld [vmem:[%s5725_s29 + $0xd60] sm:$0xff]  ;;  %v5111_v21 = vpack.c.bf16 %v702_v13, %v701_v11  ;;  %v672_v24 = vld [vmem:[%s5725_s29 + $0xcf8] sm:$0xff]  ;;  %v5151_v48 = vpack.c.bf16 %v754_v39, %v753_v44  ;;  %v758_v3 = vld [vmem:[%s5725_s29 + $0xfa8] sm:$0xff] }
  0xdf   : > { %2478 = vmatprep.mubr.f32.mxu1 %v1318_v27  ;;  %v5081_v27 = vpack.c.bf16 %v654_v16, %v653_v19  ;;  %v742_v13 = vld [vmem:[%s5725_s29 + $0xf28] sm:$0xff]  ;;  %v731_v44 = vld [vmem:[%s5725_s29 + $0xed0] sm:$0xff]  ;;  %v732_v39 = vld [vmem:[%s5725_s29 + $0xed8] sm:$0xff] }
  0xe0   : > { %5062 = vmatpush3.bf16.msra.mxu0 %v5061_v28  ;;  %v249_v28 = vld [vmem:[%s5720_s25 + $0x38] sm:$0xff]  ;;  %v5161_v16 = vpack.c.bf16 %v742_v13, %v741_v10  ;;  %v5139_v45 = vpack.c.bf16 %v732_v39, %v731_v44  ;;  %v250_v10 = vld [vmem:[%s5720_s25 + $0x40] sm:$0xff] }
  0xe1   : > { %5094 = vmatpush3.bf16.msra.mxu1 %v5093_v29  ;;  %5064 = vmatprep.subr.bf16.mxu0 %v5063_v30  ;;  %v5113_v29 = vpack.c.bf16 %v686_v22, %v685_v20  ;;  %v5083_v30 = vpack.c.bf16 %v672_v24, %v671_v23  ;;  %v6269_v52 = vrot.slane %v249_v28, %v5778_v14  ;;  %v712_v22 = vld [vmem:[%s5725_s29 + $0xe38] sm:$0xff]  ;;  %v743_v23 = vld [vmem:[%s5725_s29 + $0xf30] sm:$0xff] }
  0xe2   : > { %5096 = vmatprep.subr.bf16.mxu1 %v5095_v35  ;;  %v5115_v35 = vpack.c.bf16 %v704_v26, %v703_v25  ;;  %v744_v25 = vld [vmem:[%s5725_s29 + $0xf38] sm:$0xff]  ;;  %v729_v26 = vld [vmem:[%s5725_s29 + $0xec0] sm:$0xff] }
  0xe3   : > { %v820_v44 = vld [vmem:[%s5725_s29 + $0x1198] sm:$0xff] }
  0xe4   : > { %5066 = vmatpush3.bf16.msra.mxu0 %v5065_v40  ;;  %v1319_v40 = vcombine.high %v249_v28, %v249_v28  ;;  %v761_v28 = vld [vmem:[%s5725_s29 + $0xfc0] sm:$0xff] }
  0xe5   : > { %5098 = vmatpush3.bf16.msra.mxu1 %v5097_v53  ;;  %5068 = vmatprep.subr.bf16.mxu0 %v5067_v41  ;;  %v5085_v53 = vpack.c.bf16 %v656_v32, %v655_v31  ;;  %v5117_v41 = vpack.c.bf16 %v688_v36, %v687_v34  ;;  %v5165_v31 = vpack.c.bf16 %v744_v25, %v743_v23  ;;  %v713_v34 = vld [vmem:[%s5725_s29 + $0xe40] sm:$0xff] }
  0xe6   : > { %5100 = vmatprep.subr.bf16.mxu1 %v5099_v47  ;;  %v737_v47 = vld [vmem:[%s5725_s29 + $0xf00] sm:$0xff]  ;;  %v1336_v25 = vcombine.high %v250_v10, %v250_v10 }
  0xe7   : > { %v5153_v57 = vpack.c.bf16 %v738_v49, %v737_v47  ;;  %v745_v36 = vld [vmem:[%s5725_s29 + $0xf40] sm:$0xff]  ;;  %v716_v47 = vld [vmem:[%s5725_s29 + $0xe58] sm:$0xff] }
  0xe8   : > { %5070 = vmatpush3.bf16.msra.mxu0 %v5069_v54  ;;  %v755_v54 = vld [vmem:[%s5725_s29 + $0xf90] sm:$0xff]  ;;  %v817_v23 = vld [vmem:[%s5725_s29 + $0x1180] sm:$0xff]  ;;  %v6353_v39 = vrot.slane %v1336_v25, %v5778_v14  ;;  %v796_v25 = vld [vmem:[%s5725_s29 + $0x10d8] sm:$0xff] }
  0xe9   : > { %5102 = vmatpush3.bf16.msra.mxu1 %v5101_v33  ;;  %5072 = vmatprep.subr.bf16.mxu0 %v5071_v55  ;;  %v756_v33 = vld [vmem:[%s5725_s29 + $0xf98] sm:$0xff]  ;;  %v6274_v55 = vrot.slane %v1319_v40, %v5778_v14  ;;  %v763_v40 = vld [vmem:[%s5725_s29 + $0xfd0] sm:$0xff] }
  0xea   : > { %5104 = vmatprep.subr.bf16.mxu1 %v5103_v60  ;;  %v707_v60 = vld [vmem:[%s5725_s29 + $0xe10] sm:$0xff]  ;;  %v5155_v42 = vpack.c.bf16 %v756_v33, %v755_v54  ;;  %v734_v54 = vld [vmem:[%s5725_s29 + $0xee8] sm:$0xff]  ;;  %v765_v33 = vld [vmem:[%s5725_s29 + $0xfe0] sm:$0xff] }
  0xeb   : > { %v1335_v4 = vcombine.high %v6274_v55, %v6274_v55  ;;  %v5125_v5 = vpack.c.bf16 %v708_v61, %v707_v60  ;;  %v5143_v60 = vpack.c.bf16 %v734_v54, %v733_v51  ;;  %v717_v61 = vld [vmem:[%s5725_s29 + $0xe60] sm:$0xff] }
  0xec   : > { %5074 = vmatpush3.bf16.msra.mxu0 %v5073_v0  ;;  %v726_v0 = vld [vmem:[%s5725_s29 + $0xea8] sm:$0xff]  ;;  %v821_v54 = vld [vmem:[%s5725_s29 + $0x11a0] sm:$0xff] }
  0xed   : > { %5106 = vmatpush3.bf16.msra.mxu1 %v5105_v1  ;;  %5076 = vmatprep.subr.bf16.mxu0 %v5075_v2  ;;  %v1334_v1 = vcombine.high %v6269_v52, %v6269_v52  ;;  %v757_v2 = vld [vmem:[%s5725_s29 + $0xfa0] sm:$0xff]  ;;  %v5127_v7 = vpack.c.bf16 %v726_v0, %v725_v63  ;;  %v750_v0 = vld [vmem:[%s5725_s29 + $0xf68] sm:$0xff] }
  0xee   : > { %5108 = vmatprep.subr.bf16.mxu1 %v5107_v6  ;;  %v5157_v6 = vpack.c.bf16 %v740_v62, %v739_v58  ;;  %v5159_v11 = vpack.c.bf16 %v758_v3, %v757_v2  ;;  %v718_v58 = vld [vmem:[%s5725_s29 + $0xe68] sm:$0xff]  ;;  %v736_v2 = vld [vmem:[%s5725_s29 + $0xef8] sm:$0xff] }
  0xf0   : > { %5078 = vmatpush3.bf16.msra.mxu0 %v5077_v15  ;;  %v727_v15 = vld [vmem:[%s5725_s29 + $0xeb0] sm:$0xff] }
  0xf1   : > { %5110 = vmatpush3.bf16.msra.mxu1 %v5109_v17  ;;  %5080 = vmatprep.subr.bf16.mxu0 %v5079_v18  ;;  %v728_v17 = vld [vmem:[%s5725_s29 + $0xeb8] sm:$0xff] }
  0xf2   : > { %5112 = vmatprep.subr.bf16.mxu1 %v5111_v21  ;;  %v760_v18 = vld [vmem:[%s5725_s29 + $0xfb8] sm:$0xff]  ;;  %v5131_v20 = vpack.c.bf16 %v728_v17, %v727_v15  ;;  %v711_v21 = vld [vmem:[%s5725_s29 + $0xe30] sm:$0xff] }
  0xf3   : > { %v719_v17 = vld [vmem:[%s5725_s29 + $0xe70] sm:$0xff] }
  0xf4   : > { %5082 = vmatpush3.bf16.msra.mxu0 %v5081_v27  ;;  %v730_v27 = vld [vmem:[%s5725_s29 + $0xec8] sm:$0xff] }
  0xf5   : > { %5114 = vmatpush3.bf16.msra.mxu1 %v5113_v29  ;;  %5084 = vmatprep.subr.bf16.mxu0 %v5083_v30  ;;  %v762_v29 = vld [vmem:[%s5725_s29 + $0xfc8] sm:$0xff]  ;;  %v5133_v30 = vpack.c.bf16 %v712_v22, %v711_v21  ;;  %v5135_v32 = vpack.c.bf16 %v730_v27, %v729_v26 }
  0xf6   : > { %5116 = vmatprep.subr.bf16.mxu1 %v5115_v35  ;;  %v714_v35 = vld [vmem:[%s5725_s29 + $0xe48] sm:$0xff]  ;;  %v5167_v37 = vpack.c.bf16 %v762_v29, %v761_v28  ;;  %v769_v29 = vld [vmem:[%s5725_s29 + $0x1000] sm:$0xff] }
  0xf7   : > { %v786_v21 = vld [vmem:[%s5725_s29 + $0x1088] sm:$0xff] }
  0xf8   : > { %5086 = vmatpush3.bf16.msra.mxu0 %v5085_v53  ;;  %v764_v53 = vld [vmem:[%s5725_s29 + $0xfd8] sm:$0xff] }
  0xf9   : > { %5118 = vmatpush3.bf16.msra.mxu1 %v5117_v41  ;;  %5120 = vmatprep.subr.bf16.mxu0 %v5119_v43  ;;  %v5137_v41 = vpack.c.bf16 %v714_v35, %v713_v34  ;;  %v5169_v43 = vpack.c.bf16 %v746_v38, %v745_v36  ;;  %v5171_v49 = vpack.c.bf16 %v764_v53, %v763_v40  ;;  %v802_v34 = vld [vmem:[%s5725_s29 + $0x1108] sm:$0xff]  ;;  %v787_v35 = vld [vmem:[%s5725_s29 + $0x1090] sm:$0xff]  ;;  %v788_v36 = vld [vmem:[%s5725_s29 + $0x1098] sm:$0xff] }
  0xfa   : > { %5152 = vmatprep.subr.bf16.mxu1 %v5151_v48  ;;  %v747_v48 = vld [vmem:[%s5725_s29 + $0xf50] sm:$0xff] }
  0xfb   : > { %2409 = vmatmul.mubr.f32.vlgmr.msra.gmra.mrb[12].mxu0 %v6192_v9  ;;  %v710_v9 = vld [vmem:[%s5725_s29 + $0xe28] sm:$0xff]  ;;  %v819_v38 = vld [vmem:[%s5725_s29 + $0x1190] sm:$0xff] }
  0xfc   : > { %5122 = vmatpush3.bf16.msra.mxu0 %v5121_v56  ;;  %2479 = vmatmul.mubr.f32.vlgmr.msra.gmra.mrb[12].mxu1 %v6197_v12  ;;  %v759_v12 = vld [vmem:[%s5725_s29 + $0xfb0] sm:$0xff]  ;;  %v5129_v19 = vpack.c.bf16 %v710_v9, %v709_v8  ;;  %v766_v56 = vld [vmem:[%s5725_s29 + $0xfe8] sm:$0xff]  ;;  %v5145_v9 = vpack.c.bf16 %v718_v58, %v717_v61  ;;  %v773_v61 = vld [vmem:[%s5725_s29 + $0x1020] sm:$0xff] }
  0xfd   : > { %5154 = vmatpush3.bf16.msra.mxu1 %v5153_v57  ;;  %5124 = vmatprep.subr.bf16.mxu0 %v5123_v59  ;;  %v5163_v24 = vpack.c.bf16 %v760_v18, %v759_v12  ;;  %v5141_v57 = vpack.c.bf16 %v716_v47, %v715_v46  ;;  %v5173_v59 = vpack.c.bf16 %v748_v50, %v747_v48  ;;  %v720_v12 = vld [vmem:[%s5725_s29 + $0xe78] sm:$0xff]  ;;  %v751_v18 = vld [vmem:[%s5725_s29 + $0xf70] sm:$0xff]  ;;  %v790_v50 = vld [vmem:[%s5725_s29 + $0x10a8] sm:$0xff] }
  0xfe   : > { %5156 = vmatprep.subr.bf16.mxu1 %v5155_v42  ;;  %2548 = vmatprep.mubr.f32.mxu0 %v1334_v1  ;;  %v749_v42 = vld [vmem:[%s5725_s29 + $0xf60] sm:$0xff]  ;;  %v5175_v63 = vpack.c.bf16 %v766_v56, %v765_v33  ;;  %v735_v1 = vld [vmem:[%s5725_s29 + $0xef0] sm:$0xff]  ;;  %v5149_v26 = vpack.c.bf16 %v720_v12, %v719_v17  ;;  %v5219_v47 = vpack.c.bf16 %v820_v44, %v819_v38  ;;  %v804_v48 = vld [vmem:[%s5725_s29 + $0x1118] sm:$0xff] }
  0xff   : > { %2618 = vmatprep.mubr.f32.mxu1 %v1335_v4  ;;  %v5177_v13 = vpack.c.bf16 %v750_v0, %v749_v42  ;;  %v5147_v15 = vpack.c.bf16 %v736_v2, %v735_v1  ;;  %v803_v46 = vld [vmem:[%s5725_s29 + $0x1110] sm:$0xff]  ;;  %v822_v33 = vld [vmem:[%s5725_s29 + $0x11a8] sm:$0xff]  ;;  %v1352_v56 = vcombine.high %v6353_v39, %v6353_v39  ;;  %v805_v58 = vld [vmem:[%s5725_s29 + $0x1120] sm:$0xff] }
 0x100   : > { %5126 = vmatpush3.bf16.msra.mxu0 %v5125_v5  ;;  %v767_v5 = vld [vmem:[%s5725_s29 + $0xff0] sm:$0xff]  ;;  %v5223_v42 = vpack.c.bf16 %v822_v33, %v821_v54  ;;  %v792_v0 = vld [vmem:[%s5725_s29 + $0x10b8] sm:$0xff]  ;;  %v797_v38 = vld [vmem:[%s5725_s29 + $0x10e0] sm:$0xff] }
 0x101   : > { %5158 = vmatpush3.bf16.msra.mxu1 %v5157_v6  ;;  %5128 = vmatprep.subr.bf16.mxu0 %v5127_v7  ;;  %v768_v6 = vld [vmem:[%s5725_s29 + $0xff8] sm:$0xff]  ;;  %v798_v44 = vld [vmem:[%s5725_s29 + $0x10e8] sm:$0xff]  ;;  %v799_v54 = vld [vmem:[%s5725_s29 + $0x10f0] sm:$0xff] }
 0x102   : > { %5160 = vmatprep.subr.bf16.mxu1 %v5159_v11  ;;  %v824_v1 = vld [vmem:[%s5725_s29 + $0x11b8] sm:$0xff] }
 0x103   : > { %v800_v33 = vld [vmem:[%s5725_s29 + $0x10f8] sm:$0xff] }
 0x104   : > { %5130 = vmatpush3.bf16.msra.mxu0 %v5129_v19  ;;  %v5179_v19 = vpack.c.bf16 %v768_v6, %v767_v5  ;;  %v775_v5 = vld [vmem:[%s5725_s29 + $0x1030] sm:$0xff]  ;;  %v776_v6 = vld [vmem:[%s5725_s29 + $0x1038] sm:$0xff] }
 0x105   : > { %5162 = vmatpush3.bf16.msra.mxu1 %v5161_v16  ;;  %5132 = vmatprep.subr.bf16.mxu0 %v5131_v20  ;;  %v752_v16 = vld [vmem:[%s5725_s29 + $0xf78] sm:$0xff]  ;;  %v785_v20 = vld [vmem:[%s5725_s29 + $0x1080] sm:$0xff]  ;;  %v5197_v17 = vpack.c.bf16 %v776_v6, %v775_v5 }
 0x106   : > { %5164 = vmatprep.subr.bf16.mxu1 %v5163_v24  ;;  %v818_v24 = vld [vmem:[%s5725_s29 + $0x1188] sm:$0xff]  ;;  %v5181_v27 = vpack.c.bf16 %v752_v16, %v751_v18  ;;  %v5183_v28 = vpack.c.bf16 %v786_v21, %v785_v20  ;;  %v809_v20 = vld [vmem:[%s5725_s29 + $0x1140] sm:$0xff]  ;;  %v816_v5 = vld [vmem:[%s5725_s29 + $0x1178] sm:$0xff] }
 0x107   : > { %v778_v16 = vld [vmem:[%s5725_s29 + $0x1048] sm:$0xff]  ;;  %v849_v6 = vld [vmem:[%s5725_s29 + $0x1280] sm:$0xff] }
 0x108   : > { %5134 = vmatpush3.bf16.msra.mxu0 %v5133_v30  ;;  %v770_v30 = vld [vmem:[%s5725_s29 + $0x1008] sm:$0xff] }
 0x109   : > { %5166 = vmatpush3.bf16.msra.mxu1 %v5165_v31  ;;  %5136 = vmatprep.subr.bf16.mxu0 %v5135_v32  ;;  %v801_v31 = vld [vmem:[%s5725_s29 + $0x1100] sm:$0xff]  ;;  %v5215_v32 = vpack.c.bf16 %v818_v24, %v817_v23  ;;  %v5185_v40 = vpack.c.bf16 %v770_v30, %v769_v29  ;;  %v810_v23 = vld [vmem:[%s5725_s29 + $0x1148] sm:$0xff]  ;;  %v795_v24 = vld [vmem:[%s5725_s29 + $0x10d0] sm:$0xff] }
 0x10a   : > { %5168 = vmatprep.subr.bf16.mxu1 %v5167_v37  ;;  %v6348_v37 = vrot.slane %v250_v10, %v5778_v14  ;;  %v5217_v53 = vpack.c.bf16 %v802_v34, %v801_v31  ;;  %v793_v10 = vld [vmem:[%s5725_s29 + $0x10c0] sm:$0xff]  ;;  %v5233_v29 = vpack.c.bf16 %v810_v23, %v809_v20  ;;  %v5203_v30 = vpack.c.bf16 %v796_v25, %v795_v24  ;;  %v779_v31 = vld [vmem:[%s5725_s29 + $0x1050] sm:$0xff]  ;;  %v884_v25 = vld [vmem:[%s5725_s29 + $0x1398] sm:$0xff] }
 0x10b   : > { %v811_v34 = vld [vmem:[%s5725_s29 + $0x1150] sm:$0xff] }
 0x10c   : > { %5138 = vmatpush3.bf16.msra.mxu0 %v5137_v41  ;;  %v5187_v41 = vpack.c.bf16 %v788_v36, %v787_v35  ;;  %v1351_v51 = vcombine.high %v6348_v37, %v6348_v37  ;;  %v812_v36 = vld [vmem:[%s5725_s29 + $0x1158] sm:$0xff]  ;;  %v851_v20 = vld [vmem:[%s5725_s29 + $0x1290] sm:$0xff] }
 0x10d   : > { %5170 = vmatpush3.bf16.msra.mxu1 %v5169_v43  ;;  %5140 = vmatprep.subr.bf16.mxu0 %v5139_v45  ;;  %v771_v43 = vld [vmem:[%s5725_s29 + $0x1010] sm:$0xff]  ;;  %v772_v45 = vld [vmem:[%s5725_s29 + $0x1018] sm:$0xff] }
 0x10e   : > { %v3688_v62 = vpop.f32.mrb[0].mxu0  ;;  %5172 = vmatprep.subr.bf16.mxu1 %v5171_v49  ;;  %v789_v49 = vld [vmem:[%s5725_s29 + $0x10a0] sm:$0xff]  ;;  %v883_v24 = vld [vmem:[%s5725_s29 + $0x1390] sm:$0xff] }
 0x10f   : > { %v3723_v3 = vpop.f32.mrb[0].mxu1  ;;  %v3689_v4 = vpop.f32.mrb[1].mxu0 }
 0x110   : > { %v3690_v7 = vadd.f32 %v3689_v4, %v3688_v62  ;;  %v3724_v8 = vpop.f32.mrb[1].mxu1  ;;  %5142 = vmatpush3.bf16.msra.mxu0 %v5141_v57  ;;  %v5189_v57 = vpack.c.bf16 %v772_v45, %v771_v43  ;;  %v806_v62 = vld [vmem:[%s5725_s29 + $0x1128] sm:$0xff]  ;;  %v5237_v43 = vpack.c.bf16 %v812_v36, %v811_v34  ;;  %v5207_v45 = vpack.c.bf16 %v798_v44, %v797_v38  ;;  %v853_v36 = vld [vmem:[%s5725_s29 + $0x12a0] sm:$0xff] }
 0x111   : > { %v3725_v11 = vadd.f32 %v3724_v8, %v3723_v3  ;;  %5174 = vmatpush3.bf16.msra.mxu1 %v5173_v59  ;;  %5144 = vmatprep.subr.bf16.mxu0 %v5143_v60  ;;  %v5221_v59 = vpack.c.bf16 %v804_v48, %v803_v46  ;;  %v5191_v60 = vpack.c.bf16 %v790_v50, %v789_v49  ;;  %v781_v46 = vld [vmem:[%s5725_s29 + $0x1060] sm:$0xff]  ;;  %v854_v38 = vld [vmem:[%s5725_s29 + $0x12a8] sm:$0xff] }
 0x112   : > { %5176 = vmatprep.subr.bf16.mxu1 %v5175_v63  ;;  %v791_v63 = vld [vmem:[%s5725_s29 + $0x10b0] sm:$0xff]  ;;  %v5225_v3 = vpack.c.bf16 %v806_v62, %v805_v58  ;;  %v813_v48 = vld [vmem:[%s5725_s29 + $0x1160] sm:$0xff]  ;;  %v5283_v34 = vpack.c.bf16 %v884_v25, %v883_v24  ;;  %v862_v25 = vld [vmem:[%s5725_s29 + $0x12e8] sm:$0xff] }
 0x113   : > { %v6337_v22 = vadd.f32 %v3725_v11, %v3690_v7  ;;  %v5195_v4 = vpack.c.bf16 %v792_v0, %v791_v63  ;;  %v807_v7 = vld [vmem:[%s5725_s29 + $0x1130] sm:$0xff]  ;;  %v794_v11 = vld [vmem:[%s5725_s29 + $0x10c8] sm:$0xff]  ;;  %v5211_v0 = vpack.c.bf16 %v800_v33, %v799_v54  ;;  %v856_v54 = vld [vmem:[%s5725_s29 + $0x12b8] sm:$0xff] }
 0x114   : > { %5146 = vmatpush3.bf16.msra.mxu0 %v5145_v9  ;;  %v808_v9 = vld [vmem:[%s5725_s29 + $0x1138] sm:$0xff]  ;;  %v5199_v18 = vpack.c.bf16 %v794_v11, %v793_v10  ;;  %v861_v24 = vld [vmem:[%s5725_s29 + $0x12e0] sm:$0xff] }
 0x115   : > { %5178 = vmatpush3.bf16.msra.mxu1 %v5177_v13  ;;  %5148 = vmatprep.subr.bf16.mxu0 %v5147_v15  ;;  %v825_v13 = vld [vmem:[%s5725_s29 + $0x11c0] sm:$0xff]  ;;  %v826_v15 = vld [vmem:[%s5725_s29 + $0x11c8] sm:$0xff]  ;;  %v5229_v12 = vpack.c.bf16 %v808_v9, %v807_v7  ;;  %v888_v33 = vld [vmem:[%s5725_s29 + $0x13b8] sm:$0xff] }
 0x116   : > { %5180 = vmatprep.subr.bf16.mxu1 %v5179_v19  ;;  %v777_v19 = vld [vmem:[%s5725_s29 + $0x1040] sm:$0xff]  ;;  %v5231_v21 = vpack.c.bf16 %v826_v15, %v825_v13  ;;  %v850_v7 = vld [vmem:[%s5725_s29 + $0x1288] sm:$0xff] }
 0x117   : > { %v882_v9 = vld [vmem:[%s5725_s29 + $0x1388] sm:$0xff]  ;;  %v5247_v15 = vpack.c.bf16 %v850_v7, %v849_v6  ;;  %v873_v6 = vld [vmem:[%s5725_s29 + $0x1340] sm:$0xff] }
 0x118   : > { %5150 = vmatpush3.bf16.msra.mxu0 %v5149_v26  ;;  %v827_v26 = vld [vmem:[%s5725_s29 + $0x11d0] sm:$0xff] }
 0x119   : > { %5182 = vmatpush3.bf16.msra.mxu1 %v5181_v27  ;;  %5184 = vmatprep.subr.bf16.mxu0 %v5183_v28  ;;  %v828_v27 = vld [vmem:[%s5725_s29 + $0x11d8] sm:$0xff]  ;;  %v5201_v28 = vpack.c.bf16 %v778_v16, %v777_v19  ;;  %v866_v16 = vld [vmem:[%s5725_s29 + $0x1308] sm:$0xff] }
 0x11a   : > { %5216 = vmatprep.subr.bf16.mxu1 %v5215_v32  ;;  %v780_v32 = vld [vmem:[%s5725_s29 + $0x1058] sm:$0xff]  ;;  %v5235_v35 = vpack.c.bf16 %v828_v27, %v827_v26 }
 0x11b   : > { %2549 = vmatmul.mubr.f32.vlgmr.msra.gmra.mrb[14].mxu0 %v6269_v52  ;;  %v774_v52 = vld [vmem:[%s5725_s29 + $0x1028] sm:$0xff] }
 0x11c   : > { %5186 = vmatpush3.bf16.msra.mxu0 %v5185_v40  ;;  %2619 = vmatmul.mubr.f32.vlgmr.msra.gmra.mrb[14].mxu1 %v6274_v55  ;;  %v823_v55 = vld [vmem:[%s5725_s29 + $0x11b0] sm:$0xff]  ;;  %v5193_v2 = vpack.c.bf16 %v774_v52, %v773_v61  ;;  %v829_v40 = vld [vmem:[%s5725_s29 + $0x11e0] sm:$0xff] }
 0x11d   : > { %5218 = vmatpush3.bf16.msra.mxu1 %v5217_v53  ;;  %5188 = vmatprep.subr.bf16.mxu0 %v5187_v41  ;;  %v5227_v8 = vpack.c.bf16 %v824_v1, %v823_v55  ;;  %v830_v53 = vld [vmem:[%s5725_s29 + $0x11e8] sm:$0xff]  ;;  %v5205_v41 = vpack.c.bf16 %v780_v32, %v779_v31  ;;  %v783_v55 = vld [vmem:[%s5725_s29 + $0x1070] sm:$0xff]  ;;  %v784_v1 = vld [vmem:[%s5725_s29 + $0x1078] sm:$0xff] }
 0x11e   : > { %5220 = vmatprep.subr.bf16.mxu1 %v5219_v47  ;;  %2688 = vmatprep.mubr.f32.mxu0 %v1351_v51  ;;  %v782_v47 = vld [vmem:[%s5725_s29 + $0x1068] sm:$0xff]  ;;  %v5239_v50 = vpack.c.bf16 %v830_v53, %v829_v40  ;;  %v836_v31 = vld [vmem:[%s5725_s29 + $0x1218] sm:$0xff]  ;;  %v867_v32 = vld [vmem:[%s5725_s29 + $0x1310] sm:$0xff] }
 0x11f   : > { %2758 = vmatprep.mubr.f32.mxu1 %v1352_v56  ;;  %v814_v51 = vld [vmem:[%s5725_s29 + $0x1168] sm:$0xff]  ;;  %v5209_v58 = vpack.c.bf16 %v782_v47, %v781_v46  ;;  %v885_v40 = vld [vmem:[%s5725_s29 + $0x13a0] sm:$0xff]  ;;  %v5255_v46 = vpack.c.bf16 %v854_v38, %v853_v36 }
 0x120   : > { %5190 = vmatpush3.bf16.msra.mxu0 %v5189_v57  ;;  %v5241_v63 = vpack.c.bf16 %v814_v51, %v813_v48  ;;  %v886_v53 = vld [vmem:[%s5725_s29 + $0x13a8] sm:$0xff]  ;;  %v837_v47 = vld [vmem:[%s5725_s29 + $0x1220] sm:$0xff]  ;;  %v855_v51 = vld [vmem:[%s5725_s29 + $0x12b0] sm:$0xff] }
 0x121   : > { %5222 = vmatpush3.bf16.msra.mxu1 %v5221_v59  ;;  %5192 = vmatprep.subr.bf16.mxu0 %v5191_v60  ;;  %v831_v59 = vld [vmem:[%s5725_s29 + $0x11f0] sm:$0xff]  ;;  %v832_v60 = vld [vmem:[%s5725_s29 + $0x11f8] sm:$0xff]  ;;  %v869_v48 = vld [vmem:[%s5725_s29 + $0x1320] sm:$0xff] }
 0x122   : > { %5224 = vmatprep.subr.bf16.mxu1 %v5223_v42  ;;  %v251_v42 = vld [vmem:[%s5720_s25 + $0x48] sm:$0xff] }
 0x123   : > { %v1353_v10 = vcombine.high %v251_v42, %v251_v42  ;;  %v6428_v23 = vrot.slane %v251_v42, %v5778_v14  ;;  %v872_v42 = vld [vmem:[%s5725_s29 + $0x1338] sm:$0xff] }
 0x124   : > { %5194 = vmatpush3.bf16.msra.mxu0 %v5193_v2  ;;  %v815_v2 = vld [vmem:[%s5725_s29 + $0x1170] sm:$0xff] }
 0x125   : > { %5226 = vmatpush3.bf16.msra.mxu1 %v5225_v3  ;;  %5196 = vmatprep.subr.bf16.mxu0 %v5195_v4  ;;  %v5243_v4 = vpack.c.bf16 %v832_v60, %v831_v59  ;;  %v5245_v13 = vpack.c.bf16 %v816_v5, %v815_v2  ;;  %v6433_v26 = vrot.slane %v1353_v10, %v5778_v14  ;;  %v839_v60 = vld [vmem:[%s5725_s29 + $0x1230] sm:$0xff]  ;;  %v842_v5 = vld [vmem:[%s5725_s29 + $0x1248] sm:$0xff]  ;;  %v860_v10 = vld [vmem:[%s5725_s29 + $0x12d8] sm:$0xff] }
 0x126   : > { %5228 = vmatprep.subr.bf16.mxu1 %v5227_v8  ;;  %v881_v8 = vld [vmem:[%s5725_s29 + $0x1380] sm:$0xff]  ;;  %v1368_v44 = vcombine.high %v6428_v23, %v6428_v23  ;;  %v5259_v59 = vpack.c.bf16 %v856_v54, %v855_v51 }
 0x127   : > { %v5279_v19 = vpack.c.bf16 %v882_v9, %v881_v8  ;;  %v874_v8 = vld [vmem:[%s5725_s29 + $0x1348] sm:$0xff]  ;;  %v859_v9 = vld [vmem:[%s5725_s29 + $0x12d0] sm:$0xff] }
 0x128   : > { %5198 = vmatpush3.bf16.msra.mxu0 %v5197_v17  ;;  %v833_v17 = vld [vmem:[%s5725_s29 + $0x1200] sm:$0xff] }
 0x129   : > { %5230 = vmatpush3.bf16.msra.mxu1 %v5229_v12  ;;  %5200 = vmatprep.subr.bf16.mxu0 %v5199_v18  ;;  %v834_v12 = vld [vmem:[%s5725_s29 + $0x1208] sm:$0xff]  ;;  %v865_v18 = vld [vmem:[%s5725_s29 + $0x1300] sm:$0xff] }
 0x12a   : > { %5232 = vmatprep.subr.bf16.mxu1 %v5231_v21  ;;  %v852_v21 = vld [vmem:[%s5725_s29 + $0x1298] sm:$0xff]  ;;  %v5249_v27 = vpack.c.bf16 %v834_v12, %v833_v17  ;;  %v5297_v17 = vpack.c.bf16 %v874_v8, %v873_v6  ;;  %v5267_v12 = vpack.c.bf16 %v860_v10, %v859_v9  ;;  %v915_v6 = vld [vmem:[%s5725_s29 + $0x1490] sm:$0xff] }
 0x12b   : > { %v947_v9 = vld [vmem:[%s5725_s29 + $0x1590] sm:$0xff]  ;;  %v948_v10 = vld [vmem:[%s5725_s29 + $0x1598] sm:$0xff] }
 0x12c   : > { %5202 = vmatpush3.bf16.msra.mxu0 %v5201_v28  ;;  %v5281_v28 = vpack.c.bf16 %v866_v16, %v865_v18  ;;  %v843_v18 = vld [vmem:[%s5725_s29 + $0x1250] sm:$0xff] }
 0x12d   : > { %5234 = vmatpush3.bf16.msra.mxu1 %v5233_v29  ;;  %5204 = vmatprep.subr.bf16.mxu0 %v5203_v30  ;;  %v5251_v29 = vpack.c.bf16 %v852_v21, %v851_v20  ;;  %v835_v30 = vld [vmem:[%s5725_s29 + $0x1210] sm:$0xff]  ;;  %v876_v21 = vld [vmem:[%s5725_s29 + $0x1358] sm:$0xff] }
 0x12e   : > { %v3758_v49 = vpop.f32.mrb[2].mxu0  ;;  %5236 = vmatprep.subr.bf16.mxu1 %v5235_v35  ;;  %v868_v35 = vld [vmem:[%s5725_s29 + $0x1318] sm:$0xff]  ;;  %v875_v16 = vld [vmem:[%s5725_s29 + $0x1350] sm:$0xff] }
 0x12f   : > { %v3759_v56 = vpop.f32.mrb[3].mxu0  ;;  %v3793_v57 = vpop.f32.mrb[2].mxu1 }
 0x130   : > { %v3760_v61 = vadd.f32 %v3759_v56, %v3758_v49  ;;  %5206 = vmatpush3.bf16.msra.mxu0 %v5205_v41  ;;  %v3794_v52 = vpop.f32.mrb[3].mxu1  ;;  %v1369_v41 = vcombine.high %v6433_v26, %v6433_v26  ;;  %v5287_v49 = vpack.c.bf16 %v886_v53, %v885_v40  ;;  %v863_v40 = vld [vmem:[%s5725_s29 + $0x12f0] sm:$0xff]  ;;  %v864_v53 = vld [vmem:[%s5725_s29 + $0x12f8] sm:$0xff] }
 0x131   : > { %v3795_v62 = vadd.f32 %v3794_v52, %v3793_v57  ;;  %5238 = vmatpush3.bf16.msra.mxu1 %v5237_v43  ;;  %5208 = vmatprep.subr.bf16.mxu0 %v5207_v45  ;;  %v5253_v43 = vpack.c.bf16 %v836_v31, %v835_v30  ;;  %v5285_v45 = vpack.c.bf16 %v868_v35, %v867_v32  ;;  %v871_v52 = vld [vmem:[%s5725_s29 + $0x1330] sm:$0xff]  ;;  %v845_v32 = vld [vmem:[%s5725_s29 + $0x1260] sm:$0xff] }
 0x132   : > { %v1711_v3 = vadd.f32 %v3760_v61, %v6337_v22  ;;  %5240 = vmatprep.subr.bf16.mxu1 %v5239_v50  ;;  %v5213_v22 = vpack.c.bf16 %v784_v1, %v783_v55  ;;  %v870_v50 = vld [vmem:[%s5725_s29 + $0x1328] sm:$0xff]  ;;  %v840_v61 = vld [vmem:[%s5725_s29 + $0x1238] sm:$0xff]  ;;  %v5293_v2 = vpack.c.bf16 %v872_v42, %v871_v52  ;;  %v5301_v30 = vpack.c.bf16 %v876_v21, %v875_v16  ;;  %v877_v35 = vld [vmem:[%s5725_s29 + $0x1360] sm:$0xff] }
 0x133   : > { %v5289_v57 = vpack.c.bf16 %v870_v50, %v869_v48  ;;  %v890_v55 = vld [vmem:[%s5725_s29 + $0x13c8] sm:$0xff]  ;;  %v5261_v1 = vpack.c.bf16 %v840_v61, %v839_v60  ;;  %v5271_v31 = vpack.c.bf16 %v862_v25, %v861_v24  ;;  %v5275_v54 = vpack.c.bf16 %v864_v53, %v863_v40  ;;  %v880_v60 = vld [vmem:[%s5725_s29 + $0x1378] sm:$0xff]  ;;  %v913_v61 = vld [vmem:[%s5725_s29 + $0x1480] sm:$0xff] }
 0x134   : > { %v6419_v11 = vadd.f32 %v3795_v62, %v1711_v3  ;;  %5210 = vmatpush3.bf16.msra.mxu0 %v5209_v58  ;;  %v857_v62 = vld [vmem:[%s5725_s29 + $0x12c0] sm:$0xff]  ;;  %v914_v52 = vld [vmem:[%s5725_s29 + $0x1488] sm:$0xff]  ;;  %v5347_v16 = vpack.c.bf16 %v948_v10, %v947_v9  ;;  %v920_v40 = vld [vmem:[%s5725_s29 + $0x14b8] sm:$0xff] }
 0x135   : > { %5242 = vmatpush3.bf16.msra.mxu1 %v5241_v63  ;;  %5212 = vmatprep.subr.bf16.mxu0 %v5211_v0  ;;  %v858_v63 = vld [vmem:[%s5725_s29 + $0x12c8] sm:$0xff]  ;;  %v889_v0 = vld [vmem:[%s5725_s29 + $0x13c0] sm:$0xff]  ;;  %v952_v53 = vld [vmem:[%s5725_s29 + $0x15b8] sm:$0xff] }
 0x136   : > { %5244 = vmatprep.subr.bf16.mxu1 %v5243_v4  ;;  %v5263_v3 = vpack.c.bf16 %v858_v63, %v857_v62  ;;  %v841_v4 = vld [vmem:[%s5725_s29 + $0x1240] sm:$0xff]  ;;  %v5295_v7 = vpack.c.bf16 %v890_v55, %v889_v0  ;;  %v946_v42 = vld [vmem:[%s5725_s29 + $0x1588] sm:$0xff]  ;;  %v5311_v55 = vpack.c.bf16 %v914_v52, %v913_v61 }
 0x137   : > { %v917_v21 = vld [vmem:[%s5725_s29 + $0x14a0] sm:$0xff]  ;;  %v918_v24 = vld [vmem:[%s5725_s29 + $0x14a8] sm:$0xff] }
 0x138   : > { %5214 = vmatpush3.bf16.msra.mxu0 %v5213_v22  ;;  %v891_v22 = vld [vmem:[%s5725_s29 + $0x13d0] sm:$0xff]  ;;  %v937_v61 = vld [vmem:[%s5725_s29 + $0x1540] sm:$0xff]  ;;  %v926_v10 = vld [vmem:[%s5725_s29 + $0x14e8] sm:$0xff] }
 0x139   : > { %5246 = vmatpush3.bf16.msra.mxu1 %v5245_v13  ;;  %5248 = vmatprep.subr.bf16.mxu0 %v5247_v15  ;;  %v892_v13 = vld [vmem:[%s5725_s29 + $0x13d8] sm:$0xff]  ;;  %v5265_v15 = vpack.c.bf16 %v842_v5, %v841_v4  ;;  %v930_v5 = vld [vmem:[%s5725_s29 + $0x1508] sm:$0xff]  ;;  %v925_v9 = vld [vmem:[%s5725_s29 + $0x14e0] sm:$0xff] }
 0x13a   : > { %5280 = vmatprep.subr.bf16.mxu1 %v5279_v19  ;;  %v844_v19 = vld [vmem:[%s5725_s29 + $0x1258] sm:$0xff]  ;;  %v5299_v20 = vpack.c.bf16 %v892_v13, %v891_v22 }
 0x13b   : > { %2689 = vmatmul.mubr.f32.vlgmr.msra.gmra.mrb[16].mxu0 %v6348_v37  ;;  %v838_v37 = vld [vmem:[%s5725_s29 + $0x1228] sm:$0xff] }
 0x13c   : > { %5250 = vmatpush3.bf16.msra.mxu0 %v5249_v27  ;;  %2759 = vmatmul.mubr.f32.vlgmr.msra.gmra.mrb[16].mxu1 %v6353_v39  ;;  %v887_v39 = vld [vmem:[%s5725_s29 + $0x13b0] sm:$0xff]  ;;  %v5257_v56 = vpack.c.bf16 %v838_v37, %v837_v47  ;;  %v893_v27 = vld [vmem:[%s5725_s29 + $0x13e0] sm:$0xff] }
 0x13d   : > { %5282 = vmatpush3.bf16.msra.mxu1 %v5281_v28  ;;  %5252 = vmatprep.subr.bf16.mxu0 %v5251_v29  ;;  %v5291_v58 = vpack.c.bf16 %v888_v33, %v887_v39  ;;  %v894_v28 = vld [vmem:[%s5725_s29 + $0x13e8] sm:$0xff]  ;;  %v5269_v29 = vpack.c.bf16 %v844_v19, %v843_v18  ;;  %v847_v39 = vld [vmem:[%s5725_s29 + $0x1270] sm:$0xff]  ;;  %v848_v33 = vld [vmem:[%s5725_s29 + $0x1278] sm:$0xff] }
 0x13e   : > { %5284 = vmatprep.subr.bf16.mxu1 %v5283_v34  ;;  %2828 = vmatprep.mubr.f32.mxu0 %v1368_v44  ;;  %v846_v34 = vld [vmem:[%s5725_s29 + $0x1268] sm:$0xff]  ;;  %v5303_v38 = vpack.c.bf16 %v894_v28, %v893_v27  ;;  %v900_v18 = vld [vmem:[%s5725_s29 + $0x1418] sm:$0xff]  ;;  %v931_v19 = vld [vmem:[%s5725_s29 + $0x1510] sm:$0xff] }
 0x13f   : > { %2898 = vmatprep.mubr.f32.mxu1 %v1369_v41  ;;  %v878_v44 = vld [vmem:[%s5725_s29 + $0x1368] sm:$0xff]  ;;  %v5273_v48 = vpack.c.bf16 %v846_v34, %v845_v32  ;;  %v949_v27 = vld [vmem:[%s5725_s29 + $0x15a0] sm:$0xff]  ;;  %v5319_v32 = vpack.c.bf16 %v918_v24, %v917_v21 }
 0x140   : > { %5254 = vmatpush3.bf16.msra.mxu0 %v5253_v43  ;;  %v5305_v51 = vpack.c.bf16 %v878_v44, %v877_v35  ;;  %v950_v28 = vld [vmem:[%s5725_s29 + $0x15a8] sm:$0xff]  ;;  %v901_v34 = vld [vmem:[%s5725_s29 + $0x1420] sm:$0xff]  ;;  %v919_v44 = vld [vmem:[%s5725_s29 + $0x14b0] sm:$0xff] }
 0x141   : > { %5286 = vmatpush3.bf16.msra.mxu1 %v5285_v45  ;;  %5256 = vmatprep.subr.bf16.mxu0 %v5255_v46  ;;  %v895_v45 = vld [vmem:[%s5725_s29 + $0x13f0] sm:$0xff]  ;;  %v896_v46 = vld [vmem:[%s5725_s29 + $0x13f8] sm:$0xff]  ;;  %v933_v35 = vld [vmem:[%s5725_s29 + $0x1520] sm:$0xff] }
 0x142   : > { %5288 = vmatprep.subr.bf16.mxu1 %v5287_v49  ;;  %v252_v49 = vld [vmem:[%s5720_s25 + $0x50] sm:$0xff] }
 0x143   : > { %v1370_v62 = vcombine.high %v252_v49, %v252_v49  ;;  %v6508_v8 = vrot.slane %v252_v49, %v5778_v14  ;;  %v936_v49 = vld [vmem:[%s5725_s29 + $0x1538] sm:$0xff] }
 0x144   : > { %5258 = vmatpush3.bf16.msra.mxu0 %v5257_v56  ;;  %v879_v56 = vld [vmem:[%s5725_s29 + $0x1370] sm:$0xff] }
 0x145   : > { %5290 = vmatpush3.bf16.msra.mxu1 %v5289_v57  ;;  %5260 = vmatprep.subr.bf16.mxu0 %v5259_v59  ;;  %v5307_v59 = vpack.c.bf16 %v896_v46, %v895_v45  ;;  %v5309_v0 = vpack.c.bf16 %v880_v60, %v879_v56  ;;  %v6513_v22 = vrot.slane %v1370_v62, %v5778_v14  ;;  %v903_v46 = vld [vmem:[%s5725_s29 + $0x1430] sm:$0xff]  ;;  %v906_v60 = vld [vmem:[%s5725_s29 + $0x1448] sm:$0xff]  ;;  %v924_v62 = vld [vmem:[%s5725_s29 + $0x14d8] sm:$0xff] }
 0x146   : > { %5292 = vmatprep.subr.bf16.mxu1 %v5291_v58  ;;  %v945_v58 = vld [vmem:[%s5725_s29 + $0x1580] sm:$0xff]  ;;  %v1385_v25 = vcombine.high %v6508_v8, %v6508_v8  ;;  %v5323_v45 = vpack.c.bf16 %v920_v40, %v919_v44 }
 0x147   : > { %v5343_v4 = vpack.c.bf16 %v946_v42, %v945_v58  ;;  %v938_v58 = vld [vmem:[%s5725_s29 + $0x1548] sm:$0xff]  ;;  %v923_v42 = vld [vmem:[%s5725_s29 + $0x14d0] sm:$0xff] }
 0x148   : > { %5262 = vmatpush3.bf16.msra.mxu0 %v5261_v1  ;;  %v897_v1 = vld [vmem:[%s5725_s29 + $0x1400] sm:$0xff] }
 0x149   : > { %5294 = vmatpush3.bf16.msra.mxu1 %v5293_v2  ;;  %5264 = vmatprep.subr.bf16.mxu0 %v5263_v3  ;;  %v898_v2 = vld [vmem:[%s5725_s29 + $0x1408] sm:$0xff]  ;;  %v929_v3 = vld [vmem:[%s5725_s29 + $0x1500] sm:$0xff] }
 0x14a   : > { %5296 = vmatprep.subr.bf16.mxu1 %v5295_v7  ;;  %v916_v7 = vld [vmem:[%s5725_s29 + $0x1498] sm:$0xff]  ;;  %v5313_v13 = vpack.c.bf16 %v898_v2, %v897_v1  ;;  %v5361_v1 = vpack.c.bf16 %v938_v58, %v937_v61  ;;  %v5331_v2 = vpack.c.bf16 %v924_v62, %v923_v42  ;;  %v979_v61 = vld [vmem:[%s5725_s29 + $0x1690] sm:$0xff] }
 0x14b   : > { %v1011_v42 = vld [vmem:[%s5725_s29 + $0x1790] sm:$0xff]  ;;  %v1012_v62 = vld [vmem:[%s5725_s29 + $0x1798] sm:$0xff] }
 0x14c   : > { %5266 = vmatpush3.bf16.msra.mxu0 %v5265_v15  ;;  %v5345_v15 = vpack.c.bf16 %v930_v5, %v929_v3  ;;  %v907_v3 = vld [vmem:[%s5725_s29 + $0x1450] sm:$0xff] }
 0x14d   : > { %5298 = vmatpush3.bf16.msra.mxu1 %v5297_v17  ;;  %5268 = vmatprep.subr.bf16.mxu0 %v5267_v12  ;;  %v5315_v17 = vpack.c.bf16 %v916_v7, %v915_v6  ;;  %v899_v12 = vld [vmem:[%s5725_s29 + $0x1410] sm:$0xff]  ;;  %v940_v7 = vld [vmem:[%s5725_s29 + $0x1558] sm:$0xff] }
 0x14e   : > { %v3828_v36 = vpop.f32.mrb[4].mxu0  ;;  %5300 = vmatprep.subr.bf16.mxu1 %v5299_v20  ;;  %v932_v20 = vld [vmem:[%s5725_s29 + $0x1518] sm:$0xff]  ;;  %v939_v5 = vld [vmem:[%s5725_s29 + $0x1550] sm:$0xff] }
 0x14f   : > { %v3829_v41 = vpop.f32.mrb[5].mxu0  ;;  %v3863_v43 = vpop.f32.mrb[4].mxu1 }
 0x150   : > { %v3830_v47 = vadd.f32 %v3829_v41, %v3828_v36  ;;  %5270 = vmatpush3.bf16.msra.mxu0 %v5269_v29  ;;  %v3864_v37 = vpop.f32.mrb[5].mxu1  ;;  %v1386_v29 = vcombine.high %v6513_v22, %v6513_v22  ;;  %v5351_v36 = vpack.c.bf16 %v950_v28, %v949_v27  ;;  %v927_v27 = vld [vmem:[%s5725_s29 + $0x14f0] sm:$0xff]  ;;  %v928_v28 = vld [vmem:[%s5725_s29 + $0x14f8] sm:$0xff] }
 0x151   : > { %v3865_v50 = vadd.f32 %v3864_v37, %v3863_v43  ;;  %5302 = vmatpush3.bf16.msra.mxu1 %v5301_v30  ;;  %5272 = vmatprep.subr.bf16.mxu0 %v5271_v31  ;;  %v5317_v30 = vpack.c.bf16 %v900_v18, %v899_v12  ;;  %v5349_v31 = vpack.c.bf16 %v932_v20, %v931_v19  ;;  %v935_v37 = vld [vmem:[%s5725_s29 + $0x1530] sm:$0xff]  ;;  %v909_v19 = vld [vmem:[%s5725_s29 + $0x1460] sm:$0xff] }
 0x152   : > { %v1851_v57 = vadd.f32 %v3830_v47, %v6419_v11  ;;  %5304 = vmatprep.subr.bf16.mxu1 %v5303_v38  ;;  %v5277_v11 = vpack.c.bf16 %v848_v33, %v847_v39  ;;  %v934_v38 = vld [vmem:[%s5725_s29 + $0x1528] sm:$0xff]  ;;  %v904_v47 = vld [vmem:[%s5725_s29 + $0x1438] sm:$0xff]  ;;  %v5357_v56 = vpack.c.bf16 %v936_v49, %v935_v37  ;;  %v5365_v12 = vpack.c.bf16 %v940_v7, %v939_v5  ;;  %v941_v20 = vld [vmem:[%s5725_s29 + $0x1560] sm:$0xff] }
 0x153   : > { %v5353_v43 = vpack.c.bf16 %v934_v38, %v933_v35  ;;  %v954_v39 = vld [vmem:[%s5725_s29 + $0x15c8] sm:$0xff]  ;;  %v5325_v33 = vpack.c.bf16 %v904_v47, %v903_v46  ;;  %v5335_v18 = vpack.c.bf16 %v926_v10, %v925_v9  ;;  %v5339_v40 = vpack.c.bf16 %v928_v28, %v927_v27  ;;  %v944_v46 = vld [vmem:[%s5725_s29 + $0x1578] sm:$0xff]  ;;  %v977_v47 = vld [vmem:[%s5725_s29 + $0x1680] sm:$0xff] }
 0x154   : > { %v6499_v63 = vadd.f32 %v3865_v50, %v1851_v57  ;;  %5274 = vmatpush3.bf16.msra.mxu0 %v5273_v48  ;;  %v921_v50 = vld [vmem:[%s5725_s29 + $0x14c0] sm:$0xff]  ;;  %v978_v37 = vld [vmem:[%s5725_s29 + $0x1688] sm:$0xff]  ;;  %v5411_v5 = vpack.c.bf16 %v1012_v62, %v1011_v42  ;;  %v984_v27 = vld [vmem:[%s5725_s29 + $0x16b8] sm:$0xff] }
 0x155   : > { %5306 = vmatpush3.bf16.msra.mxu1 %v5305_v51  ;;  %5276 = vmatprep.subr.bf16.mxu0 %v5275_v54  ;;  %v922_v51 = vld [vmem:[%s5725_s29 + $0x14c8] sm:$0xff]  ;;  %v953_v54 = vld [vmem:[%s5725_s29 + $0x15c0] sm:$0xff]  ;;  %v1016_v28 = vld [vmem:[%s5725_s29 + $0x17b8] sm:$0xff] }
 0x156   : > { %5308 = vmatprep.subr.bf16.mxu1 %v5307_v59  ;;  %v5327_v57 = vpack.c.bf16 %v922_v51, %v921_v50  ;;  %v905_v59 = vld [vmem:[%s5725_s29 + $0x1440] sm:$0xff]  ;;  %v5359_v52 = vpack.c.bf16 %v954_v39, %v953_v54  ;;  %v1010_v49 = vld [vmem:[%s5725_s29 + $0x1788] sm:$0xff]  ;;  %v5375_v39 = vpack.c.bf16 %v978_v37, %v977_v47 }
 0x157   : > { %v981_v7 = vld [vmem:[%s5725_s29 + $0x16a0] sm:$0xff]  ;;  %v982_v9 = vld [vmem:[%s5725_s29 + $0x16a8] sm:$0xff] }
 0x158   : > { %5278 = vmatpush3.bf16.msra.mxu0 %v5277_v11  ;;  %v955_v11 = vld [vmem:[%s5725_s29 + $0x15d0] sm:$0xff]  ;;  %v1001_v47 = vld [vmem:[%s5725_s29 + $0x1740] sm:$0xff]  ;;  %v990_v62 = vld [vmem:[%s5725_s29 + $0x16e8] sm:$0xff] }
 0x159   : > { %5310 = vmatpush3.bf16.msra.mxu1 %v5309_v0  ;;  %5312 = vmatprep.subr.bf16.mxu0 %v5311_v55  ;;  %v956_v0 = vld [vmem:[%s5725_s29 + $0x15d8] sm:$0xff]  ;;  %v5329_v55 = vpack.c.bf16 %v906_v60, %v905_v59  ;;  %v994_v60 = vld [vmem:[%s5725_s29 + $0x1708] sm:$0xff]  ;;  %v989_v42 = vld [vmem:[%s5725_s29 + $0x16e0] sm:$0xff] }
 0x15a   : > { %5344 = vmatprep.subr.bf16.mxu1 %v5343_v4  ;;  %v908_v4 = vld [vmem:[%s5725_s29 + $0x1458] sm:$0xff]  ;;  %v5363_v6 = vpack.c.bf16 %v956_v0, %v955_v11 }
 0x15b   : > { %2829 = vmatmul.mubr.f32.vlgmr.msra.gmra.mrb[18].mxu0 %v6428_v23  ;;  %v902_v23 = vld [vmem:[%s5725_s29 + $0x1428] sm:$0xff] }
 0x15c   : > { %5314 = vmatpush3.bf16.msra.mxu0 %v5313_v13  ;;  %2899 = vmatmul.mubr.f32.vlgmr.msra.gmra.mrb[18].mxu1 %v6433_v26  ;;  %v951_v26 = vld [vmem:[%s5725_s29 + $0x15b0] sm:$0xff]  ;;  %v5321_v41 = vpack.c.bf16 %v902_v23, %v901_v34  ;;  %v957_v13 = vld [vmem:[%s5725_s29 + $0x15e0] sm:$0xff] }
 0x15d   : > { %5346 = vmatpush3.bf16.msra.mxu1 %v5345_v15  ;;  %5316 = vmatprep.subr.bf16.mxu0 %v5315_v17  ;;  %v5355_v48 = vpack.c.bf16 %v952_v53, %v951_v26  ;;  %v958_v15 = vld [vmem:[%s5725_s29 + $0x15e8] sm:$0xff]  ;;  %v5333_v17 = vpack.c.bf16 %v908_v4, %v907_v3  ;;  %v911_v26 = vld [vmem:[%s5725_s29 + $0x1470] sm:$0xff]  ;;  %v912_v53 = vld [vmem:[%s5725_s29 + $0x1478] sm:$0xff] }
 0x15e   : > { %5348 = vmatprep.subr.bf16.mxu1 %v5347_v16  ;;  %2968 = vmatprep.mubr.f32.mxu0 %v1385_v25  ;;  %v910_v16 = vld [vmem:[%s5725_s29 + $0x1468] sm:$0xff]  ;;  %v5367_v24 = vpack.c.bf16 %v958_v15, %v957_v13  ;;  %v964_v3 = vld [vmem:[%s5725_s29 + $0x1618] sm:$0xff]  ;;  %v995_v4 = vld [vmem:[%s5725_s29 + $0x1710] sm:$0xff] }
 0x15f   : > { %3038 = vmatprep.mubr.f32.mxu1 %v1386_v29  ;;  %v942_v25 = vld [vmem:[%s5725_s29 + $0x1568] sm:$0xff]  ;;  %v5337_v35 = vpack.c.bf16 %v910_v16, %v909_v19  ;;  %v1013_v13 = vld [vmem:[%s5725_s29 + $0x17a0] sm:$0xff]  ;;  %v5383_v19 = vpack.c.bf16 %v982_v9, %v981_v7 }
 0x160   : > { %5318 = vmatpush3.bf16.msra.mxu0 %v5317_v30  ;;  %v5369_v44 = vpack.c.bf16 %v942_v25, %v941_v20  ;;  %v1014_v15 = vld [vmem:[%s5725_s29 + $0x17a8] sm:$0xff]  ;;  %v965_v16 = vld [vmem:[%s5725_s29 + $0x1620] sm:$0xff]  ;;  %v983_v25 = vld [vmem:[%s5725_s29 + $0x16b0] sm:$0xff] }
 0x161   : > { %5350 = vmatpush3.bf16.msra.mxu1 %v5349_v31  ;;  %5320 = vmatprep.subr.bf16.mxu0 %v5319_v32  ;;  %v959_v31 = vld [vmem:[%s5725_s29 + $0x15f0] sm:$0xff]  ;;  %v960_v32 = vld [vmem:[%s5725_s29 + $0x15f8] sm:$0xff]  ;;  %v997_v20 = vld [vmem:[%s5725_s29 + $0x1720] sm:$0xff] }
 0x162   : > { %5352 = vmatprep.subr.bf16.mxu1 %v5351_v36  ;;  %v253_v36 = vld [vmem:[%s5720_s25 + $0x58] sm:$0xff] }
 0x163   : > { %v1387_v50 = vcombine.high %v253_v36, %v253_v36  ;;  %v6588_v58 = vrot.slane %v253_v36, %v5778_v14  ;;  %v1000_v36 = vld [vmem:[%s5725_s29 + $0x1738] sm:$0xff] }
 0x164   : > { %5322 = vmatpush3.bf16.msra.mxu0 %v5321_v41  ;;  %v943_v41 = vld [vmem:[%s5725_s29 + $0x1570] sm:$0xff] }
 0x165   : > { %5354 = vmatpush3.bf16.msra.mxu1 %v5353_v43  ;;  %5324 = vmatprep.subr.bf16.mxu0 %v5323_v45  ;;  %v5371_v45 = vpack.c.bf16 %v960_v32, %v959_v31  ;;  %v5373_v54 = vpack.c.bf16 %v944_v46, %v943_v41  ;;  %v6593_v11 = vrot.slane %v1387_v50, %v5778_v14  ;;  %v967_v32 = vld [vmem:[%s5725_s29 + $0x1630] sm:$0xff]  ;;  %v970_v46 = vld [vmem:[%s5725_s29 + $0x1648] sm:$0xff]  ;;  %v988_v50 = vld [vmem:[%s5725_s29 + $0x16d8] sm:$0xff] }
 0x166   : > { %5356 = vmatprep.subr.bf16.mxu1 %v5355_v48  ;;  %v1009_v48 = vld [vmem:[%s5725_s29 + $0x1780] sm:$0xff]  ;;  %v1402_v10 = vcombine.high %v6588_v58, %v6588_v58  ;;  %v5387_v31 = vpack.c.bf16 %v984_v27, %v983_v25 }
 0x167   : > { %v5407_v59 = vpack.c.bf16 %v1010_v49, %v1009_v48  ;;  %v1002_v48 = vld [vmem:[%s5725_s29 + $0x1748] sm:$0xff]  ;;  %v987_v49 = vld [vmem:[%s5725_s29 + $0x16d0] sm:$0xff] }
 0x168   : > { %5326 = vmatpush3.bf16.msra.mxu0 %v5325_v33  ;;  %v961_v33 = vld [vmem:[%s5725_s29 + $0x1600] sm:$0xff] }
 0x169   : > { %5358 = vmatpush3.bf16.msra.mxu1 %v5357_v56  ;;  %5328 = vmatprep.subr.bf16.mxu0 %v5327_v57  ;;  %v962_v56 = vld [vmem:[%s5725_s29 + $0x1608] sm:$0xff]  ;;  %v993_v57 = vld [vmem:[%s5725_s29 + $0x1700] sm:$0xff] }
 0x16a   : > { %5360 = vmatprep.subr.bf16.mxu1 %v5359_v52  ;;  %v980_v52 = vld [vmem:[%s5725_s29 + $0x1698] sm:$0xff]  ;;  %v5377_v0 = vpack.c.bf16 %v962_v56, %v961_v33  ;;  %v5425_v33 = vpack.c.bf16 %v1002_v48, %v1001_v47  ;;  %v5395_v56 = vpack.c.bf16 %v988_v50, %v987_v49  ;;  %v1043_v47 = vld [vmem:[%s5725_s29 + $0x1890] sm:$0xff] }
 0x16b   : > { %v1075_v49 = vld [vmem:[%s5725_s29 + $0x1990] sm:$0xff]  ;;  %v1076_v50 = vld [vmem:[%s5725_s29 + $0x1998] sm:$0xff] }
 0x16c   : > { %5330 = vmatpush3.bf16.msra.mxu0 %v5329_v55  ;;  %v5409_v55 = vpack.c.bf16 %v994_v60, %v993_v57  ;;  %v971_v57 = vld [vmem:[%s5725_s29 + $0x1650] sm:$0xff] }
 0x16d   : > { %5362 = vmatpush3.bf16.msra.mxu1 %v5361_v1  ;;  %5332 = vmatprep.subr.bf16.mxu0 %v5331_v2  ;;  %v5379_v1 = vpack.c.bf16 %v980_v52, %v979_v61  ;;  %v963_v2 = vld [vmem:[%s5725_s29 + $0x1610] sm:$0xff]  ;;  %v1004_v52 = vld [vmem:[%s5725_s29 + $0x1758] sm:$0xff] }
 0x16e   : > { %v3898_v21 = vpop.f32.mrb[6].mxu0  ;;  %5364 = vmatprep.subr.bf16.mxu1 %v5363_v6  ;;  %v996_v6 = vld [vmem:[%s5725_s29 + $0x1718] sm:$0xff]  ;;  %v1003_v60 = vld [vmem:[%s5725_s29 + $0x1750] sm:$0xff] }
 0x16f   : > { %v3899_v29 = vpop.f32.mrb[7].mxu0  ;;  %v3933_v30 = vpop.f32.mrb[6].mxu1 }
 0x170   : > { %v3900_v34 = vadd.f32 %v3899_v29, %v3898_v21  ;;  %5334 = vmatpush3.bf16.msra.mxu0 %v5333_v17  ;;  %v3934_v23 = vpop.f32.mrb[7].mxu1  ;;  %v1403_v17 = vcombine.high %v6593_v11, %v6593_v11  ;;  %v5415_v21 = vpack.c.bf16 %v1014_v15, %v1013_v13  ;;  %v991_v13 = vld [vmem:[%s5725_s29 + $0x16f0] sm:$0xff]  ;;  %v992_v15 = vld [vmem:[%s5725_s29 + $0x16f8] sm:$0xff] }
 0x171   : > { %v3935_v38 = vadd.f32 %v3934_v23, %v3933_v30  ;;  %5366 = vmatpush3.bf16.msra.mxu1 %v5365_v12  ;;  %5336 = vmatprep.subr.bf16.mxu0 %v5335_v18  ;;  %v5381_v12 = vpack.c.bf16 %v964_v3, %v963_v2  ;;  %v5413_v18 = vpack.c.bf16 %v996_v6, %v995_v4  ;;  %v999_v23 = vld [vmem:[%s5725_s29 + $0x1730] sm:$0xff]  ;;  %v973_v4 = vld [vmem:[%s5725_s29 + $0x1660] sm:$0xff] }
 0x172   : > { %v1991_v43 = vadd.f32 %v3900_v34, %v6499_v63  ;;  %5368 = vmatprep.subr.bf16.mxu1 %v5367_v24  ;;  %v5341_v63 = vpack.c.bf16 %v912_v53, %v911_v26  ;;  %v998_v24 = vld [vmem:[%s5725_s29 + $0x1728] sm:$0xff]  ;;  %v968_v34 = vld [vmem:[%s5725_s29 + $0x1638] sm:$0xff]  ;;  %v5421_v41 = vpack.c.bf16 %v1000_v36, %v999_v23  ;;  %v5429_v2 = vpack.c.bf16 %v1004_v52, %v1003_v60  ;;  %v1005_v6 = vld [vmem:[%s5725_s29 + $0x1760] sm:$0xff] }
 0x173   : > { %v5417_v30 = vpack.c.bf16 %v998_v24, %v997_v20  ;;  %v1018_v26 = vld [vmem:[%s5725_s29 + $0x17c8] sm:$0xff]  ;;  %v5389_v53 = vpack.c.bf16 %v968_v34, %v967_v32  ;;  %v5399_v3 = vpack.c.bf16 %v990_v62, %v989_v42  ;;  %v5403_v27 = vpack.c.bf16 %v992_v15, %v991_v13  ;;  %v1008_v32 = vld [vmem:[%s5725_s29 + $0x1778] sm:$0xff]  ;;  %v1041_v34 = vld [vmem:[%s5725_s29 + $0x1880] sm:$0xff] }
 0x174   : > { %v6579_v51 = vadd.f32 %v3935_v38, %v1991_v43  ;;  %5338 = vmatpush3.bf16.msra.mxu0 %v5337_v35  ;;  %v985_v38 = vld [vmem:[%s5725_s29 + $0x16c0] sm:$0xff]  ;;  %v1042_v23 = vld [vmem:[%s5725_s29 + $0x1888] sm:$0xff]  ;;  %v5475_v60 = vpack.c.bf16 %v1076_v50, %v1075_v49  ;;  %v1048_v13 = vld [vmem:[%s5725_s29 + $0x18b8] sm:$0xff] }
 0x175   : > { %5370 = vmatpush3.bf16.msra.mxu1 %v5369_v44  ;;  %5340 = vmatprep.subr.bf16.mxu0 %v5339_v40  ;;  %v986_v44 = vld [vmem:[%s5725_s29 + $0x16c8] sm:$0xff]  ;;  %v1017_v40 = vld [vmem:[%s5725_s29 + $0x17c0] sm:$0xff]  ;;  %v1080_v15 = vld [vmem:[%s5725_s29 + $0x19b8] sm:$0xff] }
 0x176   : > { %5372 = vmatprep.subr.bf16.mxu1 %v5371_v45  ;;  %v5391_v43 = vpack.c.bf16 %v986_v44, %v985_v38  ;;  %v969_v45 = vld [vmem:[%s5725_s29 + $0x1640] sm:$0xff]  ;;  %v5423_v37 = vpack.c.bf16 %v1018_v26, %v1017_v40  ;;  %v1074_v36 = vld [vmem:[%s5725_s29 + $0x1988] sm:$0xff]  ;;  %v5439_v26 = vpack.c.bf16 %v1042_v23, %v1041_v34 }
 0x177   : > { %v1045_v52 = vld [vmem:[%s5725_s29 + $0x18a0] sm:$0xff]  ;;  %v1046_v42 = vld [vmem:[%s5725_s29 + $0x18a8] sm:$0xff] }
 0x178   : > { %5342 = vmatpush3.bf16.msra.mxu0 %v5341_v63  ;;  %v1019_v63 = vld [vmem:[%s5725_s29 + $0x17d0] sm:$0xff]  ;;  %v1065_v34 = vld [vmem:[%s5725_s29 + $0x1940] sm:$0xff]  ;;  %v1054_v50 = vld [vmem:[%s5725_s29 + $0x18e8] sm:$0xff] }
 0x179   : > { %5374 = vmatpush3.bf16.msra.mxu1 %v5373_v54  ;;  %5376 = vmatprep.subr.bf16.mxu0 %v5375_v39  ;;  %v1020_v54 = vld [vmem:[%s5725_s29 + $0x17d8] sm:$0xff]  ;;  %v5393_v39 = vpack.c.bf16 %v970_v46, %v969_v45  ;;  %v1058_v46 = vld [vmem:[%s5725_s29 + $0x1908] sm:$0xff]  ;;  %v1053_v49 = vld [vmem:[%s5725_s29 + $0x18e0] sm:$0xff] }
 0x17a   : > { %5408 = vmatprep.subr.bf16.mxu1 %v5407_v59  ;;  %v972_v59 = vld [vmem:[%s5725_s29 + $0x1658] sm:$0xff]  ;;  %v5427_v61 = vpack.c.bf16 %v1020_v54, %v1019_v63 }
 0x17b   : > { %2969 = vmatmul.mubr.f32.vlgmr.msra.gmra.mrb[20].mxu0 %v6508_v8  ;;  %v966_v8 = vld [vmem:[%s5725_s29 + $0x1628] sm:$0xff] }
 0x17c   : > { %5378 = vmatpush3.bf16.msra.mxu0 %v5377_v0  ;;  %3039 = vmatmul.mubr.f32.vlgmr.msra.gmra.mrb[20].mxu1 %v6513_v22  ;;  %v1015_v22 = vld [vmem:[%s5725_s29 + $0x17b0] sm:$0xff]  ;;  %v5385_v29 = vpack.c.bf16 %v966_v8, %v965_v16  ;;  %v1021_v0 = vld [vmem:[%s5725_s29 + $0x17e0] sm:$0xff] }
 0x17d   : > { %5410 = vmatpush3.bf16.msra.mxu1 %v5409_v55  ;;  %5380 = vmatprep.subr.bf16.mxu0 %v5379_v1  ;;  %v5419_v35 = vpack.c.bf16 %v1016_v28, %v1015_v22  ;;  %v1022_v55 = vld [vmem:[%s5725_s29 + $0x17e8] sm:$0xff]  ;;  %v5397_v1 = vpack.c.bf16 %v972_v59, %v971_v57  ;;  %v975_v22 = vld [vmem:[%s5725_s29 + $0x1670] sm:$0xff]  ;;  %v976_v28 = vld [vmem:[%s5725_s29 + $0x1678] sm:$0xff] }
 0x17e   : > { %5412 = vmatprep.subr.bf16.mxu1 %v5411_v5  ;;  %3108 = vmatprep.mubr.f32.mxu0 %v1402_v10  ;;  %v974_v5 = vld [vmem:[%s5725_s29 + $0x1668] sm:$0xff]  ;;  %v5431_v9 = vpack.c.bf16 %v1022_v55, %v1021_v0  ;;  %v1028_v57 = vld [vmem:[%s5725_s29 + $0x1818] sm:$0xff]  ;;  %v1059_v59 = vld [vmem:[%s5725_s29 + $0x1910] sm:$0xff] }
 0x17f   : > { %3178 = vmatprep.mubr.f32.mxu1 %v1403_v17  ;;  %v1006_v10 = vld [vmem:[%s5725_s29 + $0x1768] sm:$0xff]  ;;  %v5401_v20 = vpack.c.bf16 %v974_v5, %v973_v4  ;;  %v1077_v0 = vld [vmem:[%s5725_s29 + $0x19a0] sm:$0xff]  ;;  %v5447_v4 = vpack.c.bf16 %v1046_v42, %v1045_v52 }
 0x180   : > { %5382 = vmatpush3.bf16.msra.mxu0 %v5381_v12  ;;  %v5433_v25 = vpack.c.bf16 %v1006_v10, %v1005_v6  ;;  %v1078_v55 = vld [vmem:[%s5725_s29 + $0x19a8] sm:$0xff]  ;;  %v1029_v5 = vld [vmem:[%s5725_s29 + $0x1820] sm:$0xff]  ;;  %v1047_v10 = vld [vmem:[%s5725_s29 + $0x18b0] sm:$0xff] }
 0x181   : > { %5414 = vmatpush3.bf16.msra.mxu1 %v5413_v18  ;;  %5384 = vmatprep.subr.bf16.mxu0 %v5383_v19  ;;  %v1023_v18 = vld [vmem:[%s5725_s29 + $0x17f0] sm:$0xff]  ;;  %v1024_v19 = vld [vmem:[%s5725_s29 + $0x17f8] sm:$0xff]  ;;  %v1061_v6 = vld [vmem:[%s5725_s29 + $0x1920] sm:$0xff] }
 0x182   : > { %5416 = vmatprep.subr.bf16.mxu1 %v5415_v21  ;;  %v254_v21 = vld [vmem:[%s5720_s25 + $0x60] sm:$0xff] }
 0x183   : > { %v1404_v38 = vcombine.high %v254_v21, %v254_v21  ;;  %v6668_v48 = vrot.slane %v254_v21, %v5778_v14  ;;  %v1064_v21 = vld [vmem:[%s5725_s29 + $0x1938] sm:$0xff] }
 0x184   : > { %5386 = vmatpush3.bf16.msra.mxu0 %v5385_v29  ;;  %v1007_v29 = vld [vmem:[%s5725_s29 + $0x1770] sm:$0xff] }
 0x185   : > { %5418 = vmatpush3.bf16.msra.mxu1 %v5417_v30  ;;  %5388 = vmatprep.subr.bf16.mxu0 %v5387_v31  ;;  %v5435_v31 = vpack.c.bf16 %v1024_v19, %v1023_v18  ;;  %v5437_v40 = vpack.c.bf16 %v1008_v32, %v1007_v29  ;;  %v6673_v63 = vrot.slane %v1404_v38, %v5778_v14  ;;  %v1031_v19 = vld [vmem:[%s5725_s29 + $0x1830] sm:$0xff]  ;;  %v1034_v32 = vld [vmem:[%s5725_s29 + $0x1848] sm:$0xff]  ;;  %v1052_v38 = vld [vmem:[%s5725_s29 + $0x18d8] sm:$0xff] }
 0x186   : > { %5420 = vmatprep.subr.bf16.mxu1 %v5419_v35  ;;  %v1073_v35 = vld [vmem:[%s5725_s29 + $0x1980] sm:$0xff]  ;;  %v1419_v62 = vcombine.high %v6668_v48, %v6668_v48  ;;  %v5451_v18 = vpack.c.bf16 %v1048_v13, %v1047_v10 }
 0x187   : > { %v5471_v45 = vpack.c.bf16 %v1074_v36, %v1073_v35  ;;  %v1066_v35 = vld [vmem:[%s5725_s29 + $0x1948] sm:$0xff]  ;;  %v1051_v36 = vld [vmem:[%s5725_s29 + $0x18d0] sm:$0xff] }
 0x188   : > { %5390 = vmatpush3.bf16.msra.mxu0 %v5389_v53  ;;  %v1025_v53 = vld [vmem:[%s5725_s29 + $0x1800] sm:$0xff] }
 0x189   : > { %5422 = vmatpush3.bf16.msra.mxu1 %v5421_v41  ;;  %5392 = vmatprep.subr.bf16.mxu0 %v5391_v43  ;;  %v1026_v41 = vld [vmem:[%s5725_s29 + $0x1808] sm:$0xff]  ;;  %v1057_v43 = vld [vmem:[%s5725_s29 + $0x1900] sm:$0xff] }
 0x18a   : > { %5424 = vmatprep.subr.bf16.mxu1 %v5423_v37  ;;  %v1044_v37 = vld [vmem:[%s5725_s29 + $0x1898] sm:$0xff]  ;;  %v5441_v54 = vpack.c.bf16 %v1026_v41, %v1025_v53  ;;  %v5489_v53 = vpack.c.bf16 %v1066_v35, %v1065_v34  ;;  %v5459_v41 = vpack.c.bf16 %v1052_v38, %v1051_v36  ;;  %v1107_v34 = vld [vmem:[%s5725_s29 + $0x1a90] sm:$0xff] }
 0x18b   : > { %v1139_v36 = vld [vmem:[%s5725_s29 + $0x1b90] sm:$0xff]  ;;  %v1140_v38 = vld [vmem:[%s5725_s29 + $0x1b98] sm:$0xff] }
 0x18c   : > { %5394 = vmatpush3.bf16.msra.mxu0 %v5393_v39  ;;  %v5473_v39 = vpack.c.bf16 %v1058_v46, %v1057_v43  ;;  %v1035_v43 = vld [vmem:[%s5725_s29 + $0x1850] sm:$0xff] }
 0x18d   : > { %5426 = vmatpush3.bf16.msra.mxu1 %v5425_v33  ;;  %5396 = vmatprep.subr.bf16.mxu0 %v5395_v56  ;;  %v5443_v33 = vpack.c.bf16 %v1044_v37, %v1043_v47  ;;  %v1027_v56 = vld [vmem:[%s5725_s29 + $0x1810] sm:$0xff]  ;;  %v1068_v37 = vld [vmem:[%s5725_s29 + $0x1958] sm:$0xff] }
 0x18e   : > { %v3968_v7 = vpop.f32.mrb[8].mxu0  ;;  %5428 = vmatprep.subr.bf16.mxu1 %v5427_v61  ;;  %v1060_v61 = vld [vmem:[%s5725_s29 + $0x1918] sm:$0xff]  ;;  %v1067_v46 = vld [vmem:[%s5725_s29 + $0x1950] sm:$0xff] }
 0x18f   : > { %v3969_v17 = vpop.f32.mrb[9].mxu0  ;;  %v4003_v12 = vpop.f32.mrb[8].mxu1 }
 0x190   : > { %v3970_v16 = vadd.f32 %v3969_v17, %v3968_v7  ;;  %5398 = vmatpush3.bf16.msra.mxu0 %v5397_v1  ;;  %v4004_v8 = vpop.f32.mrb[9].mxu1  ;;  %v1420_v1 = vcombine.high %v6673_v63, %v6673_v63  ;;  %v5479_v7 = vpack.c.bf16 %v1078_v55, %v1077_v0  ;;  %v1055_v0 = vld [vmem:[%s5725_s29 + $0x18f0] sm:$0xff]  ;;  %v1056_v55 = vld [vmem:[%s5725_s29 + $0x18f8] sm:$0xff] }
 0x191   : > { %v4005_v24 = vadd.f32 %v4004_v8, %v4003_v12  ;;  %5430 = vmatpush3.bf16.msra.mxu1 %v5429_v2  ;;  %5400 = vmatprep.subr.bf16.mxu0 %v5399_v3  ;;  %v5445_v2 = vpack.c.bf16 %v1028_v57, %v1027_v56  ;;  %v5477_v3 = vpack.c.bf16 %v1060_v61, %v1059_v59  ;;  %v1063_v8 = vld [vmem:[%s5725_s29 + $0x1930] sm:$0xff]  ;;  %v1037_v59 = vld [vmem:[%s5725_s29 + $0x1860] sm:$0xff] }
 0x192   : > { %v2131_v30 = vadd.f32 %v3970_v16, %v6579_v51  ;;  %5432 = vmatprep.subr.bf16.mxu1 %v5431_v9  ;;  %v5405_v51 = vpack.c.bf16 %v976_v28, %v975_v22  ;;  %v1062_v9 = vld [vmem:[%s5725_s29 + $0x1928] sm:$0xff]  ;;  %v1032_v16 = vld [vmem:[%s5725_s29 + $0x1838] sm:$0xff]  ;;  %v5485_v29 = vpack.c.bf16 %v1064_v21, %v1063_v8  ;;  %v5493_v56 = vpack.c.bf16 %v1068_v37, %v1067_v46  ;;  %v1069_v61 = vld [vmem:[%s5725_s29 + $0x1960] sm:$0xff] }
 0x193   : > { %v5481_v12 = vpack.c.bf16 %v1062_v9, %v1061_v6  ;;  %v1082_v22 = vld [vmem:[%s5725_s29 + $0x19c8] sm:$0xff]  ;;  %v5453_v28 = vpack.c.bf16 %v1032_v16, %v1031_v19  ;;  %v5463_v57 = vpack.c.bf16 %v1054_v50, %v1053_v49  ;;  %v5467_v13 = vpack.c.bf16 %v1056_v55, %v1055_v0  ;;  %v1072_v19 = vld [vmem:[%s5725_s29 + $0x1978] sm:$0xff]  ;;  %v1105_v16 = vld [vmem:[%s5725_s29 + $0x1a80] sm:$0xff] }
 0x194   : > { %v6659_v44 = vadd.f32 %v4005_v24, %v2131_v30  ;;  %5402 = vmatpush3.bf16.msra.mxu0 %v5401_v20  ;;  %v1049_v24 = vld [vmem:[%s5725_s29 + $0x18c0] sm:$0xff]  ;;  %v1106_v8 = vld [vmem:[%s5725_s29 + $0x1a88] sm:$0xff]  ;;  %v5539_v46 = vpack.c.bf16 %v1140_v38, %v1139_v36  ;;  %v1144_v0 = vld [vmem:[%s5725_s29 + $0x1bb8] sm:$0xff] }
 0x195   : > { %5434 = vmatpush3.bf16.msra.mxu1 %v5433_v25  ;;  %5404 = vmatprep.subr.bf16.mxu0 %v5403_v27  ;;  %v1050_v25 = vld [vmem:[%s5725_s29 + $0x18c8] sm:$0xff]  ;;  %v1081_v27 = vld [vmem:[%s5725_s29 + $0x19c0] sm:$0xff] }
 0x196   : > { %5436 = vmatprep.subr.bf16.mxu1 %v5435_v31  ;;  %v5455_v30 = vpack.c.bf16 %v1050_v25, %v1049_v24  ;;  %v1033_v31 = vld [vmem:[%s5725_s29 + $0x1840] sm:$0xff]  ;;  %v5487_v23 = vpack.c.bf16 %v1082_v22, %v1081_v27  ;;  %v1138_v21 = vld [vmem:[%s5725_s29 + $0x1b88] sm:$0xff]  ;;  %v5503_v22 = vpack.c.bf16 %v1106_v8, %v1105_v16 }
 0x197   : > { %v1109_v37 = vld [vmem:[%s5725_s29 + $0x1aa0] sm:$0xff]  ;;  %v1130_v8 = vld [vmem:[%s5725_s29 + $0x1b48] sm:$0xff] }
 0x198   : > { %5406 = vmatpush3.bf16.msra.mxu0 %v5405_v51  ;;  %v1083_v51 = vld [vmem:[%s5725_s29 + $0x19d0] sm:$0xff]  ;;  %v1141_v50 = vld [vmem:[%s5725_s29 + $0x1ba0] sm:$0xff]  ;;  %v1118_v36 = vld [vmem:[%s5725_s29 + $0x1ae8] sm:$0xff] }
 0x199   : > { %5438 = vmatpush3.bf16.msra.mxu1 %v5437_v40  ;;  %5440 = vmatprep.subr.bf16.mxu0 %v5439_v26  ;;  %v1084_v40 = vld [vmem:[%s5725_s29 + $0x19d8] sm:$0xff]  ;;  %v5457_v26 = vpack.c.bf16 %v1034_v32, %v1033_v31  ;;  %v1122_v32 = vld [vmem:[%s5725_s29 + $0x1b08] sm:$0xff]  ;;  %v1149_v38 = vld [vmem:[%s5725_s29 + $0x1be0] sm:$0xff] }
 0x19a   : > { %5472 = vmatprep.subr.bf16.mxu1 %v5471_v45  ;;  %v1036_v45 = vld [vmem:[%s5725_s29 + $0x1858] sm:$0xff]  ;;  %v5491_v47 = vpack.c.bf16 %v1084_v40, %v1083_v51 }
 0x19b   : > { %3109 = vmatmul.mubr.f32.vlgmr.msra.gmra.mrb[22].mxu0 %v6588_v58  ;;  %v1030_v58 = vld [vmem:[%s5725_s29 + $0x1828] sm:$0xff] }
 0x19c   : > { %5442 = vmatpush3.bf16.msra.mxu0 %v5441_v54  ;;  %3179 = vmatmul.mubr.f32.vlgmr.msra.gmra.mrb[22].mxu1 %v6593_v11  ;;  %v1079_v11 = vld [vmem:[%s5725_s29 + $0x19b0] sm:$0xff]  ;;  %v5449_v17 = vpack.c.bf16 %v1030_v58, %v1029_v5  ;;  %v1085_v54 = vld [vmem:[%s5725_s29 + $0x19e0] sm:$0xff] }
 0x19d   : > { %5474 = vmatpush3.bf16.msra.mxu1 %v5473_v39  ;;  %5444 = vmatprep.subr.bf16.mxu0 %v5443_v33  ;;  %v5483_v20 = vpack.c.bf16 %v1080_v15, %v1079_v11  ;;  %v1086_v39 = vld [vmem:[%s5725_s29 + $0x19e8] sm:$0xff]  ;;  %v5461_v33 = vpack.c.bf16 %v1036_v45, %v1035_v43  ;;  %v1039_v11 = vld [vmem:[%s5725_s29 + $0x1870] sm:$0xff]  ;;  %v1040_v15 = vld [vmem:[%s5725_s29 + $0x1878] sm:$0xff] }
 0x19e   : > { %5476 = vmatprep.subr.bf16.mxu1 %v5475_v60  ;;  %3248 = vmatprep.mubr.f32.mxu0 %v1419_v62  ;;  %v1038_v60 = vld [vmem:[%s5725_s29 + $0x1868] sm:$0xff]  ;;  %v5495_v42 = vpack.c.bf16 %v1086_v39, %v1085_v54  ;;  %v1092_v43 = vld [vmem:[%s5725_s29 + $0x1a18] sm:$0xff]  ;;  %v1123_v45 = vld [vmem:[%s5725_s29 + $0x1b10] sm:$0xff] }
 0x19f   : > { %3318 = vmatprep.mubr.f32.mxu1 %v1420_v1  ;;  %v1070_v62 = vld [vmem:[%s5725_s29 + $0x1968] sm:$0xff]  ;;  %v5465_v6 = vpack.c.bf16 %v1038_v60, %v1037_v59  ;;  %v1093_v59 = vld [vmem:[%s5725_s29 + $0x1a20] sm:$0xff] }
 0x1a0   : > { %5446 = vmatpush3.bf16.msra.mxu0 %v5445_v2  ;;  %v5497_v10 = vpack.c.bf16 %v1070_v62, %v1069_v61  ;;  %v1142_v54 = vld [vmem:[%s5725_s29 + $0x1ba8] sm:$0xff]  ;;  %v1125_v60 = vld [vmem:[%s5725_s29 + $0x1b20] sm:$0xff]  ;;  %v1112_v62 = vld [vmem:[%s5725_s29 + $0x1ab8] sm:$0xff] }
 0x1a1   : > { %5478 = vmatpush3.bf16.msra.mxu1 %v5477_v3  ;;  %5448 = vmatprep.subr.bf16.mxu0 %v5447_v4  ;;  %v1087_v3 = vld [vmem:[%s5725_s29 + $0x19f0] sm:$0xff]  ;;  %v1088_v4 = vld [vmem:[%s5725_s29 + $0x19f8] sm:$0xff]  ;;  %v5543_v61 = vpack.c.bf16 %v1142_v54, %v1141_v50 }
 0x1a2   : > { %5480 = vmatprep.subr.bf16.mxu1 %v5479_v7  ;;  %v255_v7 = vld [vmem:[%s5720_s25 + $0x68] sm:$0xff]  ;;  %v1120_v50 = vld [vmem:[%s5725_s29 + $0x1af8] sm:$0xff] }
 0x1a3   : > { %v1421_v24 = vcombine.high %v255_v7, %v255_v7  ;;  %v6748_v35 = vrot.slane %v255_v7, %v5778_v14  ;;  %v1113_v7 = vld [vmem:[%s5725_s29 + $0x1ac0] sm:$0xff] }
 0x1a4   : > { %5450 = vmatpush3.bf16.msra.mxu0 %v5449_v17  ;;  %v1071_v17 = vld [vmem:[%s5725_s29 + $0x1970] sm:$0xff] }
 0x1a5   : > { %5482 = vmatpush3.bf16.msra.mxu1 %v5481_v12  ;;  %5452 = vmatprep.subr.bf16.mxu0 %v5451_v18  ;;  %v5499_v18 = vpack.c.bf16 %v1088_v4, %v1087_v3  ;;  %v5501_v27 = vpack.c.bf16 %v1072_v19, %v1071_v17  ;;  %v6753_v51 = vrot.slane %v1421_v24, %v5778_v14  ;;  %v1110_v14 = vld [vmem:[%s5725_s29 + $0x1aa8] sm:$0xff]  ;;  %v1095_v3 = vld [vmem:[%s5725_s29 + $0x1a30] sm:$0xff]  ;;  %v1096_v4 = vld [vmem:[%s5725_s29 + $0x1a38] sm:$0xff] }
 0x1a6   : > { %5484 = vmatprep.subr.bf16.mxu1 %v5483_v20  ;;  %v1137_v20 = vld [vmem:[%s5725_s29 + $0x1b80] sm:$0xff]  ;;  %v1436_v49 = vcombine.high %v6748_v35, %v6748_v35  ;;  %v1147_v24 = vld [vmem:[%s5725_s29 + $0x1bd0] sm:$0xff] }
 0x1a7   : > { %v5535_v31 = vpack.c.bf16 %v1138_v21, %v1137_v20  ;;  %v1437_v39 = vcombine.high %v6753_v51, %v6753_v51  ;;  %v1129_v19 = vld [vmem:[%s5725_s29 + $0x1b40] sm:$0xff]  ;;  %v1115_v20 = vld [vmem:[%s5725_s29 + $0x1ad0] sm:$0xff]  ;;  %v1116_v21 = vld [vmem:[%s5725_s29 + $0x1ad8] sm:$0xff] }
 0x1a8   : > { %5454 = vmatpush3.bf16.msra.mxu0 %v5453_v28  ;;  %v1089_v28 = vld [vmem:[%s5725_s29 + $0x1a00] sm:$0xff] }
 0x1a9   : > { %5486 = vmatpush3.bf16.msra.mxu1 %v5485_v29  ;;  %5456 = vmatprep.subr.bf16.mxu0 %v5455_v30  ;;  %v1090_v29 = vld [vmem:[%s5725_s29 + $0x1a08] sm:$0xff]  ;;  %v1121_v30 = vld [vmem:[%s5725_s29 + $0x1b00] sm:$0xff] }
 0x1aa   : > { %5488 = vmatprep.subr.bf16.mxu1 %v5487_v23  ;;  %v1108_v23 = vld [vmem:[%s5725_s29 + $0x1a98] sm:$0xff]  ;;  %v5505_v40 = vpack.c.bf16 %v1090_v29, %v1089_v28  ;;  %v5523_v28 = vpack.c.bf16 %v1116_v21, %v1115_v20  ;;  %v1099_v29 = vld [vmem:[%s5725_s29 + $0x1a50] sm:$0xff]  ;;  %v1157_v21 = vld [vmem:[%s5725_s29 + $0x1c20] sm:$0xff] }
 0x1ac   : > { %5458 = vmatpush3.bf16.msra.mxu0 %v5457_v26  ;;  %v5537_v26 = vpack.c.bf16 %v1122_v32, %v1121_v30  ;;  %v1100_v30 = vld [vmem:[%s5725_s29 + $0x1a58] sm:$0xff] }
 0x1ad   : > { %5490 = vmatpush3.bf16.msra.mxu1 %v5489_v53  ;;  %5460 = vmatprep.subr.bf16.mxu0 %v5459_v41  ;;  %v5507_v53 = vpack.c.bf16 %v1108_v23, %v1107_v34  ;;  %v1091_v41 = vld [vmem:[%s5725_s29 + $0x1a10] sm:$0xff]  ;;  %v1132_v34 = vld [vmem:[%s5725_s29 + $0x1b58] sm:$0xff]  ;;  %v1117_v23 = vld [vmem:[%s5725_s29 + $0x1ae0] sm:$0xff] }
 0x1ae   : > { %v4038_v52 = vpop.f32.mrb[10].mxu0  ;;  %5492 = vmatprep.subr.bf16.mxu1 %v5491_v47  ;;  %v1124_v47 = vld [vmem:[%s5725_s29 + $0x1b18] sm:$0xff] }
 0x1af   : > { %v4039_v1 = vpop.f32.mrb[11].mxu0  ;;  %v4073_v2 = vpop.f32.mrb[10].mxu1 }
 0x1b0   : > { %v4040_v5 = vadd.f32 %v4039_v1, %v4038_v52  ;;  %5462 = vmatpush3.bf16.msra.mxu0 %v5461_v33  ;;  %v4074_v58 = vpop.f32.mrb[11].mxu1  ;;  %v5509_v33 = vpack.c.bf16 %v1092_v43, %v1091_v41  ;;  %v1126_v52 = vld [vmem:[%s5725_s29 + $0x1b28] sm:$0xff]  ;;  %v5527_v41 = vpack.c.bf16 %v1118_v36, %v1117_v23  ;;  %v1101_v43 = vld [vmem:[%s5725_s29 + $0x1a60] sm:$0xff]  ;;  %v1179_v36 = vld [vmem:[%s5725_s29 + $0x1cd0] sm:$0xff] }
 0x1b1   : > { %v4075_v9 = vadd.f32 %v4074_v58, %v4073_v2  ;;  %5494 = vmatpush3.bf16.msra.mxu1 %v5493_v56  ;;  %5464 = vmatprep.subr.bf16.mxu0 %v5463_v57  ;;  %v5541_v56 = vpack.c.bf16 %v1124_v47, %v1123_v45  ;;  %v5511_v57 = vpack.c.bf16 %v1110_v14, %v1109_v37  ;;  %v1102_v45 = vld [vmem:[%s5725_s29 + $0x1a68] sm:$0xff] }
 0x1b2   : > { %v2271_v12 = vadd.f32 %v4040_v5, %v6659_v44  ;;  %5496 = vmatprep.subr.bf16.mxu1 %v5495_v42  ;;  %v5469_v44 = vpack.c.bf16 %v1040_v15, %v1039_v11  ;;  %v1111_v42 = vld [vmem:[%s5725_s29 + $0x1ab0] sm:$0xff]  ;;  %v5545_v1 = vpack.c.bf16 %v1126_v52, %v1125_v60  ;;  %v5517_v11 = vpack.c.bf16 %v1096_v4, %v1095_v3  ;;  %v1134_v14 = vld [vmem:[%s5725_s29 + $0x1b68] sm:$0xff] }
 0x1b3   : > { %v5515_v2 = vpack.c.bf16 %v1112_v62, %v1111_v42  ;;  %v1127_v5 = vld [vmem:[%s5725_s29 + $0x1b30] sm:$0xff]  ;;  %v1104_v62 = vld [vmem:[%s5725_s29 + $0x1a78] sm:$0xff]  ;;  %v1170_v3 = vld [vmem:[%s5725_s29 + $0x1c88] sm:$0xff] }
 0x1b4   : > { %v6739_v25 = vadd.f32 %v4075_v9, %v2271_v12  ;;  %5466 = vmatpush3.bf16.msra.mxu0 %v5465_v6  ;;  %v1128_v6 = vld [vmem:[%s5725_s29 + $0x1b38] sm:$0xff]  ;;  %v1114_v9 = vld [vmem:[%s5725_s29 + $0x1ac8] sm:$0xff]  ;;  %v1097_v12 = vld [vmem:[%s5725_s29 + $0x1a40] sm:$0xff] }
 0x1b5   : > { %5498 = vmatpush3.bf16.msra.mxu1 %v5497_v10  ;;  %5468 = vmatprep.subr.bf16.mxu0 %v5467_v13  ;;  %v1145_v10 = vld [vmem:[%s5725_s29 + $0x1bc0] sm:$0xff]  ;;  %v1146_v13 = vld [vmem:[%s5725_s29 + $0x1bc8] sm:$0xff]  ;;  %v5549_v15 = vpack.c.bf16 %v1128_v6, %v1127_v5  ;;  %v5519_v17 = vpack.c.bf16 %v1114_v9, %v1113_v7  ;;  %v1103_v42 = vld [vmem:[%s5725_s29 + $0x1a70] sm:$0xff] }
 0x1b6   : > { %5500 = vmatprep.subr.bf16.mxu1 %v5499_v18  ;;  %v1098_v18 = vld [vmem:[%s5725_s29 + $0x1a48] sm:$0xff]  ;;  %v5551_v16 = vpack.c.bf16 %v1146_v13, %v1145_v10  ;;  %v5533_v5 = vpack.c.bf16 %v1104_v62, %v1103_v42  ;;  %v1171_v9 = vld [vmem:[%s5725_s29 + $0x1c90] sm:$0xff]  ;;  %v1172_v10 = vld [vmem:[%s5725_s29 + $0x1c98] sm:$0xff] }
 0x1b7   : > { %v1154_v7 = vld [vmem:[%s5725_s29 + $0x1c08] sm:$0xff]  ;;  %v6823_v13 = vld.sshfl [vmem:[%s5720_s25 + $0x70] sm:$0x33 pattern:$0x76325410] }
 0x1b8   : > { %5470 = vmatpush3.bf16.msra.mxu0 %v5469_v44  ;;  %v1148_v44 = vld [vmem:[%s5725_s29 + $0x1bd8] sm:$0xff]  ;;  %v1162_v23 = vld [vmem:[%s5725_s29 + $0x1c48] sm:$0xff] }
 0x1b9   : > { %5502 = vmatpush3.bf16.msra.mxu1 %v5501_v27  ;;  %5504 = vmatprep.subr.bf16.mxu0 %v5503_v22  ;;  %v5521_v27 = vpack.c.bf16 %v1098_v18, %v1097_v12  ;;  %v5553_v22 = vpack.c.bf16 %v1130_v8, %v1129_v19  ;;  %v5555_v32 = vpack.c.bf16 %v1148_v44, %v1147_v24  ;;  %v1156_v12 = vld [vmem:[%s5725_s29 + $0x1c18] sm:$0xff]  ;;  %v1173_v19 = vld [vmem:[%s5725_s29 + $0x1ca0] sm:$0xff]  ;;  %v1158_v24 = vld [vmem:[%s5725_s29 + $0x1c28] sm:$0xff] }
 0x1ba   : > { %5536 = vmatprep.subr.bf16.mxu1 %v5535_v31  ;;  %v1131_v31 = vld [vmem:[%s5725_s29 + $0x1b50] sm:$0xff]  ;;  %v1445_v18 = vcombine.high %v6823_v13, %v6823_v13 }
 0x1bb   : > { %3249 = vmatmul.mubr.f32.vlgmr.msra.gmra.mrb[24].mxu0 %v6668_v48  ;;  %v1094_v48 = vld [vmem:[%s5725_s29 + $0x1a28] sm:$0xff]  ;;  %v1175_v44 = vld [vmem:[%s5725_s29 + $0x1cb0] sm:$0xff] }
 0x1bc   : > { %5506 = vmatpush3.bf16.msra.mxu0 %v5505_v40  ;;  %3319 = vmatmul.mubr.f32.vlgmr.msra.gmra.mrb[24].mxu1 %v6673_v63  ;;  %v1143_v63 = vld [vmem:[%s5725_s29 + $0x1bb0] sm:$0xff]  ;;  %v5513_v55 = vpack.c.bf16 %v1094_v48, %v1093_v59  ;;  %v1150_v40 = vld [vmem:[%s5725_s29 + $0x1be8] sm:$0xff]  ;;  %v5529_v48 = vpack.c.bf16 %v1102_v45, %v1101_v43  ;;  %v1181_v43 = vld [vmem:[%s5725_s29 + $0x1ce0] sm:$0xff] }
 0x1bd   : > { %5538 = vmatpush3.bf16.msra.mxu1 %v5537_v26  ;;  %5508 = vmatprep.subr.bf16.mxu0 %v5507_v53  ;;  %v5547_v58 = vpack.c.bf16 %v1144_v0, %v1143_v63  ;;  %v5525_v26 = vpack.c.bf16 %v1100_v30, %v1099_v29  ;;  %v5557_v53 = vpack.c.bf16 %v1132_v34, %v1131_v31  ;;  %v1135_v63 = vld [vmem:[%s5725_s29 + $0x1b70] sm:$0xff]  ;;  %v1177_v29 = vld [vmem:[%s5725_s29 + $0x1cc0] sm:$0xff]  ;;  %v1178_v30 = vld [vmem:[%s5725_s29 + $0x1cc8] sm:$0xff] }
 0x1be   : > { %5540 = vmatprep.subr.bf16.mxu1 %v5539_v46  ;;  %3388 = vmatprep.mubr.f32.mxu0 %v1436_v49  ;;  %v1133_v46 = vld [vmem:[%s5725_s29 + $0x1b60] sm:$0xff]  ;;  %v5559_v37 = vpack.c.bf16 %v1150_v40, %v1149_v38  ;;  %v1119_v49 = vld [vmem:[%s5725_s29 + $0x1af0] sm:$0xff]  ;;  %v1180_v38 = vld [vmem:[%s5725_s29 + $0x1cd8] sm:$0xff] }
 0x1bf   : > { %3458 = vmatprep.mubr.f32.mxu1 %v1437_v39  ;;  %v5531_v52 = vpack.c.bf16 %v1120_v50, %v1119_v49  ;;  %v1161_v34 = vld [vmem:[%s5725_s29 + $0x1c40] sm:$0xff]  ;;  %v1182_v45 = vld [vmem:[%s5725_s29 + $0x1ce8] sm:$0xff]  ;;  %v1183_v50 = vld [vmem:[%s5725_s29 + $0x1cf0] sm:$0xff] }
 0x1c0   : > { %5510 = vmatpush3.bf16.msra.mxu0 %v5509_v33  ;;  %v1151_v33 = vld [vmem:[%s5725_s29 + $0x1bf0] sm:$0xff]  ;;  %v5585_v40 = vpack.c.bf16 %v1162_v23, %v1161_v34 }
 0x1c1   : > { %5542 = vmatpush3.bf16.msra.mxu1 %v5541_v56  ;;  %5512 = vmatprep.subr.bf16.mxu0 %v5511_v57  ;;  %v1152_v56 = vld [vmem:[%s5725_s29 + $0x1bf8] sm:$0xff] }
 0x1c2   : > { %5544 = vmatprep.subr.bf16.mxu1 %v5543_v61  ;;  %v5561_v61 = vpack.c.bf16 %v1134_v14, %v1133_v46  ;;  %v1166_v14 = vld [vmem:[%s5725_s29 + $0x1c68] sm:$0xff] }
 0x1c4   : > { %5514 = vmatpush3.bf16.msra.mxu0 %v5513_v55  ;;  %v5563_v55 = vpack.c.bf16 %v1152_v56, %v1151_v33 }
 0x1c5   : > { %5546 = vmatpush3.bf16.msra.mxu1 %v5545_v1  ;;  %5516 = vmatprep.subr.bf16.mxu0 %v5515_v2  ;;  %v1136_v1 = vld [vmem:[%s5725_s29 + $0x1b78] sm:$0xff]  ;;  %v1169_v2 = vld [vmem:[%s5725_s29 + $0x1c80] sm:$0xff] }
 0x1c6   : > { %5548 = vmatprep.subr.bf16.mxu1 %v5547_v58  ;;  %v5565_v58 = vpack.c.bf16 %v1136_v1, %v1135_v63  ;;  %v5567_v6 = vpack.c.bf16 %v1170_v3, %v1169_v2 }
 0x1c8   : > { %5518 = vmatpush3.bf16.msra.mxu0 %v5517_v11 }
 0x1c9   : > { %5550 = vmatpush3.bf16.msra.mxu1 %v5549_v15  ;;  %5520 = vmatprep.subr.bf16.mxu0 %v5519_v17  ;;  %v5571_v15 = vpack.c.bf16 %v1172_v10, %v1171_v9  ;;  %v1155_v17 = vld [vmem:[%s5725_s29 + $0x1c10] sm:$0xff] }
 0x1ca   : > { %5552 = vmatprep.subr.bf16.mxu1 %v5551_v16  ;;  %v1174_v16 = vld [vmem:[%s5725_s29 + $0x1ca8] sm:$0xff]  ;;  %v5573_v8 = vpack.c.bf16 %v1156_v12, %v1155_v17 }
 0x1cb   : > { %v5575_v20 = vpack.c.bf16 %v1174_v16, %v1173_v19 }
 0x1cc   : > { %5522 = vmatpush3.bf16.msra.mxu0 %v5521_v27  ;;  %v1176_v27 = vld [vmem:[%s5725_s29 + $0x1cb8] sm:$0xff] }
 0x1cd   : > { %5554 = vmatpush3.bf16.msra.mxu1 %v5553_v22  ;;  %5524 = vmatprep.subr.bf16.mxu0 %v5523_v28  ;;  %v5579_v22 = vpack.c.bf16 %v1176_v27, %v1175_v44  ;;  %v1159_v28 = vld [vmem:[%s5725_s29 + $0x1c30] sm:$0xff] }
 0x1ce   : > { %v4108_v47 = vpop.f32.mrb[12].mxu0  ;;  %5556 = vmatprep.subr.bf16.mxu1 %v5555_v32  ;;  %v5583_v32 = vpack.c.bf16 %v1178_v30, %v1177_v29 }
 0x1cf   : > { %v4109_v54 = vpop.f32.mrb[13].mxu0  ;;  %v4143_v39 = vpop.f32.mrb[12].mxu1 }
 0x1d0   : > { %v4110_v57 = vadd.f32 %v4109_v54, %v4108_v47  ;;  %5526 = vmatpush3.bf16.msra.mxu0 %v5525_v26  ;;  %v4144_v59 = vpop.f32.mrb[13].mxu1  ;;  %v5587_v26 = vpack.c.bf16 %v1180_v38, %v1179_v36  ;;  %v5591_v47 = vpack.c.bf16 %v1182_v45, %v1181_v43  ;;  %v1184_v54 = vld [vmem:[%s5725_s29 + $0x1cf8] sm:$0xff] }
 0x1d1   : > { %v4145_v60 = vadd.f32 %v4144_v59, %v4143_v39  ;;  %5558 = vmatpush3.bf16.msra.mxu1 %v5557_v53  ;;  %5528 = vmatprep.subr.bf16.mxu0 %v5527_v41  ;;  %v1163_v53 = vld [vmem:[%s5725_s29 + $0x1c50] sm:$0xff]  ;;  %v1164_v41 = vld [vmem:[%s5725_s29 + $0x1c58] sm:$0xff] }
 0x1d2   : > { %v2411_v0 = vadd.f32 %v4110_v57, %v6739_v25  ;;  %5560 = vmatprep.subr.bf16.mxu1 %v5559_v37  ;;  %v1153_v25 = vld [vmem:[%s5725_s29 + $0x1c00] sm:$0xff]  ;;  %v5589_v46 = vpack.c.bf16 %v1164_v41, %v1163_v53 }
 0x1d3   : > { %v5569_v11 = vpack.c.bf16 %v1154_v7, %v1153_v25  ;;  %v1165_v37 = vld [vmem:[%s5725_s29 + $0x1c60] sm:$0xff] }
 0x1d4   : > { %v6816_v4 = vadd.f32 %v4145_v60, %v2411_v0  ;;  %5530 = vmatpush3.bf16.msra.mxu0 %v5529_v48  ;;  %v5593_v59 = vpack.c.bf16 %v1166_v14, %v1165_v37  ;;  %v5595_v60 = vpack.c.bf16 %v1184_v54, %v1183_v50  ;;  %v241_v54 = vld [vmem:[#allocation2] sm:$0x3] }
 0x1d5   : > { %5562 = vmatpush3.bf16.msra.mxu1 %v5561_v61  ;;  %5532 = vmatprep.subr.bf16.mxu0 %v5531_v52  ;;  %v1167_v61 = vld [vmem:[%s5725_s29 + $0x1c70] sm:$0xff]  ;;  %v1168_v52 = vld [vmem:[%s5725_s29 + $0x1c78] sm:$0xff] }
 0x1d6   : > { %5564 = vmatprep.subr.bf16.mxu1 %v5563_v55  ;;  %v5597_v63 = vpack.c.bf16 %v1168_v52, %v1167_v61 }
 0x1d8   : > { %5534 = vmatpush3.bf16.msra.mxu0 %v5533_v5 }
 0x1d9   : > { %5566 = vmatpush3.bf16.msra.mxu1 %v5565_v58  ;;  %5568 = vmatprep.subr.bf16.mxu0 %v5567_v6 }
 0x1db   : > { %3389 = vmatmul.mubr.f32.vlgmr.msra.gmra.mrb[26].mxu0 %v6748_v35  ;;  %v5577_v35 = vpack.c.bf16 %v1158_v24, %v1157_v21 }
 0x1dc   : > { %5570 = vmatpush3.bf16.msra.mxu0 %v5569_v11  ;;  %3459 = vmatmul.mubr.f32.vlgmr.msra.gmra.mrb[26].mxu1 %v6753_v51  ;;  %v1160_v51 = vld [vmem:[%s5725_s29 + $0x1c38] sm:$0xff] }
 0x1dd   : > { %5572 = vmatprep.subr.bf16.mxu0 %v5571_v15  ;;  %3528 = vmatprep.mubr.f32.mxu0 %v1445_v18  ;;  %v5581_v31 = vpack.c.bf16 %v1160_v51, %v1159_v28 }
 0x1e0   : > { %5574 = vmatpush3.bf16.msra.mxu0 %v5573_v8 }
 0x1e1   : > { %5576 = vmatprep.subr.bf16.mxu0 %v5575_v20 }
 0x1e4   : > { %5578 = vmatpush3.bf16.msra.mxu0 %v5577_v35 }
 0x1e5   : > { %5580 = vmatprep.subr.bf16.mxu0 %v5579_v22 }
 0x1e8   : > { %5582 = vmatpush3.bf16.msra.mxu0 %v5581_v31 }
 0x1e9   : > { %5584 = vmatprep.subr.bf16.mxu0 %v5583_v32 }
 0x1ec   : > { %5586 = vmatpush3.bf16.msra.mxu0 %v5585_v40 }
 0x1ed   : > { %5588 = vmatprep.subr.bf16.mxu0 %v5587_v26 }
 0x1ee   : > { %v4178_v49 = vpop.f32.mrb[14].mxu0 }
 0x1ef   : > { %v4179_v39 = vpop.f32.mrb[15].mxu0  ;;  %v4213_v33 = vpop.f32.mrb[14].mxu1 }
 0x1f0   : > { %v4180_v56 = vadd.f32 %v4179_v39, %v4178_v49  ;;  %5590 = vmatpush3.bf16.msra.mxu0 %v5589_v46  ;;  %v4214_v57 = vpop.f32.mrb[15].mxu1 }
 0x1f1   : > { %v4215_v48 = vadd.f32 %v4214_v57, %v4213_v33  ;;  %5592 = vmatprep.subr.bf16.mxu0 %v5591_v47  ;;  %v3649_v57 = vld [vmem:[%s6899_s2] ss:$0 sm:$0xff] (!%p3648_p6) }
 0x1f2   : > { %v2551_v42 = vadd.f32 %v4180_v56, %v6816_v4 }
 0x1f4   : > { %v2621_v62 = vadd.f32 %v4215_v48, %v2551_v42  ;;  %5594 = vmatpush3.bf16.msra.mxu0 %v5593_v59 }
 0x1f5   : > { %5596 = vmatprep.subr.bf16.mxu0 %v5595_v60 }
 0x1f8   : > { %5598 = vmatpush3.bf16.msra.mxu0 %v5597_v63 }
 0x1fb   : > { %3529 = vmatmul.mubr.f32.vlgmr.msra.gmra.mrb[28].mxu0 %v6823_v13 }
 0x20e   : > { %v4248_v0 = vpop.f32.mrb[16].mxu0 }
 0x20f   : > { %v4249_v55 = vpop.f32.mrb[17].mxu0  ;;  %v4283_v1 = vpop.f32.mrb[16].mxu1 }
 0x210   : > { %v4250_v2 = vadd.f32 %v4249_v55, %v4248_v0  ;;  %v4284_v3 = vpop.f32.mrb[17].mxu1 }
 0x211   : > { %v4285_v5 = vadd.f32 %v4284_v3, %v4283_v1 }
 0x212   : > { %v2691_v58 = vadd.f32 %v4250_v2, %v2621_v62  ;;  %v3650_v2 = vld [vmem:[%s6900_s3] ss:$0 sm:$0xff] (!%p3648_p6) }
 0x214   : > { %v2761_v6 = vadd.f32 %v4285_v5, %v2691_v58  ;;  %v3651_v5 = vld [vmem:[%s6901_s4] ss:$0 sm:$0xff] (!%p3648_p6) }
 0x22e   : > { %v4318_v25 = vpop.f32.mrb[18].mxu0 }
 0x22f   : > { %v4319_v7 = vpop.f32.mrb[19].mxu0  ;;  %v4353_v9 = vpop.f32.mrb[18].mxu1 }
 0x230   : > { %v4320_v10 = vadd.f32 %v4319_v7, %v4318_v25  ;;  %v4354_v4 = vpop.f32.mrb[19].mxu1 }
 0x231   : > { %v4355_v11 = vadd.f32 %v4354_v4, %v4353_v9 }
 0x232   : > { %v2831_v15 = vadd.f32 %v4320_v10, %v2761_v6 }
 0x234   : > { %v2901_v17 = vadd.f32 %v4355_v11, %v2831_v15 }
 0x24e   : > { %v4388_v12 = vpop.f32.mrb[20].mxu0 }
 0x24f   : > { %v4389_v18 = vpop.f32.mrb[21].mxu0  ;;  %v4423_v19 = vpop.f32.mrb[20].mxu1 }
 0x250   : > { %v4390_v13 = vadd.f32 %v4389_v18, %v4388_v12  ;;  %v4424_v16 = vpop.f32.mrb[21].mxu1 }
 0x251   : > { %v4425_v8 = vadd.f32 %v4424_v16, %v4423_v19 }
 0x252   : > { %v2971_v20 = vadd.f32 %v4390_v13, %v2901_v17 }
 0x254   : > { %v3041_v21 = vadd.f32 %v4425_v8, %v2971_v20 }
 0x26e   : > { %v4458_v24 = vpop.f32.mrb[22].mxu0 }
 0x26f   : > { %v4459_v44 = vpop.f32.mrb[23].mxu0  ;;  %v4493_v27 = vpop.f32.mrb[22].mxu1 }
 0x270   : > { %v4460_v35 = vadd.f32 %v4459_v44, %v4458_v24  ;;  %v4494_v22 = vpop.f32.mrb[23].mxu1 }
 0x271   : > { %v4495_v28 = vadd.f32 %v4494_v22, %v4493_v27 }
 0x272   : > { %v3111_v51 = vadd.f32 %v4460_v35, %v3041_v21 }
 0x274   : > { %v3181_v29 = vadd.f32 %v4495_v28, %v3111_v51 }
 0x28e   : > { %v4528_v30 = vpop.f32.mrb[24].mxu0 }
 0x28f   : > { %v4529_v31 = vpop.f32.mrb[25].mxu0  ;;  %v4563_v32 = vpop.f32.mrb[24].mxu1 }
 0x290   : > { %v4530_v34 = vadd.f32 %v4529_v31, %v4528_v30  ;;  %v4564_v23 = vpop.f32.mrb[25].mxu1 }
 0x291   : > { %v4565_v36 = vadd.f32 %v4564_v23, %v4563_v32 }
 0x292   : > { %v3251_v38 = vadd.f32 %v4530_v34, %v3181_v29 }
 0x294   : > { %v3321_v40 = vadd.f32 %v4565_v36, %v3251_v38 }
 0x2ae   : > { %v4598_v26 = vpop.f32.mrb[26].mxu0 }
 0x2af   : > { %v4599_v53 = vpop.f32.mrb[27].mxu0  ;;  %v4633_v41 = vpop.f32.mrb[26].mxu1 }
 0x2b0   : > { %v4600_v43 = vadd.f32 %v4599_v53, %v4598_v26  ;;  %v4634_v45 = vpop.f32.mrb[27].mxu1 }
 0x2b1   : > { %v4635_v46 = vadd.f32 %v4634_v45, %v4633_v41 }
 0x2b2   : > { %v3391_v47 = vadd.f32 %v4600_v43, %v3321_v40 }
 0x2b4   : > { %v3461_v37 = vadd.f32 %v4635_v46, %v3391_v47 }
 0x2ce   : > { %v4668_v14 = vpop.f32.mrb[28].mxu0 }
 0x2cf   : > { %v4669_v49 = vpop.f32.mrb[29].mxu0 }
 0x2d0   : > { %v4670_v50 = vadd.f32 %v4669_v49, %v4668_v14  ;;  %3540 = sbr.rel (%p3648_p6) target bundleno = 1061 (0x425), region = 48 }
 0x2d2   : > { %v3531_v39 = vadd.f32 %v4670_v50, %v3461_v37 }
 0x2d4   : > { %v3534_v33 = vadd.f32 %v3531_v39, %v241_v54 }
 0x2d6   : > { %3536 = vst.msk [vmem:[#allocation2] sm:$0x3] %vm3535_vm1, %v3534_v33 }
 0x2dd   : > { %v3541_v56 = vld [vmem:[#allocation2] sm:$0x3] }
 0x2de   : > { %v3549_v59 = vadd.f32 %v3649_v57, %v3541_v56 }
 0x2e0   : > { %v3550_v48 = vsel %vm3535_vm1, %v3549_v59, 0.0 }
 0x2e1   : > { %3551 = vadd.xlane.f32.xlu0 %v3550_v48 }
 0x36e   : > { %v3552_v60 = vpop.xlane.xlu0 %3551 }
 0x36f   : > { %v3554_v61 = vmul.f32 0.03125, %v3552_v60 }
 0x371   : > { %v3555_v52 = vsub.f32 %v3549_v59, %v3554_v61 }
 0x373   : > { %v3556_v42 = vmul.f32 %v3555_v52, %v3555_v52 }
 0x375   : > { %v3557_v62 = vsel %vm3535_vm1, %v3556_v42, 0.0 }
 0x376   : > { %3558 = vadd.xlane.f32.xlu0 %v3557_v62 }
 0x403   : > { %v3559_v63 = vpop.xlane.xlu0 %3558 }
 0x404   : > { %v3560_v0 = vmul.f32 0.03125, %v3559_v63 }
 0x406   : > { %v3561_v55 = vadd.f32 1e-05, %v3560_v0 }
 0x408   : > { %5630 = vrsqrt.f32 %v3561_v55 }
 0x412   : > { %v5631_v1 = vpop.eup %5630 }
 0x413   : > { %v3563_v3 = vmul.f32 %v5631_v1, %v3555_v52 }
 0x415   : > { %v3571_v58 = vmul.f32 %v3650_v2, %v3563_v3 }
 0x417   : > { %v3579_v6 = vadd.f32 %v3651_v5, %v3571_v58 }
 0x419   : > { %5632 = vtanh.f32 %v3579_v6 }
 0x423   : > { %v5633_v25 = vpop.eup %5632 }
 0x424   : > { %3581 = vst.msk [vmem:[#allocation3] sm:$0x3] %vm3535_vm1, %v5633_v25 }
 0x425 PF: > { %p5603_p7 = scmp.eq.s32.totalorder %s5711_s19, 3  ;;  %s5674_s11 = smov [#allocation3]  }
 0x426   : > { %s3589_s12 = sshll.u32 %s5674_s11, 4  ;;  %s3590_s12 = int_to_ptr.vmem [resolvable:$true] %s3589_s12 }
 0x427   : > { %s5634_s13 = scalar_lea.vmem %s3590_s12, 32  ;;  %p5641_p11 = scmp.lt.s32.totalorder %s3590_s12, %s3590_s12 }
 0x428   : > { %p5635_p8 = scmp.ne.s32.totalorder %s3590_s12, %s5634_s13  ;;  %p5642_p12 = scmp.lt.s32.totalorder %s5634_s13, %s5634_s13 }
 0x42a   : > { %p5636_p9 = pnand %p5635_p8, %p5603_p7  ;;  %p5643_p13 = por %p5642_p12, %p5641_p11 }
 0x42c   : > { %p5637_p10 = pneg %p5636_p9 }
 0x42e   : > { %p5644_p0 = pnand %p5643_p13, %p5637_p10 }
 0x430   : > { %5647 = shalt.err (!%p5644_p0)
}
 0x431   : > { %s5648_s16 = scalar_lea.hbm %s6902_s5, 32 }
 0x432   : > { %p5649_p1 = scmp.ne.s32.totalorder %s6902_s5, %s5648_s16  ;;  %p5654_p4 = scmp.lt.u32.totalorder %s5648_s16, %s6902_s5 }
 0x434   : > { %p5650_p2 = pnand %p5649_p1, %p5603_p7 }
 0x436   : > { %p5651_p3 = pneg %p5650_p2 }
 0x438   : > { %p5656_p5 = pnand %p5654_p4, %p5651_p3 }
 0x43a   : > { %5659 = shalt.err (!%p5656_p5)
}
 0x43b   : > { %5600 = dma.vmem_to_hbm [thread:$0]  (%p5603_p7), %s3590_s12, 32, %s6902_s5, [#allocation4]  }
 0x43c   : > { %5665 = dma.done.wait (%p5603_p7), [#allocation4], 32  }
 0x43d   : > { %5667 = vsyncadd (%p5603_p7), [#allocation4], 4294967264 }
 0x43e PF: > { %s16_s18 = sadd.s32 1, %s5670_s18  }
 0x43f   : > { %p13_p6 = scmp.ge.s32.totalorder %s16_s18, 6  }
 0x441   :  { %15 = sbr.rel (!%p13_p6) target bundleno = 1 (0x1), region = 78 }
 0x448   :  { %3602 = vsyncpa [#allocation4], 1 }
 0x449   :  { %3604 = vsyncpa [#allocation4 + $0x1], 1 }

// kernel: pixel_encoder_forward.2
= control target key start
LH: loop header
LB: loop body
LE: loop exit
PB: predicated region body
PF: predicated region fallthrough
CT: control target
= control target key end

     0   :  { %s12552_s18 = smov 0   ;;  %s15584_s0 = inlined_call_operand.vmem [shape: f32[2,2,2,3,1152], index: 0, kind: input, shape index: {}]   ;;  %s15585_s1 = inlined_call_operand.vmem [shape: f32[9,32,3], index: 1, kind: input, shape index: {}]   ;;  %s15586_s2 = inlined_call_operand.vmem [shape: f32[32,1], index: 2, kind: input, shape index: {}]   ;;  %s15587_s3 = inlined_call_operand.vmem [shape: f32[9,32,32], index: 3, kind: input, shape index: {}]   ;;  %s15588_s4 = inlined_call_operand.vmem [shape: f32[32,1], index: 4, kind: input, shape index: {}]   ;;  %s15589_s5 = inlined_call_operand.vmem [shape: f32[2,32,928], index: 5, kind: output, shape index: {}]  }
   0x1 LB: > { %s10774_s19 = sadd.s32 4294967295, %s12510_s18   ;;  %p10778_p0 = scmp.ge.s32.totalorder %s12510_s18, 1  ;;  %s12510_s18 = sphi %s12552_s18, %s15_s18  }
   0x2   : > { %p187_p1 = scmp.lt.s32.totalorder %s12510_s18, 3 }
   0x4   : > { %p188_p2 = pnand %p10778_p0, %p187_p1 }
   0x6   : > { %191 = sbr.rel (%p188_p2) target bundleno = 1189 (0x4a5), region = 40 }
   0xd   : > { %p215_p3 = scmp.lt.s32.totalorder %s10774_s19, 1  ;;  %v15592_v0 = vmov 0.0   ;;  %s12513_s24 = smov 127   ;;  %vm278_vm0 = vcmask 1042432   ;;  %v12581_v10 = vld [vmem:[%s15585_s1] sm:$0xff]  ;;  %vm265_vm1 = vcmask 23552  }
   0xe   : > { %359 = vmatprep.mubr.f32.mxu0 %v15592_v0  ;;  %448 = vmatprep.mubr.f32.mxu1 %v15592_v0  ;;  %v12595_v15 = vld [vmem:[%s15585_s1 + $0x8] sm:$0xff]  ;;  %v231_v21 = vld [vmem:[%s15585_s1 + $0x10] sm:$0xff]  ;;  %v232_v25 = vld [vmem:[%s15585_s1 + $0x18] sm:$0xff]  ;;  %s12514_s10 = smov 96   ;;  %s12515_s17 = smov 95   ;;  %vm1218_vm2 = vcmask 1039360  }
   0xf   : > { %s15636_s19 = smov (!%p215_p3, %s10774_s19), 1  ;;  %v10810_v41 = vld [vmem:[%s15585_s1 + $0x20] sm:$0xff]  ;;  %v10811_v44 = vld [vmem:[%s15585_s1 + $0x28] sm:$0xff]  ;;  %v10812_v47 = vld [vmem:[%s15585_s1 + $0x30] sm:$0xff]  ;;  %vm3265_vm3 = vcmask 785408   ;;  %vm4316_vm4 = vcmask 777216  }
  0x10   : > { %s11807_s20 = smul.u32 144, %s15636_s19  ;;  %v10813_v51 = vld [vmem:[%s15585_s1 + $0x38] sm:$0xff]  ;;  %vm4961_vm5 = vcmask 261120   ;;  %s12517_s9 = smov 126   ;;  %vm6152_vm6 = vcmask 1031168   ;;  %vm8124_vm7 = vcmask 769024  }
  0x11   : > { %s12519_s16 = smov 64   ;;  %s12520_s30 = smov 63   ;;  %vm8782_vm8 = vcmask 523264   ;;  %vm9440_vm9 = vcmask 515072   ;;  %vm10098_vm10 = vcmask 506880  }
  0x12   : > { %s12568_s23 = scalar_lea.vmem %s15584_s0, %s11807_s20  ;;  %s12521_s12 = smov 62  }
  0x13   : > { %v1181_v1 = vld [vmem:[%s12568_s23] sm:$0x77]  ;;  %v1182_v2 = vld [vmem:[%s12568_s23 + $0x8] sm:$0x77]  ;;  %v1183_v6 = vld [vmem:[%s12568_s23 + $0x10] sm:$0x77] }
  0x14   : > { %1200 = vrot.lane.b32.xlu1 %v1181_v1, %s12513_s24  ;;  %v1196_v3 = vcombine.high %v1181_v1, %v1181_v1  ;;  %v1197_v4 = vcombine.high %v1182_v2, %v1182_v2  ;;  %v225_v5 = vld [vmem:[%s12568_s23] sm:$0x77]  ;;  %v226_v8 = vld [vmem:[%s12568_s23 + $0x8] sm:$0x77]  ;;  %v227_v9 = vld [vmem:[%s12568_s23 + $0x10] sm:$0x77]  ;;  %v1198_v13 = vcombine.high %v1183_v6, %v1183_v6 }
  0x15   : > { %v261_v7 = vcombine.high %v225_v5, %v225_v5  ;;  %v262_v11 = vcombine.high %v226_v8, %v226_v8  ;;  %v263_v12 = vcombine.high %v227_v9, %v227_v9  ;;  %v228_v14 = vld [vmem:[%s12568_s23 + $0x18] sm:$0x77]  ;;  %v10806_v19 = vld [vmem:[%s12568_s23 + $0x24] sm:$0x77]  ;;  %v10807_v24 = vld [vmem:[%s12568_s23 + $0x2c] sm:$0x77] }
  0x16   : > { %1202 = vrot.lane.b32.xlu0 %v1196_v3, %s12513_s24  ;;  %v1184_v16 = vld [vmem:[%s12568_s23 + $0x18] sm:$0x77]  ;;  %v264_v17 = vcombine.high %v228_v14, %v228_v14  ;;  %v10930_v20 = vld [vmem:[%s12568_s23 + $0x48] sm:$0x77]  ;;  %v697_v22 = vcombine.high %v10806_v19, %v10806_v19  ;;  %v1185_v26 = vld [vmem:[%s12568_s23 + $0x20] sm:$0x7]  ;;  %v698_v27 = vcombine.high %v10807_v24, %v10807_v24 }
  0x17   : > { %10782 = vmatprep.subr.msk.mxu0 %vm278_vm0, %v261_v7  ;;  %10788 = vmatprep.subr.msk.mxu1 %vm278_vm0, %v262_v11  ;;  %v1199_v18 = vcombine.high %v1184_v16, %v1184_v16  ;;  %v2718_v23 = vcombine.high %v10930_v20, %v10930_v20  ;;  %v10808_v28 = vld [vmem:[%s12568_s23 + $0x34] sm:$0x77]  ;;  %v10809_v31 = vld [vmem:[%s12568_s23 + $0x3c] sm:$0x77]  ;;  %v10934_v37 = vld [vmem:[%s12568_s23 + $0x68] sm:$0x7] }
  0x18   : > { %1206 = vrot.lane.b32.xlu1 %v1197_v4, %s12513_s24  ;;  %10783 = vmatpush1.msk.msra.mxu0 %vm278_vm0, %v225_v5  ;;  %v699_v29 = vcombine.high %v10808_v28, %v10808_v28  ;;  %v10931_v30 = vld [vmem:[%s12568_s23 + $0x50] sm:$0x77]  ;;  %v10932_v32 = vld [vmem:[%s12568_s23 + $0x58] sm:$0x77]  ;;  %v700_v34 = vcombine.high %v10809_v31, %v10809_v31  ;;  %v10933_v35 = vld [vmem:[%s12568_s23 + $0x60] sm:$0x77] }
  0x19   : > { %10784 = vmatmul.mubr.msk.f32.vlgmr.msra.gmra.mrb[0].mxu0 %vm265_vm1, %v12581_v10  ;;  %10789 = vmatpush1.msk.msra.mxu1 %vm278_vm0, %v226_v8  ;;  %v2719_v33 = vcombine.high %v10931_v30, %v10931_v30  ;;  %v2720_v36 = vcombine.high %v10932_v32, %v10932_v32  ;;  %v2721_v38 = vcombine.high %v10933_v35, %v10933_v35  ;;  %v3228_v39 = vld [vmem:[%s12568_s23] sm:$0x77]  ;;  %v3229_v40 = vld [vmem:[%s12568_s23 + $0x8] sm:$0x77]  ;;  %v3230_v45 = vld [vmem:[%s12568_s23 + $0x10] sm:$0x77] }
  0x1a   : > { %1204 = vrot.lane.b32.xlu0 %v1182_v2, %s12513_s24  ;;  %365 = vmatprep.mubr.f32.mxu0 %v15592_v0  ;;  %v3243_v42 = vcombine.high %v3228_v39, %v3228_v39  ;;  %v3244_v43 = vcombine.high %v3229_v40, %v3229_v40  ;;  %v3245_v46 = vcombine.high %v3230_v45, %v3230_v45  ;;  %v3231_v48 = vld [vmem:[%s12568_s23 + $0x18] sm:$0x77]  ;;  %v10991_v50 = vld [vmem:[%s12568_s23 + $0x24] sm:$0x77]  ;;  %v3232_v53 = vld [vmem:[%s12568_s23 + $0x20] sm:$0x7] }
  0x1b   : > { %10794 = vmatprep.subr.msk.mxu0 %vm278_vm0, %v263_v12  ;;  %10790 = vmatmul.mubr.msk.f32.vlgmr.msra.gmra.mrb[0].mxu1 %vm265_vm1, %v12581_v10  ;;  %v3246_v49 = vcombine.high %v3231_v48, %v3231_v48  ;;  %v3769_v52 = vcombine.high %v10991_v50, %v10991_v50  ;;  %v10992_v54 = vld [vmem:[%s12568_s23 + $0x2c] sm:$0x77]  ;;  %v10993_v55 = vld [vmem:[%s12568_s23 + $0x34] sm:$0x77]  ;;  %v10994_v57 = vld [vmem:[%s12568_s23 + $0x3c] sm:$0x77] }
  0x1c   : > { %1210 = vrot.lane.b32.xlu1 %v1198_v13, %s12513_s24  ;;  %454 = vmatprep.mubr.f32.mxu1 %v15592_v0  ;;  %v3770_v56 = vcombine.high %v10992_v54, %v10992_v54  ;;  %v3771_v58 = vcombine.high %v10993_v55, %v10993_v55  ;;  %v10995_v59 = vld [vmem:[%s12568_s23 + $0x44] sm:$0x7]  ;;  %v3772_v60 = vcombine.high %v10994_v57, %v10994_v57  ;;  %v4280_v62 = vld [vmem:[%s12568_s23 + $0x8] sm:$0x77]  ;;  %v4281_v2 = vld [vmem:[%s12568_s23 + $0x10] sm:$0x77] }
  0x1d   : > { %10785 = vmatmul.mubr.msk.f32.gmra.mrb[2].mxu0 %vm265_vm1, %v12595_v15  ;;  %10800 = vmatprep.subr.msk.mxu1 %vm278_vm0, %v264_v17  ;;  %v4279_v61 = vld [vmem:[%s12568_s23] sm:$0x77]  ;;  %v4295_v1 = vcombine.high %v4280_v62, %v4280_v62  ;;  %v4296_v3 = vcombine.high %v4281_v2, %v4281_v2  ;;  %v4282_v4 = vld [vmem:[%s12568_s23 + $0x18] sm:$0x77]  ;;  %v10839_v17 = vld [vmem:[%s15585_s1 + $0x48] sm:$0xff]  ;;  %s11230_s14 = sshll.u32 %s15636_s19, 8 }
  0x1e   : > { %1208 = vrot.lane.b32.xlu0 %v1183_v6, %s12513_s24  ;;  %371 = vmatprep.mubr.f32.mxu0 %v15592_v0  ;;  %v4294_v63 = vcombine.high %v4279_v61, %v4279_v61  ;;  %v4297_v5 = vcombine.high %v4282_v4, %v4282_v4  ;;  %v4283_v6 = vld [vmem:[%s12568_s23 + $0x20] sm:$0x7]  ;;  %s14783_s20 = scalar_lea.vmem %s15589_s5, %s11230_s14 }
  0x1f   : > { %10795 = vmatpush1.msk.msra.mxu0 %vm278_vm0, %v227_v9  ;;  %10791 = vmatmul.mubr.msk.f32.gmra.mrb[2].mxu1 %vm265_vm1, %v12595_v15  ;;  %v10838_v12 = vld [vmem:[%s15585_s1 + $0x40] sm:$0xff] }
  0x20   : > { %1214 = vrot.lane.b32.xlu1 %v1199_v18, %s12513_s24  ;;  %460 = vmatprep.mubr.f32.mxu1 %v15592_v0 }
  0x21   : > { %10786 = vmatmul.mubr.msk.f32.gmra.mrb[4].mxu0 %vm265_vm1, %v231_v21  ;;  %10801 = vmatpush1.msk.msra.mxu1 %vm278_vm0, %v228_v14 }
  0x22   : > { %1212 = vrot.lane.b32.xlu0 %v1184_v16, %s12513_s24  ;;  %377 = vmatprep.mubr.f32.mxu0 %v15592_v0 }
  0x23   : > { %10814 = vmatprep.subr.msk.mxu0 %vm278_vm0, %v697_v22  ;;  %10792 = vmatmul.mubr.msk.f32.gmra.mrb[4].mxu1 %vm265_vm1, %v231_v21  ;;  %v10840_v22 = vld [vmem:[%s15585_s1 + $0x50] sm:$0xff] }
  0x24   : > { %2724 = vrot.lane.b32.xlu1 %v2718_v23, %s12513_s24  ;;  %466 = vmatprep.mubr.f32.mxu1 %v15592_v0 }
  0x25   : > { %10787 = vmatmul.mubr.msk.f32.gmra.mrb[6].mxu0 %vm265_vm1, %v232_v25  ;;  %10820 = vmatprep.subr.msk.mxu1 %vm278_vm0, %v698_v27 }
  0x26   : > { %1216 = vrot.lane.b32.xlu0 %v1185_v26, %s12513_s24  ;;  %537 = vmatprep.mubr.f32.mxu0 %v15592_v0  ;;  %v10867_v26 = vld [vmem:[%s12568_s23 + $0x50] sm:$0x77] }
  0x27   : > { %10793 = vmatmul.mubr.msk.f32.gmra.mrb[6].mxu1 %vm265_vm1, %v232_v25 }
  0x28   : > { %2722 = vrot.lane.b32.xlu1 %v10930_v20, %s12513_s24  ;;  %626 = vmatprep.mubr.f32.mxu1 %v15592_v0 }
  0x29   : > { %10796 = vmatmul.mubr.msk.f32.vlgmr.msra.gmra.mrb[8].mxu0 %vm265_vm1, %v12581_v10 }
  0x2a   : > { %543 = vmatprep.mubr.f32.mxu0 %v15592_v0  ;;  %10815 = vmatpush1.msk.msra.mxu0 %vm278_vm0, %v10806_v19  ;;  %v10866_v19 = vld [vmem:[%s12568_s23 + $0x48] sm:$0x77] }
  0x2b   : > { %2726 = vrot.lane.b32.xlu0 %v10931_v30, %s12513_s24  ;;  %10826 = vmatprep.subr.msk.mxu0 %vm278_vm0, %v699_v29  ;;  %v10841_v30 = vld [vmem:[%s15585_s1 + $0x58] sm:$0xff] }
  0x2c   : > { %10802 = vmatmul.mubr.msk.f32.vlgmr.msra.gmra.mrb[8].mxu1 %vm265_vm1, %v12581_v10  ;;  %2730 = vrot.lane.b32.xlu1 %v10932_v32, %s12513_s24  ;;  %v10868_v32 = vld [vmem:[%s12568_s23 + $0x58] sm:$0x77] }
  0x2d   : > { %10797 = vmatmul.mubr.msk.f32.gmra.mrb[10].mxu0 %vm265_vm1, %v12595_v15  ;;  %632 = vmatprep.mubr.f32.mxu1 %v15592_v0 }
  0x2e   : > { %549 = vmatprep.mubr.f32.mxu0 %v15592_v0  ;;  %10821 = vmatpush1.msk.msra.mxu1 %vm278_vm0, %v10807_v24 }
  0x2f   : > { %2728 = vrot.lane.b32.xlu0 %v2719_v33, %s12513_s24  ;;  %10832 = vmatprep.subr.msk.mxu1 %vm278_vm0, %v700_v34  ;;  %v1723_v33 = vcombine.high %v10868_v32, %v10868_v32  ;;  %v10869_v34 = vld [vmem:[%s12568_s23 + $0x60] sm:$0x77] }
  0x30   : > { %10803 = vmatmul.mubr.msk.f32.gmra.mrb[10].mxu1 %vm265_vm1, %v12595_v15  ;;  %2734 = vrot.lane.b32.xlu1 %v10933_v35, %s12513_s24  ;;  %v1724_v35 = vcombine.high %v10869_v34, %v10869_v34 }
  0x31   : > { %10798 = vmatmul.mubr.msk.f32.gmra.mrb[12].mxu0 %vm265_vm1, %v231_v21  ;;  %638 = vmatprep.mubr.f32.mxu1 %v15592_v0 }
  0x32   : > { %555 = vmatprep.mubr.f32.mxu0 %v15592_v0 }
  0x33   : > { %2732 = vrot.lane.b32.xlu0 %v2720_v36, %s12513_s24  ;;  %v10898_v36 = vld [vmem:[%s12568_s23 + $0x6c] sm:$0x77] }
  0x34   : > { %10804 = vmatmul.mubr.msk.f32.gmra.mrb[12].mxu1 %vm265_vm1, %v231_v21  ;;  %2738 = vrot.lane.b32.xlu1 %v10934_v37, %s12513_s24  ;;  %v10870_v37 = vld [vmem:[%s15585_s1 + $0x60] sm:$0xff] }
  0x35   : > { %10799 = vmatmul.mubr.msk.f32.gmra.mrb[14].mxu0 %vm265_vm1, %v232_v25  ;;  %644 = vmatprep.mubr.f32.mxu1 %v15592_v0 }
  0x36   : > { %793 = vmatprep.mubr.f32.mxu0 %v15592_v0 }
  0x37   : > { %2736 = vrot.lane.b32.xlu0 %v2721_v38, %s12513_s24  ;;  %v2219_v38 = vcombine.high %v10898_v36, %v10898_v36 }
  0x38   : > { %10805 = vmatmul.mubr.msk.f32.gmra.mrb[14].mxu1 %vm265_vm1, %v232_v25  ;;  %3251 = vrot.lane.b32.xlu1 %v3229_v40, %s12514_s10  ;;  %v1721_v25 = vcombine.high %v10866_v19, %v10866_v19  ;;  %v10871_v40 = vld [vmem:[%s15585_s1 + $0x68] sm:$0xff] }
  0x39   : > { %10816 = vmatmul.mubr.msk.f32.vlgmr.msra.gmra.mrb[0].mxu0 %vm265_vm1, %v10810_v41  ;;  %882 = vmatprep.mubr.f32.mxu1 %v15592_v0 }
  0x3a   : > { %799 = vmatprep.mubr.f32.mxu0 %v15592_v0  ;;  %10827 = vmatpush1.msk.msra.mxu0 %vm278_vm0, %v10808_v28 }
  0x3b   : > { %3249 = vrot.lane.b32.xlu0 %v3243_v42, %s12514_s10  ;;  %v10872_v42 = vld [vmem:[%s15585_s1 + $0x70] sm:$0xff] }
  0x3c   : > { %10822 = vmatmul.mubr.msk.f32.vlgmr.msra.gmra.mrb[0].mxu1 %vm265_vm1, %v10810_v41  ;;  %3253 = vrot.lane.b32.xlu1 %v3244_v43, %s12514_s10  ;;  %v10873_v43 = vld [vmem:[%s15585_s1 + $0x78] sm:$0xff] }
  0x3d   : > { %10817 = vmatmul.mubr.msk.f32.gmra.mrb[2].mxu0 %vm265_vm1, %v10811_v44  ;;  %888 = vmatprep.mubr.f32.mxu1 %v15592_v0 }
  0x3e   : > { %805 = vmatprep.mubr.f32.mxu0 %v15592_v0  ;;  %10833 = vmatpush1.msk.msra.mxu1 %vm278_vm0, %v10809_v31  ;;  %v1722_v31 = vcombine.high %v10867_v26, %v10867_v26 }
  0x3f   : > { %3247 = vrot.lane.b32.xlu0 %v3228_v39, %s12514_s10  ;;  %v10899_v39 = vld [vmem:[%s12568_s23 + $0x74] sm:$0x77] }
  0x40   : > { %10823 = vmatmul.mubr.msk.f32.gmra.mrb[2].mxu1 %vm265_vm1, %v10811_v44  ;;  %3257 = vrot.lane.b32.xlu1 %v3245_v46, %s12514_s10  ;;  %v10901_v46 = vld [vmem:[%s12568_s23 + $0x84] sm:$0x77] }
  0x41   : > { %10818 = vmatmul.mubr.msk.f32.gmra.mrb[4].mxu0 %vm265_vm1, %v10812_v47  ;;  %894 = vmatprep.mubr.f32.mxu1 %v15592_v0 }
  0x42   : > { %811 = vmatprep.mubr.f32.mxu0 %v15592_v0 }
  0x43   : > { %3255 = vrot.lane.b32.xlu0 %v3230_v45, %s12514_s10 }
  0x44   : > { %10824 = vmatmul.mubr.msk.f32.gmra.mrb[4].mxu1 %vm265_vm1, %v10812_v47  ;;  %3261 = vrot.lane.b32.xlu1 %v3246_v49, %s12514_s10 }
  0x45   : > { %10819 = vmatmul.mubr.msk.f32.gmra.mrb[6].mxu0 %vm265_vm1, %v10813_v51  ;;  %900 = vmatprep.mubr.f32.mxu1 %v15592_v0 }
  0x46   : > { %971 = vmatprep.mubr.f32.mxu0 %v15592_v0 }
  0x47   : > { %3259 = vrot.lane.b32.xlu0 %v3231_v48, %s12514_s10 }
  0x48   : > { %10825 = vmatmul.mubr.msk.f32.gmra.mrb[6].mxu1 %vm265_vm1, %v10813_v51  ;;  %3775 = vrot.lane.b32.xlu1 %v3769_v52, %s12514_s10 }
  0x49   : > { %10828 = vmatmul.mubr.msk.f32.vlgmr.msra.gmra.mrb[8].mxu0 %vm265_vm1, %v10810_v41  ;;  %1060 = vmatprep.mubr.f32.mxu1 %v15592_v0 }
  0x4a   : > { %977 = vmatprep.mubr.f32.mxu0 %v15592_v0 }
  0x4b   : > { %3263 = vrot.lane.b32.xlu0 %v3232_v53, %s12514_s10  ;;  %v10903_v53 = vld [vmem:[%s15585_s1 + $0x88] sm:$0xff] }
  0x4c   : > { %10834 = vmatmul.mubr.msk.f32.vlgmr.msra.gmra.mrb[8].mxu1 %vm265_vm1, %v10810_v41  ;;  %3773 = vrot.lane.b32.xlu1 %v10991_v50, %s12514_s10  ;;  %v2220_v41 = vcombine.high %v10899_v39, %v10899_v39 }
  0x4d   : > { %10829 = vmatmul.mubr.msk.f32.gmra.mrb[10].mxu0 %vm265_vm1, %v10811_v44  ;;  %1066 = vmatprep.mubr.f32.mxu1 %v15592_v0 }
  0x4e   : > { %983 = vmatprep.mubr.f32.mxu0 %v15592_v0 }
  0x4f   : > { %3777 = vrot.lane.b32.xlu0 %v10992_v54, %s12514_s10 }
  0x50   : > { %10835 = vmatmul.mubr.msk.f32.gmra.mrb[10].mxu1 %vm265_vm1, %v10811_v44  ;;  %3781 = vrot.lane.b32.xlu1 %v10993_v55, %s12514_s10  ;;  %v10900_v44 = vld [vmem:[%s12568_s23 + $0x7c] sm:$0x77] }
  0x51   : > { %10830 = vmatmul.mubr.msk.f32.gmra.mrb[12].mxu0 %vm265_vm1, %v10812_v47  ;;  %1072 = vmatprep.mubr.f32.mxu1 %v15592_v0  ;;  %v2221_v45 = vcombine.high %v10900_v44, %v10900_v44 }
  0x52   : > { %989 = vmatprep.mubr.f32.mxu0 %v15592_v0 }
  0x53   : > { %3779 = vrot.lane.b32.xlu0 %v3770_v56, %s12514_s10 }
  0x54   : > { %10836 = vmatmul.mubr.msk.f32.gmra.mrb[12].mxu1 %vm265_vm1, %v10812_v47  ;;  %3785 = vrot.lane.b32.xlu1 %v10994_v57, %s12514_s10  ;;  %v2222_v47 = vcombine.high %v10901_v46, %v10901_v46  ;;  %v10904_v57 = vld [vmem:[%s15585_s1 + $0x90] sm:$0xff] }
  0x55   : > { %10831 = vmatmul.mubr.msk.f32.gmra.mrb[14].mxu0 %vm265_vm1, %v10813_v51  ;;  %1078 = vmatprep.mubr.f32.mxu1 %v15592_v0 }
  0x56   : > { %1319 = vmatprep.mubr.f32.mxu0 %v15592_v0 }
  0x57   : > { %3783 = vrot.lane.b32.xlu0 %v3771_v58, %s12514_s10  ;;  %v10905_v58 = vld [vmem:[%s15585_s1 + $0x98] sm:$0xff] }
  0x58   : > { %10837 = vmatmul.mubr.msk.f32.gmra.mrb[14].mxu1 %vm265_vm1, %v10813_v51  ;;  %3789 = vrot.lane.b32.xlu1 %v10995_v59, %s12514_s10  ;;  %v10902_v51 = vld [vmem:[%s15585_s1 + $0x80] sm:$0xff] }
  0x59   : > { %1408 = vmatprep.mubr.f32.mxu1 %v15592_v0 }
  0x5b   : > { %3787 = vrot.lane.b32.xlu0 %v3772_v60, %s12514_s10 }
  0x5c   : > { %4302 = vrot.lane.b32.xlu1 %v4280_v62, %s12515_s17 }
  0x5f   : > { %4300 = vrot.lane.b32.xlu0 %v4294_v63, %s12515_s17 }
  0x60   : > { %4304 = vrot.lane.b32.xlu1 %v4295_v1, %s12515_s17 }
  0x63   : > { %4298 = vrot.lane.b32.xlu0 %v4279_v61, %s12515_s17 }
  0x64   : > { %4308 = vrot.lane.b32.xlu1 %v4296_v3, %s12515_s17 }
  0x67   : > { %4306 = vrot.lane.b32.xlu0 %v4281_v2, %s12515_s17 }
  0x68   : > { %4312 = vrot.lane.b32.xlu1 %v4297_v5, %s12515_s17 }
  0x6b   : > { %4310 = vrot.lane.b32.xlu0 %v4282_v4, %s12515_s17 }
  0x6f   : > { %4314 = vrot.lane.b32.xlu0 %v4283_v6, %s12515_s17 }
  0x86   : > { %v1201_v7 = vpop.permute.xlu1 %1200 }
  0x88   : > { %v1203_v8 = vpop.permute.xlu0 %1202 }
  0x89   : > { %v1219_v13 = vsel %vm1218_vm2, %v1201_v7, %v1203_v8  ;;  %v10935_v7 = vld [vmem:[%s15585_s1 + $0xa0] sm:$0xff] }
  0x8a   : > { %v1207_v9 = vpop.permute.xlu1 %1206 }
  0x8c   : > { %v1205_v10 = vpop.permute.xlu0 %1204 }
  0x8d   : > { %v1220_v11 = vsel %vm1218_vm2, %v1203_v8, %v1205_v10  ;;  %v1221_v18 = vsel %vm1218_vm2, %v1205_v10, %v1207_v9  ;;  %v233_v10 = vld [vmem:[%s15586_s2] sm:$0xff] }
  0x8e   : > { %10842 = vmatprep.subr.msk.mxu0 %vm278_vm0, %v1220_v11  ;;  %v1211_v15 = vpop.permute.xlu1 %1210  ;;  %v10936_v11 = vld [vmem:[%s15585_s1 + $0xa8] sm:$0xff] }
  0x8f   : > { %10843 = vmatpush1.msk.msra.mxu0 %vm278_vm0, %v1219_v13 }
  0x90   : > { %v1209_v14 = vpop.permute.xlu0 %1208  ;;  %10844 = vmatmul.mubr.msk.f32.vlgmr.msra.gmra.mrb[0].mxu0 %vm265_vm1, %v10838_v12 }
  0x91   : > { %v1222_v16 = vsel %vm1218_vm2, %v1207_v9, %v1209_v14  ;;  %1325 = vmatprep.mubr.f32.mxu0 %v15592_v0  ;;  %v1223_v24 = vsel %vm1218_vm2, %v1209_v14, %v1211_v15  ;;  %v12516_v14 = vmov 0  }
  0x92   : > { %10848 = vmatprep.subr.msk.mxu1 %vm278_vm0, %v1222_v16  ;;  %v1215_v23 = vpop.permute.xlu1 %1214  ;;  %11826 = vset.pattern.permute.xlu1 %v12516_v14 }
  0x93   : > { %10849 = vmatpush1.msk.msra.mxu1 %vm278_vm0, %v1221_v18  ;;  %239 = vperm.xlu1 %11826, %v233_v10   ;;  %v10937_v18 = vld [vmem:[%s15585_s1 + $0xb0] sm:$0xff] }
  0x94   : > { %v1213_v20 = vpop.permute.xlu0 %1212  ;;  %10845 = vmatmul.mubr.msk.f32.gmra.mrb[2].mxu0 %vm265_vm1, %v10839_v17  ;;  %10850 = vmatmul.mubr.msk.f32.vlgmr.msra.gmra.mrb[0].mxu1 %vm265_vm1, %v10838_v12 }
  0x95   : > { %v1224_v21 = vsel %vm1218_vm2, %v1211_v15, %v1213_v20  ;;  %1331 = vmatprep.mubr.f32.mxu0 %v15592_v0  ;;  %1414 = vmatprep.mubr.f32.mxu1 %v15592_v0  ;;  %v1225_v27 = vsel %vm1218_vm2, %v1213_v20, %v1215_v23  ;;  %v10938_v20 = vld [vmem:[%s15585_s1 + $0xb8] sm:$0xff] }
  0x96   : > { %10854 = vmatprep.subr.msk.mxu0 %vm278_vm0, %v1224_v21  ;;  %v2725_v48 = vpop.permute.xlu1 %2724  ;;  %11827 = vset.pattern.permute.xlu0 %v12516_v14  ;;  %v236_v21 = vld [vmem:[%s15586_s2 + $0x18] sm:$0xff] }
  0x97   : > { %10855 = vmatpush1.msk.msra.mxu0 %vm278_vm0, %v1223_v24  ;;  %v11027_v14 = vld [vmem:[%s15585_s1 + $0x118] sm:$0xff] }
  0x98   : > { %10846 = vmatmul.mubr.msk.f32.gmra.mrb[4].mxu0 %vm265_vm1, %v10840_v22  ;;  %10851 = vmatmul.mubr.msk.f32.gmra.mrb[2].mxu1 %vm265_vm1, %v10839_v17  ;;  %v1217_v28 = vpop.permute.xlu0 %1216 }
  0x99   : > { %v1226_v29 = vsel %vm1218_vm2, %v1215_v23, %v1217_v28  ;;  %1337 = vmatprep.mubr.f32.mxu0 %v15592_v0  ;;  %1420 = vmatprep.mubr.f32.mxu1 %v15592_v0 }
  0x9a   : > { %10860 = vmatprep.subr.msk.mxu1 %vm278_vm0, %v1226_v29  ;;  %10874 = vmatprep.subr.msk.mxu0 %vm278_vm0, %v1721_v25  ;;  %v2723_v49 = vpop.permute.xlu1 %2722 }
  0x9b   : > { %10861 = vmatpush1.msk.msra.mxu1 %vm278_vm0, %v1225_v27  ;;  %v2740_v61 = vsel %vm1218_vm2, %v2723_v49, %v2725_v48 }
  0x9c   : > { %10847 = vmatmul.mubr.msk.f32.gmra.mrb[6].mxu0 %vm265_vm1, %v10841_v30  ;;  %10852 = vmatmul.mubr.msk.f32.gmra.mrb[4].mxu1 %vm265_vm1, %v10840_v22 }
  0x9d   : > { %1426 = vmatprep.mubr.f32.mxu1 %v15592_v0  ;;  %1497 = vmatprep.mubr.f32.mxu0 %v15592_v0  ;;  %v2727_v50 = vpop.permute.xlu0 %2726 }
  0x9e   : > { %10880 = vmatprep.subr.msk.mxu1 %vm278_vm0, %v1722_v31  ;;  %v2741_v52 = vsel %vm1218_vm2, %v2725_v48, %v2727_v50  ;;  %v2731_v54 = vpop.permute.xlu1 %2730 }
  0xa0   : > { %10853 = vmatmul.mubr.msk.f32.gmra.mrb[6].mxu1 %vm265_vm1, %v10841_v30  ;;  %10856 = vmatmul.mubr.msk.f32.vlgmr.msra.gmra.mrb[8].mxu0 %vm265_vm1, %v10838_v12 }
  0xa1   : > { %1503 = vmatprep.mubr.f32.mxu0 %v15592_v0  ;;  %1586 = vmatprep.mubr.f32.mxu1 %v15592_v0  ;;  %v2729_v55 = vpop.permute.xlu0 %2728 }
  0xa2   : > { %10875 = vmatpush1.msk.msra.mxu0 %vm278_vm0, %v10866_v19  ;;  %v2743_v56 = vsel %vm1218_vm2, %v2729_v55, %v2731_v54  ;;  %v2735_v59 = vpop.permute.xlu1 %2734  ;;  %v2742_v2 = vsel %vm1218_vm2, %v2727_v50, %v2729_v55  ;;  %v235_v19 = vld [vmem:[%s15586_s2 + $0x10] sm:$0xff] }
  0xa3   : > { %10886 = vmatprep.subr.msk.mxu0 %vm278_vm0, %v1723_v33  ;;  %249 = vperm.xlu1 %11826, %v235_v19   ;;  %v10963_v33 = vld [vmem:[%s15585_s1 + $0xc0] sm:$0xff] }
  0xa4   : > { %10857 = vmatmul.mubr.msk.f32.gmra.mrb[10].mxu0 %vm265_vm1, %v10839_v17  ;;  %10862 = vmatmul.mubr.msk.f32.vlgmr.msra.gmra.mrb[8].mxu1 %vm265_vm1, %v10838_v12 }
  0xa5   : > { %1509 = vmatprep.mubr.f32.mxu0 %v15592_v0  ;;  %1592 = vmatprep.mubr.f32.mxu1 %v15592_v0  ;;  %v2733_v60 = vpop.permute.xlu0 %2732 }
  0xa6   : > { %10881 = vmatpush1.msk.msra.mxu1 %vm278_vm0, %v10867_v26  ;;  %v2745_v62 = vsel %vm1218_vm2, %v2733_v60, %v2735_v59  ;;  %v2739_v63 = vpop.permute.xlu1 %2738  ;;  %v2744_v8 = vsel %vm1218_vm2, %v2731_v54, %v2733_v60  ;;  %v10996_v54 = vld [vmem:[%s15585_s1 + $0xe0] sm:$0xff] }
  0xa7   : > { %10892 = vmatprep.subr.msk.mxu1 %vm278_vm0, %v1724_v35  ;;  %254 = vperm.xlu1 %11826, %v236_v21  }
  0xa8   : > { %10858 = vmatmul.mubr.msk.f32.gmra.mrb[12].mxu0 %vm265_vm1, %v10840_v22  ;;  %10863 = vmatmul.mubr.msk.f32.gmra.mrb[10].mxu1 %vm265_vm1, %v10839_v17  ;;  %v234_v17 = vld [vmem:[%s15586_s2 + $0x8] sm:$0xff] }
  0xa9   : > { %1515 = vmatprep.mubr.f32.mxu0 %v15592_v0  ;;  %1598 = vmatprep.mubr.f32.mxu1 %v15592_v0  ;;  %v2737_v1 = vpop.permute.xlu0 %2736 }
  0xaa   : > { %v2747_v3 = vsel %vm1218_vm2, %v2737_v1, %v2739_v63  ;;  %v3252_v5 = vpop.permute.xlu1 %3251  ;;  %v2746_v15 = vsel %vm1218_vm2, %v2735_v59, %v2737_v1  ;;  %244 = vperm.xlu0 %11827, %v234_v17   ;;  %v10999_v63 = vld [vmem:[%s15585_s1 + $0xf8] sm:$0xff] }
  0xac   : > { %10859 = vmatmul.mubr.msk.f32.gmra.mrb[14].mxu0 %vm265_vm1, %v10841_v30  ;;  %10864 = vmatmul.mubr.msk.f32.gmra.mrb[12].mxu1 %vm265_vm1, %v10840_v22 }
  0xad   : > { %1604 = vmatprep.mubr.f32.mxu1 %v15592_v0  ;;  %1817 = vmatprep.mubr.f32.mxu0 %v15592_v0  ;;  %v3250_v4 = vpop.permute.xlu0 %3249 }
  0xae   : > { %v3267_v9 = vsel %vm3265_vm3, %v3250_v4, %v3252_v5  ;;  %v3254_v12 = vpop.permute.xlu1 %3253 }
  0xaf   : > { %v3268_v28 = vsel %vm3265_vm3, %v3252_v5, %v3254_v12 }
  0xb0   : > { %10865 = vmatmul.mubr.msk.f32.gmra.mrb[14].mxu1 %vm265_vm1, %v10841_v30  ;;  %10876 = vmatmul.mubr.msk.f32.vlgmr.msra.gmra.mrb[0].mxu0 %vm265_vm1, %v10870_v37 }
  0xb1   : > { %1823 = vmatprep.mubr.f32.mxu0 %v15592_v0  ;;  %1906 = vmatprep.mubr.f32.mxu1 %v15592_v0  ;;  %v3248_v6 = vpop.permute.xlu0 %3247 }
  0xb2   : > { %10887 = vmatpush1.msk.msra.mxu0 %vm278_vm0, %v10868_v32  ;;  %v3258_v22 = vpop.permute.xlu1 %3257  ;;  %v3266_v24 = vsel %vm3265_vm3, %v3248_v6, %v3250_v4 }
  0xb3   : > { %10906 = vmatprep.subr.msk.mxu0 %vm278_vm0, %v2219_v38 }
  0xb4   : > { %10877 = vmatmul.mubr.msk.f32.gmra.mrb[2].mxu0 %vm265_vm1, %v10871_v40  ;;  %10882 = vmatmul.mubr.msk.f32.vlgmr.msra.gmra.mrb[0].mxu1 %vm265_vm1, %v10870_v37 }
  0xb5   : > { %1829 = vmatprep.mubr.f32.mxu0 %v15592_v0  ;;  %1912 = vmatprep.mubr.f32.mxu1 %v15592_v0  ;;  %v12961_v13 = vpop.permute.xlu0 %3255 }
  0xb6   : > { %10893 = vmatpush1.msk.msra.mxu1 %vm278_vm0, %v10869_v34  ;;  %v3269_v16 = vsel %vm3265_vm3, %v3254_v12, %v12961_v13  ;;  %v3262_v26 = vpop.permute.xlu1 %3261  ;;  %v3270_v34 = vsel %vm3265_vm3, %v12961_v13, %v3258_v22  ;;  %v11026_v13 = vld [vmem:[%s15585_s1 + $0x110] sm:$0xff] }
  0xb7   : > { %10912 = vmatprep.subr.msk.mxu1 %vm278_vm0, %v2220_v41  ;;  %v10965_v41 = vld [vmem:[%s15585_s1 + $0xd0] sm:$0xff] }
  0xb8   : > { %10878 = vmatmul.mubr.msk.f32.gmra.mrb[4].mxu0 %vm265_vm1, %v10872_v42  ;;  %10883 = vmatmul.mubr.msk.f32.gmra.mrb[2].mxu1 %vm265_vm1, %v10871_v40 }
  0xb9   : > { %1835 = vmatprep.mubr.f32.mxu0 %v15592_v0  ;;  %1918 = vmatprep.mubr.f32.mxu1 %v15592_v0  ;;  %v3260_v23 = vpop.permute.xlu0 %3259 }
  0xba   : > { %v3271_v25 = vsel %vm3265_vm3, %v3258_v22, %v3260_v23  ;;  %v3776_v30 = vpop.permute.xlu1 %3775 }
  0xbc   : > { %10879 = vmatmul.mubr.msk.f32.gmra.mrb[6].mxu0 %vm265_vm1, %v10873_v43  ;;  %10884 = vmatmul.mubr.msk.f32.gmra.mrb[4].mxu1 %vm265_vm1, %v10872_v42 }
  0xbd   : > { %1924 = vmatprep.mubr.f32.mxu1 %v15592_v0  ;;  %1995 = vmatprep.mubr.f32.mxu0 %v15592_v0  ;;  %v3264_v27 = vpop.permute.xlu0 %3263 }
  0xbe   : > { %v3273_v29 = vsel %vm3265_vm3, %v3262_v26, %v3264_v27  ;;  %v3774_v31 = vpop.permute.xlu1 %3773 }
  0xc0   : > { %10885 = vmatmul.mubr.msk.f32.gmra.mrb[6].mxu1 %vm265_vm1, %v10873_v43  ;;  %10888 = vmatmul.mubr.msk.f32.vlgmr.msra.gmra.mrb[8].mxu0 %vm265_vm1, %v10870_v37 }
  0xc1   : > { %2001 = vmatprep.mubr.f32.mxu0 %v15592_v0  ;;  %2084 = vmatprep.mubr.f32.mxu1 %v15592_v0  ;;  %v3778_v32 = vpop.permute.xlu0 %3777 }
  0xc2   : > { %10907 = vmatpush1.msk.msra.mxu0 %vm278_vm0, %v10898_v36  ;;  %v3792_v35 = vsel %vm3265_vm3, %v3776_v30, %v3778_v32  ;;  %v10964_v36 = vld [vmem:[%s15585_s1 + $0xc8] sm:$0xff] }
  0xc3   : > { %10918 = vmatprep.subr.msk.mxu0 %vm278_vm0, %v2221_v45  ;;  %v3791_v45 = vsel %vm3265_vm3, %v3774_v31, %v3776_v30 }
  0xc4   : > { %10889 = vmatmul.mubr.msk.f32.gmra.mrb[10].mxu0 %vm265_vm1, %v10871_v40  ;;  %10894 = vmatmul.mubr.msk.f32.vlgmr.msra.gmra.mrb[8].mxu1 %vm265_vm1, %v10870_v37  ;;  %v3782_v37 = vpop.permute.xlu1 %3781 }
  0xc5   : > { %2007 = vmatprep.mubr.f32.mxu0 %v15592_v0  ;;  %2090 = vmatprep.mubr.f32.mxu1 %v15592_v0  ;;  %v3780_v38 = vpop.permute.xlu0 %3779 }
  0xc6   : > { %10913 = vmatpush1.msk.msra.mxu1 %vm278_vm0, %v10899_v39  ;;  %v3272_v39 = vsel %vm3265_vm3, %v3260_v23, %v3262_v26  ;;  %v3793_v49 = vsel %vm3265_vm3, %v3778_v32, %v3780_v38 }
  0xc7   : > { %10924 = vmatprep.subr.msk.mxu1 %vm278_vm0, %v2222_v47 }
  0xc8   : > { %10890 = vmatmul.mubr.msk.f32.gmra.mrb[12].mxu0 %vm265_vm1, %v10872_v42  ;;  %10895 = vmatmul.mubr.msk.f32.gmra.mrb[10].mxu1 %vm265_vm1, %v10871_v40  ;;  %v3794_v40 = vsel %vm3265_vm3, %v3780_v38, %v3782_v37 }
  0xc9   : > { %2013 = vmatprep.mubr.f32.mxu0 %v15592_v0  ;;  %2096 = vmatprep.mubr.f32.mxu1 %v15592_v0 }
  0xcc   : > { %10891 = vmatmul.mubr.msk.f32.gmra.mrb[14].mxu0 %vm265_vm1, %v10873_v43  ;;  %10896 = vmatmul.mubr.msk.f32.gmra.mrb[12].mxu1 %vm265_vm1, %v10872_v42  ;;  %v10966_v42 = vld [vmem:[%s15585_s1 + $0xd8] sm:$0xff] }
  0xcd   : > { %2102 = vmatprep.mubr.f32.mxu1 %v15592_v0  ;;  %2315 = vmatprep.mubr.f32.mxu0 %v15592_v0 }
  0xd0   : > { %10897 = vmatmul.mubr.msk.f32.gmra.mrb[14].mxu1 %vm265_vm1, %v10873_v43  ;;  %10908 = vmatmul.mubr.msk.f32.vlgmr.msra.gmra.mrb[0].mxu0 %vm265_vm1, %v10902_v51  ;;  %v3786_v43 = vpop.permute.xlu1 %3785 }
  0xd1   : > { %2321 = vmatprep.mubr.f32.mxu0 %v15592_v0  ;;  %2404 = vmatprep.mubr.f32.mxu1 %v15592_v0 }
  0xd2   : > { %10919 = vmatpush1.msk.msra.mxu0 %vm278_vm0, %v10900_v44  ;;  %v3784_v44 = vpop.permute.xlu0 %3783 }
  0xd3   : > { %10939 = vmatprep.subr.msk.mxu0 %vm278_vm0, %v2741_v52  ;;  %v3795_v55 = vsel %vm3265_vm3, %v3782_v37, %v3784_v44 }
  0xd4   : > { %10909 = vmatmul.mubr.msk.f32.gmra.mrb[2].mxu0 %vm265_vm1, %v10903_v53  ;;  %10914 = vmatmul.mubr.msk.f32.vlgmr.msra.gmra.mrb[0].mxu1 %vm265_vm1, %v10902_v51  ;;  %v3790_v47 = vpop.permute.xlu1 %3789 }
  0xd5   : > { %2327 = vmatprep.mubr.f32.mxu0 %v15592_v0  ;;  %2410 = vmatprep.mubr.f32.mxu1 %v15592_v0 }
  0xd6   : > { %10925 = vmatpush1.msk.msra.mxu1 %vm278_vm0, %v10901_v46  ;;  %v3796_v46 = vsel %vm3265_vm3, %v3784_v44, %v3786_v43  ;;  %v3788_v48 = vpop.permute.xlu0 %3787 }
  0xd7   : > { %10945 = vmatprep.subr.msk.mxu1 %vm278_vm0, %v2743_v56  ;;  %v3798_v50 = vsel %vm3265_vm3, %v3788_v48, %v3790_v47  ;;  %v3797_v60 = vsel %vm3265_vm3, %v3786_v43, %v3788_v48 }
  0xd8   : > { %10910 = vmatmul.mubr.msk.f32.gmra.mrb[4].mxu0 %vm265_vm1, %v10904_v57  ;;  %10915 = vmatmul.mubr.msk.f32.gmra.mrb[2].mxu1 %vm265_vm1, %v10903_v53  ;;  %v4303_v52 = vpop.permute.xlu1 %4302 }
  0xd9   : > { %2333 = vmatprep.mubr.f32.mxu0 %v15592_v0  ;;  %2416 = vmatprep.mubr.f32.mxu1 %v15592_v0 }
  0xdc   : > { %10911 = vmatmul.mubr.msk.f32.gmra.mrb[6].mxu0 %vm265_vm1, %v10905_v58  ;;  %10916 = vmatmul.mubr.msk.f32.gmra.mrb[4].mxu1 %vm265_vm1, %v10904_v57 }
  0xdd   : > { %2422 = vmatprep.mubr.f32.mxu1 %v15592_v0  ;;  %2493 = vmatprep.mubr.f32.mxu0 %v15592_v0 }
  0xe0   : > { %10917 = vmatmul.mubr.msk.f32.gmra.mrb[6].mxu1 %vm265_vm1, %v10905_v58  ;;  %10920 = vmatmul.mubr.msk.f32.vlgmr.msra.gmra.mrb[8].mxu0 %vm265_vm1, %v10902_v51 }
  0xe1   : > { %2499 = vmatprep.mubr.f32.mxu0 %v15592_v0  ;;  %2582 = vmatprep.mubr.f32.mxu1 %v15592_v0 }
  0xe2   : > { %10940 = vmatpush1.msk.msra.mxu0 %vm278_vm0, %v2740_v61 }
  0xe3   : > { %10951 = vmatprep.subr.msk.mxu0 %vm278_vm0, %v2745_v62  ;;  %v10998_v62 = vld [vmem:[%s15585_s1 + $0xf0] sm:$0xff] }
  0xe4   : > { %10921 = vmatmul.mubr.msk.f32.gmra.mrb[10].mxu0 %vm265_vm1, %v10903_v53  ;;  %10926 = vmatmul.mubr.msk.f32.vlgmr.msra.gmra.mrb[8].mxu1 %vm265_vm1, %v10902_v51  ;;  %v4301_v51 = vpop.permute.xlu0 %4300 }
  0xe5   : > { %2505 = vmatprep.mubr.f32.mxu0 %v15592_v0  ;;  %2588 = vmatprep.mubr.f32.mxu1 %v15592_v0  ;;  %v4318_v56 = vsel %vm4316_vm4, %v4301_v51, %v4303_v52 }
  0xe6   : > { %10946 = vmatpush1.msk.msra.mxu1 %vm278_vm0, %v2742_v2 }
  0xe7   : > { %10957 = vmatprep.subr.msk.mxu1 %vm278_vm0, %v2747_v3 }
  0xe8   : > { %10922 = vmatmul.mubr.msk.f32.gmra.mrb[12].mxu0 %vm265_vm1, %v10904_v57  ;;  %10927 = vmatmul.mubr.msk.f32.gmra.mrb[10].mxu1 %vm265_vm1, %v10903_v53  ;;  %v4299_v53 = vpop.permute.xlu0 %4298 }
  0xe9   : > { %2511 = vmatprep.mubr.f32.mxu0 %v15592_v0  ;;  %2594 = vmatprep.mubr.f32.mxu1 %v15592_v0  ;;  %v4317_v3 = vsel %vm4316_vm4, %v4299_v53, %v4301_v51 }
  0xec   : > { %10923 = vmatmul.mubr.msk.f32.gmra.mrb[14].mxu0 %vm265_vm1, %v10905_v58  ;;  %10928 = vmatmul.mubr.msk.f32.gmra.mrb[12].mxu1 %vm265_vm1, %v10904_v57  ;;  %v10997_v57 = vld [vmem:[%s15585_s1 + $0xe8] sm:$0xff]  ;;  %v4307_v59 = vpop.permute.xlu0 %4306 }
  0xed   : > { %2600 = vmatprep.mubr.f32.mxu1 %v15592_v0  ;;  %2840 = vmatprep.mubr.f32.mxu0 %v15592_v0 }
  0xf0   : > { %10929 = vmatmul.mubr.msk.f32.gmra.mrb[14].mxu1 %vm265_vm1, %v10905_v58  ;;  %10941 = vmatmul.mubr.msk.f32.vlgmr.msra.gmra.mrb[0].mxu0 %vm265_vm1, %v10935_v7  ;;  %v4305_v58 = vpop.permute.xlu1 %4304  ;;  %v4311_v2 = vpop.permute.xlu0 %4310 }
  0xf1   : > { %2846 = vmatprep.mubr.f32.mxu0 %v15592_v0  ;;  %2929 = vmatprep.mubr.f32.mxu1 %v15592_v0  ;;  %v4320_v61 = vsel %vm4316_vm4, %v4305_v58, %v4307_v59 }
  0xf2   : > { %10952 = vmatpush1.msk.msra.mxu0 %vm278_vm0, %v2744_v8 }
  0xf3   : > { %10967 = vmatprep.subr.msk.mxu0 %vm278_vm0, %v3267_v9  ;;  %v11024_v9 = vld [vmem:[%s15585_s1 + $0x100] sm:$0xff] }
  0xf4   : > { %10942 = vmatmul.mubr.msk.f32.gmra.mrb[2].mxu0 %vm265_vm1, %v10936_v11  ;;  %10947 = vmatmul.mubr.msk.f32.vlgmr.msra.gmra.mrb[0].mxu1 %vm265_vm1, %v10935_v7  ;;  %v4309_v1 = vpop.permute.xlu1 %4308  ;;  %v4315_v6 = vpop.permute.xlu0 %4314 }
  0xf5   : > { %2852 = vmatprep.mubr.f32.mxu0 %v15592_v0  ;;  %2935 = vmatprep.mubr.f32.mxu1 %v15592_v0  ;;  %v4322_v4 = vsel %vm4316_vm4, %v4309_v1, %v4311_v2  ;;  %v4321_v10 = vsel %vm4316_vm4, %v4307_v59, %v4309_v1 }
  0xf6   : > { %10958 = vmatpush1.msk.msra.mxu1 %vm278_vm0, %v2746_v15 }
  0xf7   : > { %10973 = vmatprep.subr.msk.mxu1 %vm278_vm0, %v3269_v16 }
  0xf8   : > { %10943 = vmatmul.mubr.msk.f32.gmra.mrb[4].mxu0 %vm265_vm1, %v10937_v18  ;;  %10948 = vmatmul.mubr.msk.f32.gmra.mrb[2].mxu1 %vm265_vm1, %v10936_v11  ;;  %v4313_v5 = vpop.permute.xlu1 %4312 }
  0xf9   : > { %2858 = vmatprep.mubr.f32.mxu0 %v15592_v0  ;;  %2941 = vmatprep.mubr.f32.mxu1 %v15592_v0  ;;  %v4324_v8 = vsel %vm4316_vm4, %v4313_v5, %v4315_v6  ;;  %v4323_v12 = vsel %vm4316_vm4, %v4311_v2, %v4313_v5 }
  0xfc   : > { %10944 = vmatmul.mubr.msk.f32.gmra.mrb[6].mxu0 %vm265_vm1, %v10938_v20  ;;  %10949 = vmatmul.mubr.msk.f32.gmra.mrb[4].mxu1 %vm265_vm1, %v10937_v18 }
  0xfd   : > { %2947 = vmatprep.mubr.f32.mxu1 %v15592_v0  ;;  %3018 = vmatprep.mubr.f32.mxu0 %v15592_v0 }
 0x100   : > { %10950 = vmatmul.mubr.msk.f32.gmra.mrb[6].mxu1 %vm265_vm1, %v10938_v20  ;;  %10953 = vmatmul.mubr.msk.f32.vlgmr.msra.gmra.mrb[8].mxu0 %vm265_vm1, %v10935_v7 }
 0x101   : > { %3024 = vmatprep.mubr.f32.mxu0 %v15592_v0  ;;  %3107 = vmatprep.mubr.f32.mxu1 %v15592_v0 }
 0x102   : > { %10968 = vmatpush1.msk.msra.mxu0 %vm278_vm0, %v3266_v24 }
 0x103   : > { %10979 = vmatprep.subr.msk.mxu0 %vm278_vm0, %v3271_v25 }
 0x104   : > { %10954 = vmatmul.mubr.msk.f32.gmra.mrb[10].mxu0 %vm265_vm1, %v10936_v11  ;;  %10959 = vmatmul.mubr.msk.f32.vlgmr.msra.gmra.mrb[8].mxu1 %vm265_vm1, %v10935_v7  ;;  %v4319_v7 = vsel %vm4316_vm4, %v4303_v52, %v4305_v58 }
 0x105   : > { %3030 = vmatprep.mubr.f32.mxu0 %v15592_v0  ;;  %3113 = vmatprep.mubr.f32.mxu1 %v15592_v0 }
 0x106   : > { %10974 = vmatpush1.msk.msra.mxu1 %vm278_vm0, %v3268_v28 }
 0x107   : > { %10985 = vmatprep.subr.msk.mxu1 %vm278_vm0, %v3273_v29 }
 0x108   : > { %10955 = vmatmul.mubr.msk.f32.gmra.mrb[12].mxu0 %vm265_vm1, %v10937_v18  ;;  %10960 = vmatmul.mubr.msk.f32.gmra.mrb[10].mxu1 %vm265_vm1, %v10936_v11  ;;  %v11025_v11 = vld [vmem:[%s15585_s1 + $0x108] sm:$0xff] }
 0x109   : > { %3036 = vmatprep.mubr.f32.mxu0 %v15592_v0  ;;  %3119 = vmatprep.mubr.f32.mxu1 %v15592_v0 }
 0x10c   : > { %10956 = vmatmul.mubr.msk.f32.gmra.mrb[14].mxu0 %vm265_vm1, %v10938_v20  ;;  %10961 = vmatmul.mubr.msk.f32.gmra.mrb[12].mxu1 %vm265_vm1, %v10937_v18 }
 0x10d   : > { %3125 = vmatprep.mubr.f32.mxu1 %v15592_v0  ;;  %3366 = vmatprep.mubr.f32.mxu0 %v15592_v0 }
 0x110   : > { %10962 = vmatmul.mubr.msk.f32.gmra.mrb[14].mxu1 %vm265_vm1, %v10938_v20  ;;  %10969 = vmatmul.mubr.msk.f32.vlgmr.msra.gmra.mrb[0].mxu0 %vm265_vm1, %v10963_v33 }
 0x111   : > { %3372 = vmatprep.mubr.f32.mxu0 %v15592_v0  ;;  %3455 = vmatprep.mubr.f32.mxu1 %v15592_v0 }
 0x112   : > { %10980 = vmatpush1.msk.msra.mxu0 %vm278_vm0, %v3270_v34  ;;  %v13192_v15 = vpop.permute.xlu1 %239 }
 0x113   : > { %11000 = vmatprep.subr.msk.mxu0 %vm278_vm0, %v3792_v35 }
 0x114   : > { %10970 = vmatmul.mubr.msk.f32.gmra.mrb[2].mxu0 %vm265_vm1, %v10964_v36  ;;  %10975 = vmatmul.mubr.msk.f32.vlgmr.msra.gmra.mrb[0].mxu1 %vm265_vm1, %v10963_v33 }
 0x115   : > { %3378 = vmatprep.mubr.f32.mxu0 %v15592_v0  ;;  %3461 = vmatprep.mubr.f32.mxu1 %v15592_v0 }
 0x116   : > { %10986 = vmatpush1.msk.msra.mxu1 %vm278_vm0, %v3272_v39 }
 0x117   : > { %11006 = vmatprep.subr.msk.mxu1 %vm278_vm0, %v3794_v40 }
 0x118   : > { %10971 = vmatmul.mubr.msk.f32.gmra.mrb[4].mxu0 %vm265_vm1, %v10965_v41  ;;  %10976 = vmatmul.mubr.msk.f32.gmra.mrb[2].mxu1 %vm265_vm1, %v10964_v36 }
 0x119   : > { %3384 = vmatprep.mubr.f32.mxu0 %v15592_v0  ;;  %3467 = vmatprep.mubr.f32.mxu1 %v15592_v0 }
 0x11c   : > { %10972 = vmatmul.mubr.msk.f32.gmra.mrb[6].mxu0 %vm265_vm1, %v10966_v42  ;;  %10977 = vmatmul.mubr.msk.f32.gmra.mrb[4].mxu1 %vm265_vm1, %v10965_v41 }
 0x11d   : > { %3473 = vmatprep.mubr.f32.mxu1 %v15592_v0  ;;  %3544 = vmatprep.mubr.f32.mxu0 %v15592_v0 }
 0x120   : > { %10978 = vmatmul.mubr.msk.f32.gmra.mrb[6].mxu1 %vm265_vm1, %v10966_v42  ;;  %10981 = vmatmul.mubr.msk.f32.vlgmr.msra.gmra.mrb[8].mxu0 %vm265_vm1, %v10963_v33 }
 0x121   : > { %3550 = vmatprep.mubr.f32.mxu0 %v15592_v0  ;;  %3633 = vmatprep.mubr.f32.mxu1 %v15592_v0 }
 0x122   : > { %11001 = vmatpush1.msk.msra.mxu0 %vm278_vm0, %v3791_v45  ;;  %v13198_v21 = vpop.permute.xlu1 %249 }
 0x123   : > { %11012 = vmatprep.subr.msk.mxu0 %vm278_vm0, %v3796_v46 }
 0x124   : > { %10982 = vmatmul.mubr.msk.f32.gmra.mrb[10].mxu0 %vm265_vm1, %v10964_v36  ;;  %10987 = vmatmul.mubr.msk.f32.vlgmr.msra.gmra.mrb[8].mxu1 %vm265_vm1, %v10963_v33 }
 0x125   : > { %3556 = vmatprep.mubr.f32.mxu0 %v15592_v0  ;;  %3639 = vmatprep.mubr.f32.mxu1 %v15592_v0 }
 0x126   : > { %11007 = vmatpush1.msk.msra.mxu1 %vm278_vm0, %v3793_v49 }
 0x127   : > { %11018 = vmatprep.subr.msk.mxu1 %vm278_vm0, %v3798_v50  ;;  %v13219_v50 = vpop.permute.xlu1 %254 }
 0x128   : > { %10983 = vmatmul.mubr.msk.f32.gmra.mrb[12].mxu0 %vm265_vm1, %v10965_v41  ;;  %10988 = vmatmul.mubr.msk.f32.gmra.mrb[10].mxu1 %vm265_vm1, %v10964_v36 }
 0x129   : > { %3562 = vmatprep.mubr.f32.mxu0 %v15592_v0  ;;  %3645 = vmatprep.mubr.f32.mxu1 %v15592_v0  ;;  %v13194_v18 = vpop.permute.xlu0 %244 }
 0x12c   : > { %10984 = vmatmul.mubr.msk.f32.gmra.mrb[14].mxu0 %vm265_vm1, %v10966_v42  ;;  %10989 = vmatmul.mubr.msk.f32.gmra.mrb[12].mxu1 %vm265_vm1, %v10965_v41 }
 0x12d   : > { %3651 = vmatprep.mubr.f32.mxu1 %v15592_v0  ;;  %3891 = vmatprep.mubr.f32.mxu0 %v15592_v0 }
 0x130   : > { %10990 = vmatmul.mubr.msk.f32.gmra.mrb[14].mxu1 %vm265_vm1, %v10966_v42  ;;  %11002 = vmatmul.mubr.msk.f32.vlgmr.msra.gmra.mrb[0].mxu0 %vm265_vm1, %v10996_v54 }
 0x131   : > { %3897 = vmatprep.mubr.f32.mxu0 %v15592_v0  ;;  %3980 = vmatprep.mubr.f32.mxu1 %v15592_v0 }
 0x132   : > { %11013 = vmatpush1.msk.msra.mxu0 %vm278_vm0, %v3795_v55 }
 0x133   : > { %11028 = vmatprep.subr.msk.mxu0 %vm278_vm0, %v4318_v56 }
 0x134   : > { %11003 = vmatmul.mubr.msk.f32.gmra.mrb[2].mxu0 %vm265_vm1, %v10997_v57  ;;  %11008 = vmatmul.mubr.msk.f32.vlgmr.msra.gmra.mrb[0].mxu1 %vm265_vm1, %v10996_v54 }
 0x135   : > { %3903 = vmatprep.mubr.f32.mxu0 %v15592_v0  ;;  %3986 = vmatprep.mubr.f32.mxu1 %v15592_v0 }
 0x136   : > { %11019 = vmatpush1.msk.msra.mxu1 %vm278_vm0, %v3797_v60 }
 0x137   : > { %11034 = vmatprep.subr.msk.mxu1 %vm278_vm0, %v4320_v61 }
 0x138   : > { %11004 = vmatmul.mubr.msk.f32.gmra.mrb[4].mxu0 %vm265_vm1, %v10998_v62  ;;  %11009 = vmatmul.mubr.msk.f32.gmra.mrb[2].mxu1 %vm265_vm1, %v10997_v57 }
 0x139   : > { %3909 = vmatprep.mubr.f32.mxu0 %v15592_v0  ;;  %3992 = vmatprep.mubr.f32.mxu1 %v15592_v0 }
 0x13c   : > { %11005 = vmatmul.mubr.msk.f32.gmra.mrb[6].mxu0 %vm265_vm1, %v10999_v63  ;;  %11010 = vmatmul.mubr.msk.f32.gmra.mrb[4].mxu1 %vm265_vm1, %v10998_v62 }
 0x13d   : > { %3998 = vmatprep.mubr.f32.mxu1 %v15592_v0  ;;  %4069 = vmatprep.mubr.f32.mxu0 %v15592_v0 }
 0x140   : > { %11011 = vmatmul.mubr.msk.f32.gmra.mrb[6].mxu1 %vm265_vm1, %v10999_v63  ;;  %11014 = vmatmul.mubr.msk.f32.vlgmr.msra.gmra.mrb[8].mxu0 %vm265_vm1, %v10996_v54 }
 0x141   : > { %4075 = vmatprep.mubr.f32.mxu0 %v15592_v0  ;;  %4158 = vmatprep.mubr.f32.mxu1 %v15592_v0 }
 0x142   : > { %11029 = vmatpush1.msk.msra.mxu0 %vm278_vm0, %v4317_v3 }
 0x143   : > { %11040 = vmatprep.subr.msk.mxu0 %vm278_vm0, %v4322_v4 }
 0x144   : > { %11015 = vmatmul.mubr.msk.f32.gmra.mrb[10].mxu0 %vm265_vm1, %v10997_v57  ;;  %11020 = vmatmul.mubr.msk.f32.vlgmr.msra.gmra.mrb[8].mxu1 %vm265_vm1, %v10996_v54 }
 0x145   : > { %4081 = vmatprep.mubr.f32.mxu0 %v15592_v0  ;;  %4164 = vmatprep.mubr.f32.mxu1 %v15592_v0 }
 0x146   : > { %11035 = vmatpush1.msk.msra.mxu1 %vm278_vm0, %v4319_v7 }
 0x147   : > { %11046 = vmatprep.subr.msk.mxu1 %vm278_vm0, %v4324_v8 }
 0x148   : > { %11016 = vmatmul.mubr.msk.f32.gmra.mrb[12].mxu0 %vm265_vm1, %v10998_v62  ;;  %11021 = vmatmul.mubr.msk.f32.gmra.mrb[10].mxu1 %vm265_vm1, %v10997_v57 }
 0x149   : > { %4087 = vmatprep.mubr.f32.mxu0 %v15592_v0  ;;  %4170 = vmatprep.mubr.f32.mxu1 %v15592_v0 }
 0x14c   : > { %11017 = vmatmul.mubr.msk.f32.gmra.mrb[14].mxu0 %vm265_vm1, %v10999_v63  ;;  %11022 = vmatmul.mubr.msk.f32.gmra.mrb[12].mxu1 %vm265_vm1, %v10998_v62 }
 0x14d   : > { %4176 = vmatprep.mubr.f32.mxu1 %v15592_v0  ;;  %4417 = vmatprep.mubr.f32.mxu0 %v15592_v0 }
 0x150   : > { %11023 = vmatmul.mubr.msk.f32.gmra.mrb[14].mxu1 %vm265_vm1, %v10999_v63  ;;  %11030 = vmatmul.mubr.msk.f32.vlgmr.msra.gmra.mrb[0].mxu0 %vm265_vm1, %v11024_v9 }
 0x151   : > { %4423 = vmatprep.mubr.f32.mxu0 %v15592_v0  ;;  %4506 = vmatprep.mubr.f32.mxu1 %v15592_v0 }
 0x152   : > { %11041 = vmatpush1.msk.msra.mxu0 %vm278_vm0, %v4321_v10 }
 0x154   : > { %11031 = vmatmul.mubr.msk.f32.gmra.mrb[2].mxu0 %vm265_vm1, %v11025_v11  ;;  %11036 = vmatmul.mubr.msk.f32.vlgmr.msra.gmra.mrb[0].mxu1 %vm265_vm1, %v11024_v9 }
 0x155   : > { %4429 = vmatprep.mubr.f32.mxu0 %v15592_v0  ;;  %4512 = vmatprep.mubr.f32.mxu1 %v15592_v0 }
 0x156   : > { %11047 = vmatpush1.msk.msra.mxu1 %vm278_vm0, %v4323_v12 }
 0x158   : > { %11032 = vmatmul.mubr.msk.f32.gmra.mrb[4].mxu0 %vm265_vm1, %v11026_v13  ;;  %11037 = vmatmul.mubr.msk.f32.gmra.mrb[2].mxu1 %vm265_vm1, %v11025_v11 }
 0x159   : > { %4435 = vmatprep.mubr.f32.mxu0 %v15592_v0  ;;  %4518 = vmatprep.mubr.f32.mxu1 %v15592_v0 }
 0x15c   : > { %11033 = vmatmul.mubr.msk.f32.gmra.mrb[6].mxu0 %vm265_vm1, %v11027_v14  ;;  %11038 = vmatmul.mubr.msk.f32.gmra.mrb[4].mxu1 %vm265_vm1, %v11026_v13 }
 0x15d   : > { %4524 = vmatprep.mubr.f32.mxu1 %v15592_v0  ;;  %4595 = vmatprep.mubr.f32.mxu0 %v15592_v0 }
 0x160   : > { %11039 = vmatmul.mubr.msk.f32.gmra.mrb[6].mxu1 %vm265_vm1, %v11027_v14  ;;  %11042 = vmatmul.mubr.msk.f32.vlgmr.msra.gmra.mrb[8].mxu0 %vm265_vm1, %v11024_v9 }
 0x161   : > { %4601 = vmatprep.mubr.f32.mxu0 %v15592_v0  ;;  %4684 = vmatprep.mubr.f32.mxu1 %v15592_v0 }
 0x164   : > { %11043 = vmatmul.mubr.msk.f32.gmra.mrb[10].mxu0 %vm265_vm1, %v11025_v11  ;;  %11048 = vmatmul.mubr.msk.f32.vlgmr.msra.gmra.mrb[8].mxu1 %vm265_vm1, %v11024_v9 }
 0x165   : > { %4607 = vmatprep.mubr.f32.mxu0 %v15592_v0  ;;  %4690 = vmatprep.mubr.f32.mxu1 %v15592_v0 }
 0x168   : > { %11044 = vmatmul.mubr.msk.f32.gmra.mrb[12].mxu0 %vm265_vm1, %v11026_v13  ;;  %11049 = vmatmul.mubr.msk.f32.gmra.mrb[10].mxu1 %vm265_vm1, %v11025_v11 }
 0x169   : > { %4613 = vmatprep.mubr.f32.mxu0 %v15592_v0  ;;  %4696 = vmatprep.mubr.f32.mxu1 %v15592_v0 }
 0x16c   : > { %11045 = vmatmul.mubr.msk.f32.gmra.mrb[14].mxu0 %vm265_vm1, %v11027_v14  ;;  %11050 = vmatmul.mubr.msk.f32.gmra.mrb[12].mxu1 %vm265_vm1, %v11026_v13 }
 0x16d   : > { %4702 = vmatprep.mubr.f32.mxu1 %v15592_v0  ;;  %5038 = vmatprep.mubr.f32.mxu0 %v15592_v0 }
 0x170   : > { %11051 = vmatmul.mubr.msk.f32.gmra.mrb[14].mxu1 %vm265_vm1, %v11027_v14 }
 0x171   : > { %5127 = vmatprep.mubr.f32.mxu1 %v15592_v0 }
 0x223   : > { %v4419_v16 = vpop.f32.mrb[0].mxu0 }
 0x224   : > { %v4421_v17 = vpop.f32.mrb[1].mxu0  ;;  %v11519_v19 = vadd.f32 %v4419_v16, %v13192_v15 }
 0x225   : > { %v11520_v20 = vadd.f32 %v4421_v17, %v13192_v15 }
 0x226   : > { %v4837_v30 = vmax.f32 %v11519_v19, 0.0 }
 0x227   : > { %v4425_v22 = vpop.f32.mrb[2].mxu0  ;;  %v4508_v23 = vpop.f32.mrb[0].mxu1  ;;  %v4838_v31 = vmax.f32 %v11520_v20, 0.0 }
 0x228   : > { %v11521_v24 = vadd.f32 %v4425_v22, %v13194_v18  ;;  %v11527_v25 = vadd.f32 %v4508_v23, %v13192_v15  ;;  %v4427_v26 = vpop.f32.mrb[3].mxu0  ;;  %v4510_v27 = vpop.f32.mrb[1].mxu1 }
 0x229   : > { %v11522_v28 = vadd.f32 %v4427_v26, %v13194_v18  ;;  %v13204_v29 = vadd.f32 %v4510_v27, %v13192_v15 }
 0x22a   : > { %v4845_v32 = vmax.f32 %v11521_v24, 0.0  ;;  %v4839_v33 = vmax.f32 %v11527_v25, 0.0 }
 0x22b   : > { %v4846_v34 = vmax.f32 %v11522_v28, 0.0  ;;  %v4840_v35 = vmax.f32 %v13204_v29, 0.0  ;;  %v4431_v36 = vpop.f32.mrb[4].mxu0  ;;  %v4514_v37 = vpop.f32.mrb[2].mxu1 }
 0x22c   : > { %v11523_v38 = vadd.f32 %v4431_v36, %v13198_v21  ;;  %v11529_v39 = vadd.f32 %v4514_v37, %v13194_v18  ;;  %v4433_v40 = vpop.f32.mrb[5].mxu0  ;;  %v4516_v41 = vpop.f32.mrb[3].mxu1  ;;  %v13209_v42 = vpack.i.bf16 %v4839_v33, %v4838_v31  ;;  %v11233_v43 = vpack.c.bf16 %v4845_v32, %v4837_v30 }
 0x22d   : > { %v11524_v44 = vadd.f32 %v4433_v40, %v13198_v21  ;;  %v13213_v45 = vadd.f32 %v4516_v41, %v13194_v18  ;;  %v11231_v46 = vpack.c.bf16 %v4846_v34, %v4838_v31  ;;  %v13215_v47 = vpack.i.bf16 %v4845_v32, %v4837_v30 }
 0x22e   : > { %v4853_v48 = vmax.f32 %v11523_v38, 0.0  ;;  %v4847_v49 = vmax.f32 %v11529_v39, 0.0  ;;  %11829 = vrot.lane.b32.xlu0 %v13209_v42, %s12513_s24 }
 0x22f   : > { %v4854_v51 = vmax.f32 %v11524_v44, 0.0  ;;  %v4848_v52 = vmax.f32 %v13213_v45, 0.0  ;;  %v4437_v53 = vpop.f32.mrb[6].mxu0  ;;  %v4520_v54 = vpop.f32.mrb[4].mxu1  ;;  %11232 = vmatprep.subr.bf16.mxu0 %v11231_v46  ;;  %v13291_v45 = vld [vmem:[%s15587_s3 + $0x8] sm:$0xff] }
 0x230   : > { %v11525_v55 = vadd.f32 %v4437_v53, %v13219_v50  ;;  %v11531_v56 = vadd.f32 %v4520_v54, %v13198_v21  ;;  %v4439_v57 = vpop.f32.mrb[7].mxu0  ;;  %v4522_v58 = vpop.f32.mrb[5].mxu1  ;;  %11234 = vmatpush1.bf16.msra.mxu0 %v11233_v43  ;;  %v11241_v59 = vpack.c.bf16 %v4847_v49, %v4839_v33  ;;  %v13224_v60 = vpack.i.bf16 %v4847_v49, %v4846_v34  ;;  %v13261_v33 = vld [vmem:[%s15587_s3] sm:$0xff] }
 0x231   : > { %v11526_v61 = vadd.f32 %v4439_v57, %v13219_v50  ;;  %v13228_v62 = vadd.f32 %v4522_v58, %v13198_v21  ;;  %v11239_v63 = vpack.c.bf16 %v4848_v52, %v4840_v35 }
 0x232   : > { %v4861_v1 = vmax.f32 %v11525_v55, 0.0  ;;  %v4855_v2 = vmax.f32 %v11531_v56, 0.0  ;;  %11834 = vrot.lane.b32.xlu0 %v13215_v47, %s12513_s24 }
 0x233   : > { %v4862_v3 = vmax.f32 %v11526_v61, 0.0  ;;  %v4856_v4 = vmax.f32 %v13228_v62, 0.0  ;;  %v4526_v5 = vpop.f32.mrb[6].mxu1  ;;  %v4597_v6 = vpop.f32.mrb[8].mxu0  ;;  %11240 = vmatprep.subr.bf16.mxu1 %v11239_v63 }
 0x234   : > { %v11533_v7 = vadd.f32 %v4526_v5, %v13219_v50  ;;  %v11535_v8 = vadd.f32 %v4597_v6, %v13192_v15  ;;  %v4528_v9 = vpop.f32.mrb[7].mxu1  ;;  %v4599_v10 = vpop.f32.mrb[9].mxu0  ;;  %11242 = vmatpush1.bf16.msra.mxu1 %v11241_v59  ;;  %v13239_v11 = vpack.i.bf16 %v4855_v2, %v4854_v51  ;;  %v11237_v12 = vpack.c.bf16 %v4861_v1, %v4853_v48 }
 0x235   : > { %v13242_v13 = vadd.f32 %v4528_v9, %v13219_v50  ;;  %v11536_v14 = vadd.f32 %v4599_v10, %v13192_v15  ;;  %v11235_v16 = vpack.c.bf16 %v4862_v3, %v4854_v51  ;;  %v13245_v17 = vpack.i.bf16 %v4861_v1, %v4853_v48 }
 0x236   : > { %v4863_v19 = vmax.f32 %v11533_v7, 0.0  ;;  %v4841_v20 = vmax.f32 %v11535_v8, 0.0  ;;  %11839 = vrot.lane.b32.xlu0 %v13224_v60, %s12513_s24  ;;  %11844 = vrot.lane.b32.xlu1 %v13239_v11, %s12513_s24 }
 0x237   : > { %v4864_v22 = vmax.f32 %v13242_v13, 0.0  ;;  %v4842_v23 = vmax.f32 %v11536_v14, 0.0  ;;  %v4603_v24 = vpop.f32.mrb[10].mxu0  ;;  %v4686_v25 = vpop.f32.mrb[8].mxu1  ;;  %11236 = vmatprep.subr.bf16.mxu0 %v11235_v16  ;;  %v4935_v13 = vld [vmem:[%s15587_s3 + $0x10] sm:$0xff] }
 0x238   : > { %v11537_v26 = vadd.f32 %v4603_v24, %v13194_v18  ;;  %v11543_v27 = vadd.f32 %v4686_v25, %v13192_v15  ;;  %v4605_v28 = vpop.f32.mrb[11].mxu0  ;;  %v4688_v30 = vpop.f32.mrb[9].mxu1  ;;  %11238 = vmatpush1.bf16.msra.mxu0 %v11237_v12  ;;  %v13256_v31 = vpack.i.bf16 %v4841_v20, %v4840_v35  ;;  %v11245_v32 = vpack.c.bf16 %v4863_v19, %v4855_v2 }
 0x239   : > { %v11538_v34 = vadd.f32 %v4605_v28, %v13194_v18  ;;  %v11544_v36 = vadd.f32 %v4688_v30, %v13192_v15  ;;  %v11243_v37 = vpack.c.bf16 %v4864_v22, %v4856_v4  ;;  %v13269_v38 = vpack.i.bf16 %v4863_v19, %v4862_v3 }
 0x23a   : > { %v4849_v29 = vmax.f32 %v11537_v26, 0.0  ;;  %v4843_v35 = vmax.f32 %v11543_v27, 0.0  ;;  %11849 = vrot.lane.b32.xlu1 %v13256_v31, %s12513_s24 }
 0x23b   : > { %v4850_v39 = vmax.f32 %v11538_v34, 0.0  ;;  %v4844_v40 = vmax.f32 %v11544_v36, 0.0  ;;  %v4609_v41 = vpop.f32.mrb[12].mxu0  ;;  %v4692_v43 = vpop.f32.mrb[10].mxu1  ;;  %11244 = vmatprep.subr.bf16.mxu1 %v11243_v37  ;;  %11052 = vmatmul.mubr.msk.f32.vlgmr.msra.gmra.mrb[16].mxu0 %vm4961_vm5, %v13261_v33  ;;  %v4936_v36 = vld [vmem:[%s15587_s3 + $0x18] sm:$0xff] }
 0x23c   : > { %v11539_v15 = vadd.f32 %v4609_v41, %v13198_v21  ;;  %v11545_v44 = vadd.f32 %v4692_v43, %v13194_v18  ;;  %v4611_v46 = vpop.f32.mrb[13].mxu0  ;;  %v4694_v48 = vpop.f32.mrb[11].mxu1  ;;  %11246 = vmatpush1.bf16.msra.mxu1 %v11245_v32  ;;  %v13279_v49 = vpack.i.bf16 %v4849_v29, %v4848_v52  ;;  %v11249_v51 = vpack.c.bf16 %v4849_v29, %v4841_v20 }
 0x23d   : > { %v11540_v53 = vadd.f32 %v4611_v46, %v13198_v21  ;;  %v11546_v54 = vadd.f32 %v4694_v48, %v13194_v18  ;;  %v11247_v55 = vpack.c.bf16 %v4850_v39, %v4842_v23  ;;  %v13283_v56 = vpack.i.bf16 %v4843_v35, %v4842_v23  ;;  %5044 = vmatprep.mubr.f32.mxu0 %v15592_v0 }
 0x23e   : > { %v4857_v57 = vmax.f32 %v11539_v15, 0.0  ;;  %v4851_v58 = vmax.f32 %v11545_v44, 0.0  ;;  %11854 = vrot.lane.b32.xlu1 %v13279_v49, %s12513_s24 }
 0x23f   : > { %v4858_v52 = vmax.f32 %v11540_v53, 0.0  ;;  %v4852_v59 = vmax.f32 %v11546_v54, 0.0  ;;  %v4615_v61 = vpop.f32.mrb[14].mxu0  ;;  %v4698_v63 = vpop.f32.mrb[12].mxu1  ;;  %11248 = vmatprep.subr.bf16.mxu0 %v11247_v55  ;;  %11056 = vmatmul.mubr.msk.f32.vlgmr.msra.gmra.mrb[16].mxu1 %vm4961_vm5, %v13261_v33 }
 0x240   : > { %v11541_v18 = vadd.f32 %v4615_v61, %v13219_v50  ;;  %v11547_v1 = vadd.f32 %v4698_v63, %v13198_v21  ;;  %v4617_v2 = vpop.f32.mrb[15].mxu0  ;;  %v4700_v3 = vpop.f32.mrb[13].mxu1  ;;  %11250 = vmatpush1.bf16.msra.mxu0 %v11249_v51  ;;  %v13299_v5 = vpack.i.bf16 %v4857_v57, %v4856_v4  ;;  %v11257_v6 = vpack.c.bf16 %v4851_v58, %v4843_v35 }
 0x241   : > { %v11542_v7 = vadd.f32 %v4617_v2, %v13219_v50  ;;  %v11548_v8 = vadd.f32 %v4700_v3, %v13198_v21  ;;  %v11255_v9 = vpack.c.bf16 %v4852_v59, %v4844_v40  ;;  %v13303_v10 = vpack.i.bf16 %v4851_v58, %v4850_v39  ;;  %11053 = vmatmul.mubr.msk.f32.gmra.mrb[18].mxu0 %vm4961_vm5, %v13291_v45 }
 0x242   : > { %v4865_v12 = vmax.f32 %v11541_v18, 0.0  ;;  %v4859_v14 = vmax.f32 %v11547_v1, 0.0  ;;  %11859 = vrot.lane.b32.xlu1 %v13269_v38, %s12513_s24  ;;  %11869 = vrot.lane.b32.xlu0 %v13299_v5, %s12513_s24  ;;  %v13311_v62 = vpack.i.bf16 %v4852_v59, %v4844_v40 }
 0x243   : > { %v4866_v4 = vmax.f32 %v11542_v7, 0.0  ;;  %v4860_v16 = vmax.f32 %v11548_v8, 0.0  ;;  %v4704_v19 = vpop.f32.mrb[14].mxu1  ;;  %11256 = vmatprep.subr.bf16.mxu1 %v11255_v9  ;;  %5133 = vmatprep.mubr.f32.mxu1 %v15592_v0 }
 0x244   : > { %v11549_v21 = vadd.f32 %v4704_v19, %v13219_v50  ;;  %v4706_v20 = vpop.f32.mrb[15].mxu1  ;;  %11258 = vmatpush1.bf16.msra.mxu1 %v11257_v6  ;;  %v13317_v23 = vpack.i.bf16 %v4865_v12, %v4864_v22  ;;  %v11253_v24 = vpack.c.bf16 %v4865_v12, %v4857_v57  ;;  %v13319_v25 = vpack.i.bf16 %v4859_v14, %v4858_v52 }
 0x245   : > { %v11550_v26 = vadd.f32 %v4706_v20, %v13219_v50  ;;  %v11251_v27 = vpack.c.bf16 %v4866_v4, %v4858_v52  ;;  %5050 = vmatprep.mubr.f32.mxu0 %v15592_v0  ;;  %11057 = vmatmul.mubr.msk.f32.gmra.mrb[18].mxu1 %vm4961_vm5, %v13291_v45 }
 0x246   : > { %v4867_v28 = vmax.f32 %v11549_v21, 0.0  ;;  %11864 = vrot.lane.b32.xlu1 %v13245_v17, %s12513_s24  ;;  %11874 = vrot.lane.b32.xlu0 %v13317_v23, %s12513_s24 }
 0x247   : > { %v4868_v22 = vmax.f32 %v11550_v26, 0.0  ;;  %11252 = vmatprep.subr.bf16.mxu0 %v11251_v27  ;;  %11054 = vmatmul.mubr.msk.f32.gmra.mrb[20].mxu0 %vm4961_vm5, %v4935_v13 }
 0x248   : > { %11254 = vmatpush1.bf16.msra.mxu0 %v11253_v24  ;;  %v11261_v50 = vpack.c.bf16 %v4867_v28, %v4859_v14  ;;  %v13332_v30 = vpack.i.bf16 %v4867_v28, %v4866_v4  ;;  %5139 = vmatprep.mubr.f32.mxu1 %v15592_v0 }
 0x249   : > { %v11259_v32 = vpack.c.bf16 %v4868_v22, %v4860_v16  ;;  %v13334_v34 = vpack.i.bf16 %v4868_v22, %v4860_v16  ;;  %5056 = vmatprep.mubr.f32.mxu0 %v15592_v0  ;;  %11058 = vmatmul.mubr.msk.f32.gmra.mrb[20].mxu1 %vm4961_vm5, %v4935_v13 }
 0x24a   : > { %11884 = vrot.lane.b32.xlu1 %v13303_v10, %s12513_s24  ;;  %11879 = vrot.lane.b32.xlu0 %v13283_v56, %s12513_s24 }
 0x24b   : > { %11260 = vmatprep.subr.bf16.mxu1 %v11259_v32  ;;  %11055 = vmatmul.mubr.msk.f32.gmra.mrb[22].mxu0 %vm4961_vm5, %v4936_v36 }
 0x24c   : > { %11262 = vmatpush1.bf16.msra.mxu1 %v11261_v50  ;;  %5145 = vmatprep.mubr.f32.mxu1 %v15592_v0 }
 0x24d   : > { %5216 = vmatprep.mubr.f32.mxu0 %v15592_v0  ;;  %11059 = vmatmul.mubr.msk.f32.gmra.mrb[22].mxu1 %vm4961_vm5, %v4936_v36 }
 0x24e   : > { %11894 = vrot.lane.b32.xlu1 %v13319_v25, %s12513_s24  ;;  %11889 = vrot.lane.b32.xlu0 %v13311_v62, %s12513_s24 }
 0x24f   : > { %11060 = vmatmul.mubr.msk.f32.vlgmr.msra.gmra.mrb[24].mxu0 %vm4961_vm5, %v13261_v33  ;;  %5305 = vmatprep.mubr.f32.mxu1 %v15592_v0 }
 0x250   : > { %5222 = vmatprep.mubr.f32.mxu0 %v15592_v0 }
 0x251   : > { %11064 = vmatmul.mubr.msk.f32.vlgmr.msra.gmra.mrb[24].mxu1 %vm4961_vm5, %v13261_v33 }
 0x252   : > { %11904 = vrot.lane.b32.xlu1 %v13256_v31, %s12517_s9  ;;  %11899 = vrot.lane.b32.xlu0 %v13209_v42, %s12517_s9 }
 0x253   : > { %11061 = vmatmul.mubr.msk.f32.gmra.mrb[26].mxu0 %vm4961_vm5, %v13291_v45  ;;  %5311 = vmatprep.mubr.f32.mxu1 %v15592_v0 }
 0x254   : > { %5228 = vmatprep.mubr.f32.mxu0 %v15592_v0 }
 0x255   : > { %11065 = vmatmul.mubr.msk.f32.gmra.mrb[26].mxu1 %vm4961_vm5, %v13291_v45 }
 0x256   : > { %11919 = vrot.lane.b32.xlu1 %v13334_v34, %s12513_s24  ;;  %11909 = vrot.lane.b32.xlu0 %v13332_v30, %s12513_s24  ;;  %s12518_s24 = smov 94  }
 0x257   : > { %11062 = vmatmul.mubr.msk.f32.gmra.mrb[28].mxu0 %vm4961_vm5, %v4935_v13  ;;  %5317 = vmatprep.mubr.f32.mxu1 %v15592_v0 }
 0x258   : > { %5234 = vmatprep.mubr.f32.mxu0 %v15592_v0 }
 0x259   : > { %11066 = vmatmul.mubr.msk.f32.gmra.mrb[28].mxu1 %vm4961_vm5, %v4935_v13 }
 0x25a   : > { %11924 = vrot.lane.b32.xlu1 %v13279_v49, %s12517_s9  ;;  %11914 = vrot.lane.b32.xlu0 %v13224_v60, %s12517_s9 }
 0x25b   : > { %11063 = vmatmul.mubr.msk.f32.gmra.mrb[30].mxu0 %vm4961_vm5, %v4936_v36  ;;  %5323 = vmatprep.mubr.f32.mxu1 %v15592_v0 }
 0x25c   : > { %5631 = vmatprep.mubr.f32.mxu0 %v15592_v0 }
 0x25d   : > { %11067 = vmatmul.mubr.msk.f32.gmra.mrb[30].mxu1 %vm4961_vm5, %v4936_v36 }
 0x25e   : > { %11934 = vrot.lane.b32.xlu1 %v13239_v11, %s12517_s9  ;;  %11929 = vrot.lane.b32.xlu0 %v13215_v47, %s12517_s9 }
 0x25f   : > { %5720 = vmatprep.mubr.f32.mxu1 %v15592_v0 }
 0x262   : > { %11944 = vrot.lane.b32.xlu1 %v13269_v38, %s12517_s9  ;;  %11939 = vrot.lane.b32.xlu0 %v13299_v5, %s12517_s9 }
 0x266   : > { %11954 = vrot.lane.b32.xlu1 %v13245_v17, %s12517_s9  ;;  %11949 = vrot.lane.b32.xlu0 %v13317_v23, %s12517_s9 }
 0x26a   : > { %11964 = vrot.lane.b32.xlu1 %v13303_v10, %s12517_s9  ;;  %11959 = vrot.lane.b32.xlu0 %v13283_v56, %s12517_s9 }
 0x26e   : > { %11974 = vrot.lane.b32.xlu1 %v13319_v25, %s12517_s9  ;;  %11969 = vrot.lane.b32.xlu0 %v13311_v62, %s12517_s9 }
 0x272   : > { %11984 = vrot.lane.b32.xlu1 %v13256_v31, %s12514_s10  ;;  %11979 = vrot.lane.b32.xlu0 %v13209_v42, %s12514_s10 }
 0x276   : > { %11999 = vrot.lane.b32.xlu1 %v13334_v34, %s12517_s9  ;;  %11989 = vrot.lane.b32.xlu0 %v13332_v30, %s12517_s9 }
 0x27a   : > { %12004 = vrot.lane.b32.xlu1 %v13279_v49, %s12514_s10  ;;  %11994 = vrot.lane.b32.xlu0 %v13224_v60, %s12514_s10 }
 0x27e   : > { %12014 = vrot.lane.b32.xlu1 %v13239_v11, %s12514_s10  ;;  %12009 = vrot.lane.b32.xlu0 %v13215_v47, %s12514_s10 }
 0x282   : > { %12024 = vrot.lane.b32.xlu1 %v13269_v38, %s12514_s10  ;;  %12019 = vrot.lane.b32.xlu0 %v13299_v5, %s12514_s10 }
 0x286   : > { %12034 = vrot.lane.b32.xlu1 %v13245_v17, %s12514_s10  ;;  %12029 = vrot.lane.b32.xlu0 %v13317_v23, %s12514_s10 }
 0x28a   : > { %12044 = vrot.lane.b32.xlu1 %v13303_v10, %s12514_s10  ;;  %12039 = vrot.lane.b32.xlu0 %v13283_v56, %s12514_s10 }
 0x28e   : > { %12054 = vrot.lane.b32.xlu1 %v13319_v25, %s12514_s10  ;;  %12049 = vrot.lane.b32.xlu0 %v13311_v62, %s12514_s10 }
 0x292   : > { %12064 = vrot.lane.b32.xlu1 %v13256_v31, %s12515_s17  ;;  %12059 = vrot.lane.b32.xlu0 %v13209_v42, %s12515_s17 }
 0x296   : > { %12079 = vrot.lane.b32.xlu1 %v13334_v34, %s12514_s10  ;;  %12069 = vrot.lane.b32.xlu0 %v13332_v30, %s12514_s10 }
 0x29a   : > { %12084 = vrot.lane.b32.xlu1 %v13279_v49, %s12515_s17  ;;  %12074 = vrot.lane.b32.xlu0 %v13224_v60, %s12515_s17 }
 0x29e   : > { %12094 = vrot.lane.b32.xlu1 %v13239_v11, %s12515_s17  ;;  %12089 = vrot.lane.b32.xlu0 %v13215_v47, %s12515_s17 }
 0x2a0   : > { %v11830_v33 = vpop.permute.xlu0 %11829 }
 0x2a1   : > { %v11832_v29 = vunpack.i.h.bf16 %v11830_v33  ;;  %v11831_v35 = vunpack.i.l.bf16 %v11830_v33 }
 0x2a2   : > { %12104 = vrot.lane.b32.xlu1 %v13269_v38, %s12515_s17  ;;  %12099 = vrot.lane.b32.xlu0 %v13299_v5, %s12515_s17 }
 0x2a3   : > { %v5496_v51 = vsel %vm1218_vm2, %v11831_v35, %v11832_v29 }
 0x2a4   : > { %v11835_v37 = vpop.permute.xlu0 %11834 }
 0x2a5   : > { %v11836_v39 = vunpack.i.l.bf16 %v11835_v37  ;;  %v11837_v43 = vunpack.i.h.bf16 %v11835_v37 }
 0x2a6   : > { %12114 = vrot.lane.b32.xlu1 %v13245_v17, %s12515_s17  ;;  %12109 = vrot.lane.b32.xlu0 %v13317_v23, %s12515_s17 }
 0x2a7   : > { %v5495_v46 = vsel %vm1218_vm2, %v11836_v39, %v11831_v35 }
 0x2a8   : > { %v11840_v40 = vpop.permute.xlu0 %11839  ;;  %v11845_v41 = vpop.permute.xlu1 %11844 }
 0x2a9   : > { %v11842_v15 = vunpack.i.h.bf16 %v11840_v40  ;;  %v11841_v44 = vunpack.i.l.bf16 %v11840_v40  ;;  %v11847_v63 = vunpack.i.h.bf16 %v11845_v41  ;;  %v11846_v18 = vunpack.i.l.bf16 %v11845_v41 }
 0x2aa   : > { %12124 = vrot.lane.b32.xlu1 %v13303_v10, %s12515_s17  ;;  %12119 = vrot.lane.b32.xlu0 %v13283_v56, %s12515_s17 }
 0x2ab   : > { %v5502_v48 = vsel %vm1218_vm2, %v11837_v43, %v11841_v44  ;;  %v5503_v53 = vsel %vm1218_vm2, %v11841_v44, %v11842_v15  ;;  %v5510_v21 = vsel %vm1218_vm2, %v11846_v18, %v11847_v63 }
 0x2ac   : > { %v13472_v54 = vpop.permute.xlu1 %11849  ;;  %v11263_v55 = vpack.c.bf16 %v5503_v53, %v5496_v51  ;;  %v11265_v57 = vpack.c.bf16 %v5502_v48, %v5495_v46 }
 0x2ad   : > { %v11852_v58 = vunpack.i.h.bf16 %v13472_v54  ;;  %v11851_v45 = vunpack.i.l.bf16 %v13472_v54 }
 0x2ae   : > { %12134 = vrot.lane.b32.xlu1 %v13319_v25, %s12515_s17  ;;  %12129 = vrot.lane.b32.xlu0 %v13311_v62, %s12515_s17 }
 0x2af   : > { %11264 = vmatprep.subr.bf16.mxu0 %v11263_v55  ;;  %v5497_v1 = vsel %vm1218_vm2, %v11832_v29, %v11851_v45  ;;  %v5498_v3 = vsel %vm1218_vm2, %v11851_v45, %v11852_v58  ;;  %v13525_v55 = vld [vmem:[%s15587_s3 + $0x20] sm:$0xff] }
 0x2b0   : > { %11266 = vmatpush1.bf16.msra.mxu0 %v11265_v57  ;;  %v11855_v52 = vpop.permute.xlu1 %11854 }
 0x2b1   : > { %v11857_v59 = vunpack.i.h.bf16 %v11855_v52  ;;  %v11856_v61 = vunpack.i.l.bf16 %v11855_v52 }
 0x2b2   : > { %12144 = vrot.lane.b32.xlu1 %v13256_v31, %s12518_s24  ;;  %12139 = vrot.lane.b32.xlu0 %v13209_v42, %s12518_s24 }
 0x2b3   : > { %v5504_v2 = vsel %vm1218_vm2, %v11842_v15, %v11856_v61  ;;  %v5505_v6 = vsel %vm1218_vm2, %v11856_v61, %v11857_v59 }
 0x2b4   : > { %v11860_v7 = vpop.permute.xlu1 %11859  ;;  %v13488_v8 = vpop.permute.xlu0 %11869  ;;  %v11271_v9 = vpack.c.bf16 %v5505_v6, %v5498_v3  ;;  %v11273_v12 = vpack.c.bf16 %v5504_v2, %v5497_v1 }
 0x2b5   : > { %v11862_v14 = vunpack.i.h.bf16 %v11860_v7  ;;  %v11861_v4 = vunpack.i.l.bf16 %v11860_v7  ;;  %v11872_v16 = vunpack.i.h.bf16 %v13488_v8  ;;  %v11871_v19 = vunpack.i.l.bf16 %v13488_v8 }
 0x2b6   : > { %11272 = vmatprep.subr.bf16.mxu1 %v11271_v9  ;;  %12159 = vrot.lane.b32.xlu1 %v13334_v34, %s12515_s17  ;;  %v13547_v9 = vld [vmem:[%s15587_s3 + $0x28] sm:$0xff] }
 0x2b7   : > { %12149 = vrot.lane.b32.xlu0 %v13332_v30, %s12515_s17  ;;  %11274 = vmatpush1.bf16.msra.mxu1 %v11273_v12  ;;  %v5517_v20 = vsel %vm1218_vm2, %v11861_v4, %v11862_v14  ;;  %v5511_v32 = vsel %vm1218_vm2, %v11847_v63, %v11871_v19  ;;  %v5512_v36 = vsel %vm1218_vm2, %v11871_v19, %v11872_v16 }
 0x2b8   : > { %v11865_v24 = vpop.permute.xlu1 %11864  ;;  %v13498_v26 = vpop.permute.xlu0 %11874  ;;  %v11267_v27 = vpack.c.bf16 %v5517_v20, %v5510_v21  ;;  %v13561_v20 = vld [vmem:[%s15587_s3 + $0x30] sm:$0xff] }
 0x2b9   : > { %v11867_v28 = vunpack.i.h.bf16 %v11865_v24  ;;  %v11866_v13 = vunpack.i.l.bf16 %v11865_v24  ;;  %v11877_v22 = vunpack.i.h.bf16 %v13498_v26  ;;  %v11876_v50 = vunpack.i.l.bf16 %v13498_v26  ;;  %v13592_v26 = vld [vmem:[%s15587_s3 + $0x38] sm:$0xff] }
 0x2ba   : > { %12164 = vrot.lane.b32.xlu1 %v13279_v49, %s12518_s24  ;;  %11268 = vmatprep.subr.bf16.mxu0 %v11267_v27 }
 0x2bb   : > { %v5509_v33 = vsel %vm1218_vm2, %v11866_v13, %v11846_v18  ;;  %v5516_v37 = vsel %vm1218_vm2, %v11867_v28, %v11861_v4  ;;  %v5518_v29 = vsel %vm1218_vm2, %v11862_v14, %v11876_v50  ;;  %12154 = vrot.lane.b32.xlu0 %v13224_v60, %s12518_s24  ;;  %v5519_v35 = vsel %vm1218_vm2, %v11876_v50, %v11877_v22 }
 0x2bc   : > { %v11885_v39 = vpop.permute.xlu1 %11884  ;;  %v11880_v40 = vpop.permute.xlu0 %11879  ;;  %v11275_v41 = vpack.c.bf16 %v5519_v35, %v5512_v36  ;;  %v11269_v43 = vpack.c.bf16 %v5516_v37, %v5509_v33  ;;  %v11277_v15 = vpack.c.bf16 %v5518_v29, %v5511_v32 }
 0x2bd   : > { %v11887_v44 = vunpack.i.h.bf16 %v11885_v39  ;;  %v11886_v46 = vunpack.i.l.bf16 %v11885_v39  ;;  %v11882_v48 = vunpack.i.h.bf16 %v11880_v40  ;;  %v11881_v51 = vunpack.i.l.bf16 %v11880_v40 }
 0x2be   : > { %12174 = vrot.lane.b32.xlu1 %v13239_v11, %s12518_s24  ;;  %11276 = vmatprep.subr.bf16.mxu1 %v11275_v41 }
 0x2bf   : > { %v5506_v53 = vsel %vm1218_vm2, %v11857_v59, %v11886_v46  ;;  %v5499_v54 = vsel %vm1218_vm2, %v11852_v58, %v11881_v51  ;;  %12169 = vrot.lane.b32.xlu0 %v13215_v47, %s12518_s24  ;;  %11270 = vmatpush1.bf16.msra.mxu0 %v11269_v43  ;;  %v5500_v57 = vsel %vm1218_vm2, %v11881_v51, %v11882_v48 }
 0x2c0   : > { %11278 = vmatpush1.bf16.msra.mxu1 %v11277_v15  ;;  %v11895_v45 = vpop.permute.xlu1 %11894  ;;  %v11890_v52 = vpop.permute.xlu0 %11889  ;;  %v5507_v61 = vsel %vm1218_vm2, %v11886_v46, %v11887_v44  ;;  %v11281_v18 = vpack.c.bf16 %v5506_v53, %v5499_v54 }
 0x2c1   : > { %v11892_v63 = vunpack.i.h.bf16 %v11890_v52  ;;  %v11891_v59 = vunpack.i.l.bf16 %v11890_v52  ;;  %v11279_v58 = vpack.c.bf16 %v5507_v61, %v5500_v57  ;;  %v11897_v14 = vunpack.i.h.bf16 %v11895_v45 }
 0x2c2   : > { %12184 = vrot.lane.b32.xlu1 %v13269_v38, %s12518_s24  ;;  %11072 = vmatmul.mubr.msk.f32.vlgmr.msra.gmra.mrb[32].mxu0 %vm4961_vm5, %v13525_v55  ;;  %v11896_v4 = vunpack.i.l.bf16 %v11895_v45 }
 0x2c3   : > { %v5508_v1 = vsel %vm1218_vm2, %v11887_v44, %v11892_v63  ;;  %v5501_v2 = vsel %vm1218_vm2, %v11882_v48, %v11891_v59  ;;  %11076 = vmatmul.mubr.msk.f32.vlgmr.msra.gmra.mrb[32].mxu1 %vm4961_vm5, %v13525_v55  ;;  %12179 = vrot.lane.b32.xlu0 %v13299_v5, %s12518_s24  ;;  %v11287_v7 = vpack.c.bf16 %v11892_v63, %v11891_v59 }
 0x2c4   : > { %11280 = vmatprep.subr.bf16.mxu0 %v11279_v58  ;;  %v13539_v3 = vpop.permute.xlu1 %11904  ;;  %v13541_v6 = vpop.permute.xlu0 %11899  ;;  %5637 = vmatprep.mubr.f32.mxu0 %v15592_v0  ;;  %v11289_v12 = vpack.c.bf16 %v5508_v1, %v5501_v2  ;;  %v5513_v50 = vsel %vm1218_vm2, %v11872_v16, %v11896_v4  ;;  %v5514_v33 = vsel %vm1218_vm2, %v11896_v4, %v11897_v14 }
 0x2c5   : > { %11282 = vmatpush1.bf16.msra.mxu0 %v11281_v18  ;;  %5726 = vmatprep.mubr.f32.mxu1 %v15592_v0  ;;  %v11907_v32 = vunpack.i.h.bf16 %v13539_v3  ;;  %v11906_v36 = vunpack.i.l.bf16 %v13539_v3  ;;  %v11902_v37 = vunpack.i.h.bf16 %v13541_v6  ;;  %v11901_v16 = vunpack.i.l.bf16 %v13541_v6 }
 0x2c6   : > { %11288 = vmatprep.subr.bf16.mxu1 %v11287_v7  ;;  %12194 = vrot.lane.b32.xlu1 %v13245_v17, %s12518_s24 }
 0x2c7   : > { %11077 = vmatmul.mubr.msk.f32.gmra.mrb[34].mxu1 %vm4961_vm5, %v13547_v9  ;;  %12189 = vrot.lane.b32.xlu0 %v13317_v23, %s12518_s24  ;;  %v6155_v52 = vsel %vm6152_vm6, %v11902_v37, %v11906_v36  ;;  %v6154_v59 = vsel %vm6152_vm6, %v11901_v16, %v11902_v37  ;;  %v6156_v18 = vsel %vm6152_vm6, %v11906_v36, %v11907_v32 }
 0x2c8   : > { %11290 = vmatpush1.bf16.msra.mxu1 %v11289_v12  ;;  %11073 = vmatmul.mubr.msk.f32.gmra.mrb[34].mxu0 %vm4961_vm5, %v13547_v9  ;;  %v11920_v19 = vpop.permute.xlu1 %11919  ;;  %v11910_v21 = vpop.permute.xlu0 %11909 }
 0x2c9   : > { %v11922_v24 = vunpack.i.h.bf16 %v11920_v19  ;;  %v11921_v27 = vunpack.i.l.bf16 %v11920_v19  ;;  %v11912_v28 = vunpack.i.h.bf16 %v11910_v21  ;;  %v11911_v13 = vunpack.i.l.bf16 %v11910_v21  ;;  %5643 = vmatprep.mubr.f32.mxu0 %v15592_v0  ;;  %5732 = vmatprep.mubr.f32.mxu1 %v15592_v0 }
 0x2ca   : > { %12204 = vrot.lane.b32.xlu1 %v13303_v10, %s12518_s24 }
 0x2cb   : > { %v5515_v29 = vsel %vm1218_vm2, %v11897_v14, %v11921_v27  ;;  %v5522_v35 = vsel %vm1218_vm2, %v11912_v28, %v11922_v24  ;;  %v5520_v8 = vsel %vm1218_vm2, %v11877_v22, %v11911_v13  ;;  %11078 = vmatmul.mubr.msk.f32.gmra.mrb[36].mxu1 %vm4961_vm5, %v13561_v20  ;;  %12199 = vrot.lane.b32.xlu0 %v13283_v56, %s12518_s24 }
 0x2cc   : > { %11074 = vmatmul.mubr.msk.f32.gmra.mrb[36].mxu0 %vm4961_vm5, %v13561_v20  ;;  %v13586_v39 = vpop.permute.xlu1 %11924  ;;  %v11915_v40 = vpop.permute.xlu0 %11914  ;;  %5738 = vmatprep.mubr.f32.mxu1 %v15592_v0  ;;  %v11291_v41 = vpack.c.bf16 %v11922_v24, %v11921_v27  ;;  %v5521_v22 = vsel %vm1218_vm2, %v11911_v13, %v11912_v28  ;;  %v11293_v43 = vpack.c.bf16 %v5522_v35, %v5515_v29 }
 0x2cd   : > { %v11927_v15 = vunpack.i.h.bf16 %v13586_v39  ;;  %v11926_v44 = vunpack.i.l.bf16 %v13586_v39  ;;  %v11917_v46 = vunpack.i.h.bf16 %v11915_v40  ;;  %v11916_v48 = vunpack.i.l.bf16 %v11915_v40  ;;  %5649 = vmatprep.mubr.f32.mxu0 %v15592_v0 }
 0x2ce   : > { %11292 = vmatprep.subr.bf16.mxu1 %v11291_v41  ;;  %12214 = vrot.lane.b32.xlu1 %v13319_v25, %s12518_s24  ;;  %v11283_v51 = vpack.c.bf16 %v5521_v22, %v5514_v33  ;;  %v11285_v53 = vpack.c.bf16 %v5520_v8, %v5513_v50 }
 0x2cf   : > { %v6162_v54 = vsel %vm6152_vm6, %v11917_v46, %v11926_v44  ;;  %11079 = vmatmul.mubr.msk.f32.gmra.mrb[38].mxu1 %vm4961_vm5, %v13592_v26  ;;  %12209 = vrot.lane.b32.xlu0 %v13311_v62, %s12518_s24  ;;  %v6161_v57 = vsel %vm6152_vm6, %v11916_v48, %v11917_v46  ;;  %v6163_v45 = vsel %vm6152_vm6, %v11926_v44, %v11927_v15 }
 0x2d0   : > { %11075 = vmatmul.mubr.msk.f32.gmra.mrb[38].mxu0 %vm4961_vm5, %v13592_v26  ;;  %11284 = vmatprep.subr.bf16.mxu0 %v11283_v51  ;;  %v11935_v61 = vpop.permute.xlu1 %11934  ;;  %v11930_v63 = vpop.permute.xlu0 %11929  ;;  %v11295_v2 = vpack.c.bf16 %v6161_v57, %v6154_v59  ;;  %v11303_v6 = vpack.c.bf16 %v6163_v45, %v6156_v18  ;;  %v11305_v7 = vpack.c.bf16 %v6162_v54, %v6155_v52 }
 0x2d1   : > { %11294 = vmatpush1.bf16.msra.mxu1 %v11293_v43  ;;  %11286 = vmatpush1.bf16.msra.mxu0 %v11285_v53  ;;  %v11932_v58 = vunpack.i.h.bf16 %v11930_v63  ;;  %v11931_v1 = vunpack.i.l.bf16 %v11930_v63  ;;  %v11937_v12 = vunpack.i.h.bf16 %v11935_v61  ;;  %v11936_v14 = vunpack.i.l.bf16 %v11935_v61 }
 0x2d2   : > { %5809 = vmatprep.mubr.f32.mxu0 %v15592_v0  ;;  %5898 = vmatprep.mubr.f32.mxu1 %v15592_v0 }
 0x2d3   : > { %v6153_v4 = vsel %vm6152_vm6, %v11931_v1, %v11901_v16  ;;  %v6160_v19 = vsel %vm6152_vm6, %v11932_v58, %v11916_v48  ;;  %12224 = vrot.lane.b32.xlu1 %v13256_v31, %s12519_s16  ;;  %12219 = vrot.lane.b32.xlu0 %v13209_v42, %s12519_s16 }
 0x2d4   : > { %11080 = vmatmul.mubr.msk.f32.vlgmr.msra.gmra.mrb[40].mxu0 %vm4961_vm5, %v13525_v55  ;;  %11084 = vmatmul.mubr.msk.f32.vlgmr.msra.gmra.mrb[40].mxu1 %vm4961_vm5, %v13525_v55  ;;  %v11945_v21 = vpop.permute.xlu1 %11944  ;;  %v13628_v24 = vpop.permute.xlu0 %11939  ;;  %v11297_v13 = vpack.c.bf16 %v6160_v19, %v6153_v4  ;;  %v6168_v55 = vsel %vm6152_vm6, %v11936_v14, %v11937_v12 }
 0x2d5   : > { %11296 = vmatprep.subr.bf16.mxu0 %v11295_v2  ;;  %11304 = vmatprep.subr.bf16.mxu1 %v11303_v6  ;;  %v11947_v27 = vunpack.i.h.bf16 %v11945_v21  ;;  %v11946_v28 = vunpack.i.l.bf16 %v11945_v21  ;;  %v11941_v50 = vunpack.i.l.bf16 %v13628_v24  ;;  %v11942_v33 = vunpack.i.h.bf16 %v13628_v24 }
 0x2d6   : > { %11306 = vmatpush1.bf16.msra.mxu1 %v11305_v7  ;;  %5815 = vmatprep.mubr.f32.mxu0 %v15592_v0 }
 0x2d7   : > { %5904 = vmatprep.mubr.f32.mxu1 %v15592_v0  ;;  %12239 = vrot.lane.b32.xlu1 %v13334_v34, %s12518_s24  ;;  %v6175_v36 = vsel %vm6152_vm6, %v11946_v28, %v11947_v27  ;;  %v6169_v22 = vsel %vm6152_vm6, %v11937_v12, %v11941_v50  ;;  %v6170_v53 = vsel %vm6152_vm6, %v11941_v50, %v11942_v33 }
 0x2d8   : > { %12229 = vrot.lane.b32.xlu0 %v13332_v30, %s12518_s24  ;;  %11081 = vmatmul.mubr.msk.f32.gmra.mrb[42].mxu0 %vm4961_vm5, %v13547_v9  ;;  %v11955_v37 = vpop.permute.xlu1 %11954  ;;  %v13642_v29 = vpop.permute.xlu0 %11949  ;;  %v11299_v35 = vpack.c.bf16 %v6175_v36, %v6168_v55 }
 0x2d9   : > { %11085 = vmatmul.mubr.msk.f32.gmra.mrb[42].mxu1 %vm4961_vm5, %v13547_v9  ;;  %11298 = vmatpush1.bf16.msra.mxu0 %v11297_v13  ;;  %v11957_v8 = vunpack.i.h.bf16 %v11955_v37  ;;  %v11956_v16 = vunpack.i.l.bf16 %v11955_v37  ;;  %v11952_v40 = vunpack.i.h.bf16 %v13642_v29  ;;  %v11951_v41 = vunpack.i.l.bf16 %v13642_v29 }
 0x2da   : > { %5821 = vmatprep.mubr.f32.mxu0 %v15592_v0  ;;  %5910 = vmatprep.mubr.f32.mxu1 %v15592_v0 }
 0x2db   : > { %v6167_v43 = vsel %vm6152_vm6, %v11956_v16, %v11936_v14  ;;  %v6174_v44 = vsel %vm6152_vm6, %v11957_v8, %v11946_v28  ;;  %v6176_v46 = vsel %vm6152_vm6, %v11947_v27, %v11951_v41  ;;  %12244 = vrot.lane.b32.xlu1 %v13279_v49, %s12519_s16  ;;  %11300 = vmatprep.subr.bf16.mxu0 %v11299_v35  ;;  %v13711_v27 = vld [vmem:[%s15587_s3 + $0x48] sm:$0xff] }
 0x2dc   : > { %12234 = vrot.lane.b32.xlu0 %v13224_v60, %s12519_s16  ;;  %11082 = vmatmul.mubr.msk.f32.gmra.mrb[44].mxu0 %vm4961_vm5, %v13561_v20  ;;  %v11965_v9 = vpop.permute.xlu1 %11964  ;;  %v11960_v48 = vpop.permute.xlu0 %11959  ;;  %v11301_v51 = vpack.c.bf16 %v6174_v44, %v6167_v43  ;;  %v6177_v54 = vsel %vm6152_vm6, %v11951_v41, %v11952_v40  ;;  %v11309_v59 = vpack.c.bf16 %v6176_v46, %v6169_v22  ;;  %v13729_v41 = vld [vmem:[%s15587_s3 + $0x50] sm:$0xff] }
 0x2dd   : > { %11086 = vmatmul.mubr.msk.f32.gmra.mrb[44].mxu1 %vm4961_vm5, %v13561_v20  ;;  %v11967_v57 = vunpack.i.h.bf16 %v11965_v9  ;;  %v11966_v45 = vunpack.i.l.bf16 %v11965_v9  ;;  %v11962_v52 = vunpack.i.h.bf16 %v11960_v48  ;;  %v11961_v61 = vunpack.i.l.bf16 %v11960_v48  ;;  %5827 = vmatprep.mubr.f32.mxu0 %v15592_v0 }
 0x2de   : > { %5916 = vmatprep.mubr.f32.mxu1 %v15592_v0  ;;  %11302 = vmatpush1.bf16.msra.mxu0 %v11301_v51  ;;  %v11307_v63 = vpack.c.bf16 %v6177_v54, %v6170_v53 }
 0x2df   : > { %v6164_v18 = vsel %vm6152_vm6, %v11927_v15, %v11966_v45  ;;  %v6157_v58 = vsel %vm6152_vm6, %v11907_v32, %v11961_v61  ;;  %12254 = vrot.lane.b32.xlu1 %v13239_v11, %s12519_s16  ;;  %v6158_v20 = vsel %vm6152_vm6, %v11961_v61, %v11962_v52  ;;  %v6165_v1 = vsel %vm6152_vm6, %v11966_v45, %v11967_v57  ;;  %v13689_v15 = vld [vmem:[%s15587_s3 + $0x40] sm:$0xff]  ;;  %v13760_v61 = vld [vmem:[%s15587_s3 + $0x58] sm:$0xff] }
 0x2e0   : > { %12249 = vrot.lane.b32.xlu0 %v13215_v47, %s12519_s16  ;;  %11083 = vmatmul.mubr.msk.f32.gmra.mrb[46].mxu0 %vm4961_vm5, %v13592_v26  ;;  %v11975_v39 = vpop.permute.xlu1 %11974  ;;  %v11970_v2 = vpop.permute.xlu0 %11969  ;;  %v11311_v6 = vpack.c.bf16 %v6165_v1, %v6158_v20  ;;  %v11313_v7 = vpack.c.bf16 %v6164_v18, %v6157_v58 }
 0x2e1   : > { %11087 = vmatmul.mubr.msk.f32.gmra.mrb[46].mxu1 %vm4961_vm5, %v13592_v26  ;;  %11308 = vmatprep.subr.bf16.mxu1 %v11307_v63  ;;  %v11972_v3 = vunpack.i.h.bf16 %v11970_v2  ;;  %v11971_v32 = vunpack.i.l.bf16 %v11970_v2  ;;  %v11976_v21 = vunpack.i.l.bf16 %v11975_v39  ;;  %v11977_v13 = vunpack.i.h.bf16 %v11975_v39 }
 0x2e2   : > { %11310 = vmatpush1.bf16.msra.mxu1 %v11309_v59  ;;  %6289 = vmatprep.mubr.f32.mxu0 %v15592_v0 }
 0x2e3   : > { %v6166_v12 = vsel %vm6152_vm6, %v11967_v57, %v11972_v3  ;;  %v6159_v14 = vsel %vm6152_vm6, %v11962_v52, %v11971_v32  ;;  %6378 = vmatprep.mubr.f32.mxu1 %v15592_v0  ;;  %12264 = vrot.lane.b32.xlu1 %v13269_v38, %s12519_s16  ;;  %v11319_v19 = vpack.c.bf16 %v11972_v3, %v11971_v32 }
 0x2e4   : > { %12259 = vrot.lane.b32.xlu0 %v13299_v5, %s12519_s16  ;;  %11092 = vmatmul.mubr.msk.f32.vlgmr.msra.gmra.mrb[48].mxu0 %vm4961_vm5, %v13689_v15  ;;  %v13701_v26 = vpop.permute.xlu1 %11984  ;;  %v13703_v4 = vpop.permute.xlu0 %11979  ;;  %v11321_v28 = vpack.c.bf16 %v6166_v12, %v6159_v14  ;;  %v6171_v16 = vsel %vm6152_vm6, %v11942_v33, %v11976_v21  ;;  %v6172_v46 = vsel %vm6152_vm6, %v11976_v21, %v11977_v13 }
 0x2e5   : > { %11096 = vmatmul.mubr.msk.f32.vlgmr.msra.gmra.mrb[48].mxu1 %vm4961_vm5, %v13689_v15  ;;  %11312 = vmatprep.subr.bf16.mxu0 %v11311_v6  ;;  %v11982_v24 = vunpack.i.h.bf16 %v13703_v4  ;;  %v11981_v33 = vunpack.i.l.bf16 %v13703_v4  ;;  %v11987_v45 = vunpack.i.h.bf16 %v13701_v26  ;;  %v11986_v52 = vunpack.i.l.bf16 %v13701_v26  ;;  %v13857_v26 = vld [vmem:[%s15587_s3 + $0x60] sm:$0xff] }
 0x2e6   : > { %11314 = vmatpush1.bf16.msra.mxu0 %v11313_v7  ;;  %6295 = vmatprep.mubr.f32.mxu0 %v15592_v0 }
 0x2e7   : > { %6384 = vmatprep.mubr.f32.mxu1 %v15592_v0  ;;  %11320 = vmatprep.subr.bf16.mxu1 %v11319_v19  ;;  %v6811_v6 = vsel %vm3265_vm3, %v11981_v33, %v11982_v24  ;;  %v6813_v4 = vsel %vm3265_vm3, %v11986_v52, %v11987_v45  ;;  %v6812_v19 = vsel %vm3265_vm3, %v11982_v24, %v11986_v52 }
 0x2e8   : > { %12274 = vrot.lane.b32.xlu1 %v13245_v17, %s12519_s16  ;;  %12269 = vrot.lane.b32.xlu0 %v13317_v23, %s12519_s16  ;;  %v12000_v50 = vpop.permute.xlu1 %11999  ;;  %v11990_v55 = vpop.permute.xlu0 %11989 }
 0x2e9   : > { %11093 = vmatmul.mubr.msk.f32.gmra.mrb[50].mxu0 %vm4961_vm5, %v13711_v27  ;;  %11097 = vmatmul.mubr.msk.f32.gmra.mrb[50].mxu1 %vm4961_vm5, %v13711_v27  ;;  %v12002_v36 = vunpack.i.h.bf16 %v12000_v50  ;;  %v12001_v37 = vunpack.i.l.bf16 %v12000_v50  ;;  %v11992_v35 = vunpack.i.h.bf16 %v11990_v55  ;;  %v11991_v8 = vunpack.i.l.bf16 %v11990_v55 }
 0x2ea   : > { %11322 = vmatpush1.bf16.msra.mxu1 %v11321_v28  ;;  %6301 = vmatprep.mubr.f32.mxu0 %v15592_v0 }
 0x2eb   : > { %v6173_v22 = vsel %vm6152_vm6, %v11977_v13, %v12001_v37  ;;  %v6180_v43 = vsel %vm6152_vm6, %v11992_v35, %v12002_v36  ;;  %6390 = vmatprep.mubr.f32.mxu1 %v15592_v0  ;;  %v11323_v44 = vpack.c.bf16 %v12002_v36, %v12001_v37  ;;  %v6178_v9 = vsel %vm6152_vm6, %v11952_v40, %v11991_v8 }
 0x2ec   : > { %12284 = vrot.lane.b32.xlu1 %v13303_v10, %s12519_s16  ;;  %12279 = vrot.lane.b32.xlu0 %v13283_v56, %s12519_s16  ;;  %v13744_v48 = vpop.permute.xlu1 %12004  ;;  %v11995_v51 = vpop.permute.xlu0 %11994  ;;  %v6179_v53 = vsel %vm6152_vm6, %v11991_v8, %v11992_v35  ;;  %v11325_v59 = vpack.c.bf16 %v6180_v43, %v6173_v22  ;;  %v11317_v18 = vpack.c.bf16 %v6178_v9, %v6171_v16 }
 0x2ed   : > { %11094 = vmatmul.mubr.msk.f32.gmra.mrb[52].mxu0 %vm4961_vm5, %v13729_v41  ;;  %11098 = vmatmul.mubr.msk.f32.gmra.mrb[52].mxu1 %vm4961_vm5, %v13729_v41  ;;  %v12007_v29 = vunpack.i.h.bf16 %v13744_v48  ;;  %v12006_v40 = vunpack.i.l.bf16 %v13744_v48  ;;  %v11997_v54 = vunpack.i.h.bf16 %v11995_v51  ;;  %v11996_v57 = vunpack.i.l.bf16 %v11995_v51 }
 0x2ee   : > { %6307 = vmatprep.mubr.f32.mxu0 %v15592_v0  ;;  %6396 = vmatprep.mubr.f32.mxu1 %v15592_v0  ;;  %v11315_v63 = vpack.c.bf16 %v6179_v53, %v6172_v46 }
 0x2ef   : > { %11324 = vmatprep.subr.bf16.mxu1 %v11323_v44  ;;  %v6818_v58 = vsel %vm3265_vm3, %v11996_v57, %v11997_v54  ;;  %v6820_v39 = vsel %vm3265_vm3, %v12006_v40, %v12007_v29  ;;  %v6819_v2 = vsel %vm3265_vm3, %v11997_v54, %v12006_v40 }
 0x2f0   : > { %12294 = vrot.lane.b32.xlu1 %v13319_v25, %s12519_s16  ;;  %12289 = vrot.lane.b32.xlu0 %v13311_v62, %s12519_s16  ;;  %v13767_v20 = vpop.permute.xlu1 %12014  ;;  %v12010_v1 = vpop.permute.xlu0 %12009  ;;  %v11327_v14 = vpack.c.bf16 %v6818_v58, %v6811_v6  ;;  %v11335_v21 = vpack.c.bf16 %v6820_v39, %v6813_v4  ;;  %v11337_v28 = vpack.c.bf16 %v6819_v2, %v6812_v19 }
 0x2f1   : > { %11095 = vmatmul.mubr.msk.f32.gmra.mrb[54].mxu0 %vm4961_vm5, %v13760_v61  ;;  %11099 = vmatmul.mubr.msk.f32.gmra.mrb[54].mxu1 %vm4961_vm5, %v13760_v61  ;;  %v12012_v3 = vunpack.i.h.bf16 %v12010_v1  ;;  %v12011_v32 = vunpack.i.l.bf16 %v12010_v1  ;;  %v12017_v7 = vunpack.i.h.bf16 %v13767_v20  ;;  %v12016_v12 = vunpack.i.l.bf16 %v13767_v20 }
 0x2f2   : > { %11316 = vmatprep.subr.bf16.mxu0 %v11315_v63  ;;  %11326 = vmatpush1.bf16.msra.mxu1 %v11325_v59 }
 0x2f3   : > { %11318 = vmatpush1.bf16.msra.mxu0 %v11317_v18  ;;  %6467 = vmatprep.mubr.f32.mxu0 %v15592_v0  ;;  %v6810_v13 = vsel %vm3265_vm3, %v12011_v32, %v11981_v33  ;;  %v6817_v50 = vsel %vm3265_vm3, %v12012_v3, %v11996_v57  ;;  %v6825_v8 = vsel %vm3265_vm3, %v12016_v12, %v12017_v7 }
 0x2f4   : > { %6556 = vmatprep.mubr.f32.mxu1 %v15592_v0  ;;  %12304 = vrot.lane.b32.xlu1 %v13256_v31, %s12520_s30  ;;  %v12025_v55 = vpop.permute.xlu1 %12024  ;;  %v13790_v36 = vpop.permute.xlu0 %12019  ;;  %v11329_v16 = vpack.c.bf16 %v6817_v50, %v6810_v13 }
 0x2f5   : > { %12299 = vrot.lane.b32.xlu0 %v13209_v42, %s12520_s30  ;;  %11104 = vmatmul.mubr.msk.f32.vlgmr.msra.gmra.mrb[56].mxu1 %vm4961_vm5, %v13689_v15  ;;  %v12027_v37 = vunpack.i.h.bf16 %v12025_v55  ;;  %v12026_v35 = vunpack.i.l.bf16 %v12025_v55  ;;  %v12022_v22 = vunpack.i.h.bf16 %v13790_v36  ;;  %v12021_v43 = vunpack.i.l.bf16 %v13790_v36 }
 0x2f6   : > { %11100 = vmatmul.mubr.msk.f32.vlgmr.msra.gmra.mrb[56].mxu0 %vm4961_vm5, %v13689_v15  ;;  %11328 = vmatprep.subr.bf16.mxu0 %v11327_v14 }
 0x2f7   : > { %11336 = vmatprep.subr.bf16.mxu1 %v11335_v21  ;;  %6473 = vmatprep.mubr.f32.mxu0 %v15592_v0  ;;  %v6832_v44 = vsel %vm3265_vm3, %v12026_v35, %v12027_v37  ;;  %v6827_v57 = vsel %vm3265_vm3, %v12021_v43, %v12022_v22  ;;  %v6826_v2 = vsel %vm3265_vm3, %v12017_v7, %v12021_v43 }
 0x2f8   : > { %11338 = vmatpush1.bf16.msra.mxu1 %v11337_v28  ;;  %6562 = vmatprep.mubr.f32.mxu1 %v15592_v0  ;;  %v12035_v46 = vpop.permute.xlu1 %12034  ;;  %v13804_v24 = vpop.permute.xlu0 %12029  ;;  %v11331_v15 = vpack.c.bf16 %v6832_v44, %v6825_v8 }
 0x2f9   : > { %12319 = vrot.lane.b32.xlu1 %v13334_v34, %s12519_s16  ;;  %12309 = vrot.lane.b32.xlu0 %v13332_v30, %s12519_s16  ;;  %v12037_v33 = vunpack.i.h.bf16 %v12035_v46  ;;  %v12036_v9 = vunpack.i.l.bf16 %v12035_v46  ;;  %v12032_v51 = vunpack.i.h.bf16 %v13804_v24  ;;  %v12031_v53 = vunpack.i.l.bf16 %v13804_v24 }
 0x2fa   : > { %11101 = vmatmul.mubr.msk.f32.gmra.mrb[58].mxu0 %vm4961_vm5, %v13711_v27  ;;  %11105 = vmatmul.mubr.msk.f32.gmra.mrb[58].mxu1 %vm4961_vm5, %v13711_v27 }
 0x2fb   : > { %11330 = vmatpush1.bf16.msra.mxu0 %v11329_v16  ;;  %v6824_v40 = vsel %vm3265_vm3, %v12036_v9, %v12016_v12  ;;  %v6831_v54 = vsel %vm3265_vm3, %v12037_v33, %v12026_v35  ;;  %6479 = vmatprep.mubr.f32.mxu0 %v15592_v0  ;;  %v6833_v63 = vsel %vm3265_vm3, %v12027_v37, %v12031_v53  ;;  %v13879_v35 = vld [vmem:[%s15587_s3 + $0x68] sm:$0xff] }
 0x2fc   : > { %v11333_v52 = vpack.c.bf16 %v6831_v54, %v6824_v40  ;;  %6568 = vmatprep.mubr.f32.mxu1 %v15592_v0  ;;  %11332 = vmatprep.subr.bf16.mxu0 %v11331_v15  ;;  %v12045_v59 = vpop.permute.xlu1 %12044  ;;  %v12040_v18 = vpop.permute.xlu0 %12039  ;;  %v6834_v27 = vsel %vm3265_vm3, %v12031_v53, %v12032_v51  ;;  %v11341_v32 = vpack.c.bf16 %v6833_v63, %v6826_v2  ;;  %v13897_v54 = vld [vmem:[%s15587_s3 + $0x70] sm:$0xff] }
 0x2fd   : > { %12324 = vrot.lane.b32.xlu1 %v13279_v49, %s12520_s30  ;;  %12314 = vrot.lane.b32.xlu0 %v13224_v60, %s12520_s30  ;;  %v12047_v58 = vunpack.i.h.bf16 %v12045_v59  ;;  %v12046_v20 = vunpack.i.l.bf16 %v12045_v59  ;;  %v12042_v1 = vunpack.i.h.bf16 %v12040_v18  ;;  %v12041_v39 = vunpack.i.l.bf16 %v12040_v18 }
 0x2fe   : > { %11102 = vmatmul.mubr.msk.f32.gmra.mrb[60].mxu0 %vm4961_vm5, %v13729_v41  ;;  %11106 = vmatmul.mubr.msk.f32.gmra.mrb[60].mxu1 %vm4961_vm5, %v13729_v41  ;;  %v11339_v3 = vpack.c.bf16 %v6834_v27, %v6827_v57 }
 0x2ff   : > { %6485 = vmatprep.mubr.f32.mxu0 %v15592_v0  ;;  %6574 = vmatprep.mubr.f32.mxu1 %v15592_v0  ;;  %v6815_v14 = vsel %vm3265_vm3, %v12041_v39, %v12042_v1  ;;  %v6822_v7 = vsel %vm3265_vm3, %v12046_v20, %v12047_v58  ;;  %v6821_v4 = vsel %vm3265_vm3, %v12007_v29, %v12046_v20 }
 0x300   : > { %11334 = vmatpush1.bf16.msra.mxu0 %v11333_v52  ;;  %11340 = vmatprep.subr.bf16.mxu1 %v11339_v3  ;;  %v12055_v6 = vpop.permute.xlu1 %12054  ;;  %v12050_v12 = vpop.permute.xlu0 %12049  ;;  %v6814_v41 = vsel %vm3265_vm3, %v11987_v45, %v12041_v39  ;;  %v11343_v48 = vpack.c.bf16 %v6822_v7, %v6815_v14 }
 0x301   : > { %12334 = vrot.lane.b32.xlu1 %v13239_v11, %s12520_s30  ;;  %12329 = vrot.lane.b32.xlu0 %v13215_v47, %s12520_s30  ;;  %v12052_v19 = vunpack.i.h.bf16 %v12050_v12  ;;  %v12051_v21 = vunpack.i.l.bf16 %v12050_v12  ;;  %v11345_v29 = vpack.c.bf16 %v6821_v4, %v6814_v41  ;;  %v12057_v55 = vunpack.i.h.bf16 %v12055_v6 }
 0x302   : > { %11103 = vmatmul.mubr.msk.f32.gmra.mrb[62].mxu0 %vm4961_vm5, %v13760_v61  ;;  %11107 = vmatmul.mubr.msk.f32.gmra.mrb[62].mxu1 %vm4961_vm5, %v13760_v61  ;;  %v12056_v37 = vunpack.i.l.bf16 %v12055_v6  ;;  %v13929_v6 = vld [vmem:[%s15587_s3 + $0x78] sm:$0xff] }
 0x303   : > { %11342 = vmatpush1.bf16.msra.mxu1 %v11341_v32  ;;  %6946 = vmatprep.mubr.f32.mxu0 %v15592_v0  ;;  %v6823_v13 = vsel %vm3265_vm3, %v12047_v58, %v12052_v19  ;;  %v6816_v61 = vsel %vm3265_vm3, %v12042_v1, %v12051_v21  ;;  %v11351_v50 = vpack.c.bf16 %v12052_v19, %v12051_v21 }
 0x304   : > { %7035 = vmatprep.mubr.f32.mxu1 %v15592_v0  ;;  %v13861_v45 = vpop.permute.xlu1 %12064  ;;  %v13863_v28 = vpop.permute.xlu0 %12059  ;;  %11344 = vmatprep.subr.bf16.mxu0 %v11343_v48  ;;  %v11353_v8 = vpack.c.bf16 %v6823_v13, %v6816_v61  ;;  %v6828_v9 = vsel %vm3265_vm3, %v12022_v22, %v12056_v37  ;;  %v6829_v57 = vsel %vm3265_vm3, %v12056_v37, %v12057_v55 }
 0x305   : > { %12344 = vrot.lane.b32.xlu1 %v13269_v38, %s12520_s30  ;;  %12339 = vrot.lane.b32.xlu0 %v13299_v5, %s12520_s30  ;;  %v12062_v20 = vunpack.i.h.bf16 %v13863_v28  ;;  %v12061_v1 = vunpack.i.l.bf16 %v13863_v28  ;;  %v12067_v3 = vunpack.i.h.bf16 %v13861_v45 }
 0x306   : > { %11112 = vmatmul.mubr.msk.f32.vlgmr.msra.gmra.mrb[64].mxu0 %vm4961_vm5, %v13857_v26  ;;  %11116 = vmatmul.mubr.msk.f32.vlgmr.msra.gmra.mrb[64].mxu1 %vm4961_vm5, %v13857_v26 }
 0x307   : > { %6952 = vmatprep.mubr.f32.mxu0 %v15592_v0  ;;  %11346 = vmatpush1.bf16.msra.mxu0 %v11345_v29  ;;  %v7468_v13 = vsel %vm4316_vm4, %v12061_v1, %v12062_v20 }
 0x308   : > { %7041 = vmatprep.mubr.f32.mxu1 %v15592_v0  ;;  %v12080_v16 = vpop.permute.xlu1 %12079  ;;  %v12070_v43 = vpop.permute.xlu0 %12069  ;;  %11352 = vmatprep.subr.bf16.mxu1 %v11351_v50 }
 0x309   : > { %12354 = vrot.lane.b32.xlu1 %v13245_v17, %s12520_s30  ;;  %v12082_v44 = vunpack.i.h.bf16 %v12080_v16  ;;  %v12081_v46 = vunpack.i.l.bf16 %v12080_v16  ;;  %v12072_v15 = vunpack.i.h.bf16 %v12070_v43  ;;  %v12071_v33 = vunpack.i.l.bf16 %v12070_v43  ;;  %12349 = vrot.lane.b32.xlu0 %v13317_v23, %s12520_s30 }
 0x30a   : > { %11113 = vmatmul.mubr.msk.f32.gmra.mrb[66].mxu0 %vm4961_vm5, %v13879_v35  ;;  %11117 = vmatmul.mubr.msk.f32.gmra.mrb[66].mxu1 %vm4961_vm5, %v13879_v35 }
 0x30b   : > { %v6830_v53 = vsel %vm3265_vm3, %v12057_v55, %v12081_v46  ;;  %v11355_v40 = vpack.c.bf16 %v12082_v44, %v12081_v46  ;;  %11354 = vmatpush1.bf16.msra.mxu1 %v11353_v8  ;;  %v6837_v52 = vsel %vm3265_vm3, %v12072_v15, %v12082_v44  ;;  %v6835_v36 = vsel %vm3265_vm3, %v12032_v51, %v12071_v33 }
 0x30c   : > { %6958 = vmatprep.mubr.f32.mxu0 %v15592_v0  ;;  %v13905_v22 = vpop.permute.xlu1 %12084  ;;  %v12075_v63 = vpop.permute.xlu0 %12074  ;;  %v6836_v59 = vsel %vm3265_vm3, %v12071_v33, %v12072_v15  ;;  %7047 = vmatprep.mubr.f32.mxu1 %v15592_v0  ;;  %v12066_v51 = vunpack.i.l.bf16 %v13861_v45  ;;  %v11349_v32 = vpack.c.bf16 %v6835_v36, %v6828_v9  ;;  %v11357_v14 = vpack.c.bf16 %v6837_v52, %v6830_v53 }
 0x30d   : > { %12364 = vrot.lane.b32.xlu1 %v13303_v10, %s12520_s30  ;;  %v12087_v18 = vunpack.i.h.bf16 %v13905_v22  ;;  %v12086_v27 = vunpack.i.l.bf16 %v13905_v22  ;;  %v12077_v58 = vunpack.i.h.bf16 %v12075_v63  ;;  %v12076_v24 = vunpack.i.l.bf16 %v12075_v63  ;;  %12359 = vrot.lane.b32.xlu0 %v13283_v56, %s12520_s30 }
 0x30e   : > { %11114 = vmatmul.mubr.msk.f32.gmra.mrb[68].mxu0 %vm4961_vm5, %v13897_v54  ;;  %v11347_v39 = vpack.c.bf16 %v6836_v59, %v6829_v57  ;;  %v13920_v2 = vpop.f32.mrb[16].mxu0  ;;  %11118 = vmatmul.mubr.msk.f32.gmra.mrb[68].mxu1 %vm4961_vm5, %v13897_v54  ;;  %v7469_v28 = vsel %vm4316_vm4, %v12062_v20, %v12066_v51  ;;  %v7470_v8 = vsel %vm4316_vm4, %v12066_v51, %v12067_v3 }
 0x30f   : > { %6964 = vmatprep.mubr.f32.mxu0 %v15592_v0  ;;  %v13931_v12 = vpop.f32.mrb[17].mxu0  ;;  %7053 = vmatprep.mubr.f32.mxu1 %v15592_v0  ;;  %v7475_v41 = vsel %vm4316_vm4, %v12076_v24, %v12077_v58  ;;  %v7476_v19 = vsel %vm4316_vm4, %v12077_v58, %v12086_v27  ;;  %v7477_v29 = vsel %vm4316_vm4, %v12086_v27, %v12087_v18 }
 0x310   : > { %11356 = vmatprep.subr.bf16.mxu1 %v11355_v40  ;;  %v13934_v7 = vpop.permute.xlu1 %12094  ;;  %v12090_v4 = vpop.permute.xlu0 %12089  ;;  %11348 = vmatprep.subr.bf16.mxu0 %v11347_v39  ;;  %v11359_v37 = vpack.c.bf16 %v7475_v41, %v7468_v13  ;;  %v11369_v43 = vpack.c.bf16 %v7476_v19, %v7469_v28  ;;  %v11367_v44 = vpack.c.bf16 %v7477_v29, %v7470_v8 }
 0x311   : > { %12374 = vrot.lane.b32.xlu1 %v13319_v25, %s12520_s30  ;;  %v12092_v21 = vunpack.i.h.bf16 %v12090_v4  ;;  %v12091_v48 = vunpack.i.l.bf16 %v12090_v4  ;;  %12369 = vrot.lane.b32.xlu0 %v13311_v62, %s12520_s30  ;;  %v12097_v50 = vunpack.i.h.bf16 %v13934_v7  ;;  %v12096_v55 = vunpack.i.l.bf16 %v13934_v7 }
 0x312   : > { %11115 = vmatmul.mubr.msk.f32.gmra.mrb[70].mxu0 %vm4961_vm5, %v13929_v6  ;;  %v13949_v61 = vpop.f32.mrb[16].mxu1  ;;  %11119 = vmatmul.mubr.msk.f32.gmra.mrb[70].mxu1 %vm4961_vm5, %v13929_v6 }
 0x313   : > { %11350 = vmatpush1.bf16.msra.mxu0 %v11349_v32  ;;  %v13958_v16 = vpop.f32.mrb[17].mxu1  ;;  %11358 = vmatpush1.bf16.msra.mxu1 %v11357_v14  ;;  %v7467_v33 = vsel %vm4316_vm4, %v12091_v48, %v12061_v1  ;;  %v7474_v9 = vsel %vm4316_vm4, %v12092_v21, %v12076_v24  ;;  %v7482_v63 = vsel %vm4316_vm4, %v12096_v55, %v12097_v50 }
 0x314   : > { %7124 = vmatprep.mubr.f32.mxu0 %v15592_v0  ;;  %v12105_v46 = vpop.permute.xlu1 %12104  ;;  %v13961_v15 = vpop.permute.xlu0 %12099  ;;  %7213 = vmatprep.mubr.f32.mxu1 %v15592_v0 }
 0x315   : > { %12384 = vrot.lane.b32.xlu1 %v13256_v31, %s12521_s12  ;;  %v12107_v53 = vunpack.i.h.bf16 %v12105_v46  ;;  %v12106_v40 = vunpack.i.l.bf16 %v12105_v46  ;;  %v13968_v57 = vpop.f32.mrb[18].mxu0  ;;  %12379 = vrot.lane.b32.xlu0 %v13209_v42, %s12521_s12  ;;  %v12102_v36 = vunpack.i.h.bf16 %v13961_v15  ;;  %v12101_v31 = vunpack.i.l.bf16 %v13961_v15  ;;  %v14156_v15 = vld [vmem:[%s15587_s3 + $0x98] sm:$0xff] }
 0x316   : > { %11120 = vmatmul.mubr.msk.f32.vlgmr.msra.gmra.mrb[72].mxu0 %vm4961_vm5, %v13857_v26  ;;  %v13974_v52 = vpop.f32.mrb[19].mxu0  ;;  %11124 = vmatmul.mubr.msk.f32.vlgmr.msra.gmra.mrb[72].mxu1 %vm4961_vm5, %v13857_v26  ;;  %v11361_v42 = vpack.c.bf16 %v7474_v9, %v7467_v33 }
 0x317   : > { %11360 = vmatprep.subr.bf16.mxu0 %v11359_v37  ;;  %v7489_v59 = vsel %vm4316_vm4, %v12106_v40, %v12107_v53  ;;  %11368 = vmatprep.subr.bf16.mxu1 %v11367_v44  ;;  %v7484_v4 = vsel %vm4316_vm4, %v12101_v31, %v12102_v36  ;;  %v7483_v46 = vsel %vm4316_vm4, %v12097_v50, %v12101_v31 }
 0x318   : > { %7130 = vmatprep.mubr.f32.mxu0 %v15592_v0  ;;  %v12115_v27 = vpop.permute.xlu1 %12114  ;;  %v13985_v58 = vpop.permute.xlu0 %12109  ;;  %v11363_v24 = vpack.c.bf16 %v7489_v59, %v7482_v63  ;;  %11370 = vmatpush1.bf16.msra.mxu1 %v11369_v43 }
 0x319   : > { %7219 = vmatprep.mubr.f32.mxu1 %v15592_v0  ;;  %v12117_v26 = vunpack.i.h.bf16 %v12115_v27  ;;  %v12116_v51 = vunpack.i.l.bf16 %v12115_v27  ;;  %v12112_v20 = vunpack.i.h.bf16 %v13985_v58  ;;  %v12111_v1 = vunpack.i.l.bf16 %v13985_v58  ;;  %12399 = vrot.lane.b32.xlu1 %v13334_v34, %s12520_s30  ;;  %v13994_v39 = vpop.f32.mrb[18].mxu1 }
 0x31a   : > { %12389 = vrot.lane.b32.xlu0 %v13332_v30, %s12520_s30  ;;  %11121 = vmatmul.mubr.msk.f32.gmra.mrb[74].mxu0 %vm4961_vm5, %v13879_v35  ;;  %v14005_v41 = vpop.f32.mrb[19].mxu1  ;;  %v14013_v8 = vpop.f32.mrb[20].mxu0 }
 0x31b   : > { %11125 = vmatmul.mubr.msk.f32.gmra.mrb[74].mxu1 %vm4961_vm5, %v13879_v35  ;;  %v7481_v32 = vsel %vm4316_vm4, %v12116_v51, %v12096_v55  ;;  %v7488_v14 = vsel %vm4316_vm4, %v12117_v26, %v12106_v40  ;;  %11362 = vmatpush1.bf16.msra.mxu0 %v11361_v42  ;;  %v7490_v21 = vsel %vm4316_vm4, %v12107_v53, %v12111_v1  ;;  %v14019_v44 = vpop.f32.mrb[21].mxu0 }
 0x31c   : > { %v11365_v19 = vpack.c.bf16 %v7488_v14, %v7481_v32  ;;  %7136 = vmatprep.mubr.f32.mxu0 %v15592_v0  ;;  %v12125_v48 = vpop.permute.xlu1 %12124  ;;  %v12120_v29 = vpop.permute.xlu0 %12119  ;;  %v7491_v35 = vsel %vm4316_vm4, %v12111_v1, %v12112_v20  ;;  %7225 = vmatprep.mubr.f32.mxu1 %v15592_v0  ;;  %v11373_v9 = vpack.c.bf16 %v7490_v21, %v7483_v46 }
 0x31d   : > { %11364 = vmatprep.subr.bf16.mxu0 %v11363_v24  ;;  %v12127_v28 = vunpack.i.h.bf16 %v12125_v48  ;;  %v12126_v13 = vunpack.i.l.bf16 %v12125_v48  ;;  %v12122_v55 = vunpack.i.h.bf16 %v12120_v29  ;;  %v12121_v37 = vunpack.i.l.bf16 %v12120_v29  ;;  %12404 = vrot.lane.b32.xlu1 %v13279_v49, %s12521_s12  ;;  %v14040_v31 = vpop.f32.mrb[20].mxu1 }
 0x31e   : > { %12394 = vrot.lane.b32.xlu0 %v13224_v60, %s12521_s12  ;;  %v11371_v43 = vpack.c.bf16 %v7491_v35, %v7484_v4  ;;  %11122 = vmatmul.mubr.msk.f32.gmra.mrb[76].mxu0 %vm4961_vm5, %v13897_v54  ;;  %v14042_v63 = vpop.f32.mrb[22].mxu0 }
 0x31f   : > { %11126 = vmatmul.mubr.msk.f32.gmra.mrb[76].mxu1 %vm4961_vm5, %v13897_v54  ;;  %v7472_v33 = vsel %vm4316_vm4, %v12121_v37, %v12122_v55  ;;  %7142 = vmatprep.mubr.f32.mxu0 %v15592_v0  ;;  %v7479_v7 = vsel %vm4316_vm4, %v12126_v13, %v12127_v28  ;;  %v7478_v50 = vsel %vm4316_vm4, %v12087_v18, %v12126_v13  ;;  %v14048_v18 = vpop.f32.mrb[21].mxu1  ;;  %v14050_v45 = vpop.f32.mrb[23].mxu0 }
 0x320   : > { %7231 = vmatprep.mubr.f32.mxu1 %v15592_v0  ;;  %v14031_v60 = vpop.permute.xlu1 %12134  ;;  %v12130_v49 = vpop.permute.xlu0 %12129  ;;  %v7471_v54 = vsel %vm4316_vm4, %v12067_v3, %v12121_v37  ;;  %11366 = vmatpush1.bf16.msra.mxu0 %v11365_v19  ;;  %15596 = vst [vmem:[#allocation3_spill] sm:$0xff] %v14042_v63  ;;  %v11375_v22 = vpack.c.bf16 %v7479_v7, %v7472_v33  ;;  %15597 = vst [vmem:[#allocation4_spill] sm:$0xff] %v14050_v45 }
 0x321   : > { %11372 = vmatprep.subr.bf16.mxu1 %v11371_v43  ;;  %v12132_v53 = vunpack.i.h.bf16 %v12130_v49  ;;  %v12131_v40 = vunpack.i.l.bf16 %v12130_v49  ;;  %12414 = vrot.lane.b32.xlu1 %v13239_v11, %s12521_s12  ;;  %v11377_v3 = vpack.c.bf16 %v7478_v50, %v7471_v54  ;;  %v14060_v11 = vld [vmem:[%s15587_s3 + $0x80] sm:$0xff]  ;;  %v12137_v32 = vunpack.i.h.bf16 %v14031_v60 }
 0x322   : > { %12409 = vrot.lane.b32.xlu0 %v13215_v47, %s12521_s12  ;;  %11123 = vmatmul.mubr.msk.f32.gmra.mrb[78].mxu0 %vm4961_vm5, %v13929_v6  ;;  %v14071_v26 = vpop.f32.mrb[24].mxu0  ;;  %v12136_v14 = vunpack.i.l.bf16 %v14031_v60  ;;  %v14119_v60 = vld [vmem:[%s15587_s3 + $0x90] sm:$0xff] }
 0x323   : > { %11127 = vmatmul.mubr.msk.f32.gmra.mrb[78].mxu1 %vm4961_vm5, %v13929_v6  ;;  %7603 = vmatprep.mubr.f32.mxu0 %v15592_v0  ;;  %v7480_v42 = vsel %vm4316_vm4, %v12127_v28, %v12132_v53  ;;  %v7473_v27 = vsel %vm4316_vm4, %v12122_v55, %v12131_v40  ;;  %v11383_v24 = vpack.c.bf16 %v12132_v53, %v12131_v40  ;;  %v14069_v6 = vpop.f32.mrb[22].mxu1  ;;  %v14079_v1 = vpop.f32.mrb[25].mxu0 }
 0x324   : > { %11374 = vmatpush1.bf16.msra.mxu1 %v11373_v9  ;;  %v14062_v47 = vpop.permute.xlu1 %12144  ;;  %v14064_v59 = vpop.permute.xlu0 %12139  ;;  %7692 = vmatprep.mubr.f32.mxu1 %v15592_v0  ;;  %15598 = vst [vmem:[#allocation5_spill] sm:$0xff] %v14069_v6  ;;  %15599 = vst [vmem:[#allocation6_spill] sm:$0xff] %v14071_v26  ;;  %v11385_v4 = vpack.c.bf16 %v7480_v42, %v7473_v27  ;;  %v7486_v46 = vsel %vm4316_vm4, %v12136_v14, %v12137_v32 }
 0x325   : > { %11376 = vmatprep.subr.bf16.mxu0 %v11375_v22  ;;  %12424 = vrot.lane.b32.xlu1 %v13269_v38, %s12521_s12  ;;  %v14077_v51 = vpop.f32.mrb[23].mxu1  ;;  %15601 = vst [vmem:[#allocation8_spill] sm:$0xff] %v14079_v1  ;;  %v14091_v38 = vld [vmem:[%s15587_s3 + $0x88] sm:$0xff]  ;;  %v12141_v33 = vunpack.i.l.bf16 %v14064_v59 }
 0x326   : > { %12419 = vrot.lane.b32.xlu0 %v13299_v5, %s12521_s12  ;;  %15600 = vst [vmem:[#allocation7_spill] sm:$0xff] %v14077_v51  ;;  %11132 = vmatmul.mubr.msk.f32.vlgmr.msra.gmra.mrb[80].mxu0 %vm4961_vm5, %v14060_v11  ;;  %v14093_v19 = vpop.f32.mrb[24].mxu1  ;;  %v14102_v55 = vpop.f32.mrb[26].mxu0 }
 0x327   : > { %11136 = vmatmul.mubr.msk.f32.vlgmr.msra.gmra.mrb[80].mxu1 %vm4961_vm5, %v14060_v11  ;;  %11378 = vmatpush1.bf16.msra.mxu0 %v11377_v3  ;;  %15602 = vst [vmem:[#allocation9_spill] sm:$0xff] %v14093_v19  ;;  %v14096_v35 = vpop.f32.mrb[25].mxu1 }
 0x328   : > { %7609 = vmatprep.mubr.f32.mxu0 %v15592_v0  ;;  %v12160_v5 = vpop.permute.xlu1 %12159  ;;  %7698 = vmatprep.mubr.f32.mxu1 %v15592_v0  ;;  %v14124_v50 = vpop.f32.mrb[26].mxu1 }
 0x329   : > { %11384 = vmatprep.subr.bf16.mxu1 %v11383_v24  ;;  %v12162_v21 = vunpack.i.h.bf16 %v12160_v5  ;;  %v12161_v48 = vunpack.i.l.bf16 %v12160_v5  ;;  %v12150_v29 = vpop.permute.xlu0 %12149  ;;  %12434 = vrot.lane.b32.xlu1 %v13245_v17, %s12521_s12  ;;  %v14110_v17 = vpop.f32.mrb[27].mxu0  ;;  %v7485_v24 = vsel %vm4316_vm4, %v12102_v36, %v12136_v14 }
 0x32a   : > { %12429 = vrot.lane.b32.xlu0 %v13317_v23, %s12521_s12  ;;  %v12152_v28 = vunpack.i.h.bf16 %v12150_v29  ;;  %v12151_v13 = vunpack.i.l.bf16 %v12150_v29  ;;  %11133 = vmatmul.mubr.msk.f32.gmra.mrb[82].mxu0 %vm4961_vm5, %v14091_v38  ;;  %v12142_v23 = vunpack.i.h.bf16 %v14064_v59  ;;  %v14132_v59 = vpop.f32.mrb[27].mxu1 }
 0x32b   : > { %11137 = vmatmul.mubr.msk.f32.gmra.mrb[82].mxu1 %vm4961_vm5, %v14091_v38  ;;  %v7487_v37 = vsel %vm4316_vm4, %v12137_v32, %v12161_v48  ;;  %v11387_v43 = vpack.c.bf16 %v12162_v21, %v12161_v48  ;;  %7615 = vmatprep.mubr.f32.mxu0 %v15592_v0  ;;  %v12147_v32 = vunpack.i.h.bf16 %v14062_v47 }
 0x32c   : > { %11386 = vmatpush1.bf16.msra.mxu1 %v11385_v4  ;;  %v7494_v9 = vsel %vm4316_vm4, %v12152_v28, %v12162_v21  ;;  %v14121_v49 = vpop.permute.xlu1 %12164  ;;  %v7493_v7 = vsel %vm4316_vm4, %v12151_v13, %v12152_v28  ;;  %v7492_v53 = vsel %vm4316_vm4, %v12112_v20, %v12151_v13  ;;  %7704 = vmatprep.mubr.f32.mxu1 %v15592_v0  ;;  %v14138_v20 = vpop.f32.mrb[28].mxu0  ;;  %v12146_v4 = vunpack.i.l.bf16 %v14062_v47 }
 0x32d   : > { %v11389_v54 = vpack.c.bf16 %v7494_v9, %v7487_v37  ;;  %v12167_v40 = vunpack.i.h.bf16 %v14121_v49  ;;  %v12166_v22 = vunpack.i.l.bf16 %v14121_v49  ;;  %v12155_v3 = vpop.permute.xlu0 %12154  ;;  %11388 = vmatprep.subr.bf16.mxu1 %v11387_v43  ;;  %12444 = vrot.lane.b32.xlu1 %v13303_v10, %s12521_s12  ;;  %v11379_v27 = vpack.c.bf16 %v7493_v7, %v7486_v46  ;;  %v14162_v21 = vpop.f32.mrb[28].mxu1 }
 0x32e   : > { %12439 = vrot.lane.b32.xlu0 %v13283_v56, %s12521_s12  ;;  %v12157_v42 = vunpack.i.h.bf16 %v12155_v3  ;;  %v12156_v58 = vunpack.i.l.bf16 %v12155_v3  ;;  %11134 = vmatmul.mubr.msk.f32.gmra.mrb[84].mxu0 %vm4961_vm5, %v14119_v60  ;;  %v14149_v56 = vpop.f32.mrb[29].mxu0  ;;  %v11381_v10 = vpack.c.bf16 %v7492_v53, %v7485_v24  ;;  %v8126_v14 = vsel %vm8124_vm7, %v12141_v33, %v12142_v23  ;;  %v14168_v37 = vpop.f32.mrb[29].mxu1 }
 0x32f   : > { %11138 = vmatmul.mubr.msk.f32.gmra.mrb[84].mxu1 %vm4961_vm5, %v14119_v60  ;;  %7621 = vmatprep.mubr.f32.mxu0 %v15592_v0  ;;  %v8135_v13 = vsel %vm8124_vm7, %v12166_v22, %v12167_v40  ;;  %v14174_v9 = vpop.f32.mrb[30].mxu0  ;;  %v8127_v7 = vsel %vm8124_vm7, %v12142_v23, %v12146_v4 }
 0x330   : > { %7710 = vmatprep.mubr.f32.mxu1 %v15592_v0  ;;  %v14158_v36 = vpop.permute.xlu1 %12174  ;;  %v8133_v5 = vsel %vm8124_vm7, %v12156_v58, %v12157_v42  ;;  %v8134_v48 = vsel %vm8124_vm7, %v12157_v42, %v12166_v22  ;;  %11380 = vmatprep.subr.bf16.mxu0 %v11379_v27  ;;  %v14189_v42 = vpop.f32.mrb[30].mxu1 }
 0x331   : > { %11390 = vmatpush1.bf16.msra.mxu1 %v11389_v54  ;;  %v12170_v29 = vpop.permute.xlu0 %12169  ;;  %v11391_v28 = vpack.c.bf16 %v8133_v5, %v8126_v14  ;;  %12454 = vrot.lane.b32.xlu1 %v13319_v25, %s12521_s12  ;;  %v8128_v54 = vsel %vm8124_vm7, %v12146_v4, %v12147_v32  ;;  %v14184_v25 = vpop.f32.mrb[31].mxu0  ;;  %v11401_v53 = vpack.c.bf16 %v8134_v48, %v8127_v7  ;;  %v12176_v22 = vunpack.i.l.bf16 %v14158_v36 }
 0x332   : > { %12449 = vrot.lane.b32.xlu0 %v13311_v62, %s12521_s12  ;;  %v12172_v43 = vunpack.i.h.bf16 %v12170_v29  ;;  %v12171_v46 = vunpack.i.l.bf16 %v12170_v29  ;;  %11135 = vmatmul.mubr.msk.f32.gmra.mrb[86].mxu0 %vm4961_vm5, %v14156_v15  ;;  %v12177_v62 = vunpack.i.h.bf16 %v14158_v36  ;;  %v11399_v23 = vpack.c.bf16 %v8135_v13, %v8128_v54  ;;  %v14196_v5 = vpop.f32.mrb[31].mxu1  ;;  %v4937_v36 = vld [vmem:[%s15588_s4] sm:$0xff] }
 0x333   : > { %11139 = vmatmul.mubr.msk.f32.gmra.mrb[86].mxu1 %vm4961_vm5, %v14156_v15  ;;  %11382 = vmatpush1.bf16.msra.mxu0 %v11381_v10 }
 0x334   : > { %7781 = vmatprep.mubr.f32.mxu0 %v15592_v0  ;;  %v12185_v3 = vpop.permute.xlu1 %12184  ;;  %v8125_v27 = vsel %vm8124_vm7, %v12171_v46, %v12141_v33  ;;  %v8132_v24 = vsel %vm8124_vm7, %v12172_v43, %v12156_v58  ;;  %7870 = vmatprep.mubr.f32.mxu1 %v15592_v0  ;;  %v4938_v58 = vld [vmem:[%s15588_s4 + $0x8] sm:$0xff] }
 0x335   : > { %11392 = vmatprep.subr.bf16.mxu0 %v11391_v28  ;;  %v12187_v4 = vunpack.i.h.bf16 %v12185_v3  ;;  %v12186_v14 = vunpack.i.l.bf16 %v12185_v3  ;;  %v14194_v10 = vpop.permute.xlu0 %12179  ;;  %12464 = vrot.lane.b32.xlu1 %v13334_v34, %s12521_s12  ;;  %v11393_v48 = vpack.c.bf16 %v8132_v24, %v8125_v27  ;;  %v4940_v27 = vld [vmem:[%s15588_s4 + $0x18] sm:$0xff]  ;;  %v4939_v24 = vld [vmem:[%s15588_s4 + $0x10] sm:$0xff] }
 0x336   : > { %12459 = vrot.lane.b32.xlu0 %v13332_v30, %s12521_s12  ;;  %11140 = vmatmul.mubr.msk.f32.vlgmr.msra.gmra.mrb[88].mxu0 %vm4961_vm5, %v14060_v11  ;;  %v12181_v33 = vunpack.i.l.bf16 %v14194_v10  ;;  %v12182_v30 = vunpack.i.h.bf16 %v14194_v10 }
 0x337   : > { %11144 = vmatmul.mubr.msk.f32.vlgmr.msra.gmra.mrb[88].mxu1 %vm4961_vm5, %v14060_v11  ;;  %v8147_v34 = vsel %vm8124_vm7, %v12186_v14, %v12187_v4  ;;  %11400 = vmatprep.subr.bf16.mxu1 %v11399_v23  ;;  %v8140_v11 = vsel %vm8124_vm7, %v12176_v22, %v12177_v62 }
 0x338   : > { %7787 = vmatprep.mubr.f32.mxu0 %v15592_v0  ;;  %v12195_v29 = vpop.permute.xlu1 %12194  ;;  %11402 = vmatpush1.bf16.msra.mxu1 %v11401_v53  ;;  %v11395_v46 = vpack.c.bf16 %v8147_v34, %v8140_v11  ;;  %v8141_v23 = vsel %vm8124_vm7, %v12177_v62, %v12181_v33 }
 0x339   : > { %7876 = vmatprep.mubr.f32.mxu1 %v15592_v0  ;;  %v12197_v28 = vunpack.i.h.bf16 %v12195_v29  ;;  %v12196_v13 = vunpack.i.l.bf16 %v12195_v29  ;;  %v14218_v43 = vpop.permute.xlu0 %12189  ;;  %4948 = vperm.xlu1 %11826, %v4938_v58  }
 0x33a   : > { %4943 = vperm.xlu0 %11827, %v4937_v36   ;;  %v12192_v7 = vunpack.i.h.bf16 %v14218_v43  ;;  %v12191_v54 = vunpack.i.l.bf16 %v14218_v43  ;;  %11141 = vmatmul.mubr.msk.f32.gmra.mrb[90].mxu0 %vm4961_vm5, %v14091_v38 }
 0x33b   : > { %11145 = vmatmul.mubr.msk.f32.gmra.mrb[90].mxu1 %vm4961_vm5, %v14091_v38  ;;  %v8139_v53 = vsel %vm8124_vm7, %v12196_v13, %v12176_v22  ;;  %v8146_v3 = vsel %vm8124_vm7, %v12197_v28, %v12186_v14  ;;  %11394 = vmatpush1.bf16.msra.mxu0 %v11393_v48  ;;  %v8142_v38 = vsel %vm8124_vm7, %v12181_v33, %v12182_v30 }
 0x33c   : > { %v8148_v62 = vsel %vm8124_vm7, %v12187_v4, %v12191_v54  ;;  %7793 = vmatprep.mubr.f32.mxu0 %v15592_v0  ;;  %v12205_v58 = vpop.permute.xlu1 %12204  ;;  %v8149_v22 = vsel %vm8124_vm7, %v12191_v54, %v12192_v7  ;;  %v11397_v14 = vpack.c.bf16 %v8146_v3, %v8139_v53  ;;  %7882 = vmatprep.mubr.f32.mxu1 %v15592_v0 }
 0x33d   : > { %11396 = vmatprep.subr.bf16.mxu0 %v11395_v46  ;;  %v12207_v36 = vunpack.i.h.bf16 %v12205_v58  ;;  %v12206_v34 = vunpack.i.l.bf16 %v12205_v58  ;;  %v12200_v48 = vpop.permute.xlu0 %12199  ;;  %v11403_v29 = vpack.c.bf16 %v8149_v22, %v8142_v38  ;;  %v11405_v4 = vpack.c.bf16 %v8148_v62, %v8141_v23  ;;  %4958 = vperm.xlu1 %11826, %v4940_v27   ;;  %v14283_v22 = vld [vmem:[%s15587_s3 + $0xa8] sm:$0xff] }
 0x33e   : > { %4953 = vperm.xlu0 %11827, %v4939_v24   ;;  %v12202_v11 = vunpack.i.h.bf16 %v12200_v48  ;;  %v12201_v28 = vunpack.i.l.bf16 %v12200_v48  ;;  %11142 = vmatmul.mubr.msk.f32.gmra.mrb[92].mxu0 %vm4961_vm5, %v14119_v60  ;;  %v14269_v24 = vld [vmem:[%s15587_s3 + $0xa0] sm:$0xff] }
 0x33f   : > { %11146 = vmatmul.mubr.msk.f32.gmra.mrb[92].mxu1 %vm4961_vm5, %v14119_v60  ;;  %v8137_v33 = vsel %vm8124_vm7, %v12206_v34, %v12207_v36  ;;  %v8136_v13 = vsel %vm8124_vm7, %v12167_v40, %v12206_v34  ;;  %7799 = vmatprep.mubr.f32.mxu0 %v15592_v0 }
 0x340   : > { %v8129_v46 = vsel %vm8124_vm7, %v12147_v32, %v12201_v28  ;;  %7888 = vmatprep.mubr.f32.mxu1 %v15592_v0  ;;  %v12215_v54 = vpop.permute.xlu1 %12214  ;;  %v8130_v23 = vsel %vm8124_vm7, %v12201_v28, %v12202_v11  ;;  %11398 = vmatpush1.bf16.msra.mxu0 %v11397_v14 }
 0x341   : > { %11404 = vmatprep.subr.bf16.mxu1 %v11403_v29  ;;  %v12210_v60 = vpop.permute.xlu0 %12209  ;;  %v11407_v53 = vpack.c.bf16 %v8137_v33, %v8130_v23  ;;  %v11409_v27 = vpack.c.bf16 %v8136_v13, %v8129_v46  ;;  %v12217_v14 = vunpack.i.h.bf16 %v12215_v54  ;;  %v14303_v23 = vld [vmem:[%s15587_s3 + $0xb0] sm:$0xff] }
 0x342   : > { %11406 = vmatpush1.bf16.msra.mxu1 %v11405_v4  ;;  %v12212_v3 = vunpack.i.h.bf16 %v12210_v60  ;;  %v12211_v49 = vunpack.i.l.bf16 %v12210_v60  ;;  %11143 = vmatmul.mubr.msk.f32.gmra.mrb[94].mxu0 %vm4961_vm5, %v14156_v15 }
 0x343   : > { %11147 = vmatmul.mubr.msk.f32.gmra.mrb[94].mxu1 %vm4961_vm5, %v14156_v15  ;;  %8261 = vmatprep.mubr.f32.mxu0 %v15592_v0  ;;  %v12216_v15 = vunpack.i.l.bf16 %v12215_v54 }
 0x344   : > { %v8138_v47 = vsel %vm8124_vm7, %v12207_v36, %v12212_v3  ;;  %v8131_v40 = vsel %vm8124_vm7, %v12202_v11, %v12211_v49  ;;  %v11415_v32 = vpack.c.bf16 %v12212_v3, %v12211_v49  ;;  %8350 = vmatprep.mubr.f32.mxu1 %v15592_v0  ;;  %11408 = vmatprep.subr.bf16.mxu0 %v11407_v53 }
 0x345   : > { %v11417_v62 = vpack.c.bf16 %v8138_v47, %v8131_v40  ;;  %v14271_v58 = vpop.permute.xlu1 %12224  ;;  %v14273_v38 = vpop.permute.xlu0 %12219  ;;  %v8143_v34 = vsel %vm8124_vm7, %v12182_v30, %v12216_v15  ;;  %v8144_v49 = vsel %vm8124_vm7, %v12216_v15, %v12217_v14  ;;  %v14324_v15 = vld [vmem:[%s15587_s3 + $0xb8] sm:$0xff] }
 0x346   : > { %11416 = vmatprep.subr.bf16.mxu1 %v11415_v32  ;;  %11152 = vmatmul.mubr.msk.f32.vlgmr.msra.gmra.mrb[96].mxu0 %vm4961_vm5, %v14269_v24  ;;  %v12227_v11 = vunpack.i.h.bf16 %v14271_v58  ;;  %v12226_v28 = vunpack.i.l.bf16 %v14271_v58  ;;  %v12222_v10 = vunpack.i.h.bf16 %v14273_v38  ;;  %v12221_v30 = vunpack.i.l.bf16 %v14273_v38 }
 0x347   : > { %11156 = vmatmul.mubr.msk.f32.vlgmr.msra.gmra.mrb[96].mxu1 %vm4961_vm5, %v14269_v24  ;;  %11410 = vmatpush1.bf16.msra.mxu0 %v11409_v27 }
 0x348   : > { %8267 = vmatprep.mubr.f32.mxu0 %v15592_v0  ;;  %8356 = vmatprep.mubr.f32.mxu1 %v15592_v0 }
 0x349   : > { %11418 = vmatpush1.bf16.msra.mxu1 %v11417_v62  ;;  %v12240_v36 = vpop.permute.xlu1 %12239 }
 0x34a   : > { %v12242_v48 = vunpack.i.h.bf16 %v12240_v36  ;;  %v12241_v29 = vunpack.i.l.bf16 %v12240_v36  ;;  %v12230_v4 = vpop.permute.xlu0 %12229  ;;  %11153 = vmatmul.mubr.msk.f32.gmra.mrb[98].mxu0 %vm4961_vm5, %v14283_v22 }
 0x34b   : > { %11157 = vmatmul.mubr.msk.f32.gmra.mrb[98].mxu1 %vm4961_vm5, %v14283_v22  ;;  %v12232_v33 = vunpack.i.h.bf16 %v12230_v4  ;;  %v12231_v13 = vunpack.i.l.bf16 %v12230_v4  ;;  %8273 = vmatprep.mubr.f32.mxu0 %v15592_v0 }
 0x34c   : > { %v8145_v46 = vsel %vm8124_vm7, %v12217_v14, %v12241_v29  ;;  %v11419_v54 = vpack.c.bf16 %v12242_v48, %v12241_v29  ;;  %8362 = vmatprep.mubr.f32.mxu1 %v15592_v0  ;;  %v8784_v14 = vsel %vm8782_vm8, %v12221_v30, %v12222_v10 }
 0x34d   : > { %v8152_v60 = vsel %vm8124_vm7, %v12232_v33, %v12242_v48  ;;  %v8150_v53 = vsel %vm8124_vm7, %v12192_v7, %v12231_v13  ;;  %v14309_v3 = vpop.permute.xlu1 %12244  ;;  %v8151_v27 = vsel %vm8124_vm7, %v12231_v13, %v12232_v33 }
 0x34e   : > { %v11421_v47 = vpack.c.bf16 %v8152_v60, %v8145_v46  ;;  %v11413_v40 = vpack.c.bf16 %v8150_v53, %v8143_v34  ;;  %v12247_v32 = vunpack.i.h.bf16 %v14309_v3  ;;  %v12246_v62 = vunpack.i.l.bf16 %v14309_v3  ;;  %v12235_v38 = vpop.permute.xlu0 %12234  ;;  %11420 = vmatprep.subr.bf16.mxu1 %v11419_v54  ;;  %11154 = vmatmul.mubr.msk.f32.gmra.mrb[100].mxu0 %vm4961_vm5, %v14303_v23 }
 0x34f   : > { %11158 = vmatmul.mubr.msk.f32.gmra.mrb[100].mxu1 %vm4961_vm5, %v14303_v23  ;;  %v12237_v43 = vunpack.i.h.bf16 %v12235_v38  ;;  %v12236_v7 = vunpack.i.l.bf16 %v12235_v38  ;;  %v11411_v36 = vpack.c.bf16 %v8151_v27, %v8144_v49  ;;  %8279 = vmatprep.mubr.f32.mxu0 %v15592_v0  ;;  %v8786_v34 = vsel %vm8782_vm8, %v12226_v28, %v12227_v11 }
 0x350   : > { %8368 = vmatprep.mubr.f32.mxu1 %v15592_v0  ;;  %v8793_v48 = vsel %vm8782_vm8, %v12246_v62, %v12247_v32  ;;  %11422 = vmatpush1.bf16.msra.mxu1 %v11421_v47  ;;  %v8785_v60 = vsel %vm8782_vm8, %v12222_v10, %v12226_v28 }
 0x351   : > { %v8792_v29 = vsel %vm8782_vm8, %v12237_v43, %v12246_v62  ;;  %11412 = vmatprep.subr.bf16.mxu0 %v11411_v36  ;;  %v12255_v4 = vpop.permute.xlu1 %12254  ;;  %v8791_v33 = vsel %vm8782_vm8, %v12236_v7, %v12237_v43  ;;  %v11431_v13 = vpack.c.bf16 %v8793_v48, %v8786_v34 }
 0x352   : > { %11414 = vmatpush1.bf16.msra.mxu0 %v11413_v40  ;;  %v12250_v46 = vpop.permute.xlu0 %12249  ;;  %v11423_v54 = vpack.c.bf16 %v8791_v33, %v8784_v14  ;;  %v11433_v27 = vpack.c.bf16 %v8792_v29, %v8785_v60  ;;  %v12257_v62 = vunpack.i.h.bf16 %v12255_v4  ;;  %v12256_v47 = vunpack.i.l.bf16 %v12255_v4 }
 0x353   : > { %11155 = vmatmul.mubr.msk.f32.gmra.mrb[102].mxu0 %vm4961_vm5, %v14324_v15  ;;  %11159 = vmatmul.mubr.msk.f32.gmra.mrb[102].mxu1 %vm4961_vm5, %v14324_v15  ;;  %v12252_v53 = vunpack.i.h.bf16 %v12250_v46  ;;  %v12251_v49 = vunpack.i.l.bf16 %v12250_v46 }
 0x354   : > { %8439 = vmatprep.mubr.f32.mxu0 %v15592_v0  ;;  %8528 = vmatprep.mubr.f32.mxu1 %v15592_v0 }
 0x355   : > { %v8783_v40 = vsel %vm8782_vm8, %v12251_v49, %v12221_v30  ;;  %v8790_v38 = vsel %vm8782_vm8, %v12252_v53, %v12236_v7  ;;  %11424 = vmatprep.subr.bf16.mxu0 %v11423_v54  ;;  %11432 = vmatprep.subr.bf16.mxu1 %v11431_v13  ;;  %v12265_v28 = vpop.permute.xlu1 %12264  ;;  %v8798_v7 = vsel %vm8782_vm8, %v12256_v47, %v12257_v62 }
 0x356   : > { %v11425_v10 = vpack.c.bf16 %v8790_v38, %v8783_v40  ;;  %v12267_v43 = vunpack.i.h.bf16 %v12265_v28  ;;  %v12266_v36 = vunpack.i.l.bf16 %v12265_v28  ;;  %v14344_v14 = vpop.permute.xlu0 %12259 }
 0x357   : > { %11160 = vmatmul.mubr.msk.f32.vlgmr.msra.gmra.mrb[104].mxu0 %vm4961_vm5, %v14269_v24  ;;  %11164 = vmatmul.mubr.msk.f32.vlgmr.msra.gmra.mrb[104].mxu1 %vm4961_vm5, %v14269_v24  ;;  %v12262_v34 = vunpack.i.h.bf16 %v14344_v14  ;;  %v12261_v30 = vunpack.i.l.bf16 %v14344_v14  ;;  %v14430_v14 = vld [vmem:[%s15587_s3 + $0xd0] sm:$0xff] }
 0x358   : > { %11434 = vmatpush1.bf16.msra.mxu1 %v11433_v27  ;;  %8445 = vmatprep.mubr.f32.mxu0 %v15592_v0  ;;  %v8805_v48 = vsel %vm8782_vm8, %v12266_v36, %v12267_v43 }
 0x359   : > { %8534 = vmatprep.mubr.f32.mxu1 %v15592_v0  ;;  %11426 = vmatpush1.bf16.msra.mxu0 %v11425_v10  ;;  %v11427_v29 = vpack.c.bf16 %v8805_v48, %v8798_v7  ;;  %v8799_v60 = vsel %vm8782_vm8, %v12257_v62, %v12261_v30  ;;  %v8800_v53 = vsel %vm8782_vm8, %v12261_v30, %v12262_v34 }
 0x35a   : > { %v12275_v4 = vpop.permute.xlu1 %12274  ;;  %v14356_v33 = vpop.permute.xlu0 %12269 }
 0x35b   : > { %11161 = vmatmul.mubr.msk.f32.gmra.mrb[106].mxu0 %vm4961_vm5, %v14283_v22  ;;  %11165 = vmatmul.mubr.msk.f32.gmra.mrb[106].mxu1 %vm4961_vm5, %v14283_v22  ;;  %v12277_v24 = vunpack.i.h.bf16 %v12275_v4  ;;  %v12276_v13 = vunpack.i.l.bf16 %v12275_v4  ;;  %v12272_v46 = vunpack.i.h.bf16 %v14356_v33  ;;  %v12271_v54 = vunpack.i.l.bf16 %v14356_v33 }
 0x35c   : > { %8451 = vmatprep.mubr.f32.mxu0 %v15592_v0  ;;  %8540 = vmatprep.mubr.f32.mxu1 %v15592_v0 }
 0x35d   : > { %v8797_v49 = vsel %vm8782_vm8, %v12276_v13, %v12256_v47  ;;  %v8804_v22 = vsel %vm8782_vm8, %v12277_v24, %v12266_v36  ;;  %v8806_v27 = vsel %vm8782_vm8, %v12267_v43, %v12271_v54  ;;  %11428 = vmatprep.subr.bf16.mxu0 %v11427_v29  ;;  %v8807_v40 = vsel %vm8782_vm8, %v12271_v54, %v12272_v46 }
 0x35e   : > { %v11429_v62 = vpack.c.bf16 %v8804_v22, %v8797_v49  ;;  %v11437_v38 = vpack.c.bf16 %v8806_v27, %v8799_v60  ;;  %v12285_v28 = vpop.permute.xlu1 %12284  ;;  %v12280_v10 = vpop.permute.xlu0 %12279  ;;  %v11435_v7 = vpack.c.bf16 %v8807_v40, %v8800_v53 }
 0x35f   : > { %11162 = vmatmul.mubr.msk.f32.gmra.mrb[108].mxu0 %vm4961_vm5, %v14303_v23  ;;  %11166 = vmatmul.mubr.msk.f32.gmra.mrb[108].mxu1 %vm4961_vm5, %v14303_v23  ;;  %v12287_v47 = vunpack.i.h.bf16 %v12285_v28  ;;  %v12286_v36 = vunpack.i.l.bf16 %v12285_v28  ;;  %v12282_v30 = vunpack.i.h.bf16 %v12280_v10  ;;  %v12281_v43 = vunpack.i.l.bf16 %v12280_v10 }
 0x360   : > { %8457 = vmatprep.mubr.f32.mxu0 %v15592_v0  ;;  %8546 = vmatprep.mubr.f32.mxu1 %v15592_v0 }
 0x361   : > { %v8794_v48 = vsel %vm8782_vm8, %v12247_v32, %v12286_v36  ;;  %v8787_v29 = vsel %vm8782_vm8, %v12227_v11, %v12281_v43  ;;  %11430 = vmatpush1.bf16.msra.mxu0 %v11429_v62  ;;  %11436 = vmatprep.subr.bf16.mxu1 %v11435_v7  ;;  %v8788_v23 = vsel %vm8782_vm8, %v12281_v43, %v12282_v30  ;;  %v14399_v11 = vld [vmem:[%s15587_s3 + $0xc0] sm:$0xff]  ;;  %v14415_v62 = vld [vmem:[%s15587_s3 + $0xc8] sm:$0xff] }
 0x362   : > { %11438 = vmatpush1.bf16.msra.mxu1 %v11437_v38  ;;  %v12295_v4 = vpop.permute.xlu1 %12294  ;;  %v12290_v24 = vpop.permute.xlu0 %12289  ;;  %v8795_v13 = vsel %vm8782_vm8, %v12286_v36, %v12287_v47  ;;  %v11441_v58 = vpack.c.bf16 %v8794_v48, %v8787_v29 }
 0x363   : > { %11163 = vmatmul.mubr.msk.f32.gmra.mrb[110].mxu0 %vm4961_vm5, %v14324_v15  ;;  %11167 = vmatmul.mubr.msk.f32.gmra.mrb[110].mxu1 %vm4961_vm5, %v14324_v15  ;;  %v12292_v3 = vunpack.i.h.bf16 %v12290_v24  ;;  %v12291_v32 = vunpack.i.l.bf16 %v12290_v24  ;;  %v11439_v54 = vpack.c.bf16 %v8795_v13, %v8788_v23  ;;  %v12296_v27 = vunpack.i.l.bf16 %v12295_v4 }
 0x364   : > { %8919 = vmatprep.mubr.f32.mxu0 %v15592_v0  ;;  %9008 = vmatprep.mubr.f32.mxu1 %v15592_v0  ;;  %v12297_v38 = vunpack.i.h.bf16 %v12295_v4 }
 0x365   : > { %v8796_v60 = vsel %vm8782_vm8, %v12287_v47, %v12292_v3  ;;  %v8789_v53 = vsel %vm8782_vm8, %v12282_v30, %v12291_v32  ;;  %v11447_v49 = vpack.c.bf16 %v12292_v3, %v12291_v32  ;;  %11440 = vmatprep.subr.bf16.mxu0 %v11439_v54  ;;  %v8801_v28 = vsel %vm8782_vm8, %v12262_v34, %v12296_v27 }
 0x366   : > { %v11449_v22 = vpack.c.bf16 %v8796_v60, %v8789_v53  ;;  %v14403_v15 = vpop.permute.xlu1 %12304  ;;  %v8802_v60 = vsel %vm8782_vm8, %v12296_v27, %v12297_v38 }
 0x367   : > { %11172 = vmatmul.mubr.msk.f32.vlgmr.msra.gmra.mrb[112].mxu0 %vm4961_vm5, %v14399_v11  ;;  %11176 = vmatmul.mubr.msk.f32.vlgmr.msra.gmra.mrb[112].mxu1 %vm4961_vm5, %v14399_v11  ;;  %v14409_v40 = vpop.permute.xlu0 %12299  ;;  %v12307_v34 = vunpack.i.h.bf16 %v14403_v15  ;;  %v12306_v48 = vunpack.i.l.bf16 %v14403_v15 }
 0x368   : > { %11442 = vmatpush1.bf16.msra.mxu0 %v11441_v58  ;;  %8925 = vmatprep.mubr.f32.mxu0 %v15592_v0  ;;  %v12302_v29 = vunpack.i.h.bf16 %v14409_v40  ;;  %v12301_v23 = vunpack.i.l.bf16 %v14409_v40  ;;  %v14456_v40 = vld [vmem:[%s15587_s3 + $0xd8] sm:$0xff] }
 0x369   : > { %9014 = vmatprep.mubr.f32.mxu1 %v15592_v0  ;;  %11448 = vmatprep.subr.bf16.mxu1 %v11447_v49 }
 0x36a   : > { %11450 = vmatpush1.bf16.msra.mxu1 %v11449_v22 }
 0x36b   : > { %11173 = vmatmul.mubr.msk.f32.gmra.mrb[114].mxu0 %vm4961_vm5, %v14415_v62  ;;  %11177 = vmatmul.mubr.msk.f32.gmra.mrb[114].mxu1 %vm4961_vm5, %v14415_v62  ;;  %v12320_v10 = vpop.permute.xlu1 %12319  ;;  %v12310_v7 = vpop.permute.xlu0 %12309 }
 0x36c   : > { %v12322_v47 = vunpack.i.h.bf16 %v12320_v10  ;;  %v12321_v36 = vunpack.i.l.bf16 %v12320_v10  ;;  %v12312_v30 = vunpack.i.h.bf16 %v12310_v7  ;;  %v12311_v43 = vunpack.i.l.bf16 %v12310_v7  ;;  %8931 = vmatprep.mubr.f32.mxu0 %v15592_v0  ;;  %9020 = vmatprep.mubr.f32.mxu1 %v15592_v0 }
 0x36e   : > { %v8803_v4 = vsel %vm8782_vm8, %v12297_v38, %v12321_v36  ;;  %v11451_v24 = vpack.c.bf16 %v12322_v47, %v12321_v36  ;;  %v8810_v13 = vsel %vm8782_vm8, %v12312_v30, %v12322_v47  ;;  %v8808_v3 = vsel %vm8782_vm8, %v12272_v46, %v12311_v43 }
 0x36f   : > { %v11453_v32 = vpack.c.bf16 %v8810_v13, %v8803_v4  ;;  %11174 = vmatmul.mubr.msk.f32.gmra.mrb[116].mxu0 %vm4961_vm5, %v14430_v14  ;;  %11178 = vmatmul.mubr.msk.f32.gmra.mrb[116].mxu1 %vm4961_vm5, %v14430_v14  ;;  %v14445_v58 = vpop.permute.xlu1 %12324  ;;  %v12315_v54 = vpop.permute.xlu0 %12314  ;;  %v8809_v53 = vsel %vm8782_vm8, %v12311_v43, %v12312_v30  ;;  %v11445_v10 = vpack.c.bf16 %v8808_v3, %v8801_v28 }
 0x370   : > { %v12327_v49 = vunpack.i.h.bf16 %v14445_v58  ;;  %v12326_v33 = vunpack.i.l.bf16 %v14445_v58  ;;  %v12317_v22 = vunpack.i.h.bf16 %v12315_v54  ;;  %v12316_v46 = vunpack.i.l.bf16 %v12315_v54  ;;  %8937 = vmatprep.mubr.f32.mxu0 %v15592_v0  ;;  %9026 = vmatprep.mubr.f32.mxu1 %v15592_v0 }
 0x371   : > { %11452 = vmatprep.subr.bf16.mxu1 %v11451_v24  ;;  %v11443_v27 = vpack.c.bf16 %v8809_v53, %v8802_v60  ;;  %v9444_v38 = vsel %vm9440_vm9, %v12306_v48, %v12307_v34  ;;  %v9442_v47 = vsel %vm9440_vm9, %v12301_v23, %v12302_v29  ;;  %v9443_v43 = vsel %vm9440_vm9, %v12302_v29, %v12306_v48 }
 0x372   : > { %v9450_v7 = vsel %vm9440_vm9, %v12317_v22, %v12326_v33  ;;  %11454 = vmatpush1.bf16.msra.mxu1 %v11453_v32  ;;  %v9449_v36 = vsel %vm9440_vm9, %v12316_v46, %v12317_v22  ;;  %v9451_v30 = vsel %vm9440_vm9, %v12326_v33, %v12327_v49 }
 0x373   : > { %11175 = vmatmul.mubr.msk.f32.gmra.mrb[118].mxu0 %vm4961_vm5, %v14456_v40  ;;  %11179 = vmatmul.mubr.msk.f32.gmra.mrb[118].mxu1 %vm4961_vm5, %v14456_v40  ;;  %v12335_v28 = vpop.permute.xlu1 %12334  ;;  %v12330_v4 = vpop.permute.xlu0 %12329  ;;  %v11455_v24 = vpack.c.bf16 %v9449_v36, %v9442_v47  ;;  %v11463_v13 = vpack.c.bf16 %v9451_v30, %v9444_v38  ;;  %v11465_v3 = vpack.c.bf16 %v9450_v7, %v9443_v43 }
 0x374   : > { %11444 = vmatprep.subr.bf16.mxu0 %v11443_v27  ;;  %v12332_v32 = vunpack.i.h.bf16 %v12330_v4  ;;  %v12331_v54 = vunpack.i.l.bf16 %v12330_v4  ;;  %9097 = vmatprep.mubr.f32.mxu0 %v15592_v0  ;;  %v12337_v48 = vunpack.i.h.bf16 %v12335_v28  ;;  %v12336_v29 = vunpack.i.l.bf16 %v12335_v28 }
 0x375   : > { %11446 = vmatpush1.bf16.msra.mxu0 %v11445_v10  ;;  %9186 = vmatprep.mubr.f32.mxu1 %v15592_v0 }
 0x376   : > { %v9441_v60 = vsel %vm9440_vm9, %v12331_v54, %v12301_v23  ;;  %v9448_v53 = vsel %vm9440_vm9, %v12332_v32, %v12316_v46  ;;  %11456 = vmatprep.subr.bf16.mxu0 %v11455_v24  ;;  %11464 = vmatprep.subr.bf16.mxu1 %v11463_v13  ;;  %v9456_v46 = vsel %vm9440_vm9, %v12336_v29, %v12337_v48 }
 0x377   : > { %v11457_v33 = vpack.c.bf16 %v9448_v53, %v9441_v60  ;;  %11184 = vmatmul.mubr.msk.f32.vlgmr.msra.gmra.mrb[120].mxu1 %vm4961_vm5, %v14399_v11  ;;  %v12345_v22 = vpop.permute.xlu1 %12344  ;;  %v14478_v27 = vpop.permute.xlu0 %12339 }
 0x378   : > { %11180 = vmatmul.mubr.msk.f32.vlgmr.msra.gmra.mrb[120].mxu0 %vm4961_vm5, %v14399_v11  ;;  %11466 = vmatpush1.bf16.msra.mxu1 %v11465_v3  ;;  %v12347_v10 = vunpack.i.h.bf16 %v12345_v22  ;;  %v12346_v38 = vunpack.i.l.bf16 %v12345_v22  ;;  %v12341_v23 = vunpack.i.l.bf16 %v14478_v27  ;;  %v12342_v47 = vunpack.i.h.bf16 %v14478_v27 }
 0x379   : > { %9103 = vmatprep.mubr.f32.mxu0 %v15592_v0  ;;  %9192 = vmatprep.mubr.f32.mxu1 %v15592_v0 }
 0x37a   : > { %11458 = vmatpush1.bf16.msra.mxu0 %v11457_v33  ;;  %v9463_v7 = vsel %vm9440_vm9, %v12346_v38, %v12347_v10  ;;  %v9457_v13 = vsel %vm9440_vm9, %v12337_v48, %v12341_v23  ;;  %v9458_v53 = vsel %vm9440_vm9, %v12341_v23, %v12342_v47 }
 0x37b   : > { %11185 = vmatmul.mubr.msk.f32.gmra.mrb[122].mxu1 %vm4961_vm5, %v14415_v62  ;;  %v12355_v11 = vpop.permute.xlu1 %12354  ;;  %v11459_v36 = vpack.c.bf16 %v9463_v7, %v9456_v46  ;;  %v14492_v28 = vpop.permute.xlu0 %12349 }
 0x37c   : > { %11181 = vmatmul.mubr.msk.f32.gmra.mrb[122].mxu0 %vm4961_vm5, %v14415_v62  ;;  %v12357_v30 = vunpack.i.h.bf16 %v12355_v11  ;;  %v12356_v43 = vunpack.i.l.bf16 %v12355_v11  ;;  %9198 = vmatprep.mubr.f32.mxu1 %v15592_v0  ;;  %v12352_v4 = vunpack.i.h.bf16 %v14492_v28  ;;  %v12351_v24 = vunpack.i.l.bf16 %v14492_v28 }
 0x37d   : > { %9109 = vmatprep.mubr.f32.mxu0 %v15592_v0  ;;  %11460 = vmatprep.subr.bf16.mxu0 %v11459_v36 }
 0x37e   : > { %v9455_v3 = vsel %vm9440_vm9, %v12356_v43, %v12336_v29  ;;  %v9462_v32 = vsel %vm9440_vm9, %v12357_v30, %v12346_v38  ;;  %v9464_v54 = vsel %vm9440_vm9, %v12347_v10, %v12351_v24  ;;  %v9465_v33 = vsel %vm9440_vm9, %v12351_v24, %v12352_v4 }
 0x37f   : > { %v11461_v62 = vpack.c.bf16 %v9462_v32, %v9455_v3  ;;  %11186 = vmatmul.mubr.msk.f32.gmra.mrb[124].mxu1 %vm4961_vm5, %v14430_v14  ;;  %v12365_v60 = vpop.permute.xlu1 %12364  ;;  %v11469_v48 = vpack.c.bf16 %v9464_v54, %v9457_v13  ;;  %v12360_v38 = vpop.permute.xlu0 %12359  ;;  %v11467_v10 = vpack.c.bf16 %v9465_v33, %v9458_v53  ;;  %v14547_v33 = vld [vmem:[%s15587_s3 + $0xe8] sm:$0xff] }
 0x380   : > { %11182 = vmatmul.mubr.msk.f32.gmra.mrb[124].mxu0 %vm4961_vm5, %v14430_v14  ;;  %v12367_v29 = vunpack.i.h.bf16 %v12365_v60  ;;  %v12366_v22 = vunpack.i.l.bf16 %v12365_v60  ;;  %9204 = vmatprep.mubr.f32.mxu1 %v15592_v0  ;;  %v12362_v46 = vunpack.i.h.bf16 %v12360_v38  ;;  %v12361_v7 = vunpack.i.l.bf16 %v12360_v38  ;;  %v14560_v38 = vld [vmem:[%s15587_s3 + $0xf0] sm:$0xff] }
 0x381   : > { %9115 = vmatprep.mubr.f32.mxu0 %v15592_v0  ;;  %11462 = vmatpush1.bf16.msra.mxu0 %v11461_v62 }
 0x382   : > { %v9452_v23 = vsel %vm9440_vm9, %v12327_v49, %v12366_v22  ;;  %11468 = vmatprep.subr.bf16.mxu1 %v11467_v10  ;;  %v9453_v11 = vsel %vm9440_vm9, %v12366_v22, %v12367_v29  ;;  %v9445_v14 = vsel %vm9440_vm9, %v12307_v34, %v12361_v7  ;;  %v9446_v30 = vsel %vm9440_vm9, %v12361_v7, %v12362_v46  ;;  %v14529_v49 = vld [vmem:[%s15587_s3 + $0xe0] sm:$0xff] }
 0x383   : > { %11187 = vmatmul.mubr.msk.f32.gmra.mrb[126].mxu1 %vm4961_vm5, %v14456_v40  ;;  %v12375_v36 = vpop.permute.xlu1 %12374  ;;  %v12370_v58 = vpop.permute.xlu0 %12369  ;;  %v11471_v43 = vpack.c.bf16 %v9453_v11, %v9446_v30  ;;  %v11473_v15 = vpack.c.bf16 %v9452_v23, %v9445_v14 }
 0x384   : > { %11183 = vmatmul.mubr.msk.f32.gmra.mrb[126].mxu0 %vm4961_vm5, %v14456_v40  ;;  %11470 = vmatpush1.bf16.msra.mxu1 %v11469_v48  ;;  %v12372_v24 = vunpack.i.h.bf16 %v12370_v58  ;;  %v12371_v34 = vunpack.i.l.bf16 %v12370_v58  ;;  %v12377_v62 = vunpack.i.h.bf16 %v12375_v36  ;;  %v12376_v54 = vunpack.i.l.bf16 %v12375_v36 }
 0x385   : > { %9577 = vmatprep.mubr.f32.mxu0 %v15592_v0  ;;  %9666 = vmatprep.mubr.f32.mxu1 %v15592_v0 }
 0x386   : > { %11472 = vmatprep.subr.bf16.mxu0 %v11471_v43  ;;  %v9454_v13 = vsel %vm9440_vm9, %v12367_v29, %v12372_v24  ;;  %v9447_v40 = vsel %vm9440_vm9, %v12362_v46, %v12371_v34  ;;  %v11479_v3 = vpack.c.bf16 %v12372_v24, %v12371_v34  ;;  %v9459_v48 = vsel %vm9440_vm9, %v12342_v47, %v12376_v54 }
 0x387   : > { %11196 = vmatmul.mubr.msk.f32.vlgmr.msra.gmra.mrb[128].mxu1 %vm4961_vm5, %v14529_v49  ;;  %v14537_v32 = vpop.permute.xlu1 %12384  ;;  %v11481_v60 = vpack.c.bf16 %v9454_v13, %v9447_v40  ;;  %v14541_v53 = vpop.permute.xlu0 %12379  ;;  %v9460_v10 = vsel %vm9440_vm9, %v12376_v54, %v12377_v62 }
 0x388   : > { %11192 = vmatmul.mubr.msk.f32.vlgmr.msra.gmra.mrb[128].mxu0 %vm4961_vm5, %v14529_v49  ;;  %9672 = vmatprep.mubr.f32.mxu1 %v15592_v0  ;;  %v15590_v47 = vunpack.i.h.bf16 %v14537_v32  ;;  %v12386_v11 = vunpack.i.l.bf16 %v14537_v32  ;;  %v12382_v14 = vunpack.i.h.bf16 %v14541_v53  ;;  %v12381_v36 = vunpack.i.l.bf16 %v14541_v53 }
 0x389   : > { %11474 = vmatpush1.bf16.msra.mxu0 %v11473_v15  ;;  %9583 = vmatprep.mubr.f32.mxu0 %v15592_v0 }
 0x38a   : > { %11480 = vmatprep.subr.bf16.mxu1 %v11479_v3  ;;  %v14584_v3 = vld [vmem:[%s15587_s3 + $0xf8] sm:$0xff]  ;;  %v10101_v53 = vsel %vm10098_vm10, %v12382_v14, %v12386_v11 }
 0x38b   : > { %11197 = vmatmul.mubr.msk.f32.gmra.mrb[130].mxu1 %vm4961_vm5, %v14547_v33  ;;  %v12400_v29 = vpop.permute.xlu1 %12399 }
 0x38c   : > { %11193 = vmatmul.mubr.msk.f32.gmra.mrb[130].mxu0 %vm4961_vm5, %v14547_v33  ;;  %11482 = vmatpush1.bf16.msra.mxu1 %v11481_v60  ;;  %v12390_v22 = vpop.permute.xlu0 %12389  ;;  %v12402_v46 = vunpack.i.h.bf16 %v12400_v29  ;;  %v12401_v7 = vunpack.i.l.bf16 %v12400_v29  ;;  %v10102_v29 = vsel %vm10098_vm10, %v12386_v11, %v15590_v47 }
 0x38d   : > { %v12392_v23 = vunpack.i.h.bf16 %v12390_v22  ;;  %v12391_v27 = vunpack.i.l.bf16 %v12390_v22  ;;  %9589 = vmatprep.mubr.f32.mxu0 %v15592_v0  ;;  %9678 = vmatprep.mubr.f32.mxu1 %v15592_v0 }
 0x38e   : > { %v9461_v30 = vsel %vm9440_vm9, %v12377_v62, %v12401_v7  ;;  %v11483_v58 = vpack.c.bf16 %v12402_v46, %v12401_v7 }
 0x38f   : > { %v9468_v43 = vsel %vm9440_vm9, %v12392_v23, %v12402_v46  ;;  %v9466_v15 = vsel %vm9440_vm9, %v12352_v4, %v12391_v27  ;;  %11198 = vmatmul.mubr.msk.f32.gmra.mrb[132].mxu1 %vm4961_vm5, %v14560_v38  ;;  %v14578_v13 = vpop.permute.xlu1 %12404  ;;  %v9467_v28 = vsel %vm9440_vm9, %v12391_v27, %v12392_v23  ;;  %v10100_v46 = vsel %vm10098_vm10, %v12381_v36, %v12382_v14 }
 0x390   : > { %v11485_v24 = vpack.c.bf16 %v9468_v43, %v9461_v30  ;;  %v11477_v34 = vpack.c.bf16 %v9466_v15, %v9459_v48  ;;  %11194 = vmatmul.mubr.msk.f32.gmra.mrb[132].mxu0 %vm4961_vm5, %v14560_v38  ;;  %v12395_v40 = vpop.permute.xlu0 %12394  ;;  %9684 = vmatprep.mubr.f32.mxu1 %v15592_v0  ;;  %v15591_v4 = vunpack.i.h.bf16 %v14578_v13  ;;  %v12406_v62 = vunpack.i.l.bf16 %v14578_v13 }
 0x391   : > { %v12397_v54 = vunpack.i.h.bf16 %v12395_v40  ;;  %v12396_v60 = vunpack.i.l.bf16 %v12395_v40  ;;  %9595 = vmatprep.mubr.f32.mxu0 %v15592_v0  ;;  %11484 = vmatprep.subr.bf16.mxu1 %v11483_v58  ;;  %v11475_v48 = vpack.c.bf16 %v9467_v28, %v9460_v10 }
 0x392   : > { %11486 = vmatpush1.bf16.msra.mxu1 %v11485_v24  ;;  %v10109_v23 = vsel %vm10098_vm10, %v12406_v62, %v15591_v4 }
 0x393   : > { %v10108_v22 = vsel %vm10098_vm10, %v12397_v54, %v12406_v62  ;;  %11199 = vmatmul.mubr.msk.f32.gmra.mrb[134].mxu1 %vm4961_vm5, %v14584_v3  ;;  %v10107_v7 = vsel %vm10098_vm10, %v12396_v60, %v12397_v54  ;;  %11476 = vmatprep.subr.bf16.mxu0 %v11475_v48  ;;  %v12415_v10 = vpop.permute.xlu1 %12414  ;;  %v11495_v58 = vpack.c.bf16 %v10109_v23, %v10102_v29 }
 0x394   : > { %v11497_v27 = vpack.c.bf16 %v10108_v22, %v10101_v53  ;;  %11195 = vmatmul.mubr.msk.f32.gmra.mrb[134].mxu0 %vm4961_vm5, %v14584_v3  ;;  %v12410_v11 = vpop.permute.xlu0 %12409  ;;  %v11487_v30 = vpack.c.bf16 %v10107_v7, %v10100_v46  ;;  %9844 = vmatprep.mubr.f32.mxu1 %v15592_v0  ;;  %v12417_v28 = vunpack.i.h.bf16 %v12415_v10  ;;  %v12416_v62 = vunpack.i.l.bf16 %v12415_v10 }
 0x395   : > { %11478 = vmatpush1.bf16.msra.mxu0 %v11477_v34  ;;  %v12412_v43 = vunpack.i.h.bf16 %v12410_v11  ;;  %v12411_v15 = vunpack.i.l.bf16 %v12410_v11  ;;  %9755 = vmatprep.mubr.f32.mxu0 %v15592_v0  ;;  %v14605_v14 = vpop.f32.mrb[32].mxu0 }
 0x396   : > { %11488 = vmatprep.subr.bf16.mxu0 %v11487_v30  ;;  %v14608_v24 = vpop.f32.mrb[32].mxu1  ;;  %v14610_v40 = vpop.f32.mrb[33].mxu0  ;;  %11496 = vmatprep.subr.bf16.mxu1 %v11495_v58 }
 0x397   : > { %v10099_v54 = vsel %vm10098_vm10, %v12411_v15, %v12381_v36  ;;  %v10106_v53 = vsel %vm10098_vm10, %v12412_v43, %v12396_v60  ;;  %11204 = vmatmul.mubr.msk.f32.vlgmr.msra.gmra.mrb[136].mxu1 %vm4961_vm5, %v14529_v49  ;;  %v14616_v34 = vpop.f32.mrb[33].mxu1  ;;  %v12425_v29 = vpop.permute.xlu1 %12424 }
 0x398   : > { %v11489_v48 = vpack.c.bf16 %v10106_v53, %v10099_v54  ;;  %11200 = vmatmul.mubr.msk.f32.vlgmr.msra.gmra.mrb[136].mxu0 %vm4961_vm5, %v14529_v49  ;;  %11498 = vmatpush1.bf16.msra.mxu1 %v11497_v27  ;;  %v14620_v22 = vpop.permute.xlu0 %12419  ;;  %v12427_v46 = vunpack.i.h.bf16 %v12425_v29  ;;  %v12426_v7 = vunpack.i.l.bf16 %v12425_v29  ;;  %v10114_v49 = vsel %vm10098_vm10, %v12416_v62, %v12417_v28 }
 0x399   : > { %9761 = vmatprep.mubr.f32.mxu0 %v15592_v0  ;;  %9850 = vmatprep.mubr.f32.mxu1 %v15592_v0  ;;  %v15594_v36 = vunpack.i.h.bf16 %v14620_v22  ;;  %v12421_v60 = vunpack.i.l.bf16 %v14620_v22 }
 0x39a   : > { %11490 = vmatpush1.bf16.msra.mxu0 %v11489_v48  ;;  %v14626_v23 = vpop.f32.mrb[34].mxu1  ;;  %v10121_v27 = vsel %vm10098_vm10, %v12426_v7, %v12427_v46 }
 0x39b   : > { %11205 = vmatmul.mubr.msk.f32.gmra.mrb[138].mxu1 %vm4961_vm5, %v14547_v33  ;;  %v14632_v10 = vpop.f32.mrb[34].mxu0  ;;  %v14634_v11 = vpop.f32.mrb[35].mxu1  ;;  %v11491_v43 = vpack.c.bf16 %v10121_v27, %v10114_v49  ;;  %v10115_v47 = vsel %vm10098_vm10, %v12417_v28, %v12421_v60 }
 0x39c   : > { %11201 = vmatmul.mubr.msk.f32.gmra.mrb[138].mxu0 %vm4961_vm5, %v14547_v33  ;;  %v12435_v30 = vpop.permute.xlu1 %12434  ;;  %v14638_v58 = vpop.permute.xlu0 %12429  ;;  %9856 = vmatprep.mubr.f32.mxu1 %v15592_v0  ;;  %v10116_v33 = vsel %vm10098_vm10, %v12421_v60, %v15594_v36 }
 0x39d   : > { %v12437_v15 = vunpack.i.h.bf16 %v12435_v30  ;;  %v12436_v54 = vunpack.i.l.bf16 %v12435_v30  ;;  %v15595_v53 = vunpack.i.h.bf16 %v14638_v58  ;;  %v12431_v48 = vunpack.i.l.bf16 %v14638_v58  ;;  %9767 = vmatprep.mubr.f32.mxu0 %v15592_v0  ;;  %v14644_v29 = vpop.f32.mrb[35].mxu0  ;;  %11492 = vmatprep.subr.bf16.mxu0 %v11491_v43 }
 0x39e   : > { %v14650_v4 = vpop.f32.mrb[36].mxu1 }
 0x39f   : > { %v10113_v49 = vsel %vm10098_vm10, %v12436_v54, %v12416_v62  ;;  %v10120_v27 = vsel %vm10098_vm10, %v12437_v15, %v12426_v7  ;;  %v10122_v30 = vsel %vm10098_vm10, %v12427_v46, %v12431_v48  ;;  %11206 = vmatmul.mubr.msk.f32.gmra.mrb[140].mxu1 %vm4961_vm5, %v14560_v38  ;;  %v10123_v28 = vsel %vm10098_vm10, %v12431_v48, %v15595_v53  ;;  %v14660_v43 = vpop.f32.mrb[36].mxu0  ;;  %v14662_v0 = vpop.f32.mrb[37].mxu1 }
 0x3a0   : > { %15603 = vst [vmem:[#allocation10_spill] sm:$0xff] %v14662_v0  ;;  %v11493_v60 = vpack.c.bf16 %v10120_v27, %v10113_v49  ;;  %v11501_v36 = vpack.c.bf16 %v10122_v30, %v10115_v47  ;;  %11202 = vmatmul.mubr.msk.f32.gmra.mrb[140].mxu0 %vm4961_vm5, %v14560_v38  ;;  %v12445_v62 = vpop.permute.xlu1 %12444  ;;  %v12440_v7 = vpop.permute.xlu0 %12439  ;;  %v15604_v15 = vmov 0.0   ;;  %v11499_v46 = vpack.c.bf16 %v10123_v28, %v10116_v33 }
 0x3a1   : > { %9862 = vmatprep.mubr.f32.mxu1 %v15604_v15  ;;  %v12447_v54 = vunpack.i.h.bf16 %v12445_v62  ;;  %v12446_v1 = vunpack.i.l.bf16 %v12445_v62  ;;  %v12442_v19 = vunpack.i.h.bf16 %v12440_v7  ;;  %v12441_v26 = vunpack.i.l.bf16 %v12440_v7  ;;  %9773 = vmatprep.mubr.f32.mxu0 %v15604_v15  ;;  %v14668_v48 = vpop.f32.mrb[37].mxu0 }
 0x3a2   : > { %11494 = vmatpush1.bf16.msra.mxu0 %v11493_v60  ;;  %11500 = vmatprep.subr.bf16.mxu1 %v11499_v46  ;;  %v14670_v49 = vpop.f32.mrb[38].mxu1  ;;  %v15606_v47 = vunpack.i.h.bf16 %v14578_v13  ;;  %v15607_v27 = vunpack.i.h.bf16 %v14537_v32  ;;  %v14691_v32 = vld [vmem:[%s15587_s3 + $0x100] sm:$0xff] }
 0x3a3   : > { %15605 = vst [vmem:[#allocation11_spill] sm:$0xff] %v14670_v49  ;;  %11207 = vmatmul.mubr.msk.f32.gmra.mrb[142].mxu1 %vm4961_vm5, %v14584_v3  ;;  %v10104_v30 = vsel %vm10098_vm10, %v12441_v26, %v12442_v19  ;;  %v10111_v28 = vsel %vm10098_vm10, %v12446_v1, %v12447_v54  ;;  %v14682_v62 = vpop.f32.mrb[38].mxu0  ;;  %v14684_v60 = vpop.f32.mrb[39].mxu1 }
 0x3a4   : > { %v10110_v38 = vsel %vm10098_vm10, %v15606_v47, %v12446_v1  ;;  %v10103_v33 = vsel %vm10098_vm10, %v15607_v27, %v12441_v26  ;;  %15608 = vst [vmem:[#allocation12_spill] sm:$0xff] %v14682_v62  ;;  %15609 = vst [vmem:[#allocation13_spill] sm:$0xff] %v14684_v60  ;;  %11203 = vmatmul.mubr.msk.f32.gmra.mrb[142].mxu0 %vm4961_vm5, %v14584_v3  ;;  %11502 = vmatpush1.bf16.msra.mxu1 %v11501_v36  ;;  %v12455_v13 = vpop.permute.xlu1 %12454  ;;  %v12450_v7 = vpop.permute.xlu0 %12449 }
 0x3a5   : > { %v11503_v46 = vpack.c.bf16 %v10111_v28, %v10104_v30  ;;  %v11505_v47 = vpack.c.bf16 %v10110_v38, %v10103_v33  ;;  %v12452_v26 = vunpack.i.h.bf16 %v12450_v7  ;;  %v12451_v27 = vunpack.i.l.bf16 %v12450_v7  ;;  %10235 = vmatprep.mubr.f32.mxu0 %v15604_v15  ;;  %10324 = vmatprep.mubr.f32.mxu1 %v15604_v15  ;;  %v14695_v1 = vpop.f32.mrb[39].mxu0 }
 0x3a6   : > { %15610 = vst [vmem:[#allocation14_spill] sm:$0xff] %v14695_v1  ;;  %v12456_v53 = vunpack.i.l.bf16 %v12455_v13  ;;  %v12457_v33 = vunpack.i.h.bf16 %v12455_v13 }
 0x3a7   : > { %11504 = vmatprep.subr.bf16.mxu0 %v11503_v46  ;;  %v10112_v3 = vsel %vm10098_vm10, %v12447_v54, %v12452_v26  ;;  %v10105_v36 = vsel %vm10098_vm10, %v12442_v19, %v12451_v27  ;;  %v11511_v60 = vpack.c.bf16 %v12452_v26, %v12451_v27  ;;  %11216 = vmatmul.mubr.msk.f32.vlgmr.msra.gmra.mrb[144].mxu1 %vm4961_vm5, %v14691_v32  ;;  %v14701_v30 = vpop.f32.mrb[40].mxu0  ;;  %v14703_v38 = vpop.f32.mrb[40].mxu1  ;;  %v14711_v19 = vld [vmem:[%s15587_s3 + $0x108] sm:$0xff] }
 0x3a8   : > { %15611 = vst [vmem:[#allocation15_spill] sm:$0xff] %v14701_v30  ;;  %15612 = vst [vmem:[#allocation16_spill] sm:$0xff] %v14703_v38  ;;  %v11513_v28 = vpack.c.bf16 %v10112_v3, %v10105_v36  ;;  %11212 = vmatmul.mubr.msk.f32.vlgmr.msra.gmra.mrb[144].mxu0 %vm4961_vm5, %v14691_v32  ;;  %v12465_v7 = vpop.permute.xlu1 %12464  ;;  %v12460_v1 = vpop.permute.xlu0 %12459  ;;  %10330 = vmatprep.mubr.f32.mxu1 %v15604_v15  ;;  %v15615_v36 = vunpack.i.h.bf16 %v14620_v22  ;;  %v14733_v22 = vld [vmem:[%s15587_s3 + $0x110] sm:$0xff] }
 0x3a9   : > { %11506 = vmatpush1.bf16.msra.mxu0 %v11505_v47  ;;  %v12467_v54 = vunpack.i.h.bf16 %v12465_v7  ;;  %v12466_v46 = vunpack.i.l.bf16 %v12465_v7  ;;  %v12462_v26 = vunpack.i.h.bf16 %v12460_v1  ;;  %v12461_v27 = vunpack.i.l.bf16 %v12460_v1  ;;  %10241 = vmatprep.mubr.f32.mxu0 %v15604_v15  ;;  %v14714_v13 = vpop.f32.mrb[41].mxu0  ;;  %v14716_v3 = vpop.f32.mrb[41].mxu1 }
 0x3aa   : > { %15613 = vst [vmem:[#allocation17_spill] sm:$0xff] %v14714_v13  ;;  %15614 = vst [vmem:[#allocation18_spill] sm:$0xff] %v14716_v3  ;;  %v10117_v38 = vsel %vm10098_vm10, %v15615_v36, %v12456_v53  ;;  %11512 = vmatprep.subr.bf16.mxu1 %v11511_v60  ;;  %v15616_v7 = vunpack.i.h.bf16 %v14638_v58  ;;  %v10118_v60 = vsel %vm10098_vm10, %v12456_v53, %v12457_v33  ;;  %v14750_v53 = vld [vmem:[%s15587_s3 + $0x118] sm:$0xff] }
 0x3ab   : > { %v10119_v30 = vsel %vm10098_vm10, %v12457_v33, %v12466_v46  ;;  %v11515_v49 = vpack.c.bf16 %v12467_v54, %v12466_v46  ;;  %v10126_v47 = vsel %vm10098_vm10, %v12462_v26, %v12467_v54  ;;  %11217 = vmatmul.mubr.msk.f32.gmra.mrb[146].mxu1 %vm4961_vm5, %v14711_v19  ;;  %v5817_v13 = vpop.f32.mrb[42].mxu0  ;;  %v10125_v58 = vsel %vm10098_vm10, %v12461_v27, %v12462_v26 }
 0x3ac   : > { %v10124_v1 = vsel %vm10098_vm10, %v15616_v7, %v12461_v27  ;;  %v11517_v62 = vpack.c.bf16 %v10126_v47, %v10119_v30  ;;  %11213 = vmatmul.mubr.msk.f32.gmra.mrb[146].mxu0 %vm4961_vm5, %v14711_v19  ;;  %11514 = vmatpush1.bf16.msra.mxu1 %v11513_v28  ;;  %v5906_v54 = vpop.f32.mrb[42].mxu1  ;;  %v5819_v46 = vpop.f32.mrb[43].mxu0  ;;  %v11507_v30 = vpack.c.bf16 %v10125_v58, %v10118_v60 }
 0x3ad   : > { %v11509_v36 = vpack.c.bf16 %v10124_v1, %v10117_v38  ;;  %10247 = vmatprep.mubr.f32.mxu0 %v15604_v15  ;;  %10336 = vmatprep.mubr.f32.mxu1 %v15604_v15  ;;  %v14739_v47 = vpop.f32.mrb[43].mxu1 }
 0x3ae   : > { %11516 = vmatprep.subr.bf16.mxu1 %v11515_v49  ;;  %11508 = vmatprep.subr.bf16.mxu0 %v11507_v30 }
 0x3af   : > { %11218 = vmatmul.mubr.msk.f32.gmra.mrb[148].mxu1 %vm4961_vm5, %v14733_v22  ;;  %v14743_v28 = vpop.f32.mrb[44].mxu0  ;;  %11510 = vmatpush1.bf16.msra.mxu0 %v11509_v36 }
 0x3b0   : > { %11214 = vmatmul.mubr.msk.f32.gmra.mrb[148].mxu0 %vm4961_vm5, %v14733_v22  ;;  %11518 = vmatpush1.bf16.msra.mxu1 %v11517_v62  ;;  %v14752_v38 = vpop.f32.mrb[44].mxu1  ;;  %v14754_v33 = vpop.f32.mrb[45].mxu0 }
 0x3b1   : > { %10253 = vmatprep.mubr.f32.mxu0 %v15604_v15  ;;  %v14757_v49 = vpop.f32.mrb[45].mxu1  ;;  %10342 = vmatprep.mubr.f32.mxu1 %v15604_v15 }
 0x3b3   : > { %11219 = vmatmul.mubr.msk.f32.gmra.mrb[150].mxu1 %vm4961_vm5, %v14750_v53  ;;  %v14762_v62 = vpop.f32.mrb[46].mxu0 }
 0x3b4   : > { %11215 = vmatmul.mubr.msk.f32.gmra.mrb[150].mxu0 %vm4961_vm5, %v14750_v53  ;;  %10502 = vmatprep.mubr.f32.mxu1 %v15604_v15  ;;  %v14767_v26 = vpop.f32.mrb[46].mxu1  ;;  %v14769_v27 = vpop.f32.mrb[47].mxu0 }
 0x3b5   : > { %10413 = vmatprep.mubr.f32.mxu0 %v15604_v15  ;;  %v14772_v7 = vpop.f32.mrb[47].mxu1 }
 0x3b6   : > { %15617 = vst [vmem:[#allocation19_spill] sm:$0xff] %v14772_v7 }
 0x3b7   : > { %11224 = vmatmul.mubr.msk.f32.vlgmr.msra.gmra.mrb[152].mxu1 %vm4961_vm5, %v14691_v32  ;;  %v6291_v1 = vpop.f32.mrb[48].mxu0 }
 0x3b8   : > { %11220 = vmatmul.mubr.msk.f32.vlgmr.msra.gmra.mrb[152].mxu0 %vm4961_vm5, %v14691_v32  ;;  %10508 = vmatprep.mubr.f32.mxu1 %v15604_v15  ;;  %v6380_v60 = vpop.f32.mrb[48].mxu1  ;;  %v6293_v58 = vpop.f32.mrb[49].mxu0 }
 0x3b9   : > { %v14785_v36 = vpop.permute.xlu1 %4948  ;;  %v14787_v30 = vpop.permute.xlu0 %4943  ;;  %10419 = vmatprep.mubr.f32.mxu0 %v15604_v15 }
 0x3ba   : > { %v5310_v3 = vadd.f32 %v14096_v35, %v14787_v30  ;;  %v5225_v32 = vadd.f32 %v14102_v55, %v14785_v36  ;;  %v5314_v51 = vadd.f32 %v14124_v50, %v14785_v36  ;;  %v5227_v45 = vadd.f32 %v14110_v17, %v14785_v36  ;;  %v6382_v6 = vpop.f32.mrb[49].mxu1 }
 0x3bb   : > { %11225 = vmatmul.mubr.msk.f32.gmra.mrb[154].mxu1 %vm4961_vm5, %v14711_v19  ;;  %v5316_v63 = vadd.f32 %v14132_v59, %v14785_v36  ;;  %v5041_v35 = vadd.f32 %v13920_v2, %v14787_v30  ;;  %v5130_v55 = vadd.f32 %v13949_v61, %v14787_v30  ;;  %v5043_v50 = vadd.f32 %v13931_v12, %v14787_v30 }
 0x3bc   : > { %5337 = vst.msk [vmem:[%s14783_s20 + $0x38] sm:$0xff] %vm4961_vm5, %v5310_v3  ;;  %11221 = vmatmul.mubr.msk.f32.gmra.mrb[154].mxu0 %vm4961_vm5, %v14711_v19  ;;  %v14812_v17 = vadd.f32 %v5817_v13, %v5225_v32  ;;  %v14814_v0 = vadd.f32 %v5906_v54, %v5314_v51  ;;  %v14816_v7 = vadd.f32 %v5819_v46, %v5227_v45  ;;  %v6297_v2 = vpop.f32.mrb[50].mxu0  ;;  %v14819_v59 = vpop.f32.mrb[50].mxu1 }
 0x3bd   : > { %10514 = vmatprep.mubr.f32.mxu1 %v15604_v15  ;;  %5345 = vst.msk [vmem:[%s14783_s20 + $0x78] sm:$0xff] %vm4961_vm5, %v5316_v63  ;;  %v14823_v61 = vpop.permute.xlu1 %4958  ;;  %v14825_v12 = vpop.permute.xlu0 %4953  ;;  %10425 = vmatprep.mubr.f32.mxu0 %v15604_v15  ;;  %v5955_v19 = vadd.f32 %v14605_v14, %v5041_v35  ;;  %v5957_v45 = vadd.f32 %v14608_v24, %v5130_v55 }
 0x3be   : > { %v5956_v51 = vadd.f32 %v14610_v40, %v5043_v50  ;;  %v5132_v13 = vadd.f32 %v13958_v16, %v14787_v30  ;;  %v5328_v63 = vadd.f32 %v14196_v5, %v14823_v61  ;;  %v5322_v3 = vadd.f32 %v14168_v37, %v14825_v12  ;;  %v6299_v46 = vpop.f32.mrb[51].mxu0  ;;  %v6388_v32 = vpop.f32.mrb[51].mxu1 }
 0x3bf   : > { %v5231_v54 = vadd.f32 %v14138_v20, %v14825_v12  ;;  %v5320_v14 = vadd.f32 %v14162_v21, %v14825_v12  ;;  %11226 = vmatmul.mubr.msk.f32.gmra.mrb[156].mxu1 %vm4961_vm5, %v14733_v22  ;;  %v5233_v16 = vadd.f32 %v14149_v56, %v14825_v12  ;;  %v5237_v5 = vadd.f32 %v14174_v9, %v14823_v61 }
 0x3c0   : > { %v5326_v37 = vadd.f32 %v14189_v42, %v14823_v61  ;;  %v5239_v20 = vadd.f32 %v14184_v25, %v14823_v61  ;;  %5361 = vst.msk [vmem:[%s14783_s20 + $0xf8] sm:$0xff] %vm4961_vm5, %v5328_v63  ;;  %5353 = vst.msk [vmem:[%s14783_s20 + $0xb8] sm:$0xff] %vm4961_vm5, %v5322_v3  ;;  %11222 = vmatmul.mubr.msk.f32.gmra.mrb[156].mxu0 %vm4961_vm5, %v14733_v22  ;;  %10520 = vmatprep.mubr.f32.mxu1 %v15604_v15  ;;  %v6303_v42 = vpop.f32.mrb[52].mxu0  ;;  %v6392_v24 = vpop.f32.mrb[52].mxu1 }
 0x3c1   : > { %v14858_v21 = vadd.f32 %v14743_v28, %v5231_v54  ;;  %v14861_v56 = vadd.f32 %v14752_v38, %v5320_v14  ;;  %v14864_v9 = vadd.f32 %v6291_v1, %v5955_v19  ;;  %v14867_v25 = vadd.f32 %v14754_v33, %v5233_v16  ;;  %10431 = vmatprep.mubr.f32.mxu0 %v15604_v15  ;;  %v6305_v38 = vpop.f32.mrb[53].mxu0  ;;  %v6394_v1 = vpop.f32.mrb[53].mxu1  ;;  %v15619_v14 = vld [vmem:[#allocation10_spill] sm:$0xff] }
 0x3c2   : > { %v14870_v40 = vadd.f32 %v14762_v62, %v5237_v5  ;;  %v14873_v22 = vadd.f32 %v14767_v26, %v5326_v37  ;;  %v14877_v28 = vadd.f32 %v14769_v27, %v5239_v20  ;;  %v14879_v35 = vadd.f32 %v6380_v60, %v5957_v45  ;;  %v15621_v5 = vld [vmem:[#allocation5_spill] sm:$0xff]  ;;  %v15622_v37 = vld [vmem:[#allocation4_spill] sm:$0xff] }
 0x3c3   : > { %v14881_v55 = vadd.f32 %v6293_v58, %v5956_v51  ;;  %v5958_v33 = vadd.f32 %v14616_v34, %v5132_v13  ;;  %v5047_v62 = vadd.f32 %v13968_v57, %v14785_v36  ;;  %11227 = vmatmul.mubr.msk.f32.gmra.mrb[158].mxu1 %vm4961_vm5, %v14750_v53  ;;  %v5136_v15 = vadd.f32 %v13994_v39, %v14785_v36 }
 0x3c4   : > { %v5049_v26 = vadd.f32 %v13974_v52, %v14785_v36  ;;  %v5138_v27 = vadd.f32 %v14005_v41, %v14785_v36  ;;  %v5053_v60 = vadd.f32 %v14013_v8, %v14825_v12  ;;  %v5938_v58 = vld [vmem:[%s14783_s20 + $0x78] sm:$0xff]  ;;  %11223 = vmatmul.mubr.msk.f32.gmra.mrb[158].mxu0 %vm4961_vm5, %v14750_v53  ;;  %v5142_v39 = vadd.f32 %v14040_v31, %v14825_v12  ;;  %v6309_v41 = vpop.f32.mrb[54].mxu0  ;;  %v6398_v36 = vpop.f32.mrb[54].mxu1 }
 0x3c5   : > { %v14899_v57 = vadd.f32 %v6382_v6, %v5958_v33  ;;  %v5963_v34 = vadd.f32 %v14632_v10, %v5047_v62  ;;  %v5055_v52 = vadd.f32 %v14019_v44, %v14825_v12  ;;  %v5970_v8 = vadd.f32 %v5938_v58, %v14739_v47  ;;  %v6311_v19 = vpop.f32.mrb[55].mxu0  ;;  %v6400_v10 = vpop.f32.mrb[55].mxu1  ;;  %v15625_v62 = vld [vmem:[#allocation9_spill] sm:$0xff]  ;;  %v15626_v58 = vld [vmem:[#allocation12_spill] sm:$0xff] }
 0x3c6   : > { %v5965_v50 = vadd.f32 %v14626_v23, %v5136_v15  ;;  %v5964_v6 = vadd.f32 %v14644_v29, %v5049_v26  ;;  %v5966_v53 = vadd.f32 %v14634_v11, %v5138_v27  ;;  %v5971_v31 = vadd.f32 %v14660_v43, %v5053_v60  ;;  %v5930_v27 = vld [vmem:[%s14783_s20 + $0x38] sm:$0xff] }
 0x3c7   : > { %v14910_v45 = vadd.f32 %v6297_v2, %v5963_v34  ;;  %v5973_v51 = vadd.f32 %v14650_v4, %v5142_v39  ;;  %v5972_v44 = vadd.f32 %v14668_v48, %v5055_v52  ;;  %6002 = vst.msk [vmem:[%s14783_s20 + $0x78] sm:$0xff] %vm4961_vm5, %v5970_v8  ;;  %v5946_v13 = vld [vmem:[%s14783_s20 + $0xb8] sm:$0xff]  ;;  %v5144_v43 = vadd.f32 %v14048_v18, %v14825_v12  ;;  %v15618_v2 = vld [vmem:[#allocation19_spill] sm:$0xff]  ;;  %v15628_v8 = vld [vmem:[#allocation8_spill] sm:$0xff] }
 0x3c8   : > { %v5954_v47 = vld [vmem:[%s14783_s20 + $0xf8] sm:$0xff]  ;;  %v14920_v23 = vadd.f32 %v14819_v59, %v5965_v50  ;;  %v14922_v11 = vadd.f32 %v6299_v46, %v5964_v6  ;;  %v14924_v29 = vadd.f32 %v6388_v32, %v5966_v53  ;;  %v5978_v4 = vadd.f32 %v5946_v13, %v14757_v49  ;;  %v6558_v54 = vpop.f32.mrb[56].mxu1  ;;  %v15620_v32 = vld [vmem:[#allocation3_spill] sm:$0xff]  ;;  %v15632_v13 = vld [vmem:[#allocation16_spill] sm:$0xff] }
 0x3c9   : > { %v5986_v48 = vadd.f32 %v5954_v47, %v15618_v2  ;;  %v14930_v63 = vadd.f32 %v6303_v42, %v5971_v31  ;;  %v14932_v3 = vadd.f32 %v6392_v24, %v5973_v51  ;;  %v14934_v59 = vadd.f32 %v6305_v38, %v5972_v44  ;;  %v6469_v12 = vpop.f32.mrb[56].mxu0  ;;  %v6560_v49 = vpop.f32.mrb[57].mxu1  ;;  %v15623_v42 = vld [vmem:[#allocation7_spill] sm:$0xff]  ;;  %v15624_v38 = vld [vmem:[#allocation6_spill] sm:$0xff] }
 0x3ca   : > { %v5974_v46 = vadd.f32 %v15619_v14, %v5144_v43  ;;  %v5059_v16 = vadd.f32 %v15620_v32, %v14823_v61  ;;  %v5148_v18 = vadd.f32 %v15621_v5, %v14823_v61  ;;  %6010 = vst.msk [vmem:[%s14783_s20 + $0xb8] sm:$0xff] %vm4961_vm5, %v5978_v4  ;;  %v5061_v20 = vadd.f32 %v15622_v37, %v14823_v61  ;;  %v6471_v26 = vpop.f32.mrb[57].mxu0  ;;  %v15627_v39 = vld [vmem:[#allocation11_spill] sm:$0xff]  ;;  %v15629_v6 = vld [vmem:[#allocation14_spill] sm:$0xff]  ;;  %v15633_v4 = vld [vmem:[#allocation17_spill] sm:$0xff] }
 0x3cb   : > { %6018 = vst.msk [vmem:[%s14783_s20 + $0xf8] sm:$0xff] %vm4961_vm5, %v5986_v48  ;;  %v5150_v24 = vadd.f32 %v15623_v42, %v14823_v61  ;;  %v5219_v33 = vadd.f32 %v15624_v38, %v14787_v30  ;;  %v5308_v15 = vadd.f32 %v15625_v62, %v14787_v30  ;;  %v5221_v50 = vadd.f32 %v15628_v8, %v14787_v30  ;;  %v15630_v61 = vld [vmem:[#allocation13_spill] sm:$0xff]  ;;  %v15631_v51 = vld [vmem:[#allocation15_spill] sm:$0xff]  ;;  %v15634_v48 = vld [vmem:[#allocation18_spill] sm:$0xff] }
 0x3cc   : > { %v14954_v60 = vadd.f32 %v6394_v1, %v5974_v46  ;;  %v5979_v34 = vadd.f32 %v15626_v58, %v5059_v16  ;;  %v5981_v52 = vadd.f32 %v15627_v39, %v5148_v18  ;;  %v5980_v53 = vadd.f32 %v15629_v6, %v5061_v20 }
 0x3cd   : > { %v5982_v31 = vadd.f32 %v15630_v61, %v5150_v24  ;;  %v5959_v44 = vadd.f32 %v15631_v51, %v5219_v33  ;;  %v5961_v47 = vadd.f32 %v15632_v13, %v5308_v15  ;;  %v5960_v2 = vadd.f32 %v15633_v4, %v5221_v50  ;;  %v6475_v46 = vpop.f32.mrb[58].mxu0  ;;  %v6564_v30 = vpop.f32.mrb[58].mxu1 }
 0x3ce   : > { %v14964_v43 = vadd.f32 %v6309_v41, %v5979_v34  ;;  %v14966_v1 = vadd.f32 %v6398_v36, %v5981_v52  ;;  %v5962_v14 = vadd.f32 %v5930_v27, %v15634_v48  ;;  %v14970_v32 = vadd.f32 %v6311_v19, %v5980_v53  ;;  %v6477_v41 = vpop.f32.mrb[59].mxu0  ;;  %v6566_v37 = vpop.f32.mrb[59].mxu1  ;;  %v6596_v36 = vld [vmem:[%s14783_s20 + $0x78] sm:$0xff] }
 0x3cf   : > { %v14972_v16 = vadd.f32 %v6400_v10, %v5982_v31  ;;  %v14974_v5 = vadd.f32 %v6469_v12, %v5959_v44  ;;  %v14976_v18 = vadd.f32 %v6558_v54, %v5961_v47  ;;  %v14979_v20 = vadd.f32 %v6471_v26, %v5960_v2 }
 0x3d0   : > { %5994 = vst.msk [vmem:[%s14783_s20 + $0x38] sm:$0xff] %vm4961_vm5, %v5962_v14  ;;  %v14984_v42 = vadd.f32 %v6475_v46, %v14812_v17  ;;  %v14987_v19 = vadd.f32 %v6564_v30, %v14814_v0  ;;  %v14990_v10 = vadd.f32 %v6477_v41, %v14816_v7  ;;  %v6628_v54 = vadd.f32 %v6596_v36, %v6566_v37 }
 0x3d1   : > { %v6481_v12 = vpop.f32.mrb[60].mxu0  ;;  %v6570_v24 = vpop.f32.mrb[60].mxu1  ;;  %v6604_v38 = vld [vmem:[%s14783_s20 + $0xb8] sm:$0xff] }
 0x3d2   : > { %6660 = vst.msk [vmem:[%s14783_s20 + $0x78] sm:$0xff] %vm4961_vm5, %v6628_v54  ;;  %v14996_v33 = vadd.f32 %v6481_v12, %v14858_v21  ;;  %v14999_v17 = vadd.f32 %v6570_v24, %v14861_v56  ;;  %v6483_v62 = vpop.f32.mrb[61].mxu0  ;;  %v6572_v0 = vpop.f32.mrb[61].mxu1  ;;  %v6612_v52 = vld [vmem:[%s14783_s20 + $0xf8] sm:$0xff] }
 0x3d3   : > { %v15002_v7 = vadd.f32 %v6483_v62, %v14867_v25  ;;  %v6636_v15 = vadd.f32 %v6604_v38, %v6572_v0 }
 0x3d5   : > { %6668 = vst.msk [vmem:[%s14783_s20 + $0xb8] sm:$0xff] %vm4961_vm5, %v6636_v15  ;;  %v6487_v26 = vpop.f32.mrb[62].mxu0  ;;  %v6576_v27 = vpop.f32.mrb[62].mxu1 }
 0x3d6   : > { %v15008_v34 = vadd.f32 %v6487_v26, %v14870_v40  ;;  %v15011_v21 = vadd.f32 %v6576_v27, %v14873_v22  ;;  %v6489_v56 = vpop.f32.mrb[63].mxu0  ;;  %v6578_v39 = vpop.f32.mrb[63].mxu1 }
 0x3d7   : > { %v6588_v58 = vld [vmem:[%s14783_s20 + $0x38] sm:$0xff]  ;;  %v15015_v50 = vadd.f32 %v6489_v56, %v14877_v28  ;;  %v6644_v25 = vadd.f32 %v6612_v52, %v6578_v39 }
 0x3d8   : > { %v6620_v8 = vadd.f32 %v6588_v58, %v6560_v49 }
 0x3d9   : > { %6676 = vst.msk [vmem:[%s14783_s20 + $0xf8] sm:$0xff] %vm4961_vm5, %v6644_v25  ;;  %v6948_v6 = vpop.f32.mrb[64].mxu0  ;;  %v7037_v53 = vpop.f32.mrb[64].mxu1  ;;  %v7253_v27 = vld [vmem:[%s14783_s20 + $0x78] sm:$0xff] }
 0x3da   : > { %6652 = vst.msk [vmem:[%s14783_s20 + $0x38] sm:$0xff] %vm4961_vm5, %v6620_v8  ;;  %v15022_v40 = vadd.f32 %v6948_v6, %v14864_v9  ;;  %v15025_v22 = vadd.f32 %v7037_v53, %v14879_v35  ;;  %v6950_v61 = vpop.f32.mrb[65].mxu0  ;;  %v7039_v31 = vpop.f32.mrb[65].mxu1 }
 0x3db   : > { %v15028_v49 = vadd.f32 %v6950_v61, %v14881_v55  ;;  %v15031_v28 = vadd.f32 %v7039_v31, %v14899_v57 }
 0x3dc   : > { %v7261_v25 = vld [vmem:[%s14783_s20 + $0xb8] sm:$0xff] }
 0x3dd   : > { %v6954_v51 = vpop.f32.mrb[66].mxu0  ;;  %v7043_v13 = vpop.f32.mrb[66].mxu1 }
 0x3de   : > { %v15034_v44 = vadd.f32 %v6954_v51, %v14910_v45  ;;  %v6956_v47 = vpop.f32.mrb[67].mxu0  ;;  %v15037_v9 = vadd.f32 %v7043_v13, %v14920_v23  ;;  %v7045_v4 = vpop.f32.mrb[67].mxu1 }
 0x3df   : > { %v15040_v35 = vadd.f32 %v6956_v47, %v14922_v11  ;;  %v15043_v2 = vadd.f32 %v7045_v4, %v14924_v29 }
 0x3e0   : > { %v7269_v13 = vld [vmem:[%s14783_s20 + $0xf8] sm:$0xff] }
 0x3e1   : > { %v6960_v55 = vpop.f32.mrb[68].mxu0  ;;  %v7049_v48 = vpop.f32.mrb[68].mxu1  ;;  %v7245_v38 = vld [vmem:[%s14783_s20 + $0x38] sm:$0xff] }
 0x3e2   : > { %v15046_v57 = vadd.f32 %v6960_v55, %v14930_v63  ;;  %v6962_v14 = vpop.f32.mrb[69].mxu0  ;;  %v15049_v45 = vadd.f32 %v7049_v48, %v14932_v3  ;;  %v7051_v23 = vpop.f32.mrb[69].mxu1 }
 0x3e3   : > { %v15052_v46 = vadd.f32 %v6962_v14, %v14934_v59  ;;  %v15055_v11 = vadd.f32 %v7051_v23, %v14954_v60 }
 0x3e5   : > { %v6966_v30 = vpop.f32.mrb[70].mxu0  ;;  %v7055_v63 = vpop.f32.mrb[70].mxu1 }
 0x3e6   : > { %v15058_v29 = vadd.f32 %v6966_v30, %v14964_v43  ;;  %v6968_v41 = vpop.f32.mrb[71].mxu0  ;;  %v15061_v37 = vadd.f32 %v7055_v63, %v14966_v1  ;;  %v7057_v59 = vpop.f32.mrb[71].mxu1 }
 0x3e7   : > { %v15064_v3 = vadd.f32 %v6968_v41, %v14970_v32  ;;  %v15067_v36 = vadd.f32 %v7057_v59, %v14972_v16 }
 0x3e9   : > { %v7126_v60 = vpop.f32.mrb[72].mxu0  ;;  %v7215_v43 = vpop.f32.mrb[72].mxu1 }
 0x3ea   : > { %v15070_v54 = vadd.f32 %v7126_v60, %v14974_v5  ;;  %v7128_v12 = vpop.f32.mrb[73].mxu0  ;;  %v15073_v24 = vadd.f32 %v7215_v43, %v14976_v18  ;;  %v7217_v32 = vpop.f32.mrb[73].mxu1 }
 0x3eb   : > { %v15076_v1 = vadd.f32 %v7128_v12, %v14979_v20  ;;  %v7277_v62 = vadd.f32 %v7245_v38, %v7217_v32 }
 0x3ed   : > { %7309 = vst.msk [vmem:[%s14783_s20 + $0x38] sm:$0xff] %vm4961_vm5, %v7277_v62  ;;  %v7132_v16 = vpop.f32.mrb[74].mxu0 }
 0x3ee   : > { %v7221_v0 = vpop.f32.mrb[74].mxu1  ;;  %v15082_v5 = vadd.f32 %v7132_v16, %v14984_v42  ;;  %v7134_v18 = vpop.f32.mrb[75].mxu0 }
 0x3ef   : > { %v15085_v15 = vadd.f32 %v7221_v0, %v14987_v19  ;;  %v7223_v26 = vpop.f32.mrb[75].mxu1  ;;  %v15089_v20 = vadd.f32 %v7134_v18, %v14990_v10 }
 0x3f0   : > { %v7285_v58 = vadd.f32 %v7253_v27, %v7223_v26 }
 0x3f1   : > { %v7138_v56 = vpop.f32.mrb[76].mxu0 }
 0x3f2   : > { %7317 = vst.msk [vmem:[%s14783_s20 + $0x78] sm:$0xff] %vm4961_vm5, %v7285_v58  ;;  %v7227_v39 = vpop.f32.mrb[76].mxu1  ;;  %v15094_v52 = vadd.f32 %v7138_v56, %v14996_v33  ;;  %v7140_v19 = vpop.f32.mrb[77].mxu0 }
 0x3f3   : > { %v15097_v42 = vadd.f32 %v7227_v39, %v14999_v17  ;;  %v7229_v8 = vpop.f32.mrb[77].mxu1  ;;  %v15101_v6 = vadd.f32 %v7140_v19, %v15002_v7 }
 0x3f4   : > { %v7293_v10 = vadd.f32 %v7261_v25, %v7229_v8  ;;  %v7902_v56 = vld [vmem:[%s14783_s20 + $0x38] sm:$0xff] }
 0x3f5   : > { %v7144_v53 = vpop.f32.mrb[78].mxu0 }
 0x3f6   : > { %7325 = vst.msk [vmem:[%s14783_s20 + $0xb8] sm:$0xff] %vm4961_vm5, %v7293_v10  ;;  %v7233_v61 = vpop.f32.mrb[78].mxu1  ;;  %v15106_v31 = vadd.f32 %v7144_v53, %v15008_v34  ;;  %v7146_v17 = vpop.f32.mrb[79].mxu0 }
 0x3f7   : > { %v15109_v33 = vadd.f32 %v7233_v61, %v15011_v21  ;;  %v7235_v51 = vpop.f32.mrb[79].mxu1  ;;  %v15113_v47 = vadd.f32 %v7146_v17, %v15015_v50 }
 0x3f8   : > { %v7301_v4 = vadd.f32 %v7269_v13, %v7235_v51 }
 0x3f9   : > { %v7605_v7 = vpop.f32.mrb[80].mxu0  ;;  %v7910_v10 = vld [vmem:[%s14783_s20 + $0x78] sm:$0xff] }
 0x3fa   : > { %7333 = vst.msk [vmem:[%s14783_s20 + $0xf8] sm:$0xff] %vm4961_vm5, %v7301_v4  ;;  %v7694_v55 = vpop.f32.mrb[80].mxu1  ;;  %v15118_v48 = vadd.f32 %v7605_v7, %v15022_v40  ;;  %v7607_v14 = vpop.f32.mrb[81].mxu0 }
 0x3fb   : > { %v15121_v34 = vadd.f32 %v7694_v55, %v15025_v22  ;;  %v7696_v21 = vpop.f32.mrb[81].mxu1  ;;  %v15124_v23 = vadd.f32 %v7607_v14, %v15028_v49 }
 0x3fc   : > { %v15127_v30 = vadd.f32 %v7696_v21, %v15031_v28 }
 0x3fd   : > { %v7611_v50 = vpop.f32.mrb[82].mxu0  ;;  %v7918_v4 = vld [vmem:[%s14783_s20 + $0xb8] sm:$0xff] }
 0x3fe   : > { %v7700_v63 = vpop.f32.mrb[82].mxu1  ;;  %v15130_v41 = vadd.f32 %v7611_v50, %v15034_v44  ;;  %v7613_v40 = vpop.f32.mrb[83].mxu0 }
 0x3ff   : > { %v15133_v59 = vadd.f32 %v7700_v63, %v15037_v9  ;;  %v7702_v60 = vpop.f32.mrb[83].mxu1  ;;  %v15136_v22 = vadd.f32 %v7613_v40, %v15040_v35 }
 0x400   : > { %v15139_v43 = vadd.f32 %v7702_v60, %v15043_v2 }
 0x401   : > { %v7617_v49 = vpop.f32.mrb[84].mxu0  ;;  %v7926_v63 = vld [vmem:[%s14783_s20 + $0xf8] sm:$0xff] }
 0x402   : > { %v7706_v12 = vpop.f32.mrb[84].mxu1  ;;  %v15142_v28 = vadd.f32 %v7617_v49, %v15046_v57  ;;  %v7619_v44 = vpop.f32.mrb[85].mxu0 }
 0x403   : > { %v15145_v32 = vadd.f32 %v7706_v12, %v15049_v45  ;;  %v7708_v38 = vpop.f32.mrb[85].mxu1  ;;  %v15148_v9 = vadd.f32 %v7619_v44, %v15052_v46 }
 0x404   : > { %v15151_v35 = vadd.f32 %v7708_v38, %v15055_v11 }
 0x405   : > { %v7623_v62 = vpop.f32.mrb[86].mxu0 }
 0x406   : > { %v7712_v2 = vpop.f32.mrb[86].mxu1  ;;  %v15154_v16 = vadd.f32 %v7623_v62, %v15058_v29  ;;  %v7625_v45 = vpop.f32.mrb[87].mxu0 }
 0x407   : > { %v15157_v57 = vadd.f32 %v7712_v2, %v15061_v37  ;;  %v7714_v0 = vpop.f32.mrb[87].mxu1  ;;  %v15160_v18 = vadd.f32 %v7625_v45, %v15064_v3 }
 0x408   : > { %v15163_v46 = vadd.f32 %v7714_v0, %v15067_v36 }
 0x409   : > { %v7783_v26 = vpop.f32.mrb[88].mxu0 }
 0x40a   : > { %v7872_v11 = vpop.f32.mrb[88].mxu1  ;;  %v15166_v27 = vadd.f32 %v7783_v26, %v15070_v54  ;;  %v7785_v37 = vpop.f32.mrb[89].mxu0 }
 0x40b   : > { %v15169_v29 = vadd.f32 %v7872_v11, %v15073_v24  ;;  %v7874_v58 = vpop.f32.mrb[89].mxu1  ;;  %v15173_v39 = vadd.f32 %v7785_v37, %v15076_v1 }
 0x40c   : > { %v7934_v3 = vadd.f32 %v7902_v56, %v7874_v58 }
 0x40d   : > { %v7789_v36 = vpop.f32.mrb[90].mxu0 }
 0x40e   : > { %7966 = vst.msk [vmem:[%s14783_s20 + $0x38] sm:$0xff] %vm4961_vm5, %v7934_v3  ;;  %v7878_v19 = vpop.f32.mrb[90].mxu1  ;;  %v15178_v8 = vadd.f32 %v7789_v36, %v15082_v5  ;;  %v7791_v24 = vpop.f32.mrb[91].mxu0 }
 0x40f   : > { %v15181_v54 = vadd.f32 %v7878_v19, %v15085_v15  ;;  %v7880_v25 = vpop.f32.mrb[91].mxu1  ;;  %v15185_v53 = vadd.f32 %v7791_v24, %v15089_v20 }
 0x410   : > { %v7942_v1 = vadd.f32 %v7910_v10, %v7880_v25 }
 0x411   : > { %v7795_v61 = vpop.f32.mrb[92].mxu0 }
 0x412   : > { %7974 = vst.msk [vmem:[%s14783_s20 + $0x78] sm:$0xff] %vm4961_vm5, %v7942_v1  ;;  %v7884_v17 = vpop.f32.mrb[92].mxu1  ;;  %v15190_v51 = vadd.f32 %v7795_v61, %v15094_v52  ;;  %v7797_v15 = vpop.f32.mrb[93].mxu0 }
 0x413   : > { %v15193_v5 = vadd.f32 %v7884_v17, %v15097_v42  ;;  %v7886_v13 = vpop.f32.mrb[93].mxu1  ;;  %v15197_v7 = vadd.f32 %v7797_v15, %v15101_v6 }
 0x414   : > { %v7950_v20 = vadd.f32 %v7918_v4, %v7886_v13 }
 0x415   : > { %v7801_v55 = vpop.f32.mrb[94].mxu0  ;;  %v8560_v61 = vld [vmem:[%s14783_s20 + $0x38] sm:$0xff] }
 0x416   : > { %7982 = vst.msk [vmem:[%s14783_s20 + $0xb8] sm:$0xff] %vm4961_vm5, %v7950_v20  ;;  %v7890_v14 = vpop.f32.mrb[94].mxu1  ;;  %v15202_v21 = vadd.f32 %v7801_v55, %v15106_v31  ;;  %v7803_v42 = vpop.f32.mrb[95].mxu0 }
 0x417   : > { %v15205_v52 = vadd.f32 %v7890_v14, %v15109_v33  ;;  %v7892_v50 = vpop.f32.mrb[95].mxu1  ;;  %v15209_v40 = vadd.f32 %v7803_v42, %v15113_v47 }
 0x418   : > { %v7958_v60 = vadd.f32 %v7926_v63, %v7892_v50 }
 0x419   : > { %v8263_v6 = vpop.f32.mrb[96].mxu0  ;;  %v8568_v20 = vld [vmem:[%s14783_s20 + $0x78] sm:$0xff] }
 0x41a   : > { %7990 = vst.msk [vmem:[%s14783_s20 + $0xf8] sm:$0xff] %vm4961_vm5, %v7958_v60  ;;  %v8352_v49 = vpop.f32.mrb[96].mxu1  ;;  %v15214_v12 = vadd.f32 %v8263_v6, %v15118_v48  ;;  %v8265_v44 = vpop.f32.mrb[97].mxu0 }
 0x41b   : > { %v15217_v31 = vadd.f32 %v8352_v49, %v15121_v34  ;;  %v8354_v33 = vpop.f32.mrb[97].mxu1  ;;  %v15220_v38 = vadd.f32 %v8265_v44, %v15124_v23 }
 0x41c   : > { %v15223_v62 = vadd.f32 %v8354_v33, %v15127_v30 }
 0x41d   : > { %v8269_v47 = vpop.f32.mrb[98].mxu0  ;;  %v8576_v60 = vld [vmem:[%s14783_s20 + $0xb8] sm:$0xff] }
 0x41e   : > { %v8358_v2 = vpop.f32.mrb[98].mxu1  ;;  %v15226_v45 = vadd.f32 %v8269_v47, %v15130_v41  ;;  %v8271_v48 = vpop.f32.mrb[99].mxu0 }
 0x41f   : > { %v15229_v0 = vadd.f32 %v8358_v2, %v15133_v59  ;;  %v8360_v26 = vpop.f32.mrb[99].mxu1  ;;  %v15232_v34 = vadd.f32 %v8271_v48, %v15136_v22 }
 0x420   : > { %v15235_v11 = vadd.f32 %v8360_v26, %v15139_v43 }
 0x421   : > { %v8275_v23 = vpop.f32.mrb[100].mxu0  ;;  %v8584_v2 = vld [vmem:[%s14783_s20 + $0xf8] sm:$0xff] }
 0x422   : > { %v8364_v37 = vpop.f32.mrb[100].mxu1  ;;  %v15238_v30 = vadd.f32 %v8275_v23, %v15142_v28  ;;  %v8277_v41 = vpop.f32.mrb[101].mxu0 }
 0x423   : > { %v15241_v58 = vadd.f32 %v8364_v37, %v15145_v32  ;;  %v8366_v56 = vpop.f32.mrb[101].mxu1  ;;  %v15244_v59 = vadd.f32 %v8277_v41, %v15148_v9 }
 0x424   : > { %v15247_v22 = vadd.f32 %v8366_v56, %v15151_v35 }
 0x426   : > { %v8281_v3 = vpop.f32.mrb[102].mxu0  ;;  %v8370_v43 = vpop.f32.mrb[102].mxu1 }
 0x427   : > { %v15250_v36 = vadd.f32 %v8281_v3, %v15154_v16  ;;  %v15253_v28 = vadd.f32 %v8370_v43, %v15157_v57  ;;  %v8283_v32 = vpop.f32.mrb[103].mxu0  ;;  %v8372_v19 = vpop.f32.mrb[103].mxu1 }
 0x428   : > { %v15256_v24 = vadd.f32 %v8283_v32, %v15160_v18  ;;  %v15259_v9 = vadd.f32 %v8372_v19, %v15163_v46 }
 0x42a   : > { %v8441_v25 = vpop.f32.mrb[104].mxu0  ;;  %v8530_v35 = vpop.f32.mrb[104].mxu1 }
 0x42b   : > { %v15262_v10 = vadd.f32 %v8441_v25, %v15166_v27  ;;  %v15265_v16 = vadd.f32 %v8530_v35, %v15169_v29  ;;  %v8443_v57 = vpop.f32.mrb[105].mxu0  ;;  %v8532_v1 = vpop.f32.mrb[105].mxu1 }
 0x42c   : > { %v15269_v17 = vadd.f32 %v8443_v57, %v15173_v39  ;;  %v8592_v18 = vadd.f32 %v8560_v61, %v8532_v1 }
 0x42e   : > { %8624 = vst.msk [vmem:[%s14783_s20 + $0x38] sm:$0xff] %vm4961_vm5, %v8592_v18  ;;  %v8447_v46 = vpop.f32.mrb[106].mxu0  ;;  %v8536_v15 = vpop.f32.mrb[106].mxu1 }
 0x42f   : > { %v15274_v13 = vadd.f32 %v8447_v46, %v15178_v8  ;;  %v15277_v27 = vadd.f32 %v8536_v15, %v15181_v54  ;;  %v8449_v29 = vpop.f32.mrb[107].mxu0  ;;  %v8538_v4 = vpop.f32.mrb[107].mxu1 }
 0x430   : > { %v15281_v55 = vadd.f32 %v8449_v29, %v15185_v53  ;;  %v8600_v39 = vadd.f32 %v8568_v20, %v8538_v4 }
 0x432   : > { %8632 = vst.msk [vmem:[%s14783_s20 + $0x78] sm:$0xff] %vm4961_vm5, %v8600_v39  ;;  %v8453_v14 = vpop.f32.mrb[108].mxu0  ;;  %v8542_v42 = vpop.f32.mrb[108].mxu1 }
 0x433   : > { %v15286_v50 = vadd.f32 %v8453_v14, %v15190_v51  ;;  %v15289_v8 = vadd.f32 %v8542_v42, %v15193_v5  ;;  %v8455_v54 = vpop.f32.mrb[109].mxu0  ;;  %v8544_v63 = vpop.f32.mrb[109].mxu1 }
 0x434   : > { %v15293_v6 = vadd.f32 %v8455_v54, %v15197_v7  ;;  %v8608_v53 = vadd.f32 %v8576_v60, %v8544_v63 }
 0x436   : > { %8640 = vst.msk [vmem:[%s14783_s20 + $0xb8] sm:$0xff] %vm4961_vm5, %v8608_v53  ;;  %v8459_v49 = vpop.f32.mrb[110].mxu0  ;;  %v8548_v44 = vpop.f32.mrb[110].mxu1 }
 0x437   : > { %v15298_v33 = vadd.f32 %v8459_v49, %v15202_v21  ;;  %v15301_v51 = vadd.f32 %v8548_v44, %v15205_v52  ;;  %v8461_v5 = vpop.f32.mrb[111].mxu0  ;;  %v8550_v47 = vpop.f32.mrb[111].mxu1 }
 0x438   : > { %v15305_v48 = vadd.f32 %v8461_v5, %v15209_v40  ;;  %v8616_v26 = vadd.f32 %v8584_v2, %v8550_v47 }
 0x439   : > { %v9226_v60 = vld [vmem:[%s14783_s20 + $0x78] sm:$0xff] }
 0x43a   : > { %8648 = vst.msk [vmem:[%s14783_s20 + $0xf8] sm:$0xff] %vm4961_vm5, %v8616_v26  ;;  %v8921_v7 = vpop.f32.mrb[112].mxu0  ;;  %v9010_v23 = vpop.f32.mrb[112].mxu1 }
 0x43b   : > { %v15310_v37 = vadd.f32 %v8921_v7, %v15214_v12  ;;  %v15313_v21 = vadd.f32 %v9010_v23, %v15217_v31  ;;  %v8923_v41 = vpop.f32.mrb[113].mxu0  ;;  %v9012_v52 = vpop.f32.mrb[113].mxu1 }
 0x43c   : > { %v15316_v56 = vadd.f32 %v8923_v41, %v15220_v38  ;;  %v15319_v3 = vadd.f32 %v9012_v52, %v15223_v62 }
 0x43d   : > { %v9234_v2 = vld [vmem:[%s14783_s20 + $0xb8] sm:$0xff] }
 0x43e   : > { %v8927_v40 = vpop.f32.mrb[114].mxu0  ;;  %v9016_v43 = vpop.f32.mrb[114].mxu1 }
 0x43f   : > { %v15322_v32 = vadd.f32 %v8927_v40, %v15226_v45  ;;  %v15325_v19 = vadd.f32 %v9016_v43, %v15229_v0  ;;  %v8929_v12 = vpop.f32.mrb[115].mxu0  ;;  %v9018_v25 = vpop.f32.mrb[115].mxu1 }
 0x440   : > { %v15328_v31 = vadd.f32 %v8929_v12, %v15232_v34  ;;  %v15331_v35 = vadd.f32 %v9018_v25, %v15235_v11 }
 0x441   : > { %v9242_v40 = vld [vmem:[%s14783_s20 + $0xf8] sm:$0xff] }
 0x442   : > { %v8933_v38 = vpop.f32.mrb[116].mxu0  ;;  %v9022_v57 = vpop.f32.mrb[116].mxu1 }
 0x443   : > { %v15334_v62 = vadd.f32 %v8933_v38, %v15238_v30  ;;  %v15337_v1 = vadd.f32 %v9022_v57, %v15241_v58  ;;  %v8935_v45 = vpop.f32.mrb[117].mxu0  ;;  %v9024_v0 = vpop.f32.mrb[117].mxu1 }
 0x444   : > { %v15340_v61 = vadd.f32 %v8935_v45, %v15244_v59  ;;  %v15343_v34 = vadd.f32 %v9024_v0, %v15247_v22 }
 0x446   : > { %v8939_v18 = vpop.f32.mrb[118].mxu0  ;;  %v9028_v11 = vpop.f32.mrb[118].mxu1 }
 0x447   : > { %v15346_v46 = vadd.f32 %v8939_v18, %v15250_v36  ;;  %v15349_v30 = vadd.f32 %v9028_v11, %v15253_v28  ;;  %v8941_v58 = vpop.f32.mrb[119].mxu0  ;;  %v9030_v15 = vpop.f32.mrb[119].mxu1  ;;  %v9218_v36 = vld [vmem:[%s14783_s20 + $0x38] sm:$0xff] }
 0x448   : > { %v15352_v29 = vadd.f32 %v8941_v58, %v15256_v24  ;;  %v15355_v59 = vadd.f32 %v9030_v15, %v15259_v9 }
 0x44a   : > { %v9188_v22 = vpop.f32.mrb[120].mxu1 }
 0x44b   : > { %v9099_v4 = vpop.f32.mrb[120].mxu0  ;;  %v15358_v20 = vadd.f32 %v9188_v22, %v15265_v16  ;;  %v9190_v39 = vpop.f32.mrb[121].mxu1 }
 0x44c   : > { %v15362_v28 = vadd.f32 %v9099_v4, %v15262_v10  ;;  %v9101_v14 = vpop.f32.mrb[121].mxu0  ;;  %v9250_v42 = vadd.f32 %v9218_v36, %v9190_v39 }
 0x44d   : > { %v15365_v24 = vadd.f32 %v9101_v14, %v15269_v17 }
 0x44e   : > { %9282 = vst.msk [vmem:[%s14783_s20 + $0x38] sm:$0xff] %vm4961_vm5, %v9250_v42  ;;  %v9194_v9 = vpop.f32.mrb[122].mxu1 }
 0x44f   : > { %v9105_v54 = vpop.f32.mrb[122].mxu0  ;;  %v15370_v63 = vadd.f32 %v9194_v9, %v15277_v27  ;;  %v9196_v16 = vpop.f32.mrb[123].mxu1 }
 0x450   : > { %v15374_v53 = vadd.f32 %v9105_v54, %v15274_v13  ;;  %v9107_v10 = vpop.f32.mrb[123].mxu0  ;;  %v9258_v49 = vadd.f32 %v9226_v60, %v9196_v16 }
 0x451   : > { %v15377_v44 = vadd.f32 %v9107_v10, %v15281_v55 }
 0x452   : > { %9290 = vst.msk [vmem:[%s14783_s20 + $0x78] sm:$0xff] %vm4961_vm5, %v9258_v49  ;;  %v9200_v17 = vpop.f32.mrb[124].mxu1 }
 0x453   : > { %v9111_v5 = vpop.f32.mrb[124].mxu0  ;;  %v15382_v47 = vadd.f32 %v9200_v17, %v15289_v8  ;;  %v9202_v27 = vpop.f32.mrb[125].mxu1 }
 0x454   : > { %v15386_v26 = vadd.f32 %v9111_v5, %v15286_v50  ;;  %v9113_v13 = vpop.f32.mrb[125].mxu0  ;;  %v9266_v7 = vadd.f32 %v9234_v2, %v9202_v27 }
 0x455   : > { %v15389_v23 = vadd.f32 %v9113_v13, %v15293_v6 }
 0x456   : > { %9298 = vst.msk [vmem:[%s14783_s20 + $0xb8] sm:$0xff] %vm4961_vm5, %v9266_v7  ;;  %v9206_v55 = vpop.f32.mrb[126].mxu1 }
 0x457   : > { %v9117_v41 = vpop.f32.mrb[126].mxu0  ;;  %v15394_v52 = vadd.f32 %v9206_v55, %v15301_v51  ;;  %v9208_v8 = vpop.f32.mrb[127].mxu1 }
 0x458   : > { %v15398_v43 = vadd.f32 %v9117_v41, %v15298_v33  ;;  %v9119_v12 = vpop.f32.mrb[127].mxu0  ;;  %v9274_v50 = vadd.f32 %v9242_v40, %v9208_v8 }
 0x459   : > { %v15401_v25 = vadd.f32 %v9119_v12, %v15305_v48  ;;  %v9884_v13 = vld [vmem:[%s14783_s20 + $0x78] sm:$0xff] }
 0x45a   : > { %9306 = vst.msk [vmem:[%s14783_s20 + $0xf8] sm:$0xff] %vm4961_vm5, %v9274_v50  ;;  %v9668_v6 = vpop.f32.mrb[128].mxu1 }
 0x45b   : > { %v9579_v38 = vpop.f32.mrb[128].mxu0  ;;  %v15406_v57 = vadd.f32 %v9668_v6, %v15313_v21  ;;  %v9670_v45 = vpop.f32.mrb[129].mxu1 }
 0x45c   : > { %v15409_v51 = vadd.f32 %v9579_v38, %v15310_v37  ;;  %v9581_v0 = vpop.f32.mrb[129].mxu0  ;;  %v15412_v33 = vadd.f32 %v9670_v45, %v15319_v3 }
 0x45d   : > { %v15415_v18 = vadd.f32 %v9581_v0, %v15316_v56  ;;  %v9892_v12 = vld [vmem:[%s14783_s20 + $0xb8] sm:$0xff] }
 0x45e   : > { %v9674_v48 = vpop.f32.mrb[130].mxu1 }
 0x45f   : > { %v9585_v11 = vpop.f32.mrb[130].mxu0  ;;  %v15418_v58 = vadd.f32 %v9674_v48, %v15325_v19  ;;  %v9676_v15 = vpop.f32.mrb[131].mxu1 }
 0x460   : > { %v15421_v21 = vadd.f32 %v9585_v11, %v15322_v32  ;;  %v9587_v22 = vpop.f32.mrb[131].mxu0  ;;  %v15424_v37 = vadd.f32 %v9676_v15, %v15331_v35 }
 0x461   : > { %v15427_v4 = vadd.f32 %v9587_v22, %v15328_v31  ;;  %v9900_v48 = vld [vmem:[%s14783_s20 + $0xf8] sm:$0xff] }
 0x462   : > { %v9680_v3 = vpop.f32.mrb[132].mxu1 }
 0x463   : > { %v9591_v39 = vpop.f32.mrb[132].mxu0  ;;  %v15430_v56 = vadd.f32 %v9680_v3, %v15337_v1  ;;  %v9682_v36 = vpop.f32.mrb[133].mxu1 }
 0x464   : > { %v15433_v19 = vadd.f32 %v9591_v39, %v15334_v62  ;;  %v9593_v14 = vpop.f32.mrb[133].mxu0  ;;  %v15436_v32 = vadd.f32 %v9682_v36, %v15343_v34 }
 0x465   : > { %v15439_v35 = vadd.f32 %v9593_v14, %v15340_v61 }
 0x466   : > { %v9686_v42 = vpop.f32.mrb[134].mxu1 }
 0x467   : > { %v9597_v31 = vpop.f32.mrb[134].mxu0  ;;  %v15442_v9 = vadd.f32 %v9686_v42, %v15349_v30  ;;  %v9688_v1 = vpop.f32.mrb[135].mxu1  ;;  %v9876_v30 = vld [vmem:[%s14783_s20 + $0x38] sm:$0xff] }
 0x468   : > { %v15445_v54 = vadd.f32 %v9597_v31, %v15346_v46  ;;  %v9599_v62 = vpop.f32.mrb[135].mxu0  ;;  %v15448_v16 = vadd.f32 %v9688_v1, %v15355_v59 }
 0x469   : > { %v15451_v34 = vadd.f32 %v9599_v62, %v15352_v29 }
 0x46a   : > { %v9846_v61 = vpop.f32.mrb[136].mxu1 }
 0x46b   : > { %v9757_v60 = vpop.f32.mrb[136].mxu0  ;;  %v15454_v10 = vadd.f32 %v9846_v61, %v15358_v20  ;;  %v9848_v49 = vpop.f32.mrb[137].mxu1 }
 0x46c   : > { %v15458_v17 = vadd.f32 %v9757_v60, %v15362_v28  ;;  %v9759_v46 = vpop.f32.mrb[137].mxu0  ;;  %v9908_v5 = vadd.f32 %v9876_v30, %v9848_v49 }
 0x46d   : > { %v15461_v59 = vadd.f32 %v9759_v46, %v15365_v24 }
 0x46e   : > { %9940 = vst.msk [vmem:[%s14783_s20 + $0x38] sm:$0xff] %vm4961_vm5, %v9908_v5  ;;  %v9852_v29 = vpop.f32.mrb[138].mxu1 }
 0x46f   : > { %v9763_v27 = vpop.f32.mrb[138].mxu0  ;;  %v15466_v2 = vadd.f32 %v9852_v29, %v15370_v63  ;;  %v9854_v20 = vpop.f32.mrb[139].mxu1 }
 0x470   : > { %v15470_v7 = vadd.f32 %v9763_v27, %v15374_v53  ;;  %v9765_v28 = vpop.f32.mrb[139].mxu0  ;;  %v9916_v55 = vadd.f32 %v9884_v13, %v9854_v20 }
 0x471   : > { %v15473_v41 = vadd.f32 %v9765_v28, %v15377_v44 }
 0x472   : > { %9948 = vst.msk [vmem:[%s14783_s20 + $0x78] sm:$0xff] %vm4961_vm5, %v9916_v55  ;;  %v9858_v24 = vpop.f32.mrb[140].mxu1 }
 0x473   : > { %v9769_v8 = vpop.f32.mrb[140].mxu0  ;;  %v15478_v40 = vadd.f32 %v9858_v24, %v15382_v47  ;;  %v9860_v63 = vpop.f32.mrb[141].mxu1 }
 0x474   : > { %v15482_v50 = vadd.f32 %v9769_v8, %v15386_v26  ;;  %v9771_v53 = vpop.f32.mrb[141].mxu0  ;;  %v9924_v6 = vadd.f32 %v9892_v12, %v9860_v63 }
 0x475   : > { %v15485_v38 = vadd.f32 %v9771_v53, %v15389_v23 }
 0x476   : > { %9956 = vst.msk [vmem:[%s14783_s20 + $0xb8] sm:$0xff] %vm4961_vm5, %v9924_v6  ;;  %v9864_v44 = vpop.f32.mrb[142].mxu1 }
 0x477   : > { %v9775_v45 = vpop.f32.mrb[142].mxu0  ;;  %v15490_v0 = vadd.f32 %v9864_v44, %v15394_v52  ;;  %v9866_v47 = vpop.f32.mrb[143].mxu1 }
 0x478   : > { %v15494_v11 = vadd.f32 %v9775_v45, %v15398_v43  ;;  %v9777_v15 = vpop.f32.mrb[143].mxu0  ;;  %v9932_v26 = vadd.f32 %v9900_v48, %v9866_v47 }
 0x479   : > { %v15497_v22 = vadd.f32 %v9777_v15, %v15401_v25 }
 0x47a   : > { %9964 = vst.msk [vmem:[%s14783_s20 + $0xf8] sm:$0xff] %vm4961_vm5, %v9932_v26  ;;  %v10326_v23 = vpop.f32.mrb[144].mxu1 }
 0x47b   : > { %v10237_v3 = vpop.f32.mrb[144].mxu0  ;;  %v10561_v39 = vadd.f32 %v10326_v23, %v15406_v57  ;;  %v10328_v52 = vpop.f32.mrb[145].mxu1 }
 0x47c   : > { %v10559_v36 = vadd.f32 %v10237_v3, %v15409_v51  ;;  %v10239_v14 = vpop.f32.mrb[145].mxu0  ;;  %v10562_v43 = vadd.f32 %v10328_v52, %v15412_v33 }
 0x47d   : > { %v10657_v42 = vmax.f32 %v10561_v39, 0.0  ;;  %v10560_v31 = vadd.f32 %v10239_v14, %v15415_v18  ;;  %v10534_v39 = vld [vmem:[%s14783_s20 + $0x38] sm:$0xff] }
 0x47e   : > { %v10655_v25 = vmax.f32 %v10559_v36, 0.0  ;;  %v10658_v1 = vmax.f32 %v10562_v43, 0.0  ;;  %v10332_v62 = vpop.f32.mrb[146].mxu1 }
 0x47f   : > { %10689 = vst [vmem:[%s14783_s20 + $0x10] sm:$0xff] %v10657_v42  ;;  %v10656_v61 = vmax.f32 %v10560_v31, 0.0  ;;  %v10243_v60 = vpop.f32.mrb[146].mxu0  ;;  %v10569_v57 = vadd.f32 %v10332_v62, %v15418_v58  ;;  %v10334_v49 = vpop.f32.mrb[147].mxu1 }
 0x480   : > { %10687 = vst [vmem:[%s14783_s20] sm:$0xff] %v10655_v25  ;;  %10690 = vst [vmem:[%s14783_s20 + $0x18] sm:$0xff] %v10658_v1  ;;  %v10567_v51 = vadd.f32 %v10243_v60, %v15421_v21  ;;  %v10245_v33 = vpop.f32.mrb[147].mxu0  ;;  %v10570_v30 = vadd.f32 %v10334_v49, %v15424_v37 }
 0x481   : > { %10688 = vst [vmem:[%s14783_s20 + $0x8] sm:$0xff] %v10656_v61  ;;  %v10665_v18 = vmax.f32 %v10569_v57, 0.0  ;;  %v10568_v46 = vadd.f32 %v10245_v33, %v15427_v4 }
 0x482   : > { %v10663_v5 = vmax.f32 %v10567_v51, 0.0  ;;  %v10666_v29 = vmax.f32 %v10570_v30, 0.0  ;;  %v10338_v27 = vpop.f32.mrb[148].mxu1 }
 0x483   : > { %10697 = vst [vmem:[%s14783_s20 + $0x50] sm:$0xff] %v10665_v18  ;;  %v10664_v58 = vmax.f32 %v10568_v46, 0.0  ;;  %v10249_v20 = vpop.f32.mrb[148].mxu0  ;;  %v10577_v13 = vadd.f32 %v10338_v27, %v15430_v56  ;;  %v10340_v28 = vpop.f32.mrb[149].mxu1  ;;  %v10550_v18 = vld [vmem:[%s14783_s20 + $0xb8] sm:$0xff] }
 0x484   : > { %10695 = vst [vmem:[%s14783_s20 + $0x40] sm:$0xff] %v10663_v5  ;;  %10698 = vst [vmem:[%s14783_s20 + $0x58] sm:$0xff] %v10666_v29  ;;  %v10575_v21 = vadd.f32 %v10249_v20, %v15433_v19  ;;  %v10251_v37 = vpop.f32.mrb[149].mxu0  ;;  %v10578_v55 = vadd.f32 %v10340_v28, %v15436_v32 }
 0x485   : > { %10696 = vst [vmem:[%s14783_s20 + $0x48] sm:$0xff] %v10664_v58  ;;  %v10673_v4 = vmax.f32 %v10577_v13, 0.0  ;;  %v10576_v24 = vadd.f32 %v10251_v37, %v15439_v35 }
 0x486   : > { %v10671_v8 = vmax.f32 %v10575_v21, 0.0  ;;  %v10674_v63 = vmax.f32 %v10578_v55, 0.0  ;;  %v10344_v12 = vpop.f32.mrb[150].mxu1  ;;  %v10558_v55 = vld [vmem:[%s14783_s20 + $0xf8] sm:$0xff] }
 0x487   : > { %10705 = vst [vmem:[%s14783_s20 + $0x90] sm:$0xff] %v10673_v4  ;;  %v10672_v56 = vmax.f32 %v10576_v24, 0.0  ;;  %v10255_v53 = vpop.f32.mrb[150].mxu0  ;;  %v10585_v6 = vadd.f32 %v10344_v12, %v15442_v9  ;;  %v10346_v44 = vpop.f32.mrb[151].mxu1 }
 0x488   : > { %10703 = vst [vmem:[%s14783_s20 + $0x80] sm:$0xff] %v10671_v8  ;;  %10706 = vst [vmem:[%s14783_s20 + $0x98] sm:$0xff] %v10674_v63  ;;  %v10583_v19 = vadd.f32 %v10255_v53, %v15445_v54  ;;  %v10257_v32 = vpop.f32.mrb[151].mxu0  ;;  %v10586_v35 = vadd.f32 %v10346_v44, %v15448_v16 }
 0x489   : > { %10704 = vst [vmem:[%s14783_s20 + $0x88] sm:$0xff] %v10672_v56  ;;  %v10681_v45 = vmax.f32 %v10585_v6, 0.0  ;;  %v10584_v47 = vadd.f32 %v10257_v32, %v15451_v34 }
 0x48a   : > { %v10679_v48 = vmax.f32 %v10583_v19, 0.0  ;;  %v10682_v15 = vmax.f32 %v10586_v35, 0.0  ;;  %v10504_v26 = vpop.f32.mrb[152].mxu1 }
 0x48b   : > { %10713 = vst [vmem:[%s14783_s20 + $0xd0] sm:$0xff] %v10681_v45  ;;  %v10680_v9 = vmax.f32 %v10584_v47, 0.0  ;;  %v10415_v23 = vpop.f32.mrb[152].mxu0  ;;  %v10565_v3 = vadd.f32 %v10504_v26, %v15454_v10  ;;  %v10506_v54 = vpop.f32.mrb[153].mxu1 }
 0x48c   : > { %10711 = vst [vmem:[%s14783_s20 + $0xc0] sm:$0xff] %v10679_v48  ;;  %10714 = vst [vmem:[%s14783_s20 + $0xd8] sm:$0xff] %v10682_v15  ;;  %v10563_v16 = vadd.f32 %v10415_v23, %v15458_v17  ;;  %v10417_v52 = vpop.f32.mrb[153].mxu0  ;;  %v10566_v34 = vadd.f32 %v10534_v39, %v10506_v54  ;;  %v10542_v17 = vld [vmem:[%s14783_s20 + $0x78] sm:$0xff] }
 0x48d   : > { %10712 = vst [vmem:[%s14783_s20 + $0xc8] sm:$0xff] %v10680_v9  ;;  %v10661_v36 = vmax.f32 %v10565_v3, 0.0  ;;  %v10564_v14 = vadd.f32 %v10417_v52, %v15461_v59 }
 0x48e   : > { %v10659_v43 = vmax.f32 %v10563_v16, 0.0  ;;  %10598 = vst.msk [vmem:[%s14783_s20 + $0x38] sm:$0xff] %vm4961_vm5, %v10566_v34  ;;  %v10510_v10 = vpop.f32.mrb[154].mxu1 }
 0x48f   : > { %10693 = vst [vmem:[%s14783_s20 + $0x30] sm:$0xff] %v10661_v36  ;;  %v10660_v42 = vmax.f32 %v10564_v14, 0.0  ;;  %v10421_v31 = vpop.f32.mrb[154].mxu0  ;;  %v10573_v25 = vadd.f32 %v10510_v10, %v15466_v2  ;;  %v10512_v1 = vpop.f32.mrb[155].mxu1 }
 0x490   : > { %10691 = vst [vmem:[%s14783_s20 + $0x20] sm:$0xff] %v10659_v43  ;;  %v10571_v62 = vadd.f32 %v10421_v31, %v15470_v7  ;;  %v10423_v61 = vpop.f32.mrb[155].mxu0  ;;  %v10574_v59 = vadd.f32 %v10542_v17, %v10512_v1 }
 0x491   : > { %10692 = vst [vmem:[%s14783_s20 + $0x28] sm:$0xff] %v10660_v42  ;;  %v10669_v60 = vmax.f32 %v10573_v25, 0.0  ;;  %v10572_v57 = vadd.f32 %v10423_v61, %v15473_v41 }
 0x492   : > { %v10667_v49 = vmax.f32 %v10571_v62, 0.0  ;;  %10606 = vst.msk [vmem:[%s14783_s20 + $0x78] sm:$0xff] %vm4961_vm5, %v10574_v59  ;;  %v10516_v51 = vpop.f32.mrb[156].mxu1 }
 0x493   : > { %10701 = vst [vmem:[%s14783_s20 + $0x70] sm:$0xff] %v10669_v60  ;;  %v10668_v2 = vmax.f32 %v10572_v57, 0.0  ;;  %v10427_v33 = vpop.f32.mrb[156].mxu0  ;;  %v10581_v30 = vadd.f32 %v10516_v51, %v15478_v40  ;;  %v10518_v7 = vpop.f32.mrb[157].mxu1 }
 0x494   : > { %10699 = vst [vmem:[%s14783_s20 + $0x60] sm:$0xff] %v10667_v49  ;;  %v10579_v46 = vadd.f32 %v10427_v33, %v15482_v50  ;;  %v10429_v5 = vpop.f32.mrb[157].mxu0  ;;  %v10582_v41 = vadd.f32 %v10550_v18, %v10518_v7 }
 0x495   : > { %v10630_v29 = vld [vmem:[%s14783_s20 + $0x38] sm:$0xff]  ;;  %10700 = vst [vmem:[%s14783_s20 + $0x68] sm:$0xff] %v10668_v2  ;;  %v10677_v27 = vmax.f32 %v10581_v30, 0.0  ;;  %v10580_v58 = vadd.f32 %v10429_v5, %v15485_v38 }
 0x496   : > { %v10662_v20 = vmax.f32 %v10630_v29, 0.0  ;;  %v10675_v13 = vmax.f32 %v10579_v46, 0.0  ;;  %10614 = vst.msk [vmem:[%s14783_s20 + $0xb8] sm:$0xff] %vm4961_vm5, %v10582_v41  ;;  %v10522_v40 = vpop.f32.mrb[158].mxu1 }
 0x497   : > { %10709 = vst [vmem:[%s14783_s20 + $0xb0] sm:$0xff] %v10677_v27  ;;  %v10676_v28 = vmax.f32 %v10580_v58, 0.0  ;;  %v10433_v50 = vpop.f32.mrb[158].mxu0  ;;  %v10589_v21 = vadd.f32 %v10522_v40, %v15490_v0  ;;  %v10524_v37 = vpop.f32.mrb[159].mxu1 }
 0x498   : > { %10694 = vst.msk [vmem:[%s14783_s20 + $0x38] sm:$0xff] %vm4961_vm5, %v10662_v20  ;;  %10707 = vst [vmem:[%s14783_s20 + $0xa0] sm:$0xff] %v10675_v13  ;;  %v10587_v38 = vadd.f32 %v10433_v50, %v15494_v11  ;;  %v10435_v4 = vpop.f32.mrb[159].mxu0  ;;  %v10590_v24 = vadd.f32 %v10558_v55, %v10524_v37 }
 0x499   : > { %v10638_v8 = vld [vmem:[%s14783_s20 + $0x78] sm:$0xff]  ;;  %10708 = vst [vmem:[%s14783_s20 + $0xa8] sm:$0xff] %v10676_v28  ;;  %v10685_v63 = vmax.f32 %v10589_v21, 0.0  ;;  %v10588_v0 = vadd.f32 %v10435_v4, %v15497_v22 }
 0x49a   : > { %v10670_v12 = vmax.f32 %v10638_v8, 0.0  ;;  %v10683_v56 = vmax.f32 %v10587_v38, 0.0  ;;  %10622 = vst.msk [vmem:[%s14783_s20 + $0xf8] sm:$0xff] %vm4961_vm5, %v10590_v24 }
 0x49b   : > { %10717 = vst [vmem:[%s14783_s20 + $0xf0] sm:$0xff] %v10685_v63  ;;  %v10684_v53 = vmax.f32 %v10588_v0, 0.0 }
 0x49c   : > { %10702 = vst.msk [vmem:[%s14783_s20 + $0x78] sm:$0xff] %vm4961_vm5, %v10670_v12  ;;  %10715 = vst [vmem:[%s14783_s20 + $0xe0] sm:$0xff] %v10683_v56 }
 0x49d   : > { %v10646_v11 = vld [vmem:[%s14783_s20 + $0xb8] sm:$0xff]  ;;  %10716 = vst [vmem:[%s14783_s20 + $0xe8] sm:$0xff] %v10684_v53 }
 0x49e   : > { %v10678_v6 = vmax.f32 %v10646_v11, 0.0 }
 0x4a0   : > { %10710 = vst.msk [vmem:[%s14783_s20 + $0xb8] sm:$0xff] %vm4961_vm5, %v10678_v6 }
 0x4a1   : > { %v10654_v44 = vld [vmem:[%s14783_s20 + $0xf8] sm:$0xff] }
 0x4a2   : > { %v10686_v19 = vmax.f32 %v10654_v44, 0.0 }
 0x4a4   : > { %10718 = vst.msk [vmem:[%s14783_s20 + $0xf8] sm:$0xff] %vm4961_vm5, %v10686_v19 }
 0x4a5 PF: > { %s15_s18 = sadd.s32 1, %s12510_s18  }
 0x4a6   : > { %p12_p4 = scmp.ge.s32.totalorder %s15_s18, 4  }
 0x4a8   :  { %14 = sbr.rel (!%p12_p4) target bundleno = 1 (0x1), region = 89 }

</bundles_post_ra>
